<compile_context>
chip_gen: v5e
topology: v5e:2x2
jax: 0.10.0
libtpu: 0.0.40
codegen_flags: <defaults>
</compile_context>

<pallas_src>
import jax
import jax.numpy as jnp
from jax.experimental import pallas as pl
from jax.experimental.pallas import tpu as pltpu

NOISE_DIM = 100
LABEL_DIM = 10
H1, H2, H3 = 256, 512, 1024
OUT_DIM = 28 * 28          # 784
BN_EPS = 1e-5
LRELU_SLOPE = 0.2


def _leaky_relu(x):
    return jnp.where(x > 0, x, LRELU_SLOPE * x)


def _batchnorm_train(x, gamma, beta):
    # BatchNorm1d in training mode: batch mean + biased variance.
    mean = jnp.mean(x, axis=0, keepdims=True)
    centered = x - mean
    var = jnp.mean(centered * centered, axis=0, keepdims=True)
    # rsqrt lowers to the (otherwise idle) EUP slot.
    return centered * jax.lax.rsqrt(var + BN_EPS) * gamma + beta


def _dot_bf16(x_f32, w_bf16):
    # bf16 operands into the MXU, f32 accumulation out.
    return jnp.dot(x_f32.astype(jnp.bfloat16), w_bf16,
                   preferred_element_type=jnp.float32)


def _dot_int8(x_f32, wq_ref):
    # int8 weights streamed from HBM; dequant in VMEM.  int8 -> f32 -> bf16 is
    # exact (|q| <= 127 fits the bf16 mantissa) and both conversions lower
    # cleanly on every TPU generation.
    w_bf16 = wq_ref[...].astype(jnp.float32).astype(jnp.bfloat16)
    return jnp.dot(x_f32.astype(jnp.bfloat16), w_bf16,
                   preferred_element_type=jnp.float32)


def generator_kernel(
    noise_ref, labels_ref,                       # (B, 100) f32, (B, 10) f32
    w1n_ref, w1l_ref, b1_ref,                    # Linear 110 -> 256 (split, bf16)
    w2_ref, s2_ref, g2_ref, be2_ref,             # Linear 256 -> 512 (int8+scale) + BN(512)
    w3_ref, s3_ref, g3_ref, be3_ref,             # Linear 512 -> 1024 (int8+scale) + BN(1024)
    w4_ref, s4_ref, b4_ref,                      # Linear 1024 -> 784 (int8+scale)
    out_ref,                                     # (B, 784) f32
):
    noise = noise_ref[...]
    labels = labels_ref[...]

    # Layer 1: Linear + LeakyReLU  (concat replaced by two dots)
    h = (_dot_bf16(noise, w1n_ref[...])
         + _dot_bf16(labels, w1l_ref[...])
         + b1_ref[...])
    h = _leaky_relu(h)

    # Layer 2: Linear (int8 weight, bias folded out by BN) + BN + LeakyReLU
    h = _dot_int8(h, w2_ref) * s2_ref[...]
    h = _batchnorm_train(h, g2_ref[...], be2_ref[...])
    h = _leaky_relu(h)

    # Layer 3: Linear (int8 weight, bias folded out by BN) + BN + LeakyReLU
    h = _dot_int8(h, w3_ref) * s3_ref[...]
    h = _batchnorm_train(h, g3_ref[...], be3_ref[...])
    h = _leaky_relu(h)

    # Layer 4: Linear (int8 weight) + Tanh — emitted at native 784 width
    h = _dot_int8(h, w4_ref) * s4_ref[...] + b4_ref[...]
    out_ref[...] = jnp.tanh(h)


def _quantize_per_channel(w):
    """Symmetric int8 quantization with one f32 scale per output channel."""
    absmax = jnp.max(jnp.abs(w), axis=0, keepdims=True)
    scale = absmax / 127.0
    scale = jnp.where(scale == 0.0, 1.0, scale)
    q = jnp.clip(jnp.round(w / scale), -127.0, 127.0).astype(jnp.int8)
    return q, scale.astype(jnp.float32)


def init_params(key):
    """Deterministic synthetic params (PyTorch-like uniform fan-in init),
    already laid out / quantized / cast for the kernel."""
    dims = [(NOISE_DIM + LABEL_DIM, H1), (H1, H2), (H2, H3), (H3, OUT_DIM)]
    raw = {}
    keys = jax.random.split(key, 2 * len(dims))
    for i, (fan_in, fan_out) in enumerate(dims):
        bound = 1.0 / jnp.sqrt(fan_in)
        raw[f"w{i+1}"] = jax.random.uniform(
            keys[2 * i], (fan_in, fan_out), jnp.float32, -bound, bound)
        raw[f"b{i+1}"] = jax.random.uniform(
            keys[2 * i + 1], (1, fan_out), jnp.float32, -bound, bound)

    p = {}
    # Layer 1 (tiny, ~56 KB): keep bf16, split weight rows (noise / label).
    p["w1n"] = raw["w1"][:NOISE_DIM].astype(jnp.bfloat16)
    p["w1l"] = raw["w1"][NOISE_DIM:].astype(jnp.bfloat16)
    p["b1"] = raw["b1"]                                    # f32
    # Layers 2/3: int8 weights + per-channel scales; pre-BN biases dropped
    # (exact no-op under BN mean subtraction).
    p["w2q"], p["s2"] = _quantize_per_channel(raw["w2"])
    p["w3q"], p["s3"] = _quantize_per_channel(raw["w3"])
    # BatchNorm affine params: gamma=1, beta=0 (PyTorch default init), f32.
    p["g2"] = jnp.ones((1, H2), jnp.float32)
    p["be2"] = jnp.zeros((1, H2), jnp.float32)
    p["g3"] = jnp.ones((1, H3), jnp.float32)
    p["be3"] = jnp.zeros((1, H3), jnp.float32)
    # Layer 4: int8 weight + per-channel scale, f32 bias, native 784 width.
    p["w4q"], p["s4"] = _quantize_per_channel(raw["w4"])
    p["b4"] = raw["b4"]                                    # f32
    return p


@jax.jit
def generator_forward(noise, labels, params):
    noise = noise.astype(jnp.float32)
    labels = labels.astype(jnp.float32)
    B = noise.shape[0]

    operands = (
        noise, labels,
        params["w1n"], params["w1l"], params["b1"],
        params["w2q"], params["s2"], params["g2"], params["be2"],
        params["w3q"], params["s3"], params["g3"], params["be3"],
        params["w4q"], params["s4"], params["b4"],
    )

    return pl.pallas_call(
        generator_kernel,
        out_shape=jax.ShapeDtypeStruct((B, OUT_DIM), jnp.float32),
        in_specs=[pl.BlockSpec(memory_space=pltpu.MemorySpace.VMEM)
                  for _ in operands],
        out_specs=pl.BlockSpec(memory_space=pltpu.MemorySpace.VMEM),
        # ~1.7 MiB of resident weights + a few MiB of dequant temporaries;
        # 32 MiB leaves ample headroom on every generation (v7x: 64 MiB phys).
        compiler_params=pltpu.CompilerParams(vmem_limit_bytes=32 << 20),
    )(*operands)


def reference_forward(noise, labels, p):
    """Pure-JAX reference with the same int8-weight / bf16-MXU / f32-accumulate
    numerics as the kernel."""
    noise = noise.astype(jnp.float32)
    labels = labels.astype(jnp.float32)

    def dot_bf16(x, w):
        return jnp.dot(x.astype(jnp.bfloat16), w,
                       preferred_element_type=jnp.float32)

    def dot_q(x, wq):
        w = wq.astype(jnp.float32).astype(jnp.bfloat16)
        return jnp.dot(x.astype(jnp.bfloat16), w,
                       preferred_element_type=jnp.float32)

    def bn(h, g, be):
        m = h.mean(0, keepdims=True)
        v = ((h - m) ** 2).mean(0, keepdims=True)
        return (h - m) * jax.lax.rsqrt(v + BN_EPS) * g + be

    h = dot_bf16(noise, p["w1n"]) + dot_bf16(labels, p["w1l"]) + p["b1"]
    h = jnp.where(h > 0, h, LRELU_SLOPE * h)
    h = bn(dot_q(h, p["w2q"]) * p["s2"], p["g2"], p["be2"])
    h = jnp.where(h > 0, h, LRELU_SLOPE * h)
    h = bn(dot_q(h, p["w3q"]) * p["s3"], p["g3"], p["be3"])
    h = jnp.where(h > 0, h, LRELU_SLOPE * h)
    h = dot_q(h, p["w4q"]) * p["s4"] + p["b4"]
    return jnp.tanh(h)


if __name__ == "__main__":
    key = jax.random.PRNGKey(0)
    k_noise, k_labels, k_params = jax.random.split(key, 3)

    B = 8
    noise = jax.random.normal(k_noise, (B, NOISE_DIM), jnp.float32)
    # one-hot conditioning labels, like a cGAN would feed in
    label_idx = jax.random.randint(k_labels, (B,), 0, LABEL_DIM)
    labels = jax.nn.one_hot(label_idx, LABEL_DIM, dtype=jnp.float32)

    params = init_params(k_params)

    out = generator_forward(noise, labels, params)
    out = jax.block_until_ready(out)

    ref = reference_forward(noise, labels, params)
    assert out.shape == (B, OUT_DIM)
    assert jnp.allclose(out, ref, atol=2e-2, rtol=2e-2), "mismatch vs reference"

    print("KERNEL_OK")
</pallas_src>

<mosaic_0001>
module attributes {stable_mosaic.version = 11 : i64} {
  func.func @generator_kernel(%arg0: memref<8x100xf32, #tpu.memory_space<vmem>>, %arg1: memref<8x10xf32, #tpu.memory_space<vmem>>, %arg2: memref<100x256xbf16, #tpu.memory_space<vmem>>, %arg3: memref<10x256xbf16, #tpu.memory_space<vmem>>, %arg4: memref<1x256xf32, #tpu.memory_space<vmem>>, %arg5: memref<256x512xi8, #tpu.memory_space<vmem>>, %arg6: memref<1x512xf32, #tpu.memory_space<vmem>>, %arg7: memref<1x512xf32, #tpu.memory_space<vmem>>, %arg8: memref<1x512xf32, #tpu.memory_space<vmem>>, %arg9: memref<512x1024xi8, #tpu.memory_space<vmem>>, %arg10: memref<1x1024xf32, #tpu.memory_space<vmem>>, %arg11: memref<1x1024xf32, #tpu.memory_space<vmem>>, %arg12: memref<1x1024xf32, #tpu.memory_space<vmem>>, %arg13: memref<1024x784xi8, #tpu.memory_space<vmem>>, %arg14: memref<1x784xf32, #tpu.memory_space<vmem>>, %arg15: memref<1x784xf32, #tpu.memory_space<vmem>>, %arg16: memref<8x784xf32, #tpu.memory_space<vmem>>) attributes {dimension_semantics = [], scalar_prefetch = 0 : i64, scratch_operands = 0 : i64, tpu.core_type = #tpu.core_type<tc>} {
    %c0 = arith.constant 0 : index
    %c0_0 = arith.constant 0 : index
    %0 = vector.load %arg0[%c0, %c0_0] : memref<8x100xf32, #tpu.memory_space<vmem>>, vector<8x100xf32>
    %c0_1 = arith.constant 0 : index
    %c0_2 = arith.constant 0 : index
    %1 = vector.load %arg1[%c0_1, %c0_2] : memref<8x10xf32, #tpu.memory_space<vmem>>, vector<8x10xf32>
    %c0_3 = arith.constant 0 : index
    %c0_4 = arith.constant 0 : index
    %2 = vector.load %arg2[%c0_3, %c0_4] : memref<100x256xbf16, #tpu.memory_space<vmem>>, vector<100x256xbf16>
    %3 = arith.truncf %0 : vector<8x100xf32> to vector<8x100xbf16>
    %cst = arith.constant dense<0.000000e+00> : vector<8x256xf32>
    %4 = tpu.matmul %3, %2, %cst {dimension_numbers = #tpu.dot_dimension_numbers<[1], [0], [0], [1], [0, 0, 1, 1], [], []>} : vector<8x100xbf16>, vector<100x256xbf16>, vector<8x256xf32> -> vector<8x256xf32>
    %c0_5 = arith.constant 0 : index
    %c0_6 = arith.constant 0 : index
    %5 = vector.load %arg3[%c0_5, %c0_6] : memref<10x256xbf16, #tpu.memory_space<vmem>>, vector<10x256xbf16>
    %6 = arith.truncf %1 : vector<8x10xf32> to vector<8x10xbf16>
    %cst_7 = arith.constant dense<0.000000e+00> : vector<8x256xf32>
    %7 = tpu.matmul %6, %5, %cst_7 {dimension_numbers = #tpu.dot_dimension_numbers<[1], [0], [0], [1], [0, 0, 1, 1], [], []>} : vector<8x10xbf16>, vector<10x256xbf16>, vector<8x256xf32> -> vector<8x256xf32>
    %8 = arith.addf %4, %7 : vector<8x256xf32>
    %c0_8 = arith.constant 0 : index
    %c0_9 = arith.constant 0 : index
    %9 = vector.load %arg4[%c0_8, %c0_9] : memref<1x256xf32, #tpu.memory_space<vmem>>, vector<1x256xf32>
    %10 = vector.broadcast %9 : vector<1x256xf32> to vector<8x256xf32>
    %11 = arith.addf %8, %10 : vector<8x256xf32>
    %cst_10 = arith.constant 0.000000e+00 : f32
    %12 = vector.broadcast %cst_10 : f32 to vector<8x256xf32>
    %13 = arith.cmpf ogt, %11, %12 : vector<8x256xf32>
    %cst_11 = arith.constant 2.000000e-01 : f32
    %14 = vector.broadcast %cst_11 : f32 to vector<8x256xf32>
    %15 = arith.mulf %14, %11 : vector<8x256xf32>
    %16 = arith.select %13, %11, %15 : vector<8x256xi1>, vector<8x256xf32>
    %c0_12 = arith.constant 0 : index
    %c0_13 = arith.constant 0 : index
    %17 = vector.load %arg5[%c0_12, %c0_13] : memref<256x512xi8, #tpu.memory_space<vmem>>, vector<256x512xi8>
    %18 = arith.sitofp %17 : vector<256x512xi8> to vector<256x512xf32>
    %19 = arith.truncf %18 : vector<256x512xf32> to vector<256x512xbf16>
    %20 = arith.truncf %16 : vector<8x256xf32> to vector<8x256xbf16>
    %cst_14 = arith.constant dense<0.000000e+00> : vector<8x512xf32>
    %21 = tpu.matmul %20, %19, %cst_14 {dimension_numbers = #tpu.dot_dimension_numbers<[1], [0], [0], [1], [0, 0, 1, 1], [], []>} : vector<8x256xbf16>, vector<256x512xbf16>, vector<8x512xf32> -> vector<8x512xf32>
    %c0_15 = arith.constant 0 : index
    %c0_16 = arith.constant 0 : index
    %22 = vector.load %arg6[%c0_15, %c0_16] : memref<1x512xf32, #tpu.memory_space<vmem>>, vector<1x512xf32>
    %23 = vector.broadcast %22 : vector<1x512xf32> to vector<8x512xf32>
    %24 = arith.mulf %21, %23 : vector<8x512xf32>
    %c0_17 = arith.constant 0 : index
    %c0_18 = arith.constant 0 : index
    %25 = vector.load %arg7[%c0_17, %c0_18] : memref<1x512xf32, #tpu.memory_space<vmem>>, vector<1x512xf32>
    %c0_19 = arith.constant 0 : index
    %c0_20 = arith.constant 0 : index
    %26 = vector.load %arg8[%c0_19, %c0_20] : memref<1x512xf32, #tpu.memory_space<vmem>>, vector<1x512xf32>
    %cst_21 = arith.constant dense<0.000000e+00> : vector<512xf32>
    %27 = vector.multi_reduction <add>, %24, %cst_21 [0] : vector<8x512xf32> to vector<512xf32>
    %28 = vector.shape_cast %27 : vector<512xf32> to vector<1x512xf32>
    %cst_22 = arith.constant 8.000000e+00 : f32
    %29 = vector.broadcast %cst_22 : f32 to vector<1x512xf32>
    %30 = arith.divf %28, %29 : vector<1x512xf32>
    %31 = vector.broadcast %30 : vector<1x512xf32> to vector<8x512xf32>
    %32 = arith.subf %24, %31 : vector<8x512xf32>
    %33 = arith.mulf %32, %32 : vector<8x512xf32>
    %cst_23 = arith.constant dense<0.000000e+00> : vector<512xf32>
    %34 = vector.multi_reduction <add>, %33, %cst_23 [0] : vector<8x512xf32> to vector<512xf32>
    %35 = vector.shape_cast %34 : vector<512xf32> to vector<1x512xf32>
    %cst_24 = arith.constant 8.000000e+00 : f32
    %36 = vector.broadcast %cst_24 : f32 to vector<1x512xf32>
    %37 = arith.divf %35, %36 : vector<1x512xf32>
    %cst_25 = arith.constant 9.99999974E-6 : f32
    %38 = vector.broadcast %cst_25 : f32 to vector<1x512xf32>
    %39 = arith.addf %37, %38 : vector<1x512xf32>
    %40 = math.rsqrt %39 : vector<1x512xf32>
    %41 = vector.broadcast %40 : vector<1x512xf32> to vector<8x512xf32>
    %42 = arith.mulf %32, %41 : vector<8x512xf32>
    %43 = vector.broadcast %25 : vector<1x512xf32> to vector<8x512xf32>
    %44 = arith.mulf %42, %43 : vector<8x512xf32>
    %45 = vector.broadcast %26 : vector<1x512xf32> to vector<8x512xf32>
    %46 = arith.addf %44, %45 : vector<8x512xf32>
    %cst_26 = arith.constant 0.000000e+00 : f32
    %47 = vector.broadcast %cst_26 : f32 to vector<8x512xf32>
    %48 = arith.cmpf ogt, %46, %47 : vector<8x512xf32>
    %cst_27 = arith.constant 2.000000e-01 : f32
    %49 = vector.broadcast %cst_27 : f32 to vector<8x512xf32>
    %50 = arith.mulf %49, %46 : vector<8x512xf32>
    %51 = arith.select %48, %46, %50 : vector<8x512xi1>, vector<8x512xf32>
    %c0_28 = arith.constant 0 : index
    %c0_29 = arith.constant 0 : index
    %52 = vector.load %arg9[%c0_28, %c0_29] : memref<512x1024xi8, #tpu.memory_space<vmem>>, vector<512x1024xi8>
    %53 = arith.sitofp %52 : vector<512x1024xi8> to vector<512x1024xf32>
    %54 = arith.truncf %53 : vector<512x1024xf32> to vector<512x1024xbf16>
    %55 = arith.truncf %51 : vector<8x512xf32> to vector<8x512xbf16>
    %cst_30 = arith.constant dense<0.000000e+00> : vector<8x1024xf32>
    %56 = tpu.matmul %55, %54, %cst_30 {dimension_numbers = #tpu.dot_dimension_numbers<[1], [0], [0], [1], [0, 0, 1, 1], [], []>} : vector<8x512xbf16>, vector<512x1024xbf16>, vector<8x1024xf32> -> vector<8x1024xf32>
    %c0_31 = arith.constant 0 : index
    %c0_32 = arith.constant 0 : index
    %57 = vector.load %arg10[%c0_31, %c0_32] : memref<1x1024xf32, #tpu.memory_space<vmem>>, vector<1x1024xf32>
    %58 = vector.broadcast %57 : vector<1x1024xf32> to vector<8x1024xf32>
    %59 = arith.mulf %56, %58 : vector<8x1024xf32>
    %c0_33 = arith.constant 0 : index
    %c0_34 = arith.constant 0 : index
    %60 = vector.load %arg11[%c0_33, %c0_34] : memref<1x1024xf32, #tpu.memory_space<vmem>>, vector<1x1024xf32>
    %c0_35 = arith.constant 0 : index
    %c0_36 = arith.constant 0 : index
    %61 = vector.load %arg12[%c0_35, %c0_36] : memref<1x1024xf32, #tpu.memory_space<vmem>>, vector<1x1024xf32>
    %cst_37 = arith.constant dense<0.000000e+00> : vector<1024xf32>
    %62 = vector.multi_reduction <add>, %59, %cst_37 [0] : vector<8x1024xf32> to vector<1024xf32>
    %63 = vector.shape_cast %62 : vector<1024xf32> to vector<1x1024xf32>
    %cst_38 = arith.constant 8.000000e+00 : f32
    %64 = vector.broadcast %cst_38 : f32 to vector<1x1024xf32>
    %65 = arith.divf %63, %64 : vector<1x1024xf32>
    %66 = vector.broadcast %65 : vector<1x1024xf32> to vector<8x1024xf32>
    %67 = arith.subf %59, %66 : vector<8x1024xf32>
    %68 = arith.mulf %67, %67 : vector<8x1024xf32>
    %cst_39 = arith.constant dense<0.000000e+00> : vector<1024xf32>
    %69 = vector.multi_reduction <add>, %68, %cst_39 [0] : vector<8x1024xf32> to vector<1024xf32>
    %70 = vector.shape_cast %69 : vector<1024xf32> to vector<1x1024xf32>
    %cst_40 = arith.constant 8.000000e+00 : f32
    %71 = vector.broadcast %cst_40 : f32 to vector<1x1024xf32>
    %72 = arith.divf %70, %71 : vector<1x1024xf32>
    %cst_41 = arith.constant 9.99999974E-6 : f32
    %73 = vector.broadcast %cst_41 : f32 to vector<1x1024xf32>
    %74 = arith.addf %72, %73 : vector<1x1024xf32>
    %75 = math.rsqrt %74 : vector<1x1024xf32>
    %76 = vector.broadcast %75 : vector<1x1024xf32> to vector<8x1024xf32>
    %77 = arith.mulf %67, %76 : vector<8x1024xf32>
    %78 = vector.broadcast %60 : vector<1x1024xf32> to vector<8x1024xf32>
    %79 = arith.mulf %77, %78 : vector<8x1024xf32>
    %80 = vector.broadcast %61 : vector<1x1024xf32> to vector<8x1024xf32>
    %81 = arith.addf %79, %80 : vector<8x1024xf32>
    %cst_42 = arith.constant 0.000000e+00 : f32
    %82 = vector.broadcast %cst_42 : f32 to vector<8x1024xf32>
    %83 = arith.cmpf ogt, %81, %82 : vector<8x1024xf32>
    %cst_43 = arith.constant 2.000000e-01 : f32
    %84 = vector.broadcast %cst_43 : f32 to vector<8x1024xf32>
    %85 = arith.mulf %84, %81 : vector<8x1024xf32>
    %86 = arith.select %83, %81, %85 : vector<8x1024xi1>, vector<8x1024xf32>
    %c0_44 = arith.constant 0 : index
    %c0_45 = arith.constant 0 : index
    %87 = vector.load %arg13[%c0_44, %c0_45] : memref<1024x784xi8, #tpu.memory_space<vmem>>, vector<1024x784xi8>
    %88 = arith.sitofp %87 : vector<1024x784xi8> to vector<1024x784xf32>
    %89 = arith.truncf %88 : vector<1024x784xf32> to vector<1024x784xbf16>
    %90 = arith.truncf %86 : vector<8x1024xf32> to vector<8x1024xbf16>
    %cst_46 = arith.constant dense<0.000000e+00> : vector<8x784xf32>
    %91 = tpu.matmul %90, %89, %cst_46 {dimension_numbers = #tpu.dot_dimension_numbers<[1], [0], [0], [1], [0, 0, 1, 1], [], []>} : vector<8x1024xbf16>, vector<1024x784xbf16>, vector<8x784xf32> -> vector<8x784xf32>
    %c0_47 = arith.constant 0 : index
    %c0_48 = arith.constant 0 : index
    %92 = vector.load %arg14[%c0_47, %c0_48] : memref<1x784xf32, #tpu.memory_space<vmem>>, vector<1x784xf32>
    %93 = vector.broadcast %92 : vector<1x784xf32> to vector<8x784xf32>
    %94 = arith.mulf %91, %93 : vector<8x784xf32>
    %c0_49 = arith.constant 0 : index
    %c0_50 = arith.constant 0 : index
    %95 = vector.load %arg15[%c0_49, %c0_50] : memref<1x784xf32, #tpu.memory_space<vmem>>, vector<1x784xf32>
    %96 = vector.broadcast %95 : vector<1x784xf32> to vector<8x784xf32>
    %97 = arith.addf %94, %96 : vector<8x784xf32>
    %98 = math.tanh %97 : vector<8x784xf32>
    %c0_51 = arith.constant 0 : index
    %c0_52 = arith.constant 0 : index
    %99 = vector.load %arg16[%c0_51, %c0_52] : memref<8x784xf32, #tpu.memory_space<vmem>>, vector<8x784xf32>
    tpu.vector_store %arg16[%c0_51, %c0_52], %98 {strides = array<i32>} : memref<8x784xf32, #tpu.memory_space<vmem>>, vector<8x784xf32>,
    return
  }
}

</mosaic_0001>

<bundles_post_ra>
// kernel: generator_forward.1
= control target key start
LH: loop header
LB: loop body
LE: loop exit
PB: predicated region body
PF: predicated region fallthrough
CT: control target
= control target key end

     0   :  { %s8988_s0 = inlined_call_operand.vmem [shape: f32[8,100], index: 0, kind: input, shape index: {}]   ;;  %s8989_s1 = inlined_call_operand.vmem [shape: f32[8,10], index: 1, kind: input, shape index: {}]   ;;  %s8990_s2 = inlined_call_operand.vmem [shape: bf16[100,256], index: 2, kind: input, shape index: {}]   ;;  %s8991_s3 = inlined_call_operand.vmem [shape: bf16[10,256], index: 3, kind: input, shape index: {}]   ;;  %s8992_s4 = inlined_call_operand.vmem [shape: f32[1,256], index: 4, kind: input, shape index: {}]   ;;  %s8993_s5 = inlined_call_operand.vmem [shape: s8[256,512], index: 5, kind: input, shape index: {}]   ;;  %s8994_s6 = inlined_call_operand.vmem [shape: f32[1,512], index: 6, kind: input, shape index: {}]   ;;  %s8995_s7 = inlined_call_operand.vmem [shape: f32[1,512], index: 7, kind: input, shape index: {}]   ;;  %s8996_s8 = inlined_call_operand.vmem [shape: f32[1,512], index: 8, kind: input, shape index: {}]   ;;  %s8997_s9 = inlined_call_operand.vmem [shape: s8[512,1024], index: 9, kind: input, shape index: {}]   ;;  %s8998_s10 = inlined_call_operand.vmem [shape: f32[1,1024], index: 10, kind: input, shape index: {}]   ;;  %s8999_s11 = inlined_call_operand.vmem [shape: f32[1,1024], index: 11, kind: input, shape index: {}]   ;;  %s9000_s12 = inlined_call_operand.vmem [shape: f32[1,1024], index: 12, kind: input, shape index: {}]   ;;  %s9001_s13 = inlined_call_operand.vmem [shape: s8[1024,784], index: 13, kind: input, shape index: {}]   ;;  %s9002_s14 = inlined_call_operand.vmem [shape: f32[1,784], index: 14, kind: input, shape index: {}]   ;;  %s9003_s15 = inlined_call_operand.vmem [shape: f32[1,784], index: 15, kind: input, shape index: {}]   ;;  %s9004_s16 = inlined_call_operand.hbm [shape: f32[8,784], index: 16, kind: output, shape index: {}]  }
   0x1   :  { %9005 = sst [smem:[#allocation5_spill]] %s8988_s0 }
   0x2   :  { %v69_v0 = vld [vmem:[%s8990_s2 + $0x60] sm:$0x33]  ;;  %vm188_vm0 = vcmask 1041408   ;;  %v6349_v3 = vld [vmem:[%s8990_s2 + $0x50] sm:$0xf]  ;;  %vm86_vm1 = vcmask 1044480  }
   0x3   :  { %v156_v1 = vunpack.c.l.b16 %v69_v0  ;;  %v157_v2 = vunpack.c.h.b16 %v69_v0  ;;  %v6368_v4 = vld [vmem:[%s8990_s2 + $0x54] sm:$0xf0]  ;;  %v6367_v5 = vld [vmem:[%s8990_s2 + $0x54] sm:$0xf]  ;;  %v6351_v6 = vld [vmem:[%s8990_s2 + $0x58] sm:$0xf0] }
   0x4   :  { %v6549_v9 = vld [vmem:[%s8990_s2 + $0x40] sm:$0xf]  ;;  %v6366_v10 = vld [vmem:[%s8990_s2 + $0x44] sm:$0xf0]  ;;  %v6365_v11 = vld [vmem:[%s8990_s2 + $0x44] sm:$0xf]  ;;  %v6350_v22 = vor.u32 %v6368_v4, %v6349_v3  ;;  %v6354_v23 = vor.u32 %v6367_v5, %v6351_v6 }
   0x5   :  { %v170_v7 = vpack.c.b16 %v156_v1, %v156_v1  ;;  %v171_v8 = vpack.c.b16 %v157_v2, %v157_v2  ;;  %v6343_v12 = vld [vmem:[%s8990_s2 + $0x48] sm:$0xf0]  ;;  %v6563_v13 = vld [vmem:[%s8990_s2 + $0x30] sm:$0xf]  ;;  %v6568_v14 = vld [vmem:[%s8990_s2 + $0x34] sm:$0xf0]  ;;  %v6342_v30 = vor.u32 %v6366_v10, %v6549_v9 }
   0x6   :  { %v6573_v15 = vld [vmem:[%s8990_s2 + $0x34] sm:$0xf]  ;;  %v6578_v16 = vld [vmem:[%s8990_s2 + $0x38] sm:$0xf0]  ;;  %v6583_v17 = vld [vmem:[%s8990_s2 + $0x20] sm:$0xf]  ;;  %v6346_v31 = vor.u32 %v6365_v11, %v6343_v12  ;;  %v6334_v32 = vor.u32 %v6568_v14, %v6563_v13 }
   0x7   :  { %v190_v18 = vsel %vm188_vm0, %v170_v7, 0  ;;  %v193_v19 = vsel %vm188_vm0, %v171_v8, 0  ;;  %v6590_v20 = vld [vmem:[%s8990_s2 + $0x24] sm:$0xf0]  ;;  %v6595_v21 = vld [vmem:[%s8990_s2 + $0x24] sm:$0xf]  ;;  %v6338_v33 = vor.u32 %v6573_v15, %v6578_v16 }
   0x8   :  { %196 = vmatpush.bf16.msra.mxu2 %v190_v18  ;;  %209 = vmatpush.bf16.msra.mxu3 %v193_v19  ;;  %v6600_v24 = vld [vmem:[%s8990_s2 + $0x28] sm:$0xf0]  ;;  %v6605_v25 = vld [vmem:[%s8990_s2 + $0x10] sm:$0xf]  ;;  %v6610_v26 = vld [vmem:[%s8990_s2 + $0x14] sm:$0xf0]  ;;  %v6326_v37 = vor.u32 %v6590_v20, %v6583_v17 }
   0x9   :  { %v6615_v27 = vld [vmem:[%s8990_s2 + $0x14] sm:$0xf]  ;;  %v6620_v28 = vld [vmem:[%s8990_s2 + $0x18] sm:$0xf0]  ;;  %v6299_v29 = vld [vmem:[%s8991_s3] sm:$0xf]  ;;  %v6330_v38 = vor.u32 %v6595_v21, %v6600_v24  ;;  %v6318_v44 = vor.u32 %v6610_v26, %v6605_v25 }
   0xa   :  { %v6370_v34 = vld [vmem:[%s8991_s3 + $0x4] sm:$0x10]  ;;  %v6369_v35 = vld [vmem:[%s8991_s3 + $0x4] sm:$0xf]  ;;  %v6301_v36 = vld [vmem:[%s8991_s3 + $0x8] sm:$0x10]  ;;  %v6322_v45 = vor.u32 %v6615_v27, %v6620_v28 }
   0xb   :  { %v6300_v39 = vor.u32 %v6370_v34, %v6299_v29  ;;  %v6304_v40 = vor.u32 %v6369_v35, %v6301_v36  ;;  %v6646_v41 = vld [vmem:[%s8990_s2] sm:$0xf]  ;;  %v6651_v42 = vld [vmem:[%s8990_s2 + $0x4] sm:$0xf0]  ;;  %v6656_v43 = vld [vmem:[%s8990_s2 + $0x4] sm:$0xf] }
   0xc   :  { %197 = vmatpush.bf16.msra.mxu2 %v6350_v22  ;;  %210 = vmatpush.bf16.msra.mxu3 %v6354_v23  ;;  %v6310_v46 = vor.u32 %v6651_v42, %v6646_v41  ;;  %v6667_v47 = vld [vmem:[%s8990_s2 + $0x8] sm:$0xf0]  ;;  %v56_v48 = vld [vmem:[%s8989_s1] sm:$0xff]  ;;  %vm82_vm2 = vcmask 80896   ;;  %s9006_s26 = sld [smem:[#allocation5_spill]] }
   0xd   :  { %v88_v49 = vsel %vm86_vm1, %v6300_v39, 0  ;;  %v91_v50 = vsel %vm86_vm1, %v6304_v40, 0  ;;  %v73_v51 = vpack.c.bf16 %v56_v48, %v56_v48  ;;  %v247_v52 = vld [vmem:[%s8993_s5 + $0x60] sm:$0xff]  ;;  %v248_v54 = vld [vmem:[%s8993_s5 + $0x68] sm:$0xff]  ;;  %v6314_v55 = vor.u32 %v6656_v43, %v6667_v47 }
   0xe   :  { %v263_v53 = vld [vmem:[%s8993_s5 + $0xe0] sm:$0xff]  ;;  %100 = vmatpush.bf16.msra.mxu0 %v88_v49  ;;  %113 = vmatpush.bf16.msra.mxu1 %v91_v50  ;;  %v323_v57 = vunpack.c.2.s8 %v247_v52  ;;  %v327_v58 = vunpack.c.3.s8 %v247_v52  ;;  %v264_v60 = vld [vmem:[%s8993_s5 + $0xe8] sm:$0xff]  ;;  %v324_v62 = vunpack.c.2.s8 %v248_v54  ;;  %v328_v63 = vunpack.c.3.s8 %v248_v54 }
   0xf   :  { %v387_v59 = vunpack.c.2.s8 %v263_v53  ;;  %v391_v61 = vunpack.c.3.s8 %v263_v53  ;;  %v388_v0 = vunpack.c.2.s8 %v264_v60  ;;  %v392_v4 = vunpack.c.3.s8 %v264_v60 }
  0x10   :  { %198 = vmatpush.bf16.msra.mxu2 %v6342_v30  ;;  %211 = vmatpush.bf16.msra.mxu3 %v6346_v31  ;;  %v451_v1 = vcvt.s32.f32 %v323_v57  ;;  %v455_v2 = vcvt.s32.f32 %v327_v58 }
  0x11   :  { %v515_v3 = vcvt.s32.f32 %v387_v59 }
  0x12   :  { %v55_v56 = vld [vmem:[%s9006_s26] sm:$0xff] }
  0x13   :  { %21 = vsyncpa [#allocation3], 0  ;;  %6305 = vmatmul.msk.bf16.vlgmr.msra.gmra.mxu0 %vm82_vm2, %v73_v51  ;;  %6306 = vmatmul.msk.bf16.vlgmr.msra.gmra.mxu1 %vm82_vm2, %v73_v51  ;;  %v6693_v5 = vpack.c.bf16 %v55_v56, %v55_v56  ;;  %v519_v6 = vcvt.s32.f32 %v391_v61  ;;  %v6695_v7 = vcvt.s32.f32 %v324_v62  ;;  %v6697_v8 = vcvt.s32.f32 %v328_v63  ;;  %v243_v18 = vld [vmem:[%s8993_s5 + $0x40] sm:$0xff]  ;;  %v244_v48 = vld [vmem:[%s8993_s5 + $0x48] sm:$0xff] }
  0x14   :  { %v551_v9 = vpack.c.bf16 %v455_v2, %v451_v1  ;;  %v6699_v10 = vcvt.s32.f32 %v388_v0  ;;  %v315_v11 = vunpack.c.0.s8 %v247_v52  ;;  %v319_v12 = vunpack.c.1.s8 %v247_v52  ;;  %199 = vmatpush.bf16.msra.mxu2 %v6334_v32  ;;  %212 = vmatpush.bf16.msra.mxu3 %v6338_v33  ;;  %v259_v36 = vld [vmem:[%s8993_s5 + $0xc0] sm:$0xff]  ;;  %v256_v47 = vld [vmem:[%s8993_s5 + $0xa8] sm:$0xff] }
  0x15   :  { %v583_v13 = vpack.c.bf16 %v519_v6, %v515_v3  ;;  %v6701_v14 = vcvt.s32.f32 %v392_v4  ;;  %v379_v15 = vunpack.c.0.s8 %v263_v53  ;;  %v383_v16 = vunpack.c.1.s8 %v263_v53  ;;  %v260_v53 = vld [vmem:[%s8993_s5 + $0xc8] sm:$0xff]  ;;  %v239_v27 = vld [vmem:[%s8993_s5 + $0x20] sm:$0xff] }
  0x16   :  { %v552_v19 = vpack.c.bf16 %v6697_v8, %v6695_v7  ;;  %v443_v22 = vcvt.s32.f32 %v315_v11  ;;  %v447_v23 = vcvt.s32.f32 %v319_v12  ;;  %v316_v29 = vunpack.c.0.s8 %v248_v54  ;;  %589 = vmatpush.bf16.msrb.mxu0 %v551_v9 }
  0x17   :  { %602 = vmatpush.bf16.msrb.mxu1 %v583_v13  ;;  %v507_v30 = vcvt.s32.f32 %v379_v15  ;;  %v511_v31 = vcvt.s32.f32 %v383_v16  ;;  %v320_v34 = vunpack.c.1.s8 %v248_v54  ;;  %v380_v35 = vunpack.c.0.s8 %v264_v60  ;;  %v255_v15 = vld [vmem:[%s8993_s5 + $0xa0] sm:$0xff] }
  0x18   :  { %v547_v39 = vpack.c.bf16 %v447_v23, %v443_v22  ;;  %v6711_v40 = vcvt.s32.f32 %v316_v29  ;;  %v384_v32 = vunpack.c.1.s8 %v264_v60  ;;  %v307_v33 = vunpack.c.2.s8 %v243_v18  ;;  %200 = vmatpush.bf16.msra.mxu2 %v6326_v37  ;;  %213 = vmatpush.bf16.msra.mxu3 %v6330_v38  ;;  %v240_v29 = vld [vmem:[%s8993_s5 + $0x28] sm:$0xff] }
  0x19   :  { %v579_v49 = vpack.c.bf16 %v511_v31, %v507_v30  ;;  %v6716_v50 = vcvt.s32.f32 %v320_v34  ;;  %v6718_v51 = vcvt.s32.f32 %v380_v35  ;;  %v311_v52 = vunpack.c.3.s8 %v243_v18 }
  0x1a   :  { %vm184_vm3 = vcmask 818176   ;;  %v6729_v54 = vcvt.s32.f32 %v384_v32  ;;  %v435_v56 = vcvt.s32.f32 %v307_v33  ;;  %v371_v57 = vunpack.c.2.s8 %v259_v36  ;;  %590 = vmatpush.bf16.msrb.mxu0 %v547_v39 }
  0x1b   :  { %v375_v58 = vunpack.c.3.s8 %v259_v36  ;;  %v584_v59 = vpack.c.bf16 %v6701_v14, %v6699_v10  ;;  %603 = vmatpush.bf16.msrb.mxu1 %v579_v49  ;;  %v439_v60 = vcvt.s32.f32 %v311_v52  ;;  %v308_v61 = vunpack.c.2.s8 %v244_v48 }
  0x1c   :  { %v312_v62 = vunpack.c.3.s8 %v244_v48  ;;  %v548_v17 = vpack.c.bf16 %v6716_v50, %v6711_v40  ;;  %v499_v20 = vcvt.s32.f32 %v371_v57  ;;  %v372_v24 = vunpack.c.2.s8 %v260_v53  ;;  %201 = vmatpush.bf16.msra.mxu2 %v6318_v44  ;;  %214 = vmatpush.bf16.msra.mxu3 %v6322_v45 }
  0x1d   :  { %v503_v21 = vcvt.s32.f32 %v375_v58  ;;  %v543_v37 = vpack.c.bf16 %v439_v60, %v435_v56  ;;  %v6735_v38 = vcvt.s32.f32 %v308_v61  ;;  %v376_v0 = vunpack.c.3.s8 %v260_v53 }
  0x1e   :  { %v6737_v63 = vcvt.s32.f32 %v312_v62  ;;  %v580_v1 = vpack.c.bf16 %v6729_v54, %v6718_v51  ;;  %v299_v3 = vunpack.c.0.s8 %v243_v18  ;;  %v303_v4 = vunpack.c.1.s8 %v243_v18 }
  0x1f   :  { %v575_v2 = vpack.c.bf16 %v503_v21, %v499_v20  ;;  %591 = vmatpush.bf16.msrb.mxu0 %v543_v37  ;;  %v6747_v6 = vcvt.s32.f32 %v372_v24  ;;  %v6749_v9 = vcvt.s32.f32 %v376_v0  ;;  %v363_v10 = vunpack.c.0.s8 %v259_v36 }
  0x20   :  { %v367_v11 = vunpack.c.1.s8 %v259_v36  ;;  %v427_v25 = vcvt.s32.f32 %v299_v3  ;;  %v431_v26 = vcvt.s32.f32 %v303_v4  ;;  %v300_v44 = vunpack.c.0.s8 %v244_v48  ;;  %202 = vmatpush.bf16.msra.mxu2 %v6310_v46  ;;  %215 = vmatpush.bf16.msra.mxu3 %v6314_v55  ;;  %v236_v3 = vld [vmem:[%s8993_s5 + $0x8] sm:$0xff] }
  0x21   :  { %604 = vmatpush.bf16.msrb.mxu1 %v575_v2  ;;  %v304_v12 = vunpack.c.1.s8 %v244_v48  ;;  %v544_v28 = vpack.c.bf16 %v6737_v63, %v6735_v38  ;;  %v491_v45 = vcvt.s32.f32 %v363_v10  ;;  %v364_v14 = vunpack.c.0.s8 %v260_v53  ;;  %v251_v38 = vld [vmem:[%s8993_s5 + $0x80] sm:$0xff] }
  0x22   :  { %v495_v13 = vcvt.s32.f32 %v367_v11  ;;  %v539_v16 = vpack.c.bf16 %v431_v26, %v427_v25  ;;  %v6765_v18 = vcvt.s32.f32 %v300_v44  ;;  %v368_v23 = vunpack.c.1.s8 %v260_v53  ;;  %v252_v11 = vld [vmem:[%s8993_s5 + $0x88] sm:$0xff] }
  0x23   :  { %v6767_v22 = vcvt.s32.f32 %v304_v12  ;;  %v576_v41 = vpack.c.bf16 %v6749_v9, %v6747_v6  ;;  %v291_v43 = vunpack.c.2.s8 %v239_v27  ;;  %v295_v46 = vunpack.c.3.s8 %v239_v27  ;;  %6355 = vmatmul.msk.bf16.vlgmr.msra.gmra.mxu2 %vm184_vm3, %v6693_v5  ;;  %6356 = vmatmul.msk.bf16.vlgmr.msra.gmra.mxu3 %vm184_vm3, %v6693_v5 }
  0x24   :  { %615 = vmatpush.bf16.msrb.mxu2 %v552_v19  ;;  %628 = vmatpush.bf16.msrb.mxu3 %v584_v59  ;;  %v571_v42 = vpack.c.bf16 %v495_v13, %v491_v45  ;;  %v492_v55 = vcvt.s32.f32 %v364_v14  ;;  %v496_v30 = vcvt.s32.f32 %v368_v23  ;;  %v355_v31 = vunpack.c.2.s8 %v255_v15 }
  0x25   :  { %592 = vmatpush.bf16.msrb.mxu0 %v539_v16  ;;  %v359_v34 = vunpack.c.3.s8 %v255_v15  ;;  %v419_v7 = vcvt.s32.f32 %v291_v43  ;;  %v423_v8 = vcvt.s32.f32 %v295_v46  ;;  %v292_v19 = vunpack.c.2.s8 %v240_v29 }
  0x26   :  { %v296_v35 = vunpack.c.3.s8 %v240_v29  ;;  %605 = vmatpush.bf16.msrb.mxu1 %v571_v42  ;;  %v540_v36 = vpack.c.bf16 %v6767_v22, %v6765_v18  ;;  %v483_v39 = vcvt.s32.f32 %v355_v31  ;;  %v356_v32 = vunpack.c.2.s8 %v256_v47 }
  0x27   :  { %v487_v40 = vcvt.s32.f32 %v359_v34  ;;  %v535_v33 = vpack.c.bf16 %v423_v8, %v419_v7  ;;  %v420_v48 = vcvt.s32.f32 %v292_v19  ;;  %v360_v50 = vunpack.c.3.s8 %v256_v47 }
  0x28   :  { %616 = vmatpush.bf16.msrb.mxu2 %v548_v17  ;;  %629 = vmatpush.bf16.msrb.mxu3 %v580_v1  ;;  %v424_v49 = vcvt.s32.f32 %v296_v35  ;;  %v484_v52 = vcvt.s32.f32 %v356_v32  ;;  %v283_v5 = vunpack.c.0.s8 %v239_v27  ;;  %v287_v53 = vunpack.c.1.s8 %v239_v27  ;;  %v235_v17 = vld [vmem:[%s8993_s5] sm:$0xff] }
  0x29   :  { %v567_v51 = vpack.c.bf16 %v487_v40, %v483_v39  ;;  %v572_v54 = vpack.c.bf16 %v496_v30, %v492_v55  ;;  %593 = vmatpush.bf16.msrb.mxu0 %v535_v33  ;;  %v488_v56 = vcvt.s32.f32 %v360_v50  ;;  %v347_v57 = vunpack.c.0.s8 %v255_v15  ;;  %v249_v40 = vld [vmem:[%s8993_s5 + $0x70] sm:$0xff] }
  0x2a   :  { %v351_v58 = vunpack.c.1.s8 %v255_v15  ;;  %v411_v59 = vcvt.s32.f32 %v283_v5  ;;  %v415_v60 = vcvt.s32.f32 %v287_v53  ;;  %v284_v61 = vunpack.c.0.s8 %v240_v29  ;;  %v265_v50 = vld [vmem:[%s8993_s5 + $0xf0] sm:$0xff] }
  0x2b   :  { %606 = vmatpush.bf16.msrb.mxu1 %v567_v51  ;;  %v288_v62 = vunpack.c.1.s8 %v240_v29  ;;  %v536_v20 = vpack.c.bf16 %v424_v49, %v420_v48  ;;  %v475_v21 = vcvt.s32.f32 %v347_v57  ;;  %v348_v37 = vunpack.c.0.s8 %v256_v47 }
  0x2c   :  { %617 = vmatpush.bf16.msrb.mxu2 %v544_v28  ;;  %630 = vmatpush.bf16.msrb.mxu3 %v576_v41  ;;  %v479_v24 = vcvt.s32.f32 %v351_v58  ;;  %v568_v63 = vpack.c.bf16 %v488_v56, %v484_v52  ;;  %v531_v0 = vpack.c.bf16 %v415_v60, %v411_v59  ;;  %v412_v1 = vcvt.s32.f32 %v284_v61  ;;  %v266_v60 = vld [vmem:[%s8993_s5 + $0xf8] sm:$0xff] }
  0x2d   :  { %v352_v2 = vunpack.c.1.s8 %v256_v47  ;;  %v416_v6 = vcvt.s32.f32 %v288_v62  ;;  %v275_v9 = vunpack.c.2.s8 %v235_v17  ;;  %v279_v10 = vunpack.c.3.s8 %v235_v17 }
  0x2e   :  { %v563_v4 = vpack.c.bf16 %v479_v24, %v475_v21  ;;  %594 = vmatpush.bf16.msrb.mxu0 %v531_v0  ;;  %v476_v25 = vcvt.s32.f32 %v348_v37  ;;  %v339_v44 = vunpack.c.2.s8 %v251_v38  ;;  %v343_v12 = vunpack.c.3.s8 %v251_v38 }
  0x2f   :  { %v480_v26 = vcvt.s32.f32 %v352_v2  ;;  %v403_v27 = vcvt.s32.f32 %v275_v9  ;;  %v407_v28 = vcvt.s32.f32 %v279_v10  ;;  %v276_v45 = vunpack.c.2.s8 %v236_v3 }
  0x30   :  { %618 = vmatpush.bf16.msrb.mxu2 %v540_v36  ;;  %631 = vmatpush.bf16.msrb.mxu3 %v572_v54  ;;  %v280_v13 = vunpack.c.3.s8 %v236_v3  ;;  %v467_v14 = vcvt.s32.f32 %v339_v44  ;;  %v471_v15 = vcvt.s32.f32 %v343_v12  ;;  %v340_v16 = vunpack.c.2.s8 %v252_v11  ;;  %v250_v54 = vld [vmem:[%s8993_s5 + $0x78] sm:$0xff] }
  0x31   :  { %607 = vmatpush.bf16.msrb.mxu1 %v563_v4  ;;  %v527_v18 = vpack.c.bf16 %v407_v28, %v403_v27  ;;  %v344_v22 = vunpack.c.3.s8 %v252_v11  ;;  %v532_v23 = vpack.c.bf16 %v416_v6, %v412_v1  ;;  %v564_v29 = vpack.c.bf16 %v480_v26, %v476_v25 }
  0x32   :  { %v559_v41 = vpack.c.bf16 %v471_v15, %v467_v14  ;;  %v404_v42 = vcvt.s32.f32 %v276_v45  ;;  %v408_v43 = vcvt.s32.f32 %v280_v13  ;;  %v468_v46 = vcvt.s32.f32 %v340_v16 }
  0x33   :  { %v472_v47 = vcvt.s32.f32 %v344_v22  ;;  %595 = vmatpush.bf16.msrb.mxu0 %v527_v18  ;;  %v267_v31 = vunpack.c.0.s8 %v235_v17  ;;  %v271_v34 = vunpack.c.1.s8 %v235_v17  ;;  %v331_v7 = vunpack.c.0.s8 %v251_v38 }
  0x34   :  { %619 = vmatpush.bf16.msrb.mxu2 %v536_v20  ;;  %632 = vmatpush.bf16.msrb.mxu3 %v568_v63  ;;  %v528_v55 = vpack.c.bf16 %v408_v43, %v404_v42  ;;  %v335_v8 = vunpack.c.1.s8 %v251_v38  ;;  %v268_v19 = vunpack.c.0.s8 %v236_v3  ;;  %v272_v35 = vunpack.c.1.s8 %v236_v3 }
  0x35   :  { %608 = vmatpush.bf16.msrb.mxu1 %v559_v41  ;;  %v560_v30 = vpack.c.bf16 %v472_v47, %v468_v46  ;;  %v332_v36 = vunpack.c.0.s8 %v252_v11  ;;  %v336_v39 = vunpack.c.1.s8 %v252_v11  ;;  %v395_v32 = vcvt.s32.f32 %v267_v31  ;;  %v245_v31 = vld [vmem:[%s8993_s5 + $0x50] sm:$0xff] }
  0x36   :  { %v399_v33 = vcvt.s32.f32 %v271_v34  ;;  %v459_v48 = vcvt.s32.f32 %v331_v7  ;;  %v463_v49 = vcvt.s32.f32 %v335_v8  ;;  %v396_v51 = vcvt.s32.f32 %v268_v19  ;;  %v261_v34 = vld [vmem:[%s8993_s5 + $0xd0] sm:$0xff]  ;;  %v246_v7 = vld [vmem:[%s8993_s5 + $0x58] sm:$0xff] }
  0x37   :  { %v400_v52 = vcvt.s32.f32 %v272_v35  ;;  %v460_v5 = vcvt.s32.f32 %v332_v36  ;;  %v464_v53 = vcvt.s32.f32 %v336_v39  ;;  %v325_v58 = vunpack.c.2.s8 %v249_v40  ;;  %v262_v39 = vld [vmem:[%s8993_s5 + $0xd8] sm:$0xff] }
  0x38   :  { %620 = vmatpush.bf16.msrb.mxu2 %v532_v23  ;;  %633 = vmatpush.bf16.msrb.mxu3 %v564_v29  ;;  %v523_v56 = vpack.c.bf16 %v399_v33, %v395_v32  ;;  %v555_v57 = vpack.c.bf16 %v463_v49, %v459_v48  ;;  %v329_v59 = vunpack.c.3.s8 %v249_v40  ;;  %v389_v17 = vunpack.c.2.s8 %v265_v50 }
  0x39   :  { %v524_v61 = vpack.c.bf16 %v400_v52, %v396_v51  ;;  %v556_v62 = vpack.c.bf16 %v464_v53, %v460_v5  ;;  %v393_v20 = vunpack.c.3.s8 %v265_v50  ;;  %v453_v21 = vcvt.s32.f32 %v325_v58 }
  0x3a   :  { %596 = vmatpush.bf16.msrb.mxu0 %v523_v56  ;;  %609 = vmatpush.bf16.msrb.mxu1 %v555_v57  ;;  %v457_v24 = vcvt.s32.f32 %v329_v59  ;;  %v326_v37 = vunpack.c.2.s8 %v250_v54  ;;  %v330_v38 = vunpack.c.3.s8 %v250_v54  ;;  %v517_v63 = vcvt.s32.f32 %v389_v17 }
  0x3b   :  { %v521_v0 = vcvt.s32.f32 %v393_v20  ;;  %v390_v1 = vunpack.c.2.s8 %v266_v60  ;;  %v394_v2 = vunpack.c.3.s8 %v266_v60  ;;  %v317_v9 = vunpack.c.0.s8 %v249_v40 }
  0x3c   :  { %621 = vmatpush.bf16.msrb.mxu2 %v528_v55  ;;  %634 = vmatpush.bf16.msrb.mxu3 %v560_v30  ;;  %v553_v3 = vpack.c.bf16 %v457_v24, %v453_v21  ;;  %v454_v4 = vcvt.s32.f32 %v326_v37  ;;  %v458_v6 = vcvt.s32.f32 %v330_v38  ;;  %v321_v26 = vunpack.c.1.s8 %v249_v40 }
  0x3d   :  { %v585_v10 = vpack.c.bf16 %v521_v0, %v517_v63  ;;  %v518_v11 = vcvt.s32.f32 %v390_v1  ;;  %v522_v25 = vcvt.s32.f32 %v394_v2  ;;  %v445_v12 = vcvt.s32.f32 %v317_v9  ;;  %v257_v9 = vld [vmem:[%s8993_s5 + $0xb0] sm:$0xff] }
  0x3e   :  { %641 = vmatpush.bf16.msra.mxu0 %v553_v3  ;;  %v554_v44 = vpack.c.bf16 %v458_v6, %v454_v4  ;;  %v381_v27 = vunpack.c.0.s8 %v265_v50  ;;  %v385_v28 = vunpack.c.1.s8 %v265_v50  ;;  %v449_v13 = vcvt.s32.f32 %v321_v26  ;;  %v241_v6 = vld [vmem:[%s8993_s5 + $0x30] sm:$0xff] }
  0x3f   :  { %654 = vmatpush.bf16.msra.mxu1 %v585_v10  ;;  %v586_v45 = vpack.c.bf16 %v522_v25, %v518_v11  ;;  %v318_v14 = vunpack.c.0.s8 %v250_v54  ;;  %v322_v15 = vunpack.c.1.s8 %v250_v54  ;;  %v382_v22 = vunpack.c.0.s8 %v266_v60  ;;  %v242_v10 = vld [vmem:[%s8993_s5 + $0x38] sm:$0xff] }
  0x40   :  { %622 = vmatpush.bf16.msrb.mxu2 %v524_v61  ;;  %635 = vmatpush.bf16.msrb.mxu3 %v556_v62  ;;  %v509_v16 = vcvt.s32.f32 %v381_v27  ;;  %v513_v18 = vcvt.s32.f32 %v385_v28  ;;  %v386_v23 = vunpack.c.1.s8 %v266_v60  ;;  %v549_v29 = vpack.c.bf16 %v449_v13, %v445_v12  ;;  %v258_v12 = vld [vmem:[%s8993_s5 + $0xb8] sm:$0xff] }
  0x41   :  { %v446_v41 = vcvt.s32.f32 %v318_v14  ;;  %v450_v42 = vcvt.s32.f32 %v322_v15  ;;  %v510_v46 = vcvt.s32.f32 %v382_v22  ;;  %v309_v8 = vunpack.c.2.s8 %v245_v31 }
  0x42   :  { %v581_v43 = vpack.c.bf16 %v513_v18, %v509_v16  ;;  %v514_v47 = vcvt.s32.f32 %v386_v23  ;;  %642 = vmatpush.bf16.msra.mxu0 %v549_v29  ;;  %v313_v19 = vunpack.c.3.s8 %v245_v31  ;;  %v373_v35 = vunpack.c.2.s8 %v261_v34 }
  0x43   :  { %v550_v55 = vpack.c.bf16 %v450_v42, %v446_v41  ;;  %v377_v36 = vunpack.c.3.s8 %v261_v34  ;;  %v310_v40 = vunpack.c.2.s8 %v246_v7  ;;  %v314_v32 = vunpack.c.3.s8 %v246_v7 }
  0x44   :  { %667 = vmatpush.bf16.msra.mxu2 %v554_v44  ;;  %680 = vmatpush.bf16.msra.mxu3 %v586_v45  ;;  %v582_v30 = vpack.c.bf16 %v514_v47, %v510_v46  ;;  %v374_v33 = vunpack.c.2.s8 %v262_v39  ;;  %v378_v48 = vunpack.c.3.s8 %v262_v39  ;;  %v437_v49 = vcvt.s32.f32 %v309_v8 }
  0x45   :  { %655 = vmatpush.bf16.msra.mxu1 %v581_v43  ;;  %v441_v50 = vcvt.s32.f32 %v313_v19  ;;  %v501_v51 = vcvt.s32.f32 %v373_v35  ;;  %v505_v52 = vcvt.s32.f32 %v377_v36  ;;  %v438_v5 = vcvt.s32.f32 %v310_v40 }
  0x46   :  { %v442_v53 = vcvt.s32.f32 %v314_v32  ;;  %v502_v54 = vcvt.s32.f32 %v374_v33  ;;  %v506_v56 = vcvt.s32.f32 %v378_v48  ;;  %v301_v61 = vunpack.c.0.s8 %v245_v31 }
  0x47   :  { %v545_v57 = vpack.c.bf16 %v441_v50, %v437_v49  ;;  %v577_v58 = vpack.c.bf16 %v505_v52, %v501_v51  ;;  %v305_v62 = vunpack.c.1.s8 %v245_v31  ;;  %v365_v17 = vunpack.c.0.s8 %v261_v34  ;;  %v237_v49 = vld [vmem:[%s8993_s5 + $0x10] sm:$0xff] }
  0x48   :  { %668 = vmatpush.bf16.msra.mxu2 %v550_v55  ;;  %681 = vmatpush.bf16.msra.mxu3 %v582_v30  ;;  %v546_v59 = vpack.c.bf16 %v442_v53, %v438_v5  ;;  %v578_v60 = vpack.c.bf16 %v506_v56, %v502_v54  ;;  %v369_v20 = vunpack.c.1.s8 %v261_v34  ;;  %v302_v21 = vunpack.c.0.s8 %v246_v7  ;;  %v253_v53 = vld [vmem:[%s8993_s5 + $0x90] sm:$0xff] }
  0x49   :  { %643 = vmatpush.bf16.msra.mxu0 %v545_v57  ;;  %656 = vmatpush.bf16.msra.mxu1 %v577_v58  ;;  %v306_v24 = vunpack.c.1.s8 %v246_v7  ;;  %v429_v37 = vcvt.s32.f32 %v301_v61  ;;  %v433_v38 = vcvt.s32.f32 %v305_v62  ;;  %v366_v63 = vunpack.c.0.s8 %v262_v39 }
  0x4a   :  { %v370_v0 = vunpack.c.1.s8 %v262_v39  ;;  %v493_v1 = vcvt.s32.f32 %v365_v17  ;;  %v497_v2 = vcvt.s32.f32 %v369_v20  ;;  %v430_v3 = vcvt.s32.f32 %v302_v21 }
  0x4b   :  { %v434_v4 = vcvt.s32.f32 %v306_v24  ;;  %v541_v11 = vpack.c.bf16 %v433_v38, %v429_v37  ;;  %v494_v25 = vcvt.s32.f32 %v366_v63  ;;  %v293_v44 = vunpack.c.2.s8 %v241_v6 }
  0x4c   :  { %669 = vmatpush.bf16.msra.mxu2 %v546_v59  ;;  %682 = vmatpush.bf16.msra.mxu3 %v578_v60  ;;  %v498_v26 = vcvt.s32.f32 %v370_v0  ;;  %v573_v27 = vpack.c.bf16 %v497_v2, %v493_v1  ;;  %v297_v45 = vunpack.c.3.s8 %v241_v6  ;;  %v357_v13 = vunpack.c.2.s8 %v257_v9  ;;  %v238_v59 = vld [vmem:[%s8993_s5 + $0x18] sm:$0xff] }
  0x4d   :  { %v542_v28 = vpack.c.bf16 %v434_v4, %v430_v3  ;;  %644 = vmatpush.bf16.msra.mxu0 %v541_v11  ;;  %v421_v18 = vcvt.s32.f32 %v293_v44  ;;  %v361_v22 = vunpack.c.3.s8 %v257_v9  ;;  %v294_v23 = vunpack.c.2.s8 %v242_v10  ;;  %v254_v0 = vld [vmem:[%s8993_s5 + $0x98] sm:$0xff] }
  0x4e   :  { %v574_v16 = vpack.c.bf16 %v498_v26, %v494_v25  ;;  %657 = vmatpush.bf16.msra.mxu1 %v573_v27  ;;  %v425_v29 = vcvt.s32.f32 %v297_v45  ;;  %v485_v41 = vcvt.s32.f32 %v357_v13  ;;  %v298_v42 = vunpack.c.3.s8 %v242_v10 }
  0x4f   :  { %v358_v43 = vunpack.c.2.s8 %v258_v12  ;;  %v489_v46 = vcvt.s32.f32 %v361_v22  ;;  %v422_v47 = vcvt.s32.f32 %v294_v23  ;;  %v362_v55 = vunpack.c.3.s8 %v258_v12 }
  0x50   :  { %670 = vmatpush.bf16.msra.mxu2 %v542_v28  ;;  %683 = vmatpush.bf16.msra.mxu3 %v574_v16  ;;  %v285_v30 = vunpack.c.0.s8 %v241_v6  ;;  %v537_v31 = vpack.c.bf16 %v425_v29, %v421_v18  ;;  %v426_v34 = vcvt.s32.f32 %v298_v42  ;;  %v289_v8 = vunpack.c.1.s8 %v241_v6 }
  0x51   :  { %v486_v7 = vcvt.s32.f32 %v358_v43  ;;  %v569_v19 = vpack.c.bf16 %v489_v46, %v485_v41  ;;  %v490_v35 = vcvt.s32.f32 %v362_v55  ;;  %v349_v39 = vunpack.c.0.s8 %v257_v9 }
  0x52   :  { %v413_v36 = vcvt.s32.f32 %v285_v30  ;;  %645 = vmatpush.bf16.msra.mxu0 %v537_v31  ;;  %v538_v40 = vpack.c.bf16 %v426_v34, %v422_v47  ;;  %v417_v32 = vcvt.s32.f32 %v289_v8  ;;  %v353_v33 = vunpack.c.1.s8 %v257_v9 }
  0x53   :  { %v286_v48 = vunpack.c.0.s8 %v242_v10  ;;  %658 = vmatpush.bf16.msra.mxu1 %v569_v19  ;;  %v570_v50 = vpack.c.bf16 %v490_v35, %v486_v7  ;;  %v477_v51 = vcvt.s32.f32 %v349_v39  ;;  %v290_v52 = vunpack.c.1.s8 %v242_v10 }
  0x54   :  { %v350_v5 = vunpack.c.0.s8 %v258_v12  ;;  %671 = vmatpush.bf16.msra.mxu2 %v538_v40  ;;  %v533_v54 = vpack.c.bf16 %v417_v32, %v413_v36  ;;  %v481_v56 = vcvt.s32.f32 %v353_v33  ;;  %v354_v58 = vunpack.c.1.s8 %v258_v12  ;;  %v221_v40 = vld [vmem:[%s8992_s4] sm:$0x3] }
  0x55   :  { %v414_v57 = vcvt.s32.f32 %v286_v48  ;;  %684 = vmatpush.bf16.msra.mxu3 %v570_v50  ;;  %v418_v62 = vcvt.s32.f32 %v290_v52  ;;  %v277_v20 = vunpack.c.2.s8 %v237_v49  ;;  %v281_v21 = vunpack.c.3.s8 %v237_v49 }
  0x56   :  { %v478_v17 = vcvt.s32.f32 %v350_v5  ;;  %646 = vmatpush.bf16.msra.mxu0 %v533_v54  ;;  %v565_v24 = vpack.c.bf16 %v481_v56, %v477_v51  ;;  %v482_v37 = vcvt.s32.f32 %v354_v58  ;;  %v341_v38 = vunpack.c.2.s8 %v253_v53 }
  0x57   :  { %v345_v63 = vunpack.c.3.s8 %v253_v53  ;;  %v534_v1 = vpack.c.bf16 %v418_v62, %v414_v57  ;;  %v405_v2 = vcvt.s32.f32 %v277_v20  ;;  %v409_v3 = vcvt.s32.f32 %v281_v21 }
  0x58   :  { %v278_v4 = vunpack.c.2.s8 %v238_v59  ;;  %659 = vmatpush.bf16.msra.mxu1 %v565_v24  ;;  %v566_v6 = vpack.c.bf16 %v482_v37, %v478_v17  ;;  %v469_v9 = vcvt.s32.f32 %v341_v38  ;;  %v282_v11 = vunpack.c.3.s8 %v238_v59 }
  0x59   :  { %v473_v10 = vcvt.s32.f32 %v345_v63  ;;  %672 = vmatpush.bf16.msra.mxu2 %v534_v1  ;;  %v529_v25 = vpack.c.bf16 %v409_v3, %v405_v2  ;;  %v342_v44 = vunpack.c.2.s8 %v254_v0  ;;  %v346_v12 = vunpack.c.3.s8 %v254_v0  ;;  %v922_v3 = vld [vmem:[%s8997_s9 + $0x1c0] sm:$0xff] }
  0x5a   :  { %v406_v26 = vcvt.s32.f32 %v278_v4  ;;  %685 = vmatpush.bf16.msra.mxu3 %v566_v6  ;;  %v410_v28 = vcvt.s32.f32 %v282_v11  ;;  %v269_v45 = vunpack.c.0.s8 %v237_v49  ;;  %v273_v13 = vunpack.c.1.s8 %v237_v49 }
  0x5b   :  { %v561_v27 = vpack.c.bf16 %v473_v10, %v469_v9  ;;  %647 = vmatpush.bf16.msra.mxu0 %v529_v25  ;;  %v470_v16 = vcvt.s32.f32 %v342_v44  ;;  %v474_v18 = vcvt.s32.f32 %v346_v12  ;;  %v333_v22 = vunpack.c.0.s8 %v253_v53  ;;  %v882_v25 = vld [vmem:[%s8997_s9 + $0x80] sm:$0xff] }
  0x5c   :  { %v337_v23 = vunpack.c.1.s8 %v253_v53  ;;  %v530_v29 = vpack.c.bf16 %v410_v28, %v406_v26  ;;  %v397_v41 = vcvt.s32.f32 %v269_v45  ;;  %v401_v42 = vcvt.s32.f32 %v273_v13 }
  0x5d   :  { %660 = vmatpush.bf16.msra.mxu1 %v561_v27  ;;  %v270_v43 = vunpack.c.0.s8 %v238_v59  ;;  %v562_v46 = vpack.c.bf16 %v474_v18, %v470_v16  ;;  %v461_v47 = vcvt.s32.f32 %v333_v22  ;;  %v274_v30 = vunpack.c.1.s8 %v238_v59 }
  0x5e   :  { %v465_v55 = vcvt.s32.f32 %v337_v23  ;;  %673 = vmatpush.bf16.msra.mxu2 %v530_v29  ;;  %v525_v31 = vpack.c.bf16 %v401_v42, %v397_v41  ;;  %v334_v7 = vunpack.c.0.s8 %v254_v0  ;;  %v338_v8 = vunpack.c.1.s8 %v254_v0 }
  0x5f   :  { %v398_v34 = vcvt.s32.f32 %v270_v43  ;;  %686 = vmatpush.bf16.msra.mxu3 %v562_v46  ;;  %v402_v35 = vcvt.s32.f32 %v274_v30  ;;  %v223_v48 = vperm.slane %v221_v40, 0  ;;  %v224_v49 = vperm.slane %v221_v40, 1  ;;  %v6867_v46 = vld [vmem:[%s8994_s6] sm:$0xf] }
  0x60   :  { %v557_v19 = vpack.c.bf16 %v465_v55, %v461_v47  ;;  %648 = vmatpush.bf16.msra.mxu0 %v525_v31  ;;  %v462_v36 = vcvt.s32.f32 %v334_v7  ;;  %v466_v39 = vcvt.s32.f32 %v338_v8  ;;  %v1234_v10 = vunpack.c.2.s8 %v922_v3  ;;  %v914_v31 = vld [vmem:[%s8997_s9 + $0x180] sm:$0xff] }
  0x61   :  { %v526_v32 = vpack.c.bf16 %v402_v35, %v398_v34  ;;  %v1242_v11 = vunpack.c.3.s8 %v922_v3  ;;  %v1074_v12 = vunpack.c.2.s8 %v882_v25  ;;  %v1082_v45 = vunpack.c.3.s8 %v882_v25  ;;  %v874_v40 = vld [vmem:[%s8997_s9 + $0x40] sm:$0xff] }
  0x62   :  { %661 = vmatpush.bf16.msra.mxu1 %v557_v19  ;;  %v558_v33 = vpack.c.bf16 %v466_v39, %v462_v36  ;;  %v1746_v44 = vcvt.s32.f32 %v1234_v10  ;;  %v1218_v16 = vunpack.c.0.s8 %v922_v3  ;;  %v1226_v23 = vunpack.c.1.s8 %v922_v3 }
  0x63   :  { %674 = vmatpush.bf16.msra.mxu2 %v526_v32  ;;  %v1754_v28 = vcvt.s32.f32 %v1242_v11  ;;  %v1586_v13 = vcvt.s32.f32 %v1074_v12  ;;  %v1594_v22 = vcvt.s32.f32 %v1082_v45  ;;  %v1058_v47 = vunpack.c.0.s8 %v882_v25  ;;  %v954_v32 = vld [vmem:[%s8997_s9 + $0x2c0] sm:$0xff] }
  0x64   :  { %687 = vmatpush.bf16.msra.mxu3 %v558_v33  ;;  %v1730_v29 = vcvt.s32.f32 %v1218_v16  ;;  %v1738_v43 = vcvt.s32.f32 %v1226_v23  ;;  %v1066_v55 = vunpack.c.1.s8 %v882_v25  ;;  %v1202_v8 = vunpack.c.2.s8 %v914_v31  ;;  %v866_v25 = vld [vmem:[%s8997_s9] sm:$0xff] }
  0x65   :  { %v2138_v18 = vpack.c.bf16 %v1754_v28, %v1746_v44  ;;  %v2058_v42 = vpack.c.bf16 %v1594_v22, %v1586_v13  ;;  %v1570_v34 = vcvt.s32.f32 %v1058_v47  ;;  %v1210_v19 = vunpack.c.3.s8 %v914_v31 }
  0x66   :  { %v2130_v30 = vpack.c.bf16 %v1738_v43, %v1730_v29  ;;  %v1578_v7 = vcvt.s32.f32 %v1066_v55  ;;  %v695_v35 = vperm.slane %v6867_v46, 0  ;;  %v696_v39 = vperm.slane %v6867_v46, 1 }
  0x67   :  { %v1010_v28 = vunpack.c.2.s8 %v866_v25  ;;  %v1018_v23 = vunpack.c.3.s8 %v866_v25 }
  0x68   :  { %v2050_v33 = vpack.c.bf16 %v1578_v7, %v1570_v34 }
  0x69   :  { %v1530_v55 = vcvt.s32.f32 %v1018_v23 }
  0x90   :  { %v6834_v14 = vpop.f32.mrf.mxu0  ;;  %v6836_v15 = vpop.f32.mrf.mxu1 }
  0x98   :  { %v104_v60 = vpop.f32.mrf.mxu0  ;;  %v117_v61 = vpop.f32.mrf.mxu1 }
  0xa6   :  { %v204_v50 = vpop.f32.mrf.mxu2  ;;  %v217_v51 = vpop.f32.mrf.mxu3 }
  0xa7   :  { %v205_v52 = vadd.f32 %v204_v50, %v6834_v14  ;;  %v218_v5 = vadd.f32 %v217_v51, %v6836_v15  ;;  %v6444_v14 = vmov 8.0   ;;  %v890_v15 = vld [vmem:[%s8997_s9 + $0xc0] sm:$0xff]  ;;  %v1042_v50 = vunpack.c.2.s8 %v874_v40 }
  0xa8   :  { %6373 = vrcp.f32 %v6444_v14  ;;  %v1106_v20 = vunpack.c.2.s8 %v890_v15  ;;  %v1114_v21 = vunpack.c.3.s8 %v890_v15  ;;  %v1090_v1 = vunpack.c.0.s8 %v890_v15 }
  0xa9   :  { %v227_v53 = vadd.f32 %v223_v48, %v205_v52  ;;  %v228_v54 = vadd.f32 %v224_v49, %v218_v5  ;;  %v1098_v2 = vunpack.c.1.s8 %v890_v15  ;;  %v1714_v48 = vcvt.s32.f32 %v1202_v8 }
  0xaa   :  { %v1618_v24 = vcvt.s32.f32 %v1106_v20  ;;  %v1626_v37 = vcvt.s32.f32 %v1114_v21  ;;  %v1602_v6 = vcvt.s32.f32 %v1090_v1  ;;  %v1722_v49 = vcvt.s32.f32 %v1210_v19 }
  0xab   :  { %vm229_vm4 = vcmp.gt.f32.partialorder %v227_v53, 0.0  ;;  %v231_v56 = vmul.f32 0.2, %v227_v53  ;;  %vm230_vm5 = vcmp.gt.f32.partialorder %v228_v54, 0.0  ;;  %v232_v57 = vmul.f32 0.2, %v228_v54 }
  0xac   :  { %v2074_v0 = vpack.c.bf16 %v1626_v37, %v1618_v24  ;;  %v1610_v9 = vcvt.s32.f32 %v1098_v2  ;;  %v697_v51 = vperm.slane %v6867_v46, 2  ;;  %v1050_v52 = vunpack.c.3.s8 %v874_v40 }
  0xad   :  { %v233_v58 = vsel %vm229_vm4, %v227_v53, %v231_v56  ;;  %v234_v59 = vsel %vm230_vm5, %v228_v54, %v232_v57  ;;  %v1362_v5 = vunpack.c.2.s8 %v954_v32  ;;  %v1370_v53 = vunpack.c.3.s8 %v954_v32 }
  0xae   :  { %v587_v60 = vpack.c.bf16 %v233_v58, %v233_v58  ;;  %v588_v61 = vpack.c.bf16 %v234_v59, %v234_v59  ;;  %v206_v62 = vpop.f32.mrf.mxu2  ;;  %v219_v17 = vpop.f32.mrf.mxu3  ;;  %v2066_v26 = vpack.c.bf16 %v1610_v9, %v1602_v6  ;;  %v2122_v54 = vpack.c.bf16 %v1722_v49, %v1714_v48 }
  0xaf   :  { %v6374_v38 = vpop.eup %6373  ;;  %v1554_v56 = vcvt.s32.f32 %v1042_v50  ;;  %v1186_v57 = vunpack.c.0.s8 %v914_v31  ;;  %v1194_v58 = vunpack.c.1.s8 %v914_v31  ;;  %v698_v59 = vperm.slane %v6867_v46, 3 }
  0xb0   :  { %597 = vmatmul.bf16.vlgmr.msrb.gmra.mxu0 %v587_v60  ;;  %610 = vmatmul.bf16.vlgmr.msrb.gmra.mxu1 %v588_v61  ;;  %v734_v63 = vmul.f32 8.0, %v6374_v38  ;;  %vm738_vm6 = vweird.f32 %v6374_v38  ;;  %v1882_v62 = vcvt.s32.f32 %v1370_v53  ;;  %v1026_v15 = vunpack.c.0.s8 %v874_v40 }
  0xb1   :  { %623 = vmatmul.bf16.vlgmr.msrb.gmra.mxu2 %v587_v60  ;;  %636 = vmatmul.bf16.vlgmr.msrb.gmra.mxu3 %v588_v61  ;;  %v1698_v17 = vcvt.s32.f32 %v1186_v57  ;;  %v1706_v14 = vcvt.s32.f32 %v1194_v58  ;;  %v1034_v20 = vunpack.c.1.s8 %v874_v40  ;;  %v1346_v37 = vunpack.c.0.s8 %v954_v32  ;;  %v6909_v57 = vld [vmem:[%s8997_s9 + $0xc8] sm:$0xff] }
  0xb2   :  { %v735_v4 = vsub.f32 1.0, %v734_v63  ;;  %2278 = vmatpush.bf16.msrb.mxu0 %v2074_v0  ;;  %2291 = vmatpush.bf16.msrb.mxu1 %v2138_v18  ;;  %v906_v63 = vld [vmem:[%s8997_s9 + $0x140] sm:$0xff]  ;;  %v1538_v2 = vcvt.s32.f32 %v1026_v15 }
  0xb3   :  { %v986_v0 = vld [vmem:[%s8997_s9 + $0x3c0] sm:$0xff]  ;;  %v2114_v1 = vpack.c.bf16 %v1706_v14, %v1698_v17  ;;  %v1546_v3 = vcvt.s32.f32 %v1034_v20  ;;  %v1858_v6 = vcvt.s32.f32 %v1346_v37  ;;  %v1178_v10 = vunpack.c.3.s8 %v906_v63 }
  0xb4   :  { %v736_v27 = vmul.f32 %v6374_v38, %v735_v4  ;;  %v1170_v4 = vunpack.c.2.s8 %v906_v63  ;;  %v1490_v11 = vunpack.c.2.s8 %v986_v0  ;;  %v1154_v31 = vunpack.c.0.s8 %v906_v63  ;;  %v6915_v15 = vld [vmem:[%s8997_s9 + $0x100] sm:$0xff] }
  0xb5   :  { %v2034_v44 = vpack.c.bf16 %v1546_v3, %v1538_v2  ;;  %v1690_v18 = vcvt.s32.f32 %v1178_v10  ;;  %v1162_v19 = vunpack.c.1.s8 %v906_v63  ;;  %v1474_v48 = vunpack.c.0.s8 %v986_v0 }
  0xb6   :  { %2279 = vmatpush.bf16.msrb.mxu0 %v2066_v26  ;;  %v737_v41 = vadd.f32 %v6374_v38, %v736_v27  ;;  %2292 = vmatpush.bf16.msrb.mxu1 %v2130_v30  ;;  %v6896_v26 = vld [vmem:[%s8997_s9 + $0x280] sm:$0xff]  ;;  %v1682_v12 = vcvt.s32.f32 %v1170_v4  ;;  %v1498_v27 = vunpack.c.3.s8 %v986_v0  ;;  %v2002_v22 = vcvt.s32.f32 %v1490_v11 }
  0xb7   :  { %v1330_v43 = vunpack.c.2.s8 %v6896_v26  ;;  %v1338_v30 = vunpack.c.3.s8 %v6896_v26  ;;  %v1674_v50 = vcvt.s32.f32 %v1162_v19  ;;  %v1107_v2 = vunpack.c.2.s8 %v6909_v57  ;;  %v6923_v4 = vld [vmem:[%s8997_s9 + $0x380] sm:$0xff] }
  0xb8   :  { %v6873_v36 = vsel %vm738_vm6, %v6374_v38, %v737_v41  ;;  %v1354_v38 = vunpack.c.1.s8 %v954_v32  ;;  %v2010_v41 = vcvt.s32.f32 %v1498_v27  ;;  %v2106_v47 = vpack.c.bf16 %v1690_v18, %v1682_v12  ;;  %v6934_v27 = vld [vmem:[%s8997_s9 + $0x240] sm:$0xff] }
  0xb9   :  { %v1842_v8 = vcvt.s32.f32 %v1330_v43  ;;  %v1850_v32 = vcvt.s32.f32 %v1338_v30  ;;  %v1115_v3 = vunpack.c.3.s8 %v6909_v57  ;;  %v1138_v11 = vunpack.c.2.s8 %v6915_v15 }
  0xba   :  { %2280 = vmatpush.bf16.msrb.mxu0 %v2058_v42  ;;  %2293 = vmatpush.bf16.msrb.mxu1 %v2122_v54  ;;  %v1866_v9 = vcvt.s32.f32 %v1354_v38  ;;  %v1522_v42 = vcvt.s32.f32 %v1010_v28  ;;  %v2266_v7 = vpack.c.bf16 %v2010_v41, %v2002_v22  ;;  %v1986_v54 = vcvt.s32.f32 %v1474_v48 }
  0xbb   :  { %v2186_v53 = vpack.c.bf16 %v1850_v32, %v1842_v8  ;;  %v1322_v38 = vunpack.c.1.s8 %v6896_v26  ;;  %v1146_v12 = vunpack.c.3.s8 %v6915_v15  ;;  %v1466_v23 = vunpack.c.3.s8 %v6923_v4 }
  0xbc   :  { %v2194_v16 = vpack.c.bf16 %v1866_v9, %v1858_v6  ;;  %v2026_v40 = vpack.c.bf16 %v1530_v55, %v1522_v42  ;;  %2317 = vmatpush.bf16.msrb.mxu3 %v2266_v7  ;;  %v1298_v42 = vunpack.c.2.s8 %v6934_v27  ;;  %v1306_v43 = vunpack.c.3.s8 %v6934_v27 }
  0xbd   :  { %v1834_v10 = vcvt.s32.f32 %v1322_v38  ;;  %v1658_v22 = vcvt.s32.f32 %v1146_v12  ;;  %v1978_v7 = vcvt.s32.f32 %v1466_v23  ;;  %v1091_v8 = vunpack.c.0.s8 %v6909_v57 }
  0xbe   :  { %2281 = vmatpush.bf16.msrb.mxu0 %v2050_v33  ;;  %2294 = vmatpush.bf16.msrb.mxu1 %v2114_v1  ;;  %v1666_v33 = vcvt.s32.f32 %v1154_v31  ;;  %v1818_v48 = vcvt.s32.f32 %v1306_v43 }
  0xc0   :  { %649 = vmatmul.bf16.vlgmr.msra.gmra.mxu0 %v587_v60  ;;  %662 = vmatmul.bf16.vlgmr.msra.gmra.mxu1 %v588_v61 }
  0xc1   :  { %675 = vmatmul.bf16.vlgmr.msra.gmra.mxu2 %v587_v60  ;;  %688 = vmatmul.bf16.vlgmr.msra.gmra.mxu3 %v588_v61  ;;  %v1562_v60 = vcvt.s32.f32 %v1050_v52  ;;  %v1874_v61 = vcvt.s32.f32 %v1362_v5  ;;  %v1482_v52 = vunpack.c.1.s8 %v986_v0  ;;  %v994_v5 = vunpack.c.0.s8 %v866_v25 }
  0xc2   :  { %2295 = vmatpush.bf16.msrb.mxu1 %v2106_v47 }
  0xc3   :  { %v2042_v21 = vpack.c.bf16 %v1562_v60, %v1554_v56  ;;  %v2202_v24 = vpack.c.bf16 %v1882_v62, %v1874_v61  ;;  %v1002_v56 = vunpack.c.1.s8 %v866_v25  ;;  %v2098_v62 = vpack.c.bf16 %v1674_v50, %v1666_v33 }
  0xc4   :  { %v1994_v17 = vcvt.s32.f32 %v1482_v52  ;;  %v1506_v14 = vcvt.s32.f32 %v994_v5  ;;  %v1810_v33 = vcvt.s32.f32 %v1298_v42  ;;  %v6985_v42 = vld [vmem:[%s8997_s9 + $0x340] sm:$0xff] }
  0xc5   :  { %2282 = vmatpush.bf16.msrb.mxu0 %v2042_v21  ;;  %2304 = vmatpush.bf16.msrb.mxu2 %v2202_v24  ;;  %v1514_v37 = vcvt.s32.f32 %v1002_v56 }
  0xc6   :  { %2296 = vmatpush.bf16.msrb.mxu1 %v2098_v62  ;;  %v2258_v1 = vpack.c.bf16 %v1994_v17, %v1986_v54  ;;  %v2170_v56 = vpack.c.bf16 %v1818_v48, %v1810_v33  ;;  %v1442_v62 = vunpack.c.0.s8 %v6923_v4  ;;  %v6958_v17 = vld [vmem:[%s8997_s9 + $0x1c8] sm:$0xff]  ;;  %v6997_v48 = vld [vmem:[%s8995_s7] sm:$0xf] }
  0xc7   :  { %v2018_v9 = vpack.c.bf16 %v1514_v37, %v1506_v14 }
  0xc8   :  { %2318 = vmatpush.bf16.msrb.mxu3 %v2258_v1  ;;  %v1243_v1 = vunpack.c.3.s8 %v6958_v17 }
  0xc9   :  { %2283 = vmatpush.bf16.msrb.mxu0 %v2034_v44  ;;  %2305 = vmatpush.bf16.msrb.mxu2 %v2194_v16  ;;  %v1627_v44 = vcvt.s32.f32 %v1115_v3 }
  0xcd   :  { %2284 = vmatpush.bf16.msrb.mxu0 %v2026_v40  ;;  %2306 = vmatpush.bf16.msrb.mxu2 %v2186_v53  ;;  %v1603_v53 = vcvt.s32.f32 %v1091_v8  ;;  %v1426_v8 = vunpack.c.2.s8 %v6985_v42 }
  0xd1   :  { %2285 = vmatpush.bf16.msrb.mxu0 %v2018_v9 }
 0x12d   :  { %v598_v45 = vpop.f32.mrf.mxu0  ;;  %v611_v13 = vpop.f32.mrf.mxu1 }
 0x12e   :  { %v612_v29 = vadd.f32 %v611_v13, %v598_v45  ;;  %v1650_v45 = vcvt.s32.f32 %v1138_v11  ;;  %v1458_v13 = vunpack.c.2.s8 %v6923_v4  ;;  %v1282_v11 = vunpack.c.0.s8 %v6934_v27 }
 0x130   :  { %v6902_v34 = vmul.f32 %v695_v35, %v612_v29  ;;  %v1314_v35 = vunpack.c.0.s8 %v6896_v26  ;;  %v1619_v26 = vcvt.s32.f32 %v1107_v2  ;;  %v1970_v41 = vcvt.s32.f32 %v1458_v13 }
 0x131   :  { %v2090_v31 = vpack.c.bf16 %v1658_v22, %v1650_v45 }
 0x132   :  { %v709_v49 = vrot.slane %v6902_v34, 4  ;;  %v1826_v63 = vcvt.s32.f32 %v1314_v35  ;;  %v2075_v18 = vpack.c.bf16 %v1627_v44, %v1619_v26  ;;  %v2250_v5 = vpack.c.bf16 %v1978_v7, %v1970_v41 }
 0x133   :  { %2297 = vmatpush.bf16.msrb.mxu1 %v2090_v31  ;;  %v1794_v41 = vcvt.s32.f32 %v1282_v11 }
 0x134   :  { %v710_v58 = vadd.f32 %v709_v49, %v6902_v34  ;;  %v624_v60 = vpop.f32.mrf.mxu2  ;;  %v637_v61 = vpop.f32.mrf.mxu3  ;;  %2330 = vmatpush.bf16.msra.mxu0 %v2075_v18  ;;  %v1099_v49 = vunpack.c.1.s8 %v6909_v57  ;;  %2319 = vmatpush.bf16.msrb.mxu3 %v2250_v5  ;;  %v1130_v57 = vunpack.c.1.s8 %v6915_v15  ;;  %v6972_v18 = vld [vmem:[%s8997_s9 + $0x88] sm:$0xff] }
 0x135   :  { %v638_v20 = vadd.f32 %v637_v61, %v624_v60  ;;  %v600_v21 = vpop.f32.mrf.mxu0  ;;  %v613_v24 = vpop.f32.mrf.mxu1 }
 0x136   :  { %v711_v0 = vrot.slane %v710_v58, 2  ;;  %v1611_v35 = vcvt.s32.f32 %v1099_v49  ;;  %v1642_v37 = vcvt.s32.f32 %v1130_v57 }
 0x137   :  { %v6927_v6 = vmul.f32 %v696_v39, %v638_v20  ;;  %v2178_v39 = vpack.c.bf16 %v1834_v10, %v1826_v63 }
 0x138   :  { %v712_v25 = vadd.f32 %v711_v0, %v710_v58  ;;  %v1122_v58 = vunpack.c.0.s8 %v6915_v15  ;;  %v2067_v20 = vpack.c.bf16 %v1611_v35, %v1603_v53  ;;  %v1954_v15 = vcvt.s32.f32 %v1442_v62 }
 0x139   :  { %v715_v28 = vrot.slane %v6927_v6, 4  ;;  %2307 = vmatpush.bf16.msrb.mxu2 %v2178_v39  ;;  %v1235_v0 = vunpack.c.2.s8 %v6958_v17 }
 0x13a   :  { %v713_v16 = vrot.slane %v712_v25, 1  ;;  %v1634_v21 = vcvt.s32.f32 %v1122_v58  ;;  %2331 = vmatpush.bf16.msra.mxu0 %v2067_v20  ;;  %v1938_v58 = vcvt.s32.f32 %v1426_v8  ;;  %v1418_v8 = vunpack.c.1.s8 %v6985_v42 }
 0x13b   :  { %v716_v29 = vadd.f32 %v715_v28, %v6927_v6  ;;  %v1747_v39 = vcvt.s32.f32 %v1235_v0  ;;  %v1227_v0 = vunpack.c.1.s8 %v6958_v17 }
 0x13c   :  { %v714_v47 = vadd.f32 %v713_v16, %v712_v25  ;;  %v626_v55 = vpop.f32.mrf.mxu2  ;;  %v639_v30 = vpop.f32.mrf.mxu3  ;;  %v1755_v16 = vcvt.s32.f32 %v1243_v1  ;;  %v7016_v1 = vld [vmem:[%s8996_s8] sm:$0xf] }
 0x13d   :  { %v717_v19 = vrot.slane %v716_v29, 2  ;;  %v650_v40 = vpop.f32.mrf.mxu0  ;;  %v663_v32 = vpop.f32.mrf.mxu1  ;;  %2308 = vmatpush.bf16.msrb.mxu2 %v2170_v56  ;;  %v1739_v11 = vcvt.s32.f32 %v1227_v0 }
 0x13e   :  { %v740_v50 = vmul.f32 %v6873_v36, %v714_v47  ;;  %v664_v52 = vadd.f32 %v663_v32, %v650_v40  ;;  %v2139_v55 = vpack.c.bf16 %v1755_v16, %v1747_v39 }
 0x13f   :  { %v718_v54 = vadd.f32 %v717_v19, %v716_v29  ;;  %v1290_v29 = vunpack.c.1.s8 %v6934_v27  ;;  %v1083_v27 = vunpack.c.3.s8 %v6972_v18 }
 0x140   :  { %v6947_v60 = vsub.f32 %v6902_v34, %v740_v50  ;;  %v6951_v61 = vmul.f32 %v697_v51, %v664_v52  ;;  %v1450_v34 = vunpack.c.1.s8 %v6923_v4  ;;  %v2082_v4 = vpack.c.bf16 %v1642_v37, %v1634_v21  ;;  %v7004_v21 = vld [vmem:[%s8997_s9 + $0x200] sm:$0xff] }
 0x141   :  { %v719_v14 = vrot.slane %v718_v54, 1  ;;  %v1802_v46 = vcvt.s32.f32 %v1290_v29  ;;  %v1595_v53 = vcvt.s32.f32 %v1083_v27  ;;  %v1219_v37 = vunpack.c.0.s8 %v6958_v17 }
 0x142   :  { %v748_v51 = vmul.f32 %v6947_v60, %v6947_v60  ;;  %v721_v24 = vrot.slane %v6951_v61, 4  ;;  %v1962_v63 = vcvt.s32.f32 %v1450_v34  ;;  %2298 = vmatpush.bf16.msrb.mxu1 %v2082_v4  ;;  %v829_v34 = vperm.slane %v6997_v48, 0 }
 0x143   :  { %v720_v38 = vadd.f32 %v719_v14, %v718_v54  ;;  %v2162_v32 = vpack.c.bf16 %v1802_v46, %v1794_v41  ;;  %v1434_v54 = vunpack.c.3.s8 %v6985_v42  ;;  %v1067_v41 = vunpack.c.1.s8 %v6972_v18 }
 0x144   :  { %v752_v2 = vrot.slane %v748_v51, 4  ;;  %v722_v3 = vadd.f32 %v721_v24, %v6951_v61  ;;  %v676_v9 = vpop.f32.mrf.mxu2  ;;  %v689_v10 = vpop.f32.mrf.mxu3  ;;  %v2242_v28 = vpack.c.bf16 %v1962_v63, %v1954_v15 }
 0x145   :  { %v741_v25 = vmul.f32 %v6873_v36, %v720_v38  ;;  %v690_v26 = vadd.f32 %v689_v10, %v676_v9  ;;  %v652_v44 = vpop.f32.mrf.mxu0  ;;  %v665_v12 = vpop.f32.mrf.mxu1  ;;  %2309 = vmatpush.bf16.msrb.mxu2 %v2162_v32  ;;  %v1946_v20 = vcvt.s32.f32 %v1434_v54  ;;  %v1731_v9 = vcvt.s32.f32 %v1219_v37 }
 0x146   :  { %v753_v45 = vadd.f32 %v752_v2, %v748_v51  ;;  %v723_v13 = vrot.slane %v722_v3, 2  ;;  %2320 = vmatpush.bf16.msrb.mxu3 %v2242_v28  ;;  %2343 = vmatpush.bf16.msra.mxu1 %v2139_v55  ;;  %v1266_v10 = vunpack.c.2.s8 %v7004_v21  ;;  %v1059_v12 = vunpack.c.0.s8 %v6972_v18 }
 0x147   :  { %v6975_v22 = vsub.f32 %v6927_v6, %v741_v25  ;;  %v6979_v23 = vmul.f32 %v698_v59, %v690_v26  ;;  %v1075_v59 = vunpack.c.2.s8 %v6972_v18  ;;  %v2234_v63 = vpack.c.bf16 %v1946_v20, %v1938_v58 }
 0x148   :  { %v754_v43 = vrot.slane %v753_v45, 2  ;;  %v724_v47 = vadd.f32 %v723_v13, %v722_v3  ;;  %v1274_v25 = vunpack.c.3.s8 %v7004_v21  ;;  %v1778_v44 = vcvt.s32.f32 %v1266_v10 }
 0x149   :  { %v749_v6 = vmul.f32 %v6975_v22, %v6975_v22  ;;  %v727_v30 = vrot.slane %v6979_v23, 4  ;;  %v1587_v33 = vcvt.s32.f32 %v1075_v59  ;;  %v842_v28 = vperm.slane %v7016_v1, 0 }
 0x14a   :  { %v755_v31 = vadd.f32 %v754_v43, %v753_v45  ;;  %v725_v7 = vrot.slane %v724_v47, 1  ;;  %2321 = vmatpush.bf16.msrb.mxu3 %v2234_v63  ;;  %v2131_v45 = vpack.c.bf16 %v1739_v11, %v1731_v9  ;;  %v1786_v29 = vcvt.s32.f32 %v1274_v25 }
 0x14b   :  { %v758_v19 = vrot.slane %v749_v6, 4  ;;  %v728_v40 = vadd.f32 %v727_v30, %v6979_v23  ;;  %v2059_v14 = vpack.c.bf16 %v1595_v53, %v1587_v33  ;;  %v830_v43 = vperm.slane %v6997_v48, 1  ;;  %v7034_v30 = vld [vmem:[%s8997_s9 + $0x188] sm:$0xff] }
 0x14c   :  { %v756_v49 = vrot.slane %v755_v31, 1  ;;  %v726_v50 = vadd.f32 %v725_v7, %v724_v47  ;;  %v678_v52 = vpop.f32.mrf.mxu2  ;;  %v691_v5 = vpop.f32.mrf.mxu3  ;;  %2344 = vmatpush.bf16.msra.mxu1 %v2131_v45  ;;  %v1571_v55 = vcvt.s32.f32 %v1059_v12  ;;  %v1579_v7 = vcvt.s32.f32 %v1067_v41 }
 0x14d   :  { %v759_v56 = vadd.f32 %v758_v19, %v749_v6  ;;  %v729_v35 = vrot.slane %v728_v40, 2  ;;  %2332 = vmatpush.bf16.msra.mxu0 %v2059_v14  ;;  %v1410_v6 = vunpack.c.0.s8 %v6985_v42  ;;  %v843_v18 = vperm.slane %v7016_v1, 1 }
 0x14e   :  { %v757_v57 = vadd.f32 %v756_v49, %v755_v31  ;;  %v742_v62 = vmul.f32 %v6873_v36, %v726_v50  ;;  %v2154_v31 = vpack.c.bf16 %v1786_v29, %v1778_v44  ;;  %v2051_v33 = vpack.c.bf16 %v1579_v7, %v1571_v55 }
 0x14f   :  { %v760_v51 = vrot.slane %v759_v56, 2  ;;  %v730_v24 = vadd.f32 %v729_v35, %v728_v40  ;;  %v1922_v19 = vcvt.s32.f32 %v1410_v6  ;;  %v1203_v49 = vunpack.c.2.s8 %v7034_v30  ;;  %v7057_v35 = vld [vmem:[%s8997_s9 + $0x48] sm:$0xff] }
 0x150   :  { %v776_v15 = vmul.f32 %v757_v57, %v6873_v36  ;;  %v7010_v38 = vsub.f32 %v6951_v61, %v742_v62  ;;  %2310 = vmatpush.bf16.msrb.mxu2 %v2154_v31  ;;  %v1930_v52 = vcvt.s32.f32 %v1418_v8  ;;  %v1211_v5 = vunpack.c.3.s8 %v7034_v30 }
 0x151   :  { %v761_v2 = vadd.f32 %v760_v51, %v759_v56  ;;  %v731_v3 = vrot.slane %v730_v24, 1  ;;  %v1250_v53 = vunpack.c.0.s8 %v7004_v21  ;;  %v831_v42 = vperm.slane %v6997_v48, 2  ;;  %2333 = vmatpush.bf16.msra.mxu0 %v2051_v33 }
 0x152   :  { %v7019_v4 = vadd.f32 1e-05, %v776_v15  ;;  %v750_v61 = vmul.f32 %v7010_v38, %v7010_v38  ;;  %v844_v56 = vperm.slane %v7016_v1, 2  ;;  %v2226_v62 = vpack.c.bf16 %v1930_v52, %v1922_v19 }
 0x153   :  { %v762_v17 = vrot.slane %v761_v2, 1  ;;  %v732_v26 = vadd.f32 %v731_v3, %v730_v24  ;;  %v1715_v14 = vcvt.s32.f32 %v1203_v49  ;;  %v1723_v51 = vcvt.s32.f32 %v1211_v5  ;;  %v7065_v3 = vld [vmem:[%s8997_s9 + $0x2c8] sm:$0xff] }
 0x154   :  { %6375 = vrsqrt.f32 %v7019_v4  ;;  %v764_v39 = vrot.slane %v750_v61, 4  ;;  %vm790_vm7 = vweird.f32 %v7019_v4  ;;  %v1258_v24 = vunpack.c.1.s8 %v7004_v21  ;;  %2322 = vmatpush.bf16.msrb.mxu3 %v2226_v62 }
 0x155   :  { %v763_v13 = vadd.f32 %v762_v17, %v761_v2  ;;  %v743_v16 = vmul.f32 %v6873_v36, %v732_v26  ;;  %v1762_v37 = vcvt.s32.f32 %v1250_v53  ;;  %v1043_v0 = vunpack.c.2.s8 %v7057_v35 }
 0x156   :  { %v765_v47 = vadd.f32 %v764_v39, %v750_v61  ;;  %v1051_v2 = vunpack.c.3.s8 %v7057_v35  ;;  %v2123_v10 = vpack.c.bf16 %v1723_v51, %v1715_v14  ;;  %v1770_v61 = vcvt.s32.f32 %v1258_v24 }
 0x157   :  { %v777_v46 = vmul.f32 %v763_v13, %v6873_v36  ;;  %v7038_v59 = vsub.f32 %v6979_v23, %v743_v16  ;;  %v832_v25 = vperm.slane %v6997_v48, 3  ;;  %v1555_v17 = vcvt.s32.f32 %v1043_v0  ;;  %v939_v48 = vld [vmem:[%s8997_s9 + $0x248] sm:$0xff] }
 0x158   :  { %v766_v27 = vrot.slane %v765_v47, 2  ;;  %2345 = vmatpush.bf16.msra.mxu1 %v2123_v10  ;;  %v2146_v12 = vpack.c.bf16 %v1770_v61, %v1762_v37  ;;  %v1563_v39 = vcvt.s32.f32 %v1051_v2  ;;  %v1363_v45 = vunpack.c.2.s8 %v7065_v3 }
 0x159   :  { %v7042_v40 = vadd.f32 1e-05, %v777_v46  ;;  %v751_v32 = vmul.f32 %v7038_v59, %v7038_v59  ;;  %v845_v41 = vperm.slane %v7016_v1, 3  ;;  %v1371_v46 = vunpack.c.3.s8 %v7065_v3 }
 0x15a   :  { %v6376_v50 = vpop.eup %6375  ;;  %v767_v23 = vadd.f32 %v766_v27, %v765_v47  ;;  %v7078_v47 = vld [vmem:[%s8997_s9 + $0x300] sm:$0xff]  ;;  %2311 = vmatpush.bf16.msrb.mxu2 %v2146_v12  ;;  %v2043_v6 = vpack.c.bf16 %v1563_v39, %v1555_v17  ;;  %v1875_v31 = vcvt.s32.f32 %v1363_v45  ;;  %v1187_v5 = vunpack.c.0.s8 %v7034_v30 }
 0x15b   :  { %v785_v54 = vmul.f32 %v6376_v50, %v7019_v4  ;;  %6377 = vrsqrt.f32 %v7042_v40  ;;  %v770_v57 = vrot.slane %v751_v32, 4  ;;  %vm791_vm8 = vweird.f32 %v6376_v50 }
 0x15c   :  { %v768_v58 = vrot.slane %v767_v23, 1  ;;  %vm800_vm9 = vweird.f32 %v7042_v40  ;;  %vm792_vm10 = vmor %vm790_vm7, %vm791_vm8  ;;  %2334 = vmatpush.bf16.msra.mxu0 %v2043_v6  ;;  %v1883_v19 = vcvt.s32.f32 %v1371_v46  ;;  %v1402_v33 = vunpack.c.3.s8 %v7078_v47 }
 0x15d   :  { %v786_v20 = vmul.f32 %v6376_v50, %v785_v54  ;;  %v771_v63 = vadd.f32 %v770_v57, %v751_v32  ;;  %v1394_v32 = vunpack.c.2.s8 %v7078_v47  ;;  %v1699_v14 = vcvt.s32.f32 %v1187_v5 }
 0x15e   :  { %v769_v15 = vadd.f32 %v768_v58, %v767_v23  ;;  %v2203_v4 = vpack.c.bf16 %v1883_v19, %v1875_v31  ;;  %v1914_v54 = vcvt.s32.f32 %v1402_v33  ;;  %v1195_v58 = vunpack.c.1.s8 %v7034_v30 }
 0x15f   :  { %v787_v9 = vmul.f32 0.5, %v786_v20  ;;  %v772_v21 = vrot.slane %v771_v63, 2  ;;  %v1906_v53 = vcvt.s32.f32 %v1394_v32  ;;  %v1035_v24 = vunpack.c.1.s8 %v7057_v35 }
 0x160   :  { %v778_v11 = vmul.f32 %v769_v15, %v6873_v36  ;;  %2356 = vmatpush.bf16.msra.mxu2 %v2203_v4  ;;  %v1707_v51 = vcvt.s32.f32 %v1195_v58  ;;  %v1355_v17 = vunpack.c.1.s8 %v7065_v3 }
 0x161   :  { %v6378_v26 = vpop.eup %6377  ;;  %v788_v44 = vsub.f32 1.5, %v787_v9  ;;  %v773_v29 = vadd.f32 %v772_v21, %v771_v63  ;;  %v2218_v20 = vpack.c.bf16 %v1914_v54, %v1906_v53  ;;  %v947_v53 = vld [vmem:[%s8997_s9 + $0x288] sm:$0xff] }
 0x162   :  { %v795_v13 = vmul.f32 %v6378_v26, %v7042_v40  ;;  %v7072_v16 = vadd.f32 1e-05, %v778_v11  ;;  %vm801_vm11 = vweird.f32 %v6378_v26  ;;  %v1547_v40 = vcvt.s32.f32 %v1035_v24  ;;  %v7115_v11 = vld [vmem:[%s8997_s9 + $0x148] sm:$0xff] }
 0x163   :  { %v789_v55 = vmul.f32 %v6376_v50, %v788_v44  ;;  %v774_v27 = vrot.slane %v773_v29, 1  ;;  %vm802_vm12 = vmor %vm800_vm9, %vm801_vm11  ;;  %2323 = vmatpush.bf16.msrb.mxu3 %v2218_v20 }
 0x164   :  { %v796_v7 = vmul.f32 %v6378_v26, %v795_v13  ;;  %6379 = vrsqrt.f32 %v7072_v16  ;;  %vm810_vm13 = vweird.f32 %v7072_v16 }
 0x165   :  { %v793_v8 = vsel %vm792_vm10, %v6376_v50, %v789_v55  ;;  %v775_v52 = vadd.f32 %v774_v27, %v773_v29  ;;  %v1867_v29 = vcvt.s32.f32 %v1355_v17  ;;  %v1386_v55 = vunpack.c.1.s8 %v7078_v47 }
 0x166   :  { %v824_v49 = vmul.f32 %v793_v8, %v6947_v60  ;;  %v797_v23 = vmul.f32 0.5, %v796_v7  ;;  %v1027_v60 = vunpack.c.0.s8 %v7057_v35  ;;  %v2115_v35 = vpack.c.bf16 %v1707_v51, %v1699_v14 }
 0x167   :  { %v779_v62 = vmul.f32 %v775_v52, %v6873_v36  ;;  %v1179_v7 = vunpack.c.3.s8 %v7115_v11  ;;  %v1898_v19 = vcvt.s32.f32 %v1386_v55 }
 0x168   :  { %v837_v50 = vmul.f32 %v829_v34, %v824_v49  ;;  %v798_v57 = vsub.f32 1.5, %v797_v23  ;;  %v1347_v34 = vunpack.c.0.s8 %v7065_v3  ;;  %v1539_v2 = vcvt.s32.f32 %v1027_v60  ;;  %2346 = vmatpush.bf16.msra.mxu1 %v2115_v35  ;;  %v7145_v23 = vld [vmem:[%s8997_s9 + $0x8] sm:$0xff] }
 0x169   :  { %v7099_v63 = vadd.f32 1e-05, %v779_v62  ;;  %v1171_v3 = vunpack.c.2.s8 %v7115_v11  ;;  %v1691_v5 = vcvt.s32.f32 %v1179_v7  ;;  %v1011_v20 = vunpack.c.2.s8 %v7145_v23 }
 0x16a   :  { %v7095_v37 = vpop.eup %6379  ;;  %v850_v15 = vadd.f32 %v842_v28, %v837_v50  ;;  %v799_v30 = vmul.f32 %v6378_v26, %v798_v57  ;;  %v1859_v44 = vcvt.s32.f32 %v1347_v34  ;;  %v2035_v13 = vpack.c.bf16 %v1547_v40, %v1539_v2 }
 0x16b   :  { %v805_v0 = vmul.f32 %v7095_v37, %v7072_v16  ;;  %6381 = vrsqrt.f32 %v7099_v63  ;;  %vm811_vm15 = vweird.f32 %v7095_v37  ;;  %v1683_v32 = vcvt.s32.f32 %v1171_v3 }
 0x16c   :  { %vm854_vm14 = vcmp.gt.f32.partialorder %v850_v15, 0.0  ;;  %v858_v9 = vmul.f32 0.2, %v850_v15  ;;  %v803_v28 = vsel %vm802_vm12, %v6378_v26, %v799_v30  ;;  %v1378_v26 = vunpack.c.0.s8 %v7078_v47  ;;  %2335 = vmatpush.bf16.msra.mxu0 %v2035_v13  ;;  %vm812_vm2 = vmor %vm810_vm13, %vm811_vm15 }
 0x16d   :  { %v825_v10 = vmul.f32 %v803_v28, %v6975_v22  ;;  %v806_v61 = vmul.f32 %v7095_v37, %v805_v0  ;;  %v7122_v22 = vld [vmem:[%s8997_s9 + $0x3c8] sm:$0xff]  ;;  %vm820_vm1 = vweird.f32 %v7099_v63  ;;  %v2107_v14 = vpack.c.bf16 %v1691_v5, %v1683_v32 }
 0x16e   :  { %v862_v21 = vsel %vm854_vm14, %v850_v15, %v858_v9  ;;  %v1890_v6 = vcvt.s32.f32 %v1378_v26  ;;  %v1491_v27 = vunpack.c.2.s8 %v7122_v22  ;;  %v1499_v33 = vunpack.c.3.s8 %v7122_v22 }
 0x16f   :  { %v7124_v12 = vpack.c.bf16 %v862_v21, %v862_v21  ;;  %v838_v39 = vmul.f32 %v830_v43, %v825_v10  ;;  %v807_v45 = vmul.f32 0.5, %v806_v61  ;;  %v2195_v43 = vpack.c.bf16 %v1867_v29, %v1859_v44  ;;  %2347 = vmatpush.bf16.msra.mxu1 %v2107_v14 }
 0x170   :  { %v2210_v52 = vpack.c.bf16 %v1898_v19, %v1890_v6  ;;  %v2003_v4 = vcvt.s32.f32 %v1491_v27  ;;  %v2011_v57 = vcvt.s32.f32 %v1499_v33  ;;  %v1019_v24 = vunpack.c.3.s8 %v7145_v23 }
 0x171   :  { %v851_v46 = vadd.f32 %v843_v18, %v838_v39  ;;  %v808_v31 = vsub.f32 1.5, %v807_v45  ;;  %v7134_v8 = vpop.eup %6381  ;;  %2286 = vmatmul.bf16.vlgmr.msrb.gmra.mxu0 %v7124_v12  ;;  %2357 = vmatpush.bf16.msra.mxu2 %v2195_v43  ;;  %v1331_v15 = vunpack.c.2.s8 %v947_v53  ;;  %v1339_v34 = vunpack.c.3.s8 %v947_v53  ;;  %v979_v43 = vld [vmem:[%s8997_s9 + $0x388] sm:$0xff] }
 0x172   :  { %v815_v18 = vmul.f32 %v7134_v8, %v7099_v63  ;;  %vm821_vm3 = vweird.f32 %v7134_v8  ;;  %2324 = vmatpush.bf16.msrb.mxu3 %v2210_v52  ;;  %v2267_v60 = vpack.c.bf16 %v2011_v57, %v2003_v4  ;;  %v1155_v0 = vunpack.c.0.s8 %v7115_v11 }
 0x173   :  { %vm855_vm0 = vcmp.gt.f32.partialorder %v851_v46, 0.0  ;;  %v859_v47 = vmul.f32 0.2, %v851_v46  ;;  %v809_v49 = vmul.f32 %v7095_v37, %v808_v31  ;;  %v1843_v2 = vcvt.s32.f32 %v1331_v15  ;;  %vm822_vm5 = vmor %vm820_vm1, %vm821_vm3 }
 0x174   :  { %v816_v50 = vmul.f32 %v7134_v8, %v815_v18  ;;  %v1163_v9 = vunpack.c.1.s8 %v7115_v11  ;;  %v1851_v10 = vcvt.s32.f32 %v1339_v34  ;;  %v1667_v61 = vcvt.s32.f32 %v1155_v0 }
 0x175   :  { %v863_v54 = vsel %vm855_vm0, %v851_v46, %v859_v47  ;;  %v813_v58 = vsel %vm812_vm2, %v7095_v37, %v809_v49  ;;  %v1523_v37 = vcvt.s32.f32 %v1011_v20  ;;  %v1483_v44 = vunpack.c.1.s8 %v7122_v22  ;;  %v899_v46 = vld [vmem:[%s8997_s9 + $0x108] sm:$0xff] }
 0x176   :  { %v7157_v62 = vpack.c.bf16 %v863_v54, %v863_v54  ;;  %v826_v16 = vmul.f32 %v813_v58, %v7010_v38  ;;  %v817_v51 = vmul.f32 0.5, %v816_v50  ;;  %2369 = vmatpush.bf16.msra.mxu3 %v2267_v60  ;;  %v1531_v38 = vcvt.s32.f32 %v1019_v24 }
 0x177   :  { %v1675_v17 = vcvt.s32.f32 %v1163_v9  ;;  %v2187_v11 = vpack.c.bf16 %v1851_v10, %v1843_v2  ;;  %v1995_v13 = vcvt.s32.f32 %v1483_v44  ;;  %v995_v29 = vunpack.c.0.s8 %v7145_v23 }
 0x178   :  { %v839_v30 = vmul.f32 %v831_v42, %v826_v16  ;;  %v818_v35 = vsub.f32 1.5, %v817_v51  ;;  %2299 = vmatmul.bf16.vlgmr.msrb.gmra.mxu1 %v7157_v62  ;;  %v1475_v42 = vunpack.c.0.s8 %v7122_v22  ;;  %v2027_v21 = vpack.c.bf16 %v1531_v38, %v1523_v37  ;;  %v892_v22 = vld [vmem:[%s8997_s9 + $0xd0] sm:$0xff] }
 0x179   :  { %v2099_v45 = vpack.c.bf16 %v1675_v17, %v1667_v61  ;;  %2358 = vmatpush.bf16.msra.mxu2 %v2187_v11  ;;  %v1003_v63 = vunpack.c.1.s8 %v7145_v23  ;;  %v1315_v3 = vunpack.c.0.s8 %v947_v53  ;;  %v1507_v27 = vcvt.s32.f32 %v995_v29  ;;  %v924_v38 = vld [vmem:[%s8997_s9 + $0x1d0] sm:$0xff] }
 0x17a   :  { %v852_v28 = vadd.f32 %v844_v56, %v839_v30  ;;  %v819_v40 = vmul.f32 %v7134_v8, %v818_v35  ;;  %v1987_v39 = vcvt.s32.f32 %v1475_v42  ;;  %2336 = vmatpush.bf16.msra.mxu0 %v2027_v21  ;;  %v1108_v33 = vunpack.c.2.s8 %v892_v22  ;;  %v884_v17 = vld [vmem:[%s8997_s9 + $0x90] sm:$0xff] }
 0x17b   :  { %2348 = vmatpush.bf16.msra.mxu1 %v2099_v45  ;;  %v1515_v19 = vcvt.s32.f32 %v1003_v63  ;;  %v1827_v32 = vcvt.s32.f32 %v1315_v3  ;;  %v1116_v49 = vunpack.c.3.s8 %v892_v22  ;;  %v1139_v18 = vunpack.c.2.s8 %v899_v46 }
 0x17c   :  { %vm856_vm4 = vcmp.gt.f32.partialorder %v852_v28, 0.0  ;;  %v860_v26 = vmul.f32 0.2, %v852_v28  ;;  %v823_v56 = vsel %vm822_vm5, %v7134_v8, %v819_v40  ;;  %v2259_v7 = vpack.c.bf16 %v1995_v13, %v1987_v39 }
 0x17d   :  { %v827_v6 = vmul.f32 %v823_v56, %v7038_v59  ;;  %v1323_v8 = vunpack.c.1.s8 %v947_v53  ;;  %v1147_v23 = vunpack.c.3.s8 %v899_v46  ;;  %v2019_v5 = vpack.c.bf16 %v1515_v19, %v1507_v27 }
 0x17e   :  { %v864_v55 = vsel %vm856_vm4, %v852_v28, %v860_v26  ;;  %2370 = vmatpush.bf16.msra.mxu3 %v2259_v7  ;;  %v1620_v4 = vcvt.s32.f32 %v1108_v33  ;;  %v1459_v53 = vunpack.c.2.s8 %v979_v43  ;;  %v1628_v54 = vcvt.s32.f32 %v1116_v49 }
 0x17f   :  { %v7186_v31 = vpack.c.bf16 %v864_v55, %v864_v55  ;;  %v840_v59 = vmul.f32 %v832_v25, %v827_v6  ;;  %v1835_v47 = vcvt.s32.f32 %v1323_v8  ;;  %v1651_v58 = vcvt.s32.f32 %v1139_v18  ;;  %2337 = vmatpush.bf16.msra.mxu0 %v2019_v5 }
 0x180   :  { %v1659_v50 = vcvt.s32.f32 %v1147_v23  ;;  %v1467_v16 = vunpack.c.3.s8 %v979_v43  ;;  %v1971_v14 = vcvt.s32.f32 %v1459_v53  ;;  %v2076_v20 = vpack.c.bf16 %v1628_v54, %v1620_v4 }
 0x181   :  { %2312 = vmatmul.bf16.vlgmr.msrb.gmra.mxu2 %v7186_v31  ;;  %v853_v52 = vadd.f32 %v845_v41, %v840_v59  ;;  %v2179_v25 = vpack.c.bf16 %v1835_v47, %v1827_v32  ;;  %v1299_v41 = vunpack.c.2.s8 %v939_v48  ;;  %v1307_v51 = vunpack.c.3.s8 %v939_v48 }
 0x182   :  { %v2091_v1 = vpack.c.bf16 %v1659_v50, %v1651_v58  ;;  %v1979_v24 = vcvt.s32.f32 %v1467_v16  ;;  %v1092_v15 = vunpack.c.0.s8 %v892_v22  ;;  %v1100_v30 = vunpack.c.1.s8 %v892_v22  ;;  %2338 = vmatmul.bf16.vlgmr.msra.gmra.mxu0 %v7124_v12  ;;  %v971_v22 = vld [vmem:[%s8997_s9 + $0x348] sm:$0xff]  ;;  %v916_v50 = vld [vmem:[%s8997_s9 + $0x190] sm:$0xff] }
 0x183   :  { %vm857_vm6 = vcmp.gt.f32.partialorder %v853_v52, 0.0  ;;  %v861_v57 = vmul.f32 0.2, %v853_v52  ;;  %2359 = vmatpush.bf16.msra.mxu2 %v2179_v25  ;;  %2382 = vmatpush.bf16.msrb.mxu0 %v2076_v20  ;;  %v1811_v34 = vcvt.s32.f32 %v1299_v41  ;;  %v1819_v0 = vcvt.s32.f32 %v1307_v51 }
 0x184   :  { %2349 = vmatpush.bf16.msra.mxu1 %v2091_v1  ;;  %v1123_v35 = vunpack.c.0.s8 %v899_v46  ;;  %v2251_v2 = vpack.c.bf16 %v1979_v24, %v1971_v14  ;;  %v1604_v9 = vcvt.s32.f32 %v1092_v15  ;;  %v1612_v28 = vcvt.s32.f32 %v1100_v30  ;;  %v876_v24 = vld [vmem:[%s8997_s9 + $0x50] sm:$0xff] }
 0x185   :  { %v865_v60 = vsel %vm857_vm6, %v853_v52, %v861_v57  ;;  %v1131_v10 = vunpack.c.1.s8 %v899_v46  ;;  %v2171_v61 = vpack.c.bf16 %v1819_v0, %v1811_v34  ;;  %v1443_v40 = vunpack.c.0.s8 %v979_v43 }
 0x186   :  { %v7199_v37 = vpack.c.bf16 %v865_v60, %v865_v60  ;;  %v1635_v42 = vcvt.s32.f32 %v1123_v35  ;;  %v1451_v21 = vunpack.c.1.s8 %v979_v43  ;;  %2371 = vmatpush.bf16.msra.mxu3 %v2251_v2  ;;  %v2068_v44 = vpack.c.bf16 %v1612_v28, %v1604_v9  ;;  %v931_v43 = vld [vmem:[%s8997_s9 + $0x208] sm:$0xff]  ;;  %v956_v28 = vld [vmem:[%s8997_s9 + $0x2d0] sm:$0xff] }
 0x187   :  { %v1643_v26 = vcvt.s32.f32 %v1131_v10  ;;  %v1236_v11 = vunpack.c.2.s8 %v924_v38  ;;  %v1244_v39 = vunpack.c.3.s8 %v924_v38  ;;  %2360 = vmatpush.bf16.msra.mxu2 %v2171_v61  ;;  %v1955_v56 = vcvt.s32.f32 %v1443_v40 }
 0x188   :  { %2325 = vmatmul.bf16.vlgmr.msrb.gmra.mxu3 %v7199_v37  ;;  %v1963_v45 = vcvt.s32.f32 %v1451_v21  ;;  %v1283_v13 = vunpack.c.0.s8 %v939_v48  ;;  %v1291_v29 = vunpack.c.1.s8 %v939_v48  ;;  %2383 = vmatpush.bf16.msrb.mxu0 %v2068_v44  ;;  %v1076_v3 = vunpack.c.2.s8 %v884_v17  ;;  %v963_v21 = vld [vmem:[%s8997_s9 + $0x308] sm:$0xff] }
 0x189   :  { %v2083_v55 = vpack.c.bf16 %v1643_v26, %v1635_v42  ;;  %v1748_v6 = vcvt.s32.f32 %v1236_v11  ;;  %v1756_v63 = vcvt.s32.f32 %v1244_v39  ;;  %v1084_v8 = vunpack.c.3.s8 %v884_v17 }
 0x18a   :  { %v2243_v46 = vpack.c.bf16 %v1963_v45, %v1955_v56  ;;  %v1795_v7 = vcvt.s32.f32 %v1283_v13  ;;  %v1803_v27 = vcvt.s32.f32 %v1291_v29  ;;  %v1588_v19 = vcvt.s32.f32 %v1076_v3 }
 0x18b   :  { %2350 = vmatpush.bf16.msra.mxu1 %v2083_v55  ;;  %v2140_v59 = vpack.c.bf16 %v1756_v63, %v1748_v6  ;;  %v1427_v32 = vunpack.c.2.s8 %v971_v22  ;;  %v1435_v33 = vunpack.c.3.s8 %v971_v22  ;;  %v1596_v49 = vcvt.s32.f32 %v1084_v8 }
 0x18c   :  { %2372 = vmatpush.bf16.msra.mxu3 %v2243_v46  ;;  %v2163_v47 = vpack.c.bf16 %v1803_v27, %v1795_v7  ;;  %v1220_v18 = vunpack.c.0.s8 %v924_v38  ;;  %v1228_v23 = vunpack.c.1.s8 %v924_v38  ;;  %v1267_v4 = vunpack.c.2.s8 %v931_v43 }
 0x18d   :  { %v1939_v52 = vcvt.s32.f32 %v1427_v32  ;;  %v1947_v5 = vcvt.s32.f32 %v1435_v33  ;;  %v1275_v53 = vunpack.c.3.s8 %v931_v43  ;;  %v2060_v48 = vpack.c.bf16 %v1596_v49, %v1588_v19  ;;  %v908_v49 = vld [vmem:[%s8997_s9 + $0x150] sm:$0xff] }
 0x18e   :  { %2361 = vmatpush.bf16.msra.mxu2 %v2163_v47  ;;  %v1732_v25 = vcvt.s32.f32 %v1220_v18  ;;  %v1740_v54 = vcvt.s32.f32 %v1228_v23  ;;  %v1060_v58 = vunpack.c.0.s8 %v884_v17  ;;  %2351 = vmatmul.bf16.vlgmr.msra.gmra.mxu1 %v7157_v62  ;;  %v1779_v16 = vcvt.s32.f32 %v1267_v4  ;;  %v988_v4 = vld [vmem:[%s8997_s9 + $0x3d0] sm:$0xff] }
 0x18f   :  { %2395 = vmatpush.bf16.msrb.mxu1 %v2140_v59  ;;  %v2235_v57 = vpack.c.bf16 %v1947_v5, %v1939_v52  ;;  %v1787_v14 = vcvt.s32.f32 %v1275_v53  ;;  %v1068_v20 = vunpack.c.1.s8 %v884_v17  ;;  %2384 = vmatpush.bf16.msrb.mxu0 %v2060_v48  ;;  %v1411_v51 = vunpack.c.0.s8 %v971_v22 }
 0x190   :  { %v2132_v1 = vpack.c.bf16 %v1740_v54, %v1732_v25  ;;  %v1572_v41 = vcvt.s32.f32 %v1060_v58  ;;  %v1419_v60 = vunpack.c.1.s8 %v971_v22  ;;  %v1204_v34 = vunpack.c.2.s8 %v916_v50 }
 0x191   :  { %2373 = vmatpush.bf16.msra.mxu3 %v2235_v57  ;;  %v2155_v15 = vpack.c.bf16 %v1787_v14, %v1779_v16  ;;  %v1580_v30 = vcvt.s32.f32 %v1068_v20  ;;  %v1212_v0 = vunpack.c.3.s8 %v916_v50  ;;  %v1923_v35 = vcvt.s32.f32 %v1411_v51  ;;  %v868_v14 = vld [vmem:[%s8997_s9 + $0x10] sm:$0xff] }
 0x192   :  { %v1931_v38 = vcvt.s32.f32 %v1419_v60  ;;  %v1251_v2 = vunpack.c.0.s8 %v931_v43  ;;  %v1259_v9 = vunpack.c.1.s8 %v931_v43  ;;  %v1716_v61 = vcvt.s32.f32 %v1204_v34  ;;  %v948_v60 = vld [vmem:[%s8997_s9 + $0x290] sm:$0xff] }
 0x193   :  { %2396 = vmatpush.bf16.msrb.mxu1 %v2132_v1  ;;  %2362 = vmatpush.bf16.msra.mxu2 %v2155_v15  ;;  %v2052_v10 = vpack.c.bf16 %v1580_v30, %v1572_v41  ;;  %v1724_v42 = vcvt.s32.f32 %v1212_v0  ;;  %v1044_v40 = vunpack.c.2.s8 %v876_v24  ;;  %v1052_v11 = vunpack.c.3.s8 %v876_v24 }
 0x194   :  { %v2227_v17 = vpack.c.bf16 %v1931_v38, %v1923_v35  ;;  %v1763_v44 = vcvt.s32.f32 %v1251_v2  ;;  %v1771_v26 = vcvt.s32.f32 %v1259_v9  ;;  %v1364_v45 = vunpack.c.2.s8 %v956_v28 }
 0x195   :  { %2385 = vmatpush.bf16.msrb.mxu0 %v2052_v10  ;;  %v2124_v39 = vpack.c.bf16 %v1724_v42, %v1716_v61  ;;  %v1556_v56 = vcvt.s32.f32 %v1044_v40  ;;  %v1372_v13 = vunpack.c.3.s8 %v956_v28  ;;  %v1564_v22 = vcvt.s32.f32 %v1052_v11 }
 0x196   :  { %2374 = vmatpush.bf16.msra.mxu3 %v2227_v17  ;;  %v2147_v29 = vpack.c.bf16 %v1771_v26, %v1763_v44  ;;  %v1395_v55 = vunpack.c.2.s8 %v963_v21  ;;  %v1403_v6 = vunpack.c.3.s8 %v963_v21  ;;  %v1876_v63 = vcvt.s32.f32 %v1364_v45 }
 0x197   :  { %2397 = vmatpush.bf16.msrb.mxu1 %v2124_v39  ;;  %v1884_v3 = vcvt.s32.f32 %v1372_v13  ;;  %v1188_v46 = vunpack.c.0.s8 %v916_v50  ;;  %v1196_v7 = vunpack.c.1.s8 %v916_v50  ;;  %v2044_v27 = vpack.c.bf16 %v1564_v22, %v1556_v56  ;;  %v893_v22 = vld [vmem:[%s8997_s9 + $0xd8] sm:$0xff] }
 0x198   :  { %2363 = vmatpush.bf16.msra.mxu2 %v2147_v29  ;;  %v1907_v8 = vcvt.s32.f32 %v1395_v55  ;;  %v1915_v43 = vcvt.s32.f32 %v1403_v6  ;;  %v1028_v59 = vunpack.c.0.s8 %v876_v24  ;;  %v1036_v47 = vunpack.c.1.s8 %v876_v24 }
 0x199   :  { %v2204_v19 = vpack.c.bf16 %v1884_v3, %v1876_v63  ;;  %v1700_v32 = vcvt.s32.f32 %v1188_v46  ;;  %v1708_v33 = vcvt.s32.f32 %v1196_v7  ;;  %2386 = vmatpush.bf16.msrb.mxu0 %v2044_v27  ;;  %v1348_v52 = vunpack.c.0.s8 %v956_v28  ;;  %v900_v46 = vld [vmem:[%s8997_s9 + $0x110] sm:$0xff] }
 0x19a   :  { %v2219_v18 = vpack.c.bf16 %v1915_v43, %v1907_v8  ;;  %v1540_v23 = vcvt.s32.f32 %v1028_v59  ;;  %v1356_v5 = vunpack.c.1.s8 %v956_v28  ;;  %v1548_v48 = vcvt.s32.f32 %v1036_v47  ;;  %v980_v47 = vld [vmem:[%s8997_s9 + $0x390] sm:$0xff] }
 0x19b   :  { %v2116_v53 = vpack.c.bf16 %v1708_v33, %v1700_v32  ;;  %v1379_v25 = vunpack.c.0.s8 %v963_v21  ;;  %v1387_v54 = vunpack.c.1.s8 %v963_v21  ;;  %v1860_v58 = vcvt.s32.f32 %v1348_v52  ;;  %2364 = vmatmul.bf16.vlgmr.msra.gmra.mxu2 %v7186_v31 }
 0x19c   :  { %2408 = vmatpush.bf16.msrb.mxu2 %v2204_v19  ;;  %2375 = vmatpush.bf16.msra.mxu3 %v2219_v18  ;;  %v1868_v50 = vcvt.s32.f32 %v1356_v5  ;;  %v1172_v57 = vunpack.c.2.s8 %v908_v49  ;;  %v1180_v16 = vunpack.c.3.s8 %v908_v49  ;;  %v2036_v20 = vpack.c.bf16 %v1548_v48, %v1540_v23  ;;  %v940_v5 = vld [vmem:[%s8997_s9 + $0x250] sm:$0xff] }
 0x19d   :  { %2398 = vmatpush.bf16.msrb.mxu1 %v2116_v53  ;;  %v1891_v1 = vcvt.s32.f32 %v1379_v25  ;;  %v1899_v41 = vcvt.s32.f32 %v1387_v54  ;;  %v1492_v51 = vunpack.c.2.s8 %v988_v4  ;;  %v1500_v34 = vunpack.c.3.s8 %v988_v4 }
 0x19e   :  { %v2196_v24 = vpack.c.bf16 %v1868_v50, %v1860_v58  ;;  %v1684_v15 = vcvt.s32.f32 %v1172_v57  ;;  %v1692_v30 = vcvt.s32.f32 %v1180_v16  ;;  %2387 = vmatpush.bf16.msrb.mxu0 %v2036_v20  ;;  %v1012_v38 = vunpack.c.2.s8 %v868_v14 }
 0x19f   :  { %v2211_v0 = vpack.c.bf16 %v1899_v41, %v1891_v1  ;;  %v2004_v35 = vcvt.s32.f32 %v1492_v51  ;;  %v1020_v2 = vunpack.c.3.s8 %v868_v14  ;;  %v2012_v28 = vcvt.s32.f32 %v1500_v34 }
 0x1a0   :  { %2409 = vmatpush.bf16.msrb.mxu2 %v2196_v24  ;;  %v2108_v9 = vpack.c.bf16 %v1692_v30, %v1684_v15  ;;  %v1332_v10 = vunpack.c.2.s8 %v948_v60  ;;  %v1340_v61 = vunpack.c.3.s8 %v948_v60  ;;  %v1524_v42 = vcvt.s32.f32 %v1012_v38 }
 0x1a1   :  { %2376 = vmatpush.bf16.msra.mxu3 %v2211_v0  ;;  %v1532_v40 = vcvt.s32.f32 %v1020_v2  ;;  %v1156_v21 = vunpack.c.0.s8 %v908_v49  ;;  %v1164_v17 = vunpack.c.1.s8 %v908_v49  ;;  %v2268_v44 = vpack.c.bf16 %v2012_v28, %v2004_v35  ;;  %v925_v35 = vld [vmem:[%s8997_s9 + $0x1d8] sm:$0xff] }
 0x1a2   :  { %2399 = vmatpush.bf16.msrb.mxu1 %v2108_v9  ;;  %v1844_v26 = vcvt.s32.f32 %v1332_v10  ;;  %v1852_v11 = vcvt.s32.f32 %v1340_v61  ;;  %v1476_v39 = vunpack.c.0.s8 %v988_v4  ;;  %v1484_v29 = vunpack.c.1.s8 %v988_v4 }
 0x1a3   :  { %v2028_v56 = vpack.c.bf16 %v1532_v40, %v1524_v42  ;;  %v1668_v45 = vcvt.s32.f32 %v1156_v21  ;;  %v1676_v13 = vcvt.s32.f32 %v1164_v17  ;;  %v996_v63 = vunpack.c.0.s8 %v868_v14  ;;  %v885_v21 = vld [vmem:[%s8997_s9 + $0x98] sm:$0xff] }
 0x1a4   :  { %v2188_v55 = vpack.c.bf16 %v1852_v11, %v1844_v26  ;;  %v1988_v6 = vcvt.s32.f32 %v1476_v39  ;;  %v1004_v3 = vunpack.c.1.s8 %v868_v14  ;;  %v1996_v27 = vcvt.s32.f32 %v1484_v29  ;;  %2377 = vmatmul.bf16.vlgmr.msra.gmra.mxu3 %v7199_v37  ;;  %v972_v29 = vld [vmem:[%s8997_s9 + $0x350] sm:$0xff] }
 0x1a5   :  { %2421 = vmatpush.bf16.msrb.mxu3 %v2268_v44  ;;  %2388 = vmatpush.bf16.msrb.mxu0 %v2028_v56  ;;  %v2100_v7 = vpack.c.bf16 %v1676_v13, %v1668_v45  ;;  %v1316_v8 = vunpack.c.0.s8 %v948_v60  ;;  %v1324_v43 = vunpack.c.1.s8 %v948_v60  ;;  %v1508_v59 = vcvt.s32.f32 %v996_v63 }
 0x1a6   :  { %2410 = vmatpush.bf16.msrb.mxu2 %v2188_v55  ;;  %v1516_v19 = vcvt.s32.f32 %v1004_v3  ;;  %v1109_v32 = vunpack.c.2.s8 %v893_v22  ;;  %v1117_v33 = vunpack.c.3.s8 %v893_v22  ;;  %v2260_v49 = vpack.c.bf16 %v1996_v27, %v1988_v6 }
 0x1a7   :  { %2400 = vmatpush.bf16.msrb.mxu1 %v2100_v7  ;;  %v1828_v18 = vcvt.s32.f32 %v1316_v8  ;;  %v1836_v23 = vcvt.s32.f32 %v1324_v43  ;;  %v1140_v52 = vunpack.c.2.s8 %v900_v46  ;;  %v1148_v25 = vunpack.c.3.s8 %v900_v46  ;;  %v932_v8 = vld [vmem:[%s8997_s9 + $0x210] sm:$0xff] }
 0x1a8   :  { %v2020_v4 = vpack.c.bf16 %v1516_v19, %v1508_v59  ;;  %v1621_v53 = vcvt.s32.f32 %v1109_v32  ;;  %v1629_v48 = vcvt.s32.f32 %v1117_v33  ;;  %v1460_v50 = vunpack.c.2.s8 %v980_v47 }
 0x1a9   :  { %2422 = vmatpush.bf16.msrb.mxu3 %v2260_v49  ;;  %v2180_v54 = vpack.c.bf16 %v1836_v23, %v1828_v18  ;;  %v1652_v58 = vcvt.s32.f32 %v1140_v52  ;;  %v1468_v57 = vunpack.c.3.s8 %v980_v47  ;;  %v1660_v14 = vcvt.s32.f32 %v1148_v25 }
 0x1aa   :  { %2389 = vmatpush.bf16.msrb.mxu0 %v2020_v4  ;;  %v2077_v16 = vpack.c.bf16 %v1629_v48, %v1621_v53  ;;  %v1300_v20 = vunpack.c.2.s8 %v940_v5  ;;  %v1308_v1 = vunpack.c.3.s8 %v940_v5  ;;  %v1972_v41 = vcvt.s32.f32 %v1460_v50 }
 0x1ab   :  { %2411 = vmatpush.bf16.msrb.mxu2 %v2180_v54  ;;  %v1980_v51 = vcvt.s32.f32 %v1468_v57  ;;  %v1093_v60 = vunpack.c.0.s8 %v893_v22  ;;  %v1101_v24 = vunpack.c.1.s8 %v893_v22  ;;  %v2092_v15 = vpack.c.bf16 %v1660_v14, %v1652_v58  ;;  %v917_v58 = vld [vmem:[%s8997_s9 + $0x198] sm:$0xff] }
 0x1ac   :  { %v1812_v30 = vcvt.s32.f32 %v1300_v20  ;;  %v1820_v34 = vcvt.s32.f32 %v1308_v1  ;;  %v1124_v0 = vunpack.c.0.s8 %v900_v46  ;;  %v1132_v28 = vunpack.c.1.s8 %v900_v46 }
 0x1ad   :  { %v2252_v38 = vpack.c.bf16 %v1980_v51, %v1972_v41  ;;  %2390 = vmatmul.bf16.vlgmr.msrb.gmra.mxu0 %v7124_v12  ;;  %v1605_v2 = vcvt.s32.f32 %v1093_v60  ;;  %v1613_v9 = vcvt.s32.f32 %v1101_v24  ;;  %2401 = vmatpush.bf16.msrb.mxu1 %v2092_v15  ;;  %v1444_v42 = vunpack.c.0.s8 %v980_v47  ;;  %v877_v60 = vld [vmem:[%s8997_s9 + $0x58] sm:$0xff] }
 0x1ae   :  { %2434 = vmatpush.bf16.msra.mxu0 %v2077_v16  ;;  %v2172_v10 = vpack.c.bf16 %v1820_v34, %v1812_v30  ;;  %v1636_v61 = vcvt.s32.f32 %v1124_v0  ;;  %v1452_v40 = vunpack.c.1.s8 %v980_v47  ;;  %v1644_v44 = vcvt.s32.f32 %v1132_v28 }
 0x1af   :  { %2423 = vmatpush.bf16.msrb.mxu3 %v2252_v38  ;;  %v2069_v17 = vpack.c.bf16 %v1613_v9, %v1605_v2  ;;  %v1237_v26 = vunpack.c.2.s8 %v925_v35  ;;  %v1245_v11 = vunpack.c.3.s8 %v925_v35  ;;  %v1956_v39 = vcvt.s32.f32 %v1444_v42  ;;  %v957_v9 = vld [vmem:[%s8997_s9 + $0x2d8] sm:$0xff] }
 0x1b0   :  { %2412 = vmatpush.bf16.msrb.mxu2 %v2172_v10  ;;  %v1964_v56 = vcvt.s32.f32 %v1452_v40  ;;  %v1284_v45 = vunpack.c.0.s8 %v940_v5  ;;  %v1292_v13 = vunpack.c.1.s8 %v940_v5  ;;  %v2084_v22 = vpack.c.bf16 %v1644_v44, %v1636_v61  ;;  %v964_v40 = vld [vmem:[%s8997_s9 + $0x310] sm:$0xff] }
 0x1b1   :  { %v1749_v55 = vcvt.s32.f32 %v1237_v26  ;;  %v1757_v6 = vcvt.s32.f32 %v1245_v11  ;;  %v1077_v63 = vunpack.c.2.s8 %v885_v21  ;;  %v1085_v27 = vunpack.c.3.s8 %v885_v21 }
 0x1b2   :  { %2435 = vmatpush.bf16.msra.mxu0 %v2069_v17  ;;  %v2244_v3 = vpack.c.bf16 %v1964_v56, %v1956_v39  ;;  %v1796_v46 = vcvt.s32.f32 %v1284_v45  ;;  %v1804_v7 = vcvt.s32.f32 %v1292_v13  ;;  %2402 = vmatpush.bf16.msrb.mxu1 %v2084_v22  ;;  %v1428_v19 = vunpack.c.2.s8 %v972_v29 }
 0x1b3   :  { %v2141_v43 = vpack.c.bf16 %v1757_v6, %v1749_v55  ;;  %v1589_v59 = vcvt.s32.f32 %v1077_v63  ;;  %v1436_v32 = vunpack.c.3.s8 %v972_v29  ;;  %v1597_v47 = vcvt.s32.f32 %v1085_v27 }
 0x1b4   :  { %2424 = vmatpush.bf16.msrb.mxu3 %v2244_v3  ;;  %v2164_v33 = vpack.c.bf16 %v1804_v7, %v1796_v46  ;;  %v1221_v49 = vunpack.c.0.s8 %v925_v35  ;;  %v1229_v18 = vunpack.c.1.s8 %v925_v35  ;;  %v1940_v23 = vcvt.s32.f32 %v1428_v19 }
 0x1b5   :  { %v1948_v52 = vcvt.s32.f32 %v1436_v32  ;;  %v1268_v5 = vunpack.c.2.s8 %v932_v8  ;;  %v1276_v4 = vunpack.c.3.s8 %v932_v8  ;;  %v2061_v53 = vpack.c.bf16 %v1597_v47, %v1589_v59  ;;  %2403 = vmatmul.bf16.vlgmr.msrb.gmra.mxu1 %v7157_v62  ;;  %v909_v47 = vld [vmem:[%s8997_s9 + $0x158] sm:$0xff] }
 0x1b6   :  { %2447 = vmatpush.bf16.msra.mxu1 %v2141_v43  ;;  %2413 = vmatpush.bf16.msrb.mxu2 %v2164_v33  ;;  %v1733_v48 = vcvt.s32.f32 %v1221_v49  ;;  %v1741_v25 = vcvt.s32.f32 %v1229_v18  ;;  %v1061_v54 = vunpack.c.0.s8 %v885_v21  ;;  %v1069_v14 = vunpack.c.1.s8 %v885_v21 }
 0x1b7   :  { %v2236_v50 = vpack.c.bf16 %v1948_v52, %v1940_v23  ;;  %v1780_v57 = vcvt.s32.f32 %v1268_v5  ;;  %v1788_v16 = vcvt.s32.f32 %v1276_v4  ;;  %2436 = vmatpush.bf16.msra.mxu0 %v2061_v53  ;;  %v1412_v41 = vunpack.c.0.s8 %v972_v29  ;;  %v989_v5 = vld [vmem:[%s8997_s9 + $0x3d8] sm:$0xff] }
 0x1b8   :  { %v2133_v20 = vpack.c.bf16 %v1741_v25, %v1733_v48  ;;  %v1573_v1 = vcvt.s32.f32 %v1061_v54  ;;  %v1420_v51 = vunpack.c.1.s8 %v972_v29  ;;  %v1581_v15 = vcvt.s32.f32 %v1069_v14 }
 0x1b9   :  { %2425 = vmatpush.bf16.msrb.mxu3 %v2236_v50  ;;  %v2156_v24 = vpack.c.bf16 %v1788_v16, %v1780_v57  ;;  %v1205_v30 = vunpack.c.2.s8 %v917_v58  ;;  %v1213_v34 = vunpack.c.3.s8 %v917_v58  ;;  %v1924_v0 = vcvt.s32.f32 %v1412_v41  ;;  %v869_v16 = vld [vmem:[%s8997_s9 + $0x18] sm:$0xff] }
 0x1ba   :  { %2448 = vmatpush.bf16.msra.mxu1 %v2133_v20  ;;  %v1932_v35 = vcvt.s32.f32 %v1420_v51  ;;  %v1252_v38 = vunpack.c.0.s8 %v932_v8  ;;  %v1260_v2 = vunpack.c.1.s8 %v932_v8  ;;  %v2053_v28 = vpack.c.bf16 %v1581_v15, %v1573_v1  ;;  %v949_v51 = vld [vmem:[%s8997_s9 + $0x298] sm:$0xff] }
 0x1bb   :  { %2414 = vmatpush.bf16.msrb.mxu2 %v2156_v24  ;;  %v1717_v10 = vcvt.s32.f32 %v1205_v30  ;;  %v1725_v61 = vcvt.s32.f32 %v1213_v34  ;;  %v1045_v42 = vunpack.c.2.s8 %v877_v60  ;;  %v1053_v26 = vunpack.c.3.s8 %v877_v60 }
 0x1bc   :  { %v2228_v21 = vpack.c.bf16 %v1932_v35, %v1924_v0  ;;  %v1764_v17 = vcvt.s32.f32 %v1252_v38  ;;  %v1772_v44 = vcvt.s32.f32 %v1260_v2  ;;  %2437 = vmatpush.bf16.msra.mxu0 %v2053_v28  ;;  %v1365_v56 = vunpack.c.2.s8 %v957_v9 }
 0x1bd   :  { %v2125_v11 = vpack.c.bf16 %v1725_v61, %v1717_v10  ;;  %v1557_v39 = vcvt.s32.f32 %v1045_v42  ;;  %v1373_v45 = vunpack.c.3.s8 %v957_v9  ;;  %v1565_v29 = vcvt.s32.f32 %v1053_v26 }
 0x1be   :  { %2426 = vmatpush.bf16.msrb.mxu3 %v2228_v21  ;;  %v2148_v13 = vpack.c.bf16 %v1772_v44, %v1764_v17  ;;  %v1396_v22 = vunpack.c.2.s8 %v964_v40  ;;  %v1404_v55 = vunpack.c.3.s8 %v964_v40  ;;  %v1877_v6 = vcvt.s32.f32 %v1365_v56 }
 0x1bf   :  { %2449 = vmatpush.bf16.msra.mxu1 %v2125_v11  ;;  %v1885_v63 = vcvt.s32.f32 %v1373_v45  ;;  %v1189_v3 = vunpack.c.0.s8 %v917_v58  ;;  %v1197_v46 = vunpack.c.1.s8 %v917_v58  ;;  %v2045_v7 = vpack.c.bf16 %v1565_v29, %v1557_v39  ;;  %v894_v29 = vld [vmem:[%s8997_s9 + $0xe0] sm:$0xff] }
 0x1c0   :  { %2415 = vmatpush.bf16.msrb.mxu2 %v2148_v13  ;;  %v1908_v27 = vcvt.s32.f32 %v1396_v22  ;;  %v1916_v8 = vcvt.s32.f32 %v1404_v55  ;;  %v1029_v43 = vunpack.c.0.s8 %v877_v60  ;;  %v1037_v33 = vunpack.c.1.s8 %v877_v60 }
 0x1c1   :  { %v2205_v59 = vpack.c.bf16 %v1885_v63, %v1877_v6  ;;  %v1701_v19 = vcvt.s32.f32 %v1189_v3  ;;  %v1709_v32 = vcvt.s32.f32 %v1197_v46  ;;  %2438 = vmatpush.bf16.msra.mxu0 %v2045_v7  ;;  %v1349_v23 = vunpack.c.0.s8 %v957_v9  ;;  %v901_v3 = vld [vmem:[%s8997_s9 + $0x118] sm:$0xff] }
 0x1c2   :  { %v2220_v49 = vpack.c.bf16 %v1916_v8, %v1908_v27  ;;  %v1541_v18 = vcvt.s32.f32 %v1029_v43  ;;  %v1357_v52 = vunpack.c.1.s8 %v957_v9  ;;  %v1549_v53 = vcvt.s32.f32 %v1037_v33  ;;  %v981_v33 = vld [vmem:[%s8997_s9 + $0x398] sm:$0xff] }
 0x1c3   :  { %v2117_v4 = vpack.c.bf16 %v1709_v32, %v1701_v19  ;;  %v1380_v48 = vunpack.c.0.s8 %v964_v40  ;;  %v1388_v25 = vunpack.c.1.s8 %v964_v40  ;;  %2416 = vmatmul.bf16.vlgmr.msrb.gmra.mxu2 %v7186_v31  ;;  %v1861_v54 = vcvt.s32.f32 %v1349_v23 }
 0x1c4   :  { %2460 = vmatpush.bf16.msra.mxu2 %v2205_v59  ;;  %2427 = vmatpush.bf16.msrb.mxu3 %v2220_v49  ;;  %v1869_v58 = vcvt.s32.f32 %v1357_v52  ;;  %v1173_v50 = vunpack.c.2.s8 %v909_v47  ;;  %v1181_v57 = vunpack.c.3.s8 %v909_v47  ;;  %v2037_v14 = vpack.c.bf16 %v1549_v53, %v1541_v18  ;;  %v941_v52 = vld [vmem:[%s8997_s9 + $0x258] sm:$0xff] }
 0x1c5   :  { %2450 = vmatpush.bf16.msra.mxu1 %v2117_v4  ;;  %v1892_v20 = vcvt.s32.f32 %v1380_v48  ;;  %v1900_v1 = vcvt.s32.f32 %v1388_v25  ;;  %v1493_v41 = vunpack.c.2.s8 %v989_v5  ;;  %v1501_v30 = vunpack.c.3.s8 %v989_v5 }
 0x1c6   :  { %v2197_v60 = vpack.c.bf16 %v1869_v58, %v1861_v54  ;;  %v1685_v24 = vcvt.s32.f32 %v1173_v50  ;;  %v1693_v15 = vcvt.s32.f32 %v1181_v57  ;;  %2439 = vmatpush.bf16.msra.mxu0 %v2037_v14  ;;  %v1013_v35 = vunpack.c.2.s8 %v869_v16 }
 0x1c7   :  { %v2212_v34 = vpack.c.bf16 %v1900_v1, %v1892_v20  ;;  %v2005_v0 = vcvt.s32.f32 %v1493_v41  ;;  %v1021_v38 = vunpack.c.3.s8 %v869_v16  ;;  %v2013_v9 = vcvt.s32.f32 %v1501_v30 }
 0x1c8   :  { %2461 = vmatpush.bf16.msra.mxu2 %v2197_v60  ;;  %v2109_v2 = vpack.c.bf16 %v1693_v15, %v1685_v24  ;;  %v1333_v28 = vunpack.c.2.s8 %v949_v51  ;;  %v1341_v10 = vunpack.c.3.s8 %v949_v51  ;;  %v1525_v61 = vcvt.s32.f32 %v1013_v35 }
 0x1c9   :  { %2428 = vmatpush.bf16.msrb.mxu3 %v2212_v34  ;;  %v1533_v42 = vcvt.s32.f32 %v1021_v38  ;;  %v1157_v40 = vunpack.c.0.s8 %v909_v47  ;;  %v1165_v21 = vunpack.c.1.s8 %v909_v47  ;;  %v2269_v17 = vpack.c.bf16 %v2013_v9, %v2005_v0  ;;  %v926_v0 = vld [vmem:[%s8997_s9 + $0x1e0] sm:$0xff] }
 0x1ca   :  { %2451 = vmatpush.bf16.msra.mxu1 %v2109_v2  ;;  %v1845_v44 = vcvt.s32.f32 %v1333_v28  ;;  %v1853_v26 = vcvt.s32.f32 %v1341_v10  ;;  %v1477_v11 = vunpack.c.0.s8 %v989_v5  ;;  %v1485_v13 = vunpack.c.1.s8 %v989_v5 }
 0x1cb   :  { %v2029_v39 = vpack.c.bf16 %v1533_v42, %v1525_v61  ;;  %v1669_v56 = vcvt.s32.f32 %v1157_v40  ;;  %v1677_v45 = vcvt.s32.f32 %v1165_v21  ;;  %v997_v6 = vunpack.c.0.s8 %v869_v16  ;;  %v886_v40 = vld [vmem:[%s8997_s9 + $0xa0] sm:$0xff] }
 0x1cc   :  { %v2189_v22 = vpack.c.bf16 %v1853_v26, %v1845_v44  ;;  %v1989_v55 = vcvt.s32.f32 %v1477_v11  ;;  %v1005_v63 = vunpack.c.1.s8 %v869_v16  ;;  %2429 = vmatmul.bf16.vlgmr.msrb.gmra.mxu3 %v7199_v37  ;;  %v1997_v7 = vcvt.s32.f32 %v1485_v13  ;;  %v973_v13 = vld [vmem:[%s8997_s9 + $0x358] sm:$0xff] }
 0x1cd   :  { %2473 = vmatpush.bf16.msra.mxu3 %v2269_v17  ;;  %2440 = vmatpush.bf16.msra.mxu0 %v2029_v39  ;;  %v2101_v46 = vpack.c.bf16 %v1677_v45, %v1669_v56  ;;  %v1317_v27 = vunpack.c.0.s8 %v949_v51  ;;  %v1325_v8 = vunpack.c.1.s8 %v949_v51  ;;  %v1509_v43 = vcvt.s32.f32 %v997_v6 }
 0x1ce   :  { %2462 = vmatpush.bf16.msra.mxu2 %v2189_v22  ;;  %v1517_v59 = vcvt.s32.f32 %v1005_v63  ;;  %v1110_v19 = vunpack.c.2.s8 %v894_v29  ;;  %v1118_v32 = vunpack.c.3.s8 %v894_v29  ;;  %v2261_v47 = vpack.c.bf16 %v1997_v7, %v1989_v55 }
 0x1cf   :  { %2452 = vmatpush.bf16.msra.mxu1 %v2101_v46  ;;  %v1829_v49 = vcvt.s32.f32 %v1317_v27  ;;  %v1837_v18 = vcvt.s32.f32 %v1325_v8  ;;  %v1141_v23 = vunpack.c.2.s8 %v901_v3  ;;  %v1149_v48 = vunpack.c.3.s8 %v901_v3  ;;  %v933_v27 = vld [vmem:[%s8997_s9 + $0x218] sm:$0xff] }
 0x1d0   :  { %v2021_v5 = vpack.c.bf16 %v1517_v59, %v1509_v43  ;;  %v1622_v4 = vcvt.s32.f32 %v1110_v19  ;;  %v1630_v53 = vcvt.s32.f32 %v1118_v32  ;;  %v1461_v58 = vunpack.c.2.s8 %v981_v33 }
 0x1d1   :  { %2474 = vmatpush.bf16.msra.mxu3 %v2261_v47  ;;  %v2181_v25 = vpack.c.bf16 %v1837_v18, %v1829_v49  ;;  %v1653_v54 = vcvt.s32.f32 %v1141_v23  ;;  %v1469_v50 = vunpack.c.3.s8 %v981_v33  ;;  %v1661_v16 = vcvt.s32.f32 %v1149_v48 }
 0x1d2   :  { %2441 = vmatpush.bf16.msra.mxu0 %v2021_v5  ;;  %v2078_v57 = vpack.c.bf16 %v1630_v53, %v1622_v4  ;;  %v1301_v14 = vunpack.c.2.s8 %v941_v52  ;;  %v1309_v20 = vunpack.c.3.s8 %v941_v52  ;;  %v1973_v1 = vcvt.s32.f32 %v1461_v58 }
 0x1d3   :  { %2463 = vmatpush.bf16.msra.mxu2 %v2181_v25  ;;  %v1981_v41 = vcvt.s32.f32 %v1469_v50  ;;  %v1094_v51 = vunpack.c.0.s8 %v894_v29  ;;  %v1102_v60 = vunpack.c.1.s8 %v894_v29  ;;  %v2093_v24 = vpack.c.bf16 %v1661_v16, %v1653_v54  ;;  %v918_v54 = vld [vmem:[%s8997_s9 + $0x1a0] sm:$0xff] }
 0x1d4   :  { %v1813_v15 = vcvt.s32.f32 %v1301_v14  ;;  %v1821_v30 = vcvt.s32.f32 %v1309_v20  ;;  %v1125_v34 = vunpack.c.0.s8 %v901_v3  ;;  %v1133_v9 = vunpack.c.1.s8 %v901_v3 }
 0x1d5   :  { %v2253_v35 = vpack.c.bf16 %v1981_v41, %v1973_v1  ;;  %2442 = vmatmul.bf16.vlgmr.msra.gmra.mxu0 %v7124_v12  ;;  %v1606_v38 = vcvt.s32.f32 %v1094_v51  ;;  %v1614_v2 = vcvt.s32.f32 %v1102_v60  ;;  %2453 = vmatpush.bf16.msra.mxu1 %v2093_v24  ;;  %v1445_v61 = vunpack.c.0.s8 %v981_v33  ;;  %v878_v51 = vld [vmem:[%s8997_s9 + $0x60] sm:$0xff] }
 0x1d6   :  { %2486 = vmatpush.bf16.msrb.mxu0 %v2078_v57  ;;  %v2173_v28 = vpack.c.bf16 %v1821_v30, %v1813_v15  ;;  %v1637_v10 = vcvt.s32.f32 %v1125_v34  ;;  %v1453_v42 = vunpack.c.1.s8 %v981_v33  ;;  %v1645_v17 = vcvt.s32.f32 %v1133_v9 }
 0x1d7   :  { %2475 = vmatpush.bf16.msra.mxu3 %v2253_v35  ;;  %v2070_v21 = vpack.c.bf16 %v1614_v2, %v1606_v38  ;;  %v1238_v44 = vunpack.c.2.s8 %v926_v0  ;;  %v1246_v26 = vunpack.c.3.s8 %v926_v0  ;;  %v1957_v11 = vcvt.s32.f32 %v1445_v61  ;;  %v958_v2 = vld [vmem:[%s8997_s9 + $0x2e0] sm:$0xff] }
 0x1d8   :  { %2464 = vmatpush.bf16.msra.mxu2 %v2173_v28  ;;  %v1965_v39 = vcvt.s32.f32 %v1453_v42  ;;  %v1285_v56 = vunpack.c.0.s8 %v941_v52  ;;  %v1293_v45 = vunpack.c.1.s8 %v941_v52  ;;  %v2085_v29 = vpack.c.bf16 %v1645_v17, %v1637_v10  ;;  %v965_v42 = vld [vmem:[%s8997_s9 + $0x318] sm:$0xff] }
 0x1d9   :  { %v1750_v22 = vcvt.s32.f32 %v1238_v44  ;;  %v1758_v55 = vcvt.s32.f32 %v1246_v26  ;;  %v1078_v6 = vunpack.c.2.s8 %v886_v40  ;;  %v1086_v7 = vunpack.c.3.s8 %v886_v40 }
 0x1da   :  { %2487 = vmatpush.bf16.msrb.mxu0 %v2070_v21  ;;  %v2245_v63 = vpack.c.bf16 %v1965_v39, %v1957_v11  ;;  %v1797_v3 = vcvt.s32.f32 %v1285_v56  ;;  %v1805_v46 = vcvt.s32.f32 %v1293_v45  ;;  %2454 = vmatpush.bf16.msra.mxu1 %v2085_v29  ;;  %v1429_v59 = vunpack.c.2.s8 %v973_v13 }
 0x1db   :  { %v2142_v8 = vpack.c.bf16 %v1758_v55, %v1750_v22  ;;  %v1590_v43 = vcvt.s32.f32 %v1078_v6  ;;  %v1437_v19 = vunpack.c.3.s8 %v973_v13  ;;  %v1598_v33 = vcvt.s32.f32 %v1086_v7 }
 0x1dc   :  { %2476 = vmatpush.bf16.msra.mxu3 %v2245_v63  ;;  %v2165_v32 = vpack.c.bf16 %v1805_v46, %v1797_v3  ;;  %v1222_v47 = vunpack.c.0.s8 %v926_v0  ;;  %v1230_v49 = vunpack.c.1.s8 %v926_v0  ;;  %v1941_v18 = vcvt.s32.f32 %v1429_v59 }
 0x1dd   :  { %v1949_v23 = vcvt.s32.f32 %v1437_v19  ;;  %v1269_v52 = vunpack.c.2.s8 %v933_v27  ;;  %v1277_v5 = vunpack.c.3.s8 %v933_v27  ;;  %2455 = vmatmul.bf16.vlgmr.msra.gmra.mxu1 %v7157_v62  ;;  %v2062_v4 = vpack.c.bf16 %v1598_v33, %v1590_v43  ;;  %v910_v33 = vld [vmem:[%s8997_s9 + $0x160] sm:$0xff] }
 0x1de   :  { %2499 = vmatpush.bf16.msrb.mxu1 %v2142_v8  ;;  %2465 = vmatpush.bf16.msra.mxu2 %v2165_v32  ;;  %v1734_v53 = vcvt.s32.f32 %v1222_v47  ;;  %v1742_v48 = vcvt.s32.f32 %v1230_v49  ;;  %v1062_v25 = vunpack.c.0.s8 %v886_v40  ;;  %v1070_v16 = vunpack.c.1.s8 %v886_v40 }
 0x1df   :  { %v2237_v58 = vpack.c.bf16 %v1949_v23, %v1941_v18  ;;  %v1781_v50 = vcvt.s32.f32 %v1269_v52  ;;  %v1789_v57 = vcvt.s32.f32 %v1277_v5  ;;  %2488 = vmatpush.bf16.msrb.mxu0 %v2062_v4  ;;  %v1413_v1 = vunpack.c.0.s8 %v973_v13  ;;  %v990_v52 = vld [vmem:[%s8997_s9 + $0x3e0] sm:$0xff] }
 0x1e0   :  { %v2134_v14 = vpack.c.bf16 %v1742_v48, %v1734_v53  ;;  %v1574_v20 = vcvt.s32.f32 %v1062_v25  ;;  %v1421_v41 = vunpack.c.1.s8 %v973_v13  ;;  %v1582_v24 = vcvt.s32.f32 %v1070_v16 }
 0x1e1   :  { %2477 = vmatpush.bf16.msra.mxu3 %v2237_v58  ;;  %v2157_v60 = vpack.c.bf16 %v1789_v57, %v1781_v50  ;;  %v1206_v15 = vunpack.c.2.s8 %v918_v54  ;;  %v1214_v30 = vunpack.c.3.s8 %v918_v54  ;;  %v1925_v34 = vcvt.s32.f32 %v1413_v1  ;;  %v870_v57 = vld [vmem:[%s8997_s9 + $0x20] sm:$0xff] }
 0x1e2   :  { %2500 = vmatpush.bf16.msrb.mxu1 %v2134_v14  ;;  %v1933_v0 = vcvt.s32.f32 %v1421_v41  ;;  %v1253_v35 = vunpack.c.0.s8 %v933_v27  ;;  %v1261_v38 = vunpack.c.1.s8 %v933_v27  ;;  %v2054_v9 = vpack.c.bf16 %v1582_v24, %v1574_v20  ;;  %v950_v41 = vld [vmem:[%s8997_s9 + $0x2a0] sm:$0xff] }
 0x1e3   :  { %2466 = vmatpush.bf16.msra.mxu2 %v2157_v60  ;;  %v1718_v28 = vcvt.s32.f32 %v1206_v15  ;;  %v1726_v10 = vcvt.s32.f32 %v1214_v30  ;;  %v1046_v61 = vunpack.c.2.s8 %v878_v51  ;;  %v1054_v44 = vunpack.c.3.s8 %v878_v51 }
 0x1e4   :  { %v2229_v40 = vpack.c.bf16 %v1933_v0, %v1925_v34  ;;  %v1765_v21 = vcvt.s32.f32 %v1253_v35  ;;  %v1773_v17 = vcvt.s32.f32 %v1261_v38  ;;  %2489 = vmatpush.bf16.msrb.mxu0 %v2054_v9  ;;  %v1366_v39 = vunpack.c.2.s8 %v958_v2 }
 0x1e5   :  { %v2126_v26 = vpack.c.bf16 %v1726_v10, %v1718_v28  ;;  %v1558_v11 = vcvt.s32.f32 %v1046_v61  ;;  %v1374_v56 = vunpack.c.3.s8 %v958_v2  ;;  %v1566_v13 = vcvt.s32.f32 %v1054_v44 }
 0x1e6   :  { %2478 = vmatpush.bf16.msra.mxu3 %v2229_v40  ;;  %v2149_v45 = vpack.c.bf16 %v1773_v17, %v1765_v21  ;;  %v1397_v29 = vunpack.c.2.s8 %v965_v42  ;;  %v1405_v22 = vunpack.c.3.s8 %v965_v42  ;;  %v1878_v55 = vcvt.s32.f32 %v1366_v39 }
 0x1e7   :  { %2501 = vmatpush.bf16.msrb.mxu1 %v2126_v26  ;;  %v1886_v6 = vcvt.s32.f32 %v1374_v56  ;;  %v1190_v63 = vunpack.c.0.s8 %v918_v54  ;;  %v1198_v3 = vunpack.c.1.s8 %v918_v54  ;;  %v2046_v46 = vpack.c.bf16 %v1566_v13, %v1558_v11  ;;  %v895_v13 = vld [vmem:[%s8997_s9 + $0xe8] sm:$0xff] }
 0x1e8   :  { %2467 = vmatpush.bf16.msra.mxu2 %v2149_v45  ;;  %v1909_v7 = vcvt.s32.f32 %v1397_v29  ;;  %v1917_v27 = vcvt.s32.f32 %v1405_v22  ;;  %v1030_v8 = vunpack.c.0.s8 %v878_v51  ;;  %v1038_v32 = vunpack.c.1.s8 %v878_v51 }
 0x1e9   :  { %v2206_v43 = vpack.c.bf16 %v1886_v6, %v1878_v55  ;;  %v1702_v59 = vcvt.s32.f32 %v1190_v63  ;;  %v1710_v19 = vcvt.s32.f32 %v1198_v3  ;;  %2490 = vmatpush.bf16.msrb.mxu0 %v2046_v46  ;;  %v1350_v18 = vunpack.c.0.s8 %v958_v2  ;;  %v902_v63 = vld [vmem:[%s8997_s9 + $0x120] sm:$0xff] }
 0x1ea   :  { %v2221_v47 = vpack.c.bf16 %v1917_v27, %v1909_v7  ;;  %v1542_v49 = vcvt.s32.f32 %v1030_v8  ;;  %v1358_v23 = vunpack.c.1.s8 %v958_v2  ;;  %v1550_v4 = vcvt.s32.f32 %v1038_v32  ;;  %v982_v32 = vld [vmem:[%s8997_s9 + $0x3a0] sm:$0xff] }
 0x1eb   :  { %v2118_v5 = vpack.c.bf16 %v1710_v19, %v1702_v59  ;;  %v1381_v53 = vunpack.c.0.s8 %v965_v42  ;;  %v1389_v48 = vunpack.c.1.s8 %v965_v42  ;;  %2468 = vmatmul.bf16.vlgmr.msra.gmra.mxu2 %v7186_v31  ;;  %v1862_v25 = vcvt.s32.f32 %v1350_v18 }
 0x1ec   :  { %2512 = vmatpush.bf16.msrb.mxu2 %v2206_v43  ;;  %2479 = vmatpush.bf16.msra.mxu3 %v2221_v47  ;;  %v1870_v54 = vcvt.s32.f32 %v1358_v23  ;;  %v1174_v58 = vunpack.c.2.s8 %v910_v33  ;;  %v1182_v50 = vunpack.c.3.s8 %v910_v33  ;;  %v2038_v16 = vpack.c.bf16 %v1550_v4, %v1542_v49  ;;  %v942_v23 = vld [vmem:[%s8997_s9 + $0x260] sm:$0xff] }
 0x1ed   :  { %2502 = vmatpush.bf16.msrb.mxu1 %v2118_v5  ;;  %v1893_v14 = vcvt.s32.f32 %v1381_v53  ;;  %v1901_v20 = vcvt.s32.f32 %v1389_v48  ;;  %v1494_v1 = vunpack.c.2.s8 %v990_v52  ;;  %v1502_v15 = vunpack.c.3.s8 %v990_v52 }
 0x1ee   :  { %v2198_v51 = vpack.c.bf16 %v1870_v54, %v1862_v25  ;;  %v1686_v60 = vcvt.s32.f32 %v1174_v58  ;;  %v1694_v24 = vcvt.s32.f32 %v1182_v50  ;;  %2491 = vmatpush.bf16.msrb.mxu0 %v2038_v16  ;;  %v1014_v0 = vunpack.c.2.s8 %v870_v57 }
 0x1ef   :  { %v2213_v30 = vpack.c.bf16 %v1901_v20, %v1893_v14  ;;  %v2006_v34 = vcvt.s32.f32 %v1494_v1  ;;  %v1022_v35 = vunpack.c.3.s8 %v870_v57  ;;  %v2014_v2 = vcvt.s32.f32 %v1502_v15 }
 0x1f0   :  { %2513 = vmatpush.bf16.msrb.mxu2 %v2198_v51  ;;  %v2110_v38 = vpack.c.bf16 %v1694_v24, %v1686_v60  ;;  %v1334_v9 = vunpack.c.2.s8 %v950_v41  ;;  %v1342_v28 = vunpack.c.3.s8 %v950_v41  ;;  %v1526_v10 = vcvt.s32.f32 %v1014_v0 }
 0x1f1   :  { %2480 = vmatpush.bf16.msra.mxu3 %v2213_v30  ;;  %v1534_v61 = vcvt.s32.f32 %v1022_v35  ;;  %v1158_v42 = vunpack.c.0.s8 %v910_v33  ;;  %v1166_v40 = vunpack.c.1.s8 %v910_v33  ;;  %v2270_v21 = vpack.c.bf16 %v2014_v2, %v2006_v34  ;;  %v927_v34 = vld [vmem:[%s8997_s9 + $0x1e8] sm:$0xff] }
 0x1f2   :  { %2503 = vmatpush.bf16.msrb.mxu1 %v2110_v38  ;;  %v1846_v17 = vcvt.s32.f32 %v1334_v9  ;;  %v1854_v44 = vcvt.s32.f32 %v1342_v28  ;;  %v1478_v26 = vunpack.c.0.s8 %v990_v52  ;;  %v1486_v45 = vunpack.c.1.s8 %v990_v52 }
 0x1f3   :  { %v2030_v11 = vpack.c.bf16 %v1534_v61, %v1526_v10  ;;  %v1670_v39 = vcvt.s32.f32 %v1158_v42  ;;  %v1678_v56 = vcvt.s32.f32 %v1166_v40  ;;  %v998_v55 = vunpack.c.0.s8 %v870_v57  ;;  %v887_v42 = vld [vmem:[%s8997_s9 + $0xa8] sm:$0xff] }
 0x1f4   :  { %v2190_v29 = vpack.c.bf16 %v1854_v44, %v1846_v17  ;;  %v1990_v22 = vcvt.s32.f32 %v1478_v26  ;;  %v1006_v6 = vunpack.c.1.s8 %v870_v57  ;;  %2481 = vmatmul.bf16.vlgmr.msra.gmra.mxu3 %v7199_v37  ;;  %v1998_v46 = vcvt.s32.f32 %v1486_v45  ;;  %v974_v45 = vld [vmem:[%s8997_s9 + $0x360] sm:$0xff] }
 0x1f5   :  { %2525 = vmatpush.bf16.msrb.mxu3 %v2270_v21  ;;  %2492 = vmatpush.bf16.msrb.mxu0 %v2030_v11  ;;  %v2102_v3 = vpack.c.bf16 %v1678_v56, %v1670_v39  ;;  %v1318_v7 = vunpack.c.0.s8 %v950_v41  ;;  %v1326_v27 = vunpack.c.1.s8 %v950_v41  ;;  %v1510_v8 = vcvt.s32.f32 %v998_v55 }
 0x1f6   :  { %2514 = vmatpush.bf16.msrb.mxu2 %v2190_v29  ;;  %v1518_v43 = vcvt.s32.f32 %v1006_v6  ;;  %v1111_v59 = vunpack.c.2.s8 %v895_v13  ;;  %v1119_v19 = vunpack.c.3.s8 %v895_v13  ;;  %v2262_v33 = vpack.c.bf16 %v1998_v46, %v1990_v22 }
 0x1f7   :  { %2504 = vmatpush.bf16.msrb.mxu1 %v2102_v3  ;;  %v1830_v47 = vcvt.s32.f32 %v1318_v7  ;;  %v1838_v49 = vcvt.s32.f32 %v1326_v27  ;;  %v1142_v18 = vunpack.c.2.s8 %v902_v63  ;;  %v1150_v53 = vunpack.c.3.s8 %v902_v63  ;;  %v934_v7 = vld [vmem:[%s8997_s9 + $0x220] sm:$0xff] }
 0x1f8   :  { %v2022_v52 = vpack.c.bf16 %v1518_v43, %v1510_v8  ;;  %v1623_v5 = vcvt.s32.f32 %v1111_v59  ;;  %v1631_v4 = vcvt.s32.f32 %v1119_v19  ;;  %v1462_v54 = vunpack.c.2.s8 %v982_v32 }
 0x1f9   :  { %2526 = vmatpush.bf16.msrb.mxu3 %v2262_v33  ;;  %v2182_v48 = vpack.c.bf16 %v1838_v49, %v1830_v47  ;;  %v1654_v25 = vcvt.s32.f32 %v1142_v18  ;;  %v1470_v58 = vunpack.c.3.s8 %v982_v32  ;;  %v1662_v57 = vcvt.s32.f32 %v1150_v53 }
 0x1fa   :  { %2493 = vmatpush.bf16.msrb.mxu0 %v2022_v52  ;;  %v2079_v50 = vpack.c.bf16 %v1631_v4, %v1623_v5  ;;  %v1302_v16 = vunpack.c.2.s8 %v942_v23  ;;  %v1310_v14 = vunpack.c.3.s8 %v942_v23  ;;  %v1974_v20 = vcvt.s32.f32 %v1462_v54 }
 0x1fb   :  { %2515 = vmatpush.bf16.msrb.mxu2 %v2182_v48  ;;  %v1982_v1 = vcvt.s32.f32 %v1470_v58  ;;  %v1095_v41 = vunpack.c.0.s8 %v895_v13  ;;  %v1103_v51 = vunpack.c.1.s8 %v895_v13  ;;  %v2094_v60 = vpack.c.bf16 %v1662_v57, %v1654_v25  ;;  %v919_v25 = vld [vmem:[%s8997_s9 + $0x1a8] sm:$0xff] }
 0x1fc   :  { %v1814_v24 = vcvt.s32.f32 %v1302_v16  ;;  %v1822_v15 = vcvt.s32.f32 %v1310_v14  ;;  %v1126_v30 = vunpack.c.0.s8 %v902_v63  ;;  %v1134_v2 = vunpack.c.1.s8 %v902_v63 }
 0x1fd   :  { %v2254_v0 = vpack.c.bf16 %v1982_v1, %v1974_v20  ;;  %2494 = vmatmul.bf16.vlgmr.msrb.gmra.mxu0 %v7124_v12  ;;  %v1607_v35 = vcvt.s32.f32 %v1095_v41  ;;  %v1615_v38 = vcvt.s32.f32 %v1103_v51  ;;  %2505 = vmatpush.bf16.msrb.mxu1 %v2094_v60  ;;  %v1446_v10 = vunpack.c.0.s8 %v982_v32  ;;  %v879_v41 = vld [vmem:[%s8997_s9 + $0x68] sm:$0xff] }
 0x1fe   :  { %2538 = vmatpush.bf16.msra.mxu0 %v2079_v50  ;;  %v2174_v9 = vpack.c.bf16 %v1822_v15, %v1814_v24  ;;  %v1638_v28 = vcvt.s32.f32 %v1126_v30  ;;  %v1454_v61 = vunpack.c.1.s8 %v982_v32  ;;  %v1646_v21 = vcvt.s32.f32 %v1134_v2 }
 0x1ff   :  { %2527 = vmatpush.bf16.msrb.mxu3 %v2254_v0  ;;  %v2071_v40 = vpack.c.bf16 %v1615_v38, %v1607_v35  ;;  %v1239_v17 = vunpack.c.2.s8 %v927_v34  ;;  %v1247_v44 = vunpack.c.3.s8 %v927_v34  ;;  %v1958_v26 = vcvt.s32.f32 %v1446_v10  ;;  %v959_v38 = vld [vmem:[%s8997_s9 + $0x2e8] sm:$0xff] }
 0x200   :  { %2516 = vmatpush.bf16.msrb.mxu2 %v2174_v9  ;;  %v1966_v11 = vcvt.s32.f32 %v1454_v61  ;;  %v1286_v39 = vunpack.c.0.s8 %v942_v23  ;;  %v1294_v56 = vunpack.c.1.s8 %v942_v23  ;;  %v2086_v13 = vpack.c.bf16 %v1646_v21, %v1638_v28  ;;  %v966_v61 = vld [vmem:[%s8997_s9 + $0x320] sm:$0xff] }
 0x201   :  { %v1751_v29 = vcvt.s32.f32 %v1239_v17  ;;  %v1759_v22 = vcvt.s32.f32 %v1247_v44  ;;  %v1079_v55 = vunpack.c.2.s8 %v887_v42  ;;  %v1087_v46 = vunpack.c.3.s8 %v887_v42 }
 0x202   :  { %2539 = vmatpush.bf16.msra.mxu0 %v2071_v40  ;;  %v2246_v6 = vpack.c.bf16 %v1966_v11, %v1958_v26  ;;  %v1798_v63 = vcvt.s32.f32 %v1286_v39  ;;  %v1806_v3 = vcvt.s32.f32 %v1294_v56  ;;  %2506 = vmatpush.bf16.msrb.mxu1 %v2086_v13  ;;  %v1430_v43 = vunpack.c.2.s8 %v974_v45 }
 0x203   :  { %v2143_v27 = vpack.c.bf16 %v1759_v22, %v1751_v29  ;;  %v1591_v8 = vcvt.s32.f32 %v1079_v55  ;;  %v1438_v59 = vunpack.c.3.s8 %v974_v45  ;;  %v1599_v32 = vcvt.s32.f32 %v1087_v46 }
 0x204   :  { %2528 = vmatpush.bf16.msrb.mxu3 %v2246_v6  ;;  %v2166_v19 = vpack.c.bf16 %v1806_v3, %v1798_v63  ;;  %v1223_v33 = vunpack.c.0.s8 %v927_v34  ;;  %v1231_v47 = vunpack.c.1.s8 %v927_v34  ;;  %v1942_v49 = vcvt.s32.f32 %v1430_v43 }
 0x205   :  { %v1950_v18 = vcvt.s32.f32 %v1438_v59  ;;  %v1270_v23 = vunpack.c.2.s8 %v934_v7  ;;  %v1278_v52 = vunpack.c.3.s8 %v934_v7  ;;  %2507 = vmatmul.bf16.vlgmr.msrb.gmra.mxu1 %v7157_v62  ;;  %v2063_v5 = vpack.c.bf16 %v1599_v32, %v1591_v8  ;;  %v7384_v8 = vpop.f32.mrf.mxu0 }
 0x206   :  { %2551 = vmatpush.bf16.msra.mxu1 %v2143_v27  ;;  %2517 = vmatpush.bf16.msrb.mxu2 %v2166_v19  ;;  %v1735_v4 = vcvt.s32.f32 %v1223_v33  ;;  %v1743_v53 = vcvt.s32.f32 %v1231_v47  ;;  %v1063_v48 = vunpack.c.0.s8 %v887_v42  ;;  %v1071_v57 = vunpack.c.1.s8 %v887_v42  ;;  %v911_v33 = vld [vmem:[%s8997_s9 + $0x168] sm:$0xff] }
 0x207   :  { %v2238_v54 = vpack.c.bf16 %v1950_v18, %v1942_v49  ;;  %v1782_v58 = vcvt.s32.f32 %v1270_v23  ;;  %v1790_v50 = vcvt.s32.f32 %v1278_v52  ;;  %2540 = vmatpush.bf16.msra.mxu0 %v2063_v5  ;;  %v1414_v20 = vunpack.c.0.s8 %v974_v45  ;;  %v991_v52 = vld [vmem:[%s8997_s9 + $0x3e8] sm:$0xff] }
 0x208   :  { %v2135_v16 = vpack.c.bf16 %v1743_v53, %v1735_v4  ;;  %v1575_v14 = vcvt.s32.f32 %v1063_v48  ;;  %v1422_v1 = vunpack.c.1.s8 %v974_v45  ;;  %v1583_v60 = vcvt.s32.f32 %v1071_v57  ;;  %v871_v57 = vld [vmem:[%s8997_s9 + $0x28] sm:$0xff] }
 0x209   :  { %2529 = vmatpush.bf16.msrb.mxu3 %v2238_v54  ;;  %v2158_v51 = vpack.c.bf16 %v1790_v50, %v1782_v58  ;;  %v1207_v24 = vunpack.c.2.s8 %v919_v25  ;;  %v1215_v15 = vunpack.c.3.s8 %v919_v25  ;;  %v1926_v30 = vcvt.s32.f32 %v1414_v20 }
 0x20a   :  { %2552 = vmatpush.bf16.msra.mxu1 %v2135_v16  ;;  %v1934_v34 = vcvt.s32.f32 %v1422_v1  ;;  %v1254_v0 = vunpack.c.0.s8 %v934_v7  ;;  %v1262_v35 = vunpack.c.1.s8 %v934_v7  ;;  %v2055_v2 = vpack.c.bf16 %v1583_v60, %v1575_v14 }
 0x20b   :  { %2518 = vmatpush.bf16.msrb.mxu2 %v2158_v51  ;;  %v1719_v9 = vcvt.s32.f32 %v1207_v24  ;;  %v1727_v28 = vcvt.s32.f32 %v1215_v15  ;;  %v1047_v10 = vunpack.c.2.s8 %v879_v41  ;;  %v1055_v17 = vunpack.c.3.s8 %v879_v41 }
 0x20c   :  { %v2230_v42 = vpack.c.bf16 %v1934_v34, %v1926_v30  ;;  %v1766_v40 = vcvt.s32.f32 %v1254_v0  ;;  %v1774_v21 = vcvt.s32.f32 %v1262_v35  ;;  %2541 = vmatpush.bf16.msra.mxu0 %v2055_v2  ;;  %v1367_v11 = vunpack.c.2.s8 %v959_v38 }
 0x20d   :  { %v2127_v44 = vpack.c.bf16 %v1727_v28, %v1719_v9  ;;  %v1559_v26 = vcvt.s32.f32 %v1047_v10  ;;  %v1375_v39 = vunpack.c.3.s8 %v959_v38  ;;  %v1567_v45 = vcvt.s32.f32 %v1055_v17 }
 0x20e   :  { %2530 = vmatpush.bf16.msrb.mxu3 %v2230_v42  ;;  %v2150_v56 = vpack.c.bf16 %v1774_v21, %v1766_v40  ;;  %v1398_v13 = vunpack.c.2.s8 %v966_v61  ;;  %v1406_v29 = vunpack.c.3.s8 %v966_v61  ;;  %v1879_v22 = vcvt.s32.f32 %v1367_v11 }
 0x20f   :  { %2553 = vmatpush.bf16.msra.mxu1 %v2127_v44  ;;  %v1887_v55 = vcvt.s32.f32 %v1375_v39  ;;  %v1191_v6 = vunpack.c.0.s8 %v919_v25  ;;  %v1199_v63 = vunpack.c.1.s8 %v919_v25  ;;  %v2047_v3 = vpack.c.bf16 %v1567_v45, %v1559_v26 }
 0x210   :  { %2519 = vmatpush.bf16.msrb.mxu2 %v2150_v56  ;;  %v1910_v46 = vcvt.s32.f32 %v1398_v13  ;;  %v1918_v7 = vcvt.s32.f32 %v1406_v29  ;;  %v1031_v27 = vunpack.c.0.s8 %v879_v41  ;;  %v1039_v32 = vunpack.c.1.s8 %v879_v41  ;;  %v951_v41 = vld [vmem:[%s8997_s9 + $0x2a8] sm:$0xff] }
 0x211   :  { %v2207_v43 = vpack.c.bf16 %v1887_v55, %v1879_v22  ;;  %v1703_v59 = vcvt.s32.f32 %v1191_v6  ;;  %v1711_v19 = vcvt.s32.f32 %v1199_v63  ;;  %2542 = vmatpush.bf16.msra.mxu0 %v2047_v3  ;;  %v1351_v18 = vunpack.c.0.s8 %v959_v38  ;;  %v896_v22 = vld [vmem:[%s8997_s9 + $0xf0] sm:$0xff] }
 0x212   :  { %v2222_v47 = vpack.c.bf16 %v1918_v7, %v1910_v46  ;;  %v1543_v49 = vcvt.s32.f32 %v1031_v27  ;;  %v1359_v23 = vunpack.c.1.s8 %v959_v38  ;;  %v1551_v4 = vcvt.s32.f32 %v1039_v32  ;;  %v7399_v38 = vpop.f32.mrf.mxu1  ;;  %v903_v46 = vld [vmem:[%s8997_s9 + $0x128] sm:$0xff] }
 0x213   :  { %v2119_v5 = vpack.c.bf16 %v1711_v19, %v1703_v59  ;;  %v1382_v53 = vunpack.c.0.s8 %v966_v61  ;;  %v1390_v48 = vunpack.c.1.s8 %v966_v61  ;;  %2520 = vmatmul.bf16.vlgmr.msrb.gmra.mxu2 %v7186_v31  ;;  %v1863_v25 = vcvt.s32.f32 %v1351_v18  ;;  %v2289_v61 = vpop.f32.mrf.mxu0 }
 0x214   :  { %2564 = vmatpush.bf16.msra.mxu2 %v2207_v43  ;;  %2531 = vmatpush.bf16.msrb.mxu3 %v2222_v47  ;;  %v1871_v54 = vcvt.s32.f32 %v1359_v23  ;;  %v1175_v58 = vunpack.c.2.s8 %v911_v33  ;;  %v1183_v50 = vunpack.c.3.s8 %v911_v33  ;;  %v2039_v16 = vpack.c.bf16 %v1551_v4, %v1543_v49  ;;  %v983_v49 = vld [vmem:[%s8997_s9 + $0x3a8] sm:$0xff] }
 0x215   :  { %2554 = vmatpush.bf16.msra.mxu1 %v2119_v5  ;;  %v1894_v14 = vcvt.s32.f32 %v1382_v53  ;;  %v1902_v20 = vcvt.s32.f32 %v1390_v48  ;;  %v1495_v1 = vunpack.c.2.s8 %v991_v52  ;;  %v1503_v15 = vunpack.c.3.s8 %v991_v52  ;;  %v943_v4 = vld [vmem:[%s8997_s9 + $0x268] sm:$0xff] }
 0x216   :  { %v2199_v51 = vpack.c.bf16 %v1871_v54, %v1863_v25  ;;  %v1687_v60 = vcvt.s32.f32 %v1175_v58  ;;  %v1695_v24 = vcvt.s32.f32 %v1183_v50  ;;  %2543 = vmatpush.bf16.msra.mxu0 %v2039_v16  ;;  %v1015_v0 = vunpack.c.2.s8 %v871_v57 }
 0x217   :  { %v2214_v30 = vpack.c.bf16 %v1902_v20, %v1894_v14  ;;  %v2007_v34 = vcvt.s32.f32 %v1495_v1  ;;  %v1023_v35 = vunpack.c.3.s8 %v871_v57  ;;  %v2015_v9 = vcvt.s32.f32 %v1503_v15 }
 0x218   :  { %2565 = vmatpush.bf16.msra.mxu2 %v2199_v51  ;;  %v2111_v2 = vpack.c.bf16 %v1695_v24, %v1687_v60  ;;  %v1335_v28 = vunpack.c.2.s8 %v951_v41  ;;  %v1343_v10 = vunpack.c.3.s8 %v951_v41  ;;  %v1527_v42 = vcvt.s32.f32 %v1015_v0 }
 0x219   :  { %2532 = vmatpush.bf16.msrb.mxu3 %v2214_v30  ;;  %v1535_v40 = vcvt.s32.f32 %v1023_v35  ;;  %v1159_v21 = vunpack.c.0.s8 %v911_v33  ;;  %v1167_v17 = vunpack.c.1.s8 %v911_v33  ;;  %v2271_v44 = vpack.c.bf16 %v2015_v9, %v2007_v34  ;;  %v928_v9 = vld [vmem:[%s8997_s9 + $0x1f0] sm:$0xff] }
 0x21a   :  { %2555 = vmatpush.bf16.msra.mxu1 %v2111_v2  ;;  %v1847_v26 = vcvt.s32.f32 %v1335_v28  ;;  %v1855_v11 = vcvt.s32.f32 %v1343_v10  ;;  %v1479_v39 = vunpack.c.0.s8 %v991_v52  ;;  %v1487_v29 = vunpack.c.1.s8 %v991_v52  ;;  %v2302_v53 = vpop.f32.mrf.mxu1 }
 0x21b   :  { %v2031_v56 = vpack.c.bf16 %v1535_v40, %v1527_v42  ;;  %v1671_v45 = vcvt.s32.f32 %v1159_v21  ;;  %v1679_v13 = vcvt.s32.f32 %v1167_v17  ;;  %v999_v63 = vunpack.c.0.s8 %v871_v57 }
 0x21c   :  { %v2191_v55 = vpack.c.bf16 %v1855_v11, %v1847_v26  ;;  %v1991_v6 = vcvt.s32.f32 %v1479_v39  ;;  %v1007_v3 = vunpack.c.1.s8 %v871_v57  ;;  %2533 = vmatmul.bf16.vlgmr.msrb.gmra.mxu3 %v7199_v37  ;;  %v1999_v27 = vcvt.s32.f32 %v1487_v29  ;;  %v888_v26 = vld [vmem:[%s8997_s9 + $0xb0] sm:$0xff]  ;;  %v7421_v11 = vpop.f32.mrf.mxu0 }
 0x21d   :  { %2577 = vmatpush.bf16.msra.mxu3 %v2271_v44  ;;  %2544 = vmatpush.bf16.msra.mxu0 %v2031_v56  ;;  %v2103_v7 = vpack.c.bf16 %v1679_v13, %v1671_v45  ;;  %v1319_v43 = vunpack.c.0.s8 %v951_v41  ;;  %v1327_v59 = vunpack.c.1.s8 %v951_v41  ;;  %v1511_v19 = vcvt.s32.f32 %v999_v63  ;;  %v975_v63 = vld [vmem:[%s8997_s9 + $0x368] sm:$0xff] }
 0x21e   :  { %2566 = vmatpush.bf16.msra.mxu2 %v2191_v55  ;;  %v1519_v32 = vcvt.s32.f32 %v1007_v3  ;;  %v1112_v33 = vunpack.c.2.s8 %v896_v22  ;;  %v1120_v47 = vunpack.c.3.s8 %v896_v22  ;;  %v2263_v18 = vpack.c.bf16 %v1999_v27, %v1991_v6 }
 0x21f   :  { %2556 = vmatpush.bf16.msra.mxu1 %v2103_v7  ;;  %v1831_v23 = vcvt.s32.f32 %v1319_v43  ;;  %v1839_v52 = vcvt.s32.f32 %v1327_v59  ;;  %v1143_v5 = vunpack.c.2.s8 %v903_v46  ;;  %v1151_v58 = vunpack.c.3.s8 %v903_v46 }
 0x220   :  { %v2023_v48 = vpack.c.bf16 %v1519_v32, %v1511_v19  ;;  %v1624_v25 = vcvt.s32.f32 %v1112_v33  ;;  %v1632_v54 = vcvt.s32.f32 %v1120_v47  ;;  %v1463_v16 = vunpack.c.2.s8 %v983_v49  ;;  %v935_v33 = vld [vmem:[%s8997_s9 + $0x228] sm:$0xff] }
 0x221   :  { %2578 = vmatpush.bf16.msra.mxu3 %v2263_v18  ;;  %v2183_v50 = vpack.c.bf16 %v1839_v52, %v1831_v23  ;;  %v1655_v57 = vcvt.s32.f32 %v1143_v5  ;;  %v1471_v14 = vunpack.c.3.s8 %v983_v49  ;;  %v1663_v1 = vcvt.s32.f32 %v1151_v58 }
 0x222   :  { %2545 = vmatpush.bf16.msra.mxu0 %v2023_v48  ;;  %v2080_v20 = vpack.c.bf16 %v1632_v54, %v1624_v25  ;;  %v1303_v41 = vunpack.c.2.s8 %v943_v4  ;;  %v1311_v51 = vunpack.c.3.s8 %v943_v4  ;;  %v1975_v60 = vcvt.s32.f32 %v1463_v16 }
 0x223   :  { %2567 = vmatpush.bf16.msra.mxu2 %v2183_v50  ;;  %v1983_v24 = vcvt.s32.f32 %v1471_v14  ;;  %v1096_v15 = vunpack.c.0.s8 %v896_v22  ;;  %v1104_v30 = vunpack.c.1.s8 %v896_v22  ;;  %v2095_v34 = vpack.c.bf16 %v1663_v1, %v1655_v57 }
 0x224   :  { %v1815_v0 = vcvt.s32.f32 %v1303_v41  ;;  %v1823_v35 = vcvt.s32.f32 %v1311_v51  ;;  %v1127_v2 = vunpack.c.0.s8 %v903_v46  ;;  %v1135_v42 = vunpack.c.1.s8 %v903_v46  ;;  %v2341_v1 = vpop.f32.mrf.mxu0 }
 0x225   :  { %v2255_v28 = vpack.c.bf16 %v1983_v24, %v1975_v60  ;;  %2546 = vmatmul.bf16.vlgmr.msra.gmra.mxu0 %v7124_v12  ;;  %v1608_v10 = vcvt.s32.f32 %v1096_v15  ;;  %v1616_v61 = vcvt.s32.f32 %v1104_v30  ;;  %2557 = vmatpush.bf16.msra.mxu1 %v2095_v34  ;;  %v1447_v17 = vunpack.c.0.s8 %v983_v49  ;;  %v7435_v15 = vpop.f32.mrf.mxu2  ;;  %v7437_v30 = vpop.f32.mrf.mxu1 }
 0x226   :  { %2590 = vmatpush.bf16.msrb.mxu0 %v2080_v20  ;;  %v2175_v40 = vpack.c.bf16 %v1823_v35, %v1815_v0  ;;  %v1639_v21 = vcvt.s32.f32 %v1127_v2  ;;  %v1455_v44 = vunpack.c.1.s8 %v983_v49  ;;  %v1647_v56 = vcvt.s32.f32 %v1135_v42  ;;  %v7433_v20 = vld [vmem:[%s8997_s9 + $0x1b0] sm:$0xff] }
 0x227   :  { %2579 = vmatpush.bf16.msra.mxu3 %v2255_v28  ;;  %v2072_v39 = vpack.c.bf16 %v1616_v61, %v1608_v10  ;;  %v1240_v45 = vunpack.c.2.s8 %v928_v9  ;;  %v1248_v13 = vunpack.c.3.s8 %v928_v9  ;;  %v1959_v29 = vcvt.s32.f32 %v1447_v17  ;;  %v880_v42 = vld [vmem:[%s8997_s9 + $0x70] sm:$0xff] }
 0x228   :  { %2568 = vmatpush.bf16.msra.mxu2 %v2175_v40  ;;  %v1967_v22 = vcvt.s32.f32 %v1455_v44  ;;  %v1287_v55 = vunpack.c.0.s8 %v943_v4  ;;  %v1295_v6 = vunpack.c.1.s8 %v943_v4  ;;  %v2087_v3 = vpack.c.bf16 %v1647_v56, %v1639_v21 }
 0x229   :  { %v1752_v46 = vcvt.s32.f32 %v1240_v45  ;;  %v1760_v7 = vcvt.s32.f32 %v1248_v13  ;;  %v1080_v27 = vunpack.c.2.s8 %v888_v26  ;;  %v1088_v32 = vunpack.c.3.s8 %v888_v26 }
 0x22a   :  { %2591 = vmatpush.bf16.msrb.mxu0 %v2072_v39  ;;  %v2247_v43 = vpack.c.bf16 %v1967_v22, %v1959_v29  ;;  %v1799_v59 = vcvt.s32.f32 %v1287_v55  ;;  %v1807_v19 = vcvt.s32.f32 %v1295_v6  ;;  %2558 = vmatpush.bf16.msra.mxu1 %v2087_v3  ;;  %v1431_v18 = vunpack.c.2.s8 %v975_v63  ;;  %v967_v29 = vld [vmem:[%s8997_s9 + $0x328] sm:$0xff] }
 0x22b   :  { %v2144_v47 = vpack.c.bf16 %v1760_v7, %v1752_v46  ;;  %v1592_v49 = vcvt.s32.f32 %v1080_v27  ;;  %v1439_v23 = vunpack.c.3.s8 %v975_v63  ;;  %v1600_v5 = vcvt.s32.f32 %v1088_v32 }
 0x22c   :  { %2580 = vmatpush.bf16.msra.mxu3 %v2247_v43  ;;  %v2167_v52 = vpack.c.bf16 %v1807_v19, %v1799_v59  ;;  %v1224_v4 = vunpack.c.0.s8 %v928_v9  ;;  %v1232_v53 = vunpack.c.1.s8 %v928_v9  ;;  %v1943_v48 = vcvt.s32.f32 %v1431_v18 }
 0x22d   :  { %v1951_v25 = vcvt.s32.f32 %v1439_v23  ;;  %v1271_v54 = vunpack.c.2.s8 %v935_v33  ;;  %v1279_v58 = vunpack.c.3.s8 %v935_v33  ;;  %2559 = vmatmul.bf16.vlgmr.msra.gmra.mxu1 %v7157_v62  ;;  %v2064_v50 = vpack.c.bf16 %v1600_v5, %v1592_v49  ;;  %v2315_v49 = vpop.f32.mrf.mxu2  ;;  %v2354_v18 = vpop.f32.mrf.mxu1 }
 0x22e   :  { %2603 = vmatpush.bf16.msrb.mxu1 %v2144_v47  ;;  %2569 = vmatpush.bf16.msra.mxu2 %v2167_v52  ;;  %v1736_v57 = vcvt.s32.f32 %v1224_v4  ;;  %v1744_v16 = vcvt.s32.f32 %v1232_v53  ;;  %v1064_v14 = vunpack.c.0.s8 %v888_v26  ;;  %v1072_v24 = vunpack.c.1.s8 %v888_v26  ;;  %v960_v26 = vld [vmem:[%s8997_s9 + $0x2f0] sm:$0xff]  ;;  %v7456_v53 = vpop.f32.mrf.mxu3 }
 0x22f   :  { %v2239_v41 = vpack.c.bf16 %v1951_v25, %v1943_v48  ;;  %v1783_v51 = vcvt.s32.f32 %v1271_v54  ;;  %v1791_v60 = vcvt.s32.f32 %v1279_v58  ;;  %2592 = vmatpush.bf16.msrb.mxu0 %v2064_v50  ;;  %v1415_v35 = vunpack.c.0.s8 %v975_v63  ;;  %v912_v50 = vld [vmem:[%s8997_s9 + $0x170] sm:$0xff] }
 0x230   :  { %v2136_v34 = vpack.c.bf16 %v1744_v16, %v1736_v57  ;;  %v1576_v0 = vcvt.s32.f32 %v1064_v14  ;;  %v1423_v2 = vunpack.c.1.s8 %v975_v63  ;;  %v1584_v28 = vcvt.s32.f32 %v1072_v24  ;;  %v992_v24 = vld [vmem:[%s8997_s9 + $0x3f0] sm:$0xff] }
 0x231   :  { %2581 = vmatpush.bf16.msra.mxu3 %v2239_v41  ;;  %v2159_v9 = vpack.c.bf16 %v1791_v60, %v1783_v51  ;;  %v1208_v10 = vunpack.c.2.s8 %v7433_v20  ;;  %v1216_v61 = vunpack.c.3.s8 %v7433_v20  ;;  %v1927_v40 = vcvt.s32.f32 %v1415_v35 }
 0x232   :  { %2604 = vmatpush.bf16.msrb.mxu1 %v2136_v34  ;;  %v1935_v21 = vcvt.s32.f32 %v1423_v2  ;;  %v7446_v17 = vadd.f32 %v7399_v38, %v7384_v8  ;;  %v1255_v44 = vunpack.c.0.s8 %v935_v33  ;;  %v2056_v39 = vpack.c.bf16 %v1584_v28, %v1576_v0 }
 0x233   :  { %2570 = vmatpush.bf16.msra.mxu2 %v2159_v9  ;;  %v1720_v56 = vcvt.s32.f32 %v1208_v10  ;;  %v1728_v45 = vcvt.s32.f32 %v1216_v61  ;;  %v1263_v13 = vunpack.c.1.s8 %v935_v33  ;;  %v1048_v6 = vunpack.c.2.s8 %v880_v42  ;;  %v872_v9 = vld [vmem:[%s8997_s9 + $0x30] sm:$0xff] }
 0x234   :  { %v2231_v22 = vpack.c.bf16 %v1935_v21, %v1927_v40  ;;  %v1767_v55 = vcvt.s32.f32 %v1255_v44  ;;  %v1056_v63 = vunpack.c.3.s8 %v880_v42  ;;  %2593 = vmatpush.bf16.msrb.mxu0 %v2056_v39  ;;  %v1368_v3 = vunpack.c.2.s8 %v960_v26  ;;  %v952_v40 = vld [vmem:[%s8997_s9 + $0x2b0] sm:$0xff] }
 0x235   :  { %v2128_v8 = vpack.c.bf16 %v1728_v45, %v1720_v56  ;;  %v1775_v38 = vcvt.s32.f32 %v1263_v13  ;;  %v1376_v46 = vunpack.c.3.s8 %v960_v26  ;;  %v1560_v7 = vcvt.s32.f32 %v1048_v6 }
 0x236   :  { %2582 = vmatpush.bf16.msra.mxu3 %v2231_v22  ;;  %v1568_v27 = vcvt.s32.f32 %v1056_v63  ;;  %v1399_v43 = vunpack.c.2.s8 %v967_v29  ;;  %v1407_v59 = vunpack.c.3.s8 %v967_v29  ;;  %v1880_v32 = vcvt.s32.f32 %v1368_v3  ;;  %v7471_v22 = vpop.f32.mrf.mxu0 }
 0x237   :  { %2605 = vmatpush.bf16.msrb.mxu1 %v2128_v8  ;;  %v2151_v19 = vpack.c.bf16 %v1775_v38, %v1767_v55  ;;  %v1888_v33 = vcvt.s32.f32 %v1376_v46  ;;  %v1192_v47 = vunpack.c.0.s8 %v7433_v20  ;;  %v1200_v4 = vunpack.c.1.s8 %v7433_v20  ;;  %v2328_v38 = vpop.f32.mrf.mxu3 }
 0x238   :  { %v2048_v23 = vpack.c.bf16 %v1568_v27, %v1560_v7  ;;  %v1911_v52 = vcvt.s32.f32 %v1399_v43  ;;  %v1919_v5 = vcvt.s32.f32 %v1407_v59  ;;  %v1032_v54 = vunpack.c.0.s8 %v880_v42 }
 0x239   :  { %2571 = vmatpush.bf16.msra.mxu2 %v2151_v19  ;;  %v2208_v48 = vpack.c.bf16 %v1888_v33, %v1880_v32  ;;  %v1704_v25 = vcvt.s32.f32 %v1192_v47  ;;  %v1040_v58 = vunpack.c.1.s8 %v880_v42  ;;  %v1712_v16 = vcvt.s32.f32 %v1200_v4 }
 0x23a   :  { %2594 = vmatpush.bf16.msrb.mxu0 %v2048_v23  ;;  %v2223_v57 = vpack.c.bf16 %v1919_v5, %v1911_v52  ;;  %v1352_v14 = vunpack.c.0.s8 %v960_v26  ;;  %v1360_v1 = vunpack.c.1.s8 %v960_v26  ;;  %v1544_v41 = vcvt.s32.f32 %v1032_v54  ;;  %v897_v23 = vld [vmem:[%s8997_s9 + $0xf8] sm:$0xff] }
 0x23b   :  { %v1552_v51 = vcvt.s32.f32 %v1040_v58  ;;  %v1383_v20 = vunpack.c.0.s8 %v967_v29  ;;  %v1391_v60 = vunpack.c.1.s8 %v967_v29  ;;  %v2120_v34 = vpack.c.bf16 %v1712_v16, %v1704_v25 }
 0x23c   :  { %2583 = vmatpush.bf16.msra.mxu3 %v2223_v57  ;;  %2572 = vmatmul.bf16.vlgmr.msra.gmra.mxu2 %v7186_v31  ;;  %v1864_v0 = vcvt.s32.f32 %v1352_v14  ;;  %v1872_v35 = vcvt.s32.f32 %v1360_v1  ;;  %v1176_v2 = vunpack.c.2.s8 %v912_v50  ;;  %v1184_v42 = vunpack.c.3.s8 %v912_v50  ;;  %v904_v57 = vld [vmem:[%s8997_s9 + $0x130] sm:$0xff] }
 0x23d   :  { %2616 = vmatpush.bf16.msrb.mxu2 %v2208_v48  ;;  %v2040_v28 = vpack.c.bf16 %v1552_v51, %v1544_v41  ;;  %v1895_v10 = vcvt.s32.f32 %v1383_v20  ;;  %v1903_v61 = vcvt.s32.f32 %v1391_v60  ;;  %2606 = vmatpush.bf16.msrb.mxu1 %v2120_v34  ;;  %v1496_v26 = vunpack.c.2.s8 %v992_v24  ;;  %v984_v51 = vld [vmem:[%s8997_s9 + $0x3b0] sm:$0xff] }
 0x23e   :  { %v2200_v21 = vpack.c.bf16 %v1872_v35, %v1864_v0  ;;  %v1688_v44 = vcvt.s32.f32 %v1176_v2  ;;  %v1504_v39 = vunpack.c.3.s8 %v992_v24  ;;  %v1696_v45 = vcvt.s32.f32 %v1184_v42  ;;  %v2393_v0 = vpop.f32.mrf.mxu0 }
 0x23f   :  { %2595 = vmatpush.bf16.msrb.mxu0 %v2040_v28  ;;  %v2215_v56 = vpack.c.bf16 %v1903_v61, %v1895_v10  ;;  %v1016_v13 = vunpack.c.2.s8 %v872_v9  ;;  %v1024_v29 = vunpack.c.3.s8 %v872_v9  ;;  %v2008_v55 = vcvt.s32.f32 %v1496_v26  ;;  %v7486_v10 = vld [vmem:[%s8997_s9 + $0x270] sm:$0xff]  ;;  %v7490_v26 = vpop.f32.mrf.mxu1 }
 0x240   :  { %v2016_v6 = vcvt.s32.f32 %v1504_v39  ;;  %v1336_v63 = vunpack.c.2.s8 %v952_v40  ;;  %v1344_v8 = vunpack.c.3.s8 %v952_v40  ;;  %v2112_v3 = vpack.c.bf16 %v1696_v45, %v1688_v44  ;;  %v7488_v44 = vpop.f32.mrf.mxu2 }
 0x241   :  { %2617 = vmatpush.bf16.msrb.mxu2 %v2200_v21  ;;  %2584 = vmatpush.bf16.msra.mxu3 %v2215_v56  ;;  %v1528_v46 = vcvt.s32.f32 %v1016_v13  ;;  %v1536_v7 = vcvt.s32.f32 %v1024_v29  ;;  %v1160_v27 = vunpack.c.0.s8 %v912_v50  ;;  %v1168_v32 = vunpack.c.1.s8 %v912_v50 }
 0x242   :  { %v2272_v43 = vpack.c.bf16 %v2016_v6, %v2008_v55  ;;  %v1848_v59 = vcvt.s32.f32 %v1336_v63  ;;  %v1856_v19 = vcvt.s32.f32 %v1344_v8  ;;  %2607 = vmatpush.bf16.msrb.mxu1 %v2112_v3  ;;  %v1480_v49 = vunpack.c.0.s8 %v992_v24 }
 0x243   :  { %v2032_v33 = vpack.c.bf16 %v1536_v7, %v1528_v46  ;;  %v1672_v47 = vcvt.s32.f32 %v1160_v27  ;;  %v1488_v18 = vunpack.c.1.s8 %v992_v24  ;;  %v1680_v5 = vcvt.s32.f32 %v1168_v32  ;;  %v7503_v7 = vld [vmem:[%s8997_s9 + $0x1f8] sm:$0xff] }
 0x244   :  { %v2192_v52 = vpack.c.bf16 %v1856_v19, %v1848_v59  ;;  %v1000_v4 = vunpack.c.0.s8 %v872_v9  ;;  %v1008_v48 = vunpack.c.1.s8 %v872_v9  ;;  %2585 = vmatmul.bf16.vlgmr.msra.gmra.mxu3 %v7199_v37  ;;  %v1992_v25 = vcvt.s32.f32 %v1480_v49 }
 0x245   :  { %2629 = vmatpush.bf16.msrb.mxu3 %v2272_v43  ;;  %2596 = vmatpush.bf16.msrb.mxu0 %v2032_v33  ;;  %v2000_v54 = vcvt.s32.f32 %v1488_v18  ;;  %v1320_v58 = vunpack.c.0.s8 %v952_v40  ;;  %v1328_v50 = vunpack.c.1.s8 %v952_v40  ;;  %v2104_v16 = vpack.c.bf16 %v1680_v5, %v1672_v47  ;;  %v7510_v18 = vld [vmem:[%s8998_s10] sm:$0xff] }
 0x246   :  { %2618 = vmatpush.bf16.msrb.mxu2 %v2192_v52  ;;  %v1512_v14 = vcvt.s32.f32 %v1000_v4  ;;  %v1520_v1 = vcvt.s32.f32 %v1008_v48  ;;  %v1113_v41 = vunpack.c.2.s8 %v897_v23  ;;  %v1121_v34 = vunpack.c.3.s8 %v897_v23  ;;  %v889_v48 = vld [vmem:[%s8997_s9 + $0xb8] sm:$0xff] }
 0x247   :  { %v2264_v20 = vpack.c.bf16 %v2000_v54, %v1992_v25  ;;  %v1832_v60 = vcvt.s32.f32 %v1320_v58  ;;  %v1840_v24 = vcvt.s32.f32 %v1328_v50  ;;  %2608 = vmatpush.bf16.msrb.mxu1 %v2104_v16  ;;  %v1144_v9 = vunpack.c.2.s8 %v904_v57 }
 0x248   :  { %v2024_v35 = vpack.c.bf16 %v1520_v1, %v1512_v14  ;;  %v1625_v2 = vcvt.s32.f32 %v1113_v41  ;;  %v1152_v28 = vunpack.c.3.s8 %v904_v57  ;;  %v1633_v42 = vcvt.s32.f32 %v1121_v34  ;;  %v2367_v16 = vpop.f32.mrf.mxu2  ;;  %v2406_v14 = vpop.f32.mrf.mxu1 }
 0x249   :  { %2630 = vmatpush.bf16.msrb.mxu3 %v2264_v20  ;;  %v2184_v61 = vpack.c.bf16 %v1840_v24, %v1832_v60  ;;  %v1464_v40 = vunpack.c.2.s8 %v984_v51  ;;  %v1472_v21 = vunpack.c.3.s8 %v984_v51  ;;  %v1656_v39 = vcvt.s32.f32 %v1144_v9 }
 0x24a   :  { %2597 = vmatpush.bf16.msrb.mxu0 %v2024_v35  ;;  %v1664_v56 = vcvt.s32.f32 %v1152_v28  ;;  %v2314_v45 = vadd.f32 %v7435_v15, %v7446_v17  ;;  %v7496_v13 = vadd.f32 %v7437_v30, %v7421_v11  ;;  %v2081_v29 = vpack.c.bf16 %v1633_v42, %v1625_v2  ;;  %v7525_v35 = vpop.f32.mrf.mxu3 }
 0x24b   :  { %2619 = vmatpush.bf16.msrb.mxu2 %v2184_v61  ;;  %v1976_v55 = vcvt.s32.f32 %v1464_v40  ;;  %v1984_v6 = vcvt.s32.f32 %v1472_v21  ;;  %v1304_v63 = vunpack.c.2.s8 %v7486_v10  ;;  %v1312_v38 = vunpack.c.3.s8 %v7486_v10 }
 0x24c   :  { %v2096_v8 = vpack.c.bf16 %v1664_v56, %v1656_v39  ;;  %v1097_v3 = vunpack.c.0.s8 %v897_v23  ;;  %v1105_v46 = vunpack.c.1.s8 %v897_v23  ;;  %v1128_v30 = vunpack.c.0.s8 %v904_v57 }
 0x24d   :  { %v2256_v15 = vpack.c.bf16 %v1984_v6, %v1976_v55  ;;  %v1816_v11 = vcvt.s32.f32 %v1304_v63  ;;  %v1136_v17 = vunpack.c.1.s8 %v904_v57  ;;  %2598 = vmatmul.bf16.vlgmr.msrb.gmra.mxu0 %v7124_v12  ;;  %v1824_v27 = vcvt.s32.f32 %v1312_v38  ;;  %v7520_v57 = vld [vmem:[%s8997_s9 + $0x370] sm:$0xff] }
 0x24e   :  { %2642 = vmatpush.bf16.msra.mxu0 %v2081_v29  ;;  %2609 = vmatpush.bf16.msrb.mxu1 %v2096_v8  ;;  %v1609_v43 = vcvt.s32.f32 %v1097_v3  ;;  %v1617_v59 = vcvt.s32.f32 %v1105_v46  ;;  %v1448_v19 = vunpack.c.0.s8 %v984_v51  ;;  %v1640_v32 = vcvt.s32.f32 %v1128_v30 }
 0x24f   :  { %2631 = vmatpush.bf16.msrb.mxu3 %v2256_v15  ;;  %v1648_v33 = vcvt.s32.f32 %v1136_v17  ;;  %v1456_v47 = vunpack.c.1.s8 %v984_v51  ;;  %v1241_v49 = vunpack.c.2.s8 %v7503_v7  ;;  %v2176_v23 = vpack.c.bf16 %v1824_v27, %v1816_v11  ;;  %v7542_v11 = vld [vmem:[%s8997_s9 + $0x1b8] sm:$0xff] }
 0x250   :  { %v2073_v52 = vpack.c.bf16 %v1617_v59, %v1609_v43  ;;  %v1960_v5 = vcvt.s32.f32 %v1448_v19  ;;  %v1249_v4 = vunpack.c.3.s8 %v7503_v7  ;;  %v1288_v50 = vunpack.c.0.s8 %v7486_v10 }
 0x251   :  { %v2088_v25 = vpack.c.bf16 %v1648_v33, %v1640_v32  ;;  %v1968_v54 = vcvt.s32.f32 %v1456_v47  ;;  %v1753_v58 = vcvt.s32.f32 %v1241_v49  ;;  %2620 = vmatpush.bf16.msrb.mxu2 %v2176_v23  ;;  %v1296_v41 = vunpack.c.1.s8 %v7486_v10  ;;  %v936_v10 = vld [vmem:[%s8997_s9 + $0x230] sm:$0xff] }
 0x252   :  { %2643 = vmatpush.bf16.msra.mxu0 %v2073_v52  ;;  %v1761_v1 = vcvt.s32.f32 %v1249_v4  ;;  %v2327_v51 = vadd.f32 %v7456_v53, %v2314_v45  ;;  %v2696_v20 = vperm.slane %v7510_v18, 0  ;;  %v1800_v24 = vcvt.s32.f32 %v1288_v50  ;;  %v881_v52 = vld [vmem:[%s8997_s9 + $0x78] sm:$0xff] }
 0x253   :  { %2610 = vmatpush.bf16.msrb.mxu1 %v2088_v25  ;;  %v2248_v60 = vpack.c.bf16 %v1968_v54, %v1960_v5  ;;  %v1081_v34 = vunpack.c.2.s8 %v889_v48  ;;  %v1089_v0 = vunpack.c.3.s8 %v889_v48  ;;  %v1808_v9 = vcvt.s32.f32 %v1296_v41  ;;  %v2380_v5 = vpop.f32.mrf.mxu3 }
 0x254   :  { %v2145_v2 = vpack.c.bf16 %v1761_v1, %v1753_v58  ;;  %v7527_v28 = vmul.f32 %v2696_v20, %v2327_v51  ;;  %v1432_v61 = vunpack.c.2.s8 %v7520_v57  ;;  %v1440_v40 = vunpack.c.3.s8 %v7520_v57  ;;  %v961_v58 = vld [vmem:[%s8997_s9 + $0x2f8] sm:$0xff] }
 0x255   :  { %2632 = vmatpush.bf16.msrb.mxu3 %v2248_v60  ;;  %v1593_v53 = vcvt.s32.f32 %v1081_v34  ;;  %v1601_v42 = vcvt.s32.f32 %v1089_v0  ;;  %v1225_v21 = vunpack.c.0.s8 %v7503_v7  ;;  %v2168_v39 = vpack.c.bf16 %v1808_v9, %v1800_v24  ;;  %v968_v60 = vld [vmem:[%s8997_s9 + $0x330] sm:$0xff] }
 0x256   :  { %v2722_v56 = vrot.slane %v7527_v28, 4  ;;  %v1944_v45 = vcvt.s32.f32 %v1432_v61  ;;  %v1233_v29 = vunpack.c.1.s8 %v7503_v7  ;;  %2611 = vmatmul.bf16.vlgmr.msrb.gmra.mxu1 %v7157_v62  ;;  %v1952_v6 = vcvt.s32.f32 %v1440_v40 }
 0x257   :  { %2655 = vmatpush.bf16.msra.mxu1 %v2145_v2  ;;  %v2065_v55 = vpack.c.bf16 %v1601_v42, %v1593_v53  ;;  %v1737_v63 = vcvt.s32.f32 %v1225_v21  ;;  %v1272_v8 = vunpack.c.2.s8 %v936_v10  ;;  %2621 = vmatpush.bf16.msrb.mxu2 %v2168_v39  ;;  %v1280_v46 = vunpack.c.3.s8 %v936_v10 }
 0x258   :  { %v2723_v38 = vadd.f32 %v2722_v56, %v7527_v28  ;;  %v1745_v3 = vcvt.s32.f32 %v1233_v29  ;;  %v1065_v15 = vunpack.c.0.s8 %v889_v48  ;;  %v2240_v30 = vpack.c.bf16 %v1952_v6, %v1944_v45 }
 0x259   :  { %2644 = vmatpush.bf16.msra.mxu0 %v2065_v55  ;;  %v1784_v7 = vcvt.s32.f32 %v1272_v8  ;;  %v1073_v17 = vunpack.c.1.s8 %v889_v48  ;;  %v1416_v27 = vunpack.c.0.s8 %v7520_v57  ;;  %v1792_v19 = vcvt.s32.f32 %v1280_v46 }
 0x25a   :  { %v2724_v43 = vrot.slane %v2723_v38, 2  ;;  %v2137_v59 = vpack.c.bf16 %v1745_v3, %v1737_v63  ;;  %v1577_v32 = vcvt.s32.f32 %v1065_v15  ;;  %2633 = vmatpush.bf16.msrb.mxu3 %v2240_v30  ;;  %v1424_v47 = vunpack.c.1.s8 %v7520_v57  ;;  %v7563_v15 = vpop.f32.mrf.mxu2 }
 0x25b   :  { %v1585_v33 = vcvt.s32.f32 %v1073_v17  ;;  %v1928_v49 = vcvt.s32.f32 %v1416_v27  ;;  %v1209_v23 = vunpack.c.2.s8 %v7542_v11  ;;  %v2160_v48 = vpack.c.bf16 %v1792_v19, %v1784_v7 }
 0x25c   :  { %v2725_v4 = vadd.f32 %v2724_v43, %v2723_v38  ;;  %2656 = vmatpush.bf16.msra.mxu1 %v2137_v59  ;;  %v1217_v25 = vunpack.c.3.s8 %v7542_v11  ;;  %v1256_v54 = vunpack.c.0.s8 %v936_v10  ;;  %v1936_v57 = vcvt.s32.f32 %v1424_v47 }
 0x25d   :  { %v2057_v50 = vpack.c.bf16 %v1585_v33, %v1577_v32  ;;  %v1721_v16 = vcvt.s32.f32 %v1209_v23  ;;  %v1264_v14 = vunpack.c.1.s8 %v936_v10  ;;  %2622 = vmatpush.bf16.msrb.mxu2 %v2160_v48  ;;  %v1049_v20 = vunpack.c.2.s8 %v881_v52  ;;  %v7576_v48 = vld [vmem:[%s8997_s9 + $0x3f8] sm:$0xff] }
 0x25e   :  { %v2726_v1 = vrot.slane %v2725_v4, 1  ;;  %v1729_v41 = vcvt.s32.f32 %v1217_v25  ;;  %v1768_v51 = vcvt.s32.f32 %v1256_v54  ;;  %v2232_v24 = vpack.c.bf16 %v1936_v57, %v1928_v49 }
 0x25f   :  { %2645 = vmatpush.bf16.msra.mxu0 %v2057_v50  ;;  %v1776_v34 = vcvt.s32.f32 %v1264_v14  ;;  %v1057_v0 = vunpack.c.3.s8 %v881_v52  ;;  %v1369_v2 = vunpack.c.2.s8 %v961_v58  ;;  %v1561_v53 = vcvt.s32.f32 %v1049_v20 }
 0x260   :  { %v2727_v9 = vadd.f32 %v2726_v1, %v2725_v4  ;;  %v2129_v61 = vpack.c.bf16 %v1729_v41, %v1721_v16  ;;  %v1377_v42 = vunpack.c.3.s8 %v961_v58  ;;  %2634 = vmatpush.bf16.msrb.mxu3 %v2232_v24  ;;  %v1400_v39 = vunpack.c.2.s8 %v968_v60  ;;  %v7582_v41 = vpop.f32.mrf.mxu3 }
 0x261   :  { %v2152_v10 = vpack.c.bf16 %v1776_v34, %v1768_v51  ;;  %v1569_v40 = vcvt.s32.f32 %v1057_v0  ;;  %v1881_v21 = vcvt.s32.f32 %v1369_v2  ;;  %v1408_v29 = vunpack.c.3.s8 %v968_v60  ;;  %v7584_v51 = vpop.f32.mrf.mxu0  ;;  %v873_v0 = vld [vmem:[%s8997_s9 + $0x38] sm:$0xff] }
 0x262   :  { %v2770_v56 = vmul.f32 %v2727_v9, %v6873_v36  ;;  %2657 = vmatpush.bf16.msra.mxu1 %v2129_v61  ;;  %v1889_v45 = vcvt.s32.f32 %v1377_v42  ;;  %v1912_v6 = vcvt.s32.f32 %v1400_v39  ;;  %v1193_v63 = vunpack.c.0.s8 %v7542_v11 }
 0x263   :  { %2623 = vmatpush.bf16.msrb.mxu2 %v2152_v10  ;;  %v2049_v55 = vpack.c.bf16 %v1569_v40, %v1561_v53  ;;  %v1920_v3 = vcvt.s32.f32 %v1408_v29  ;;  %v1201_v46 = vunpack.c.1.s8 %v7542_v11  ;;  %v1033_v7 = vunpack.c.0.s8 %v881_v52  ;;  %v2419_v53 = vpop.f32.mrf.mxu2 }
 0x264   :  { %v7560_v8 = vsub.f32 %v7527_v28, %v2770_v56  ;;  %v2209_v38 = vpack.c.bf16 %v1889_v45, %v1881_v21  ;;  %v1705_v30 = vcvt.s32.f32 %v1193_v63  ;;  %v1041_v17 = vunpack.c.1.s8 %v881_v52  ;;  %v7570_v28 = vld [vmem:[%s8997_s9 + $0x178] sm:$0xff]  ;;  %v7637_v53 = vld [vmem:[%s9000_s12] sm:$0xff] }
 0x265   :  { %2646 = vmatpush.bf16.msra.mxu0 %v2049_v55  ;;  %v1353_v27 = vunpack.c.0.s8 %v961_v58  ;;  %v2224_v59 = vpack.c.bf16 %v1920_v3, %v1912_v6  ;;  %v1713_v19 = vcvt.s32.f32 %v1201_v46  ;;  %v1361_v32 = vunpack.c.1.s8 %v961_v58 }
 0x266   :  { %v2786_v43 = vmul.f32 %v7560_v8, %v7560_v8  ;;  %2624 = vmatmul.bf16.vlgmr.msrb.gmra.mxu2 %v7186_v31  ;;  %v1545_v11 = vcvt.s32.f32 %v1033_v7  ;;  %v1553_v33 = vcvt.s32.f32 %v1041_v17  ;;  %v1384_v49 = vunpack.c.0.s8 %v968_v60 }
 0x267   :  { %2668 = vmatpush.bf16.msra.mxu2 %v2209_v38  ;;  %v1865_v47 = vcvt.s32.f32 %v1353_v27  ;;  %2635 = vmatpush.bf16.msrb.mxu3 %v2224_v59  ;;  %v2121_v52 = vpack.c.bf16 %v1713_v19, %v1705_v30  ;;  %v1873_v5 = vcvt.s32.f32 %v1361_v32  ;;  %v1392_v4 = vunpack.c.1.s8 %v968_v60  ;;  %v7612_v32 = vpop.f32.mrf.mxu1 }
 0x268   :  { %v2794_v23 = vrot.slane %v2786_v43, 4  ;;  %v2041_v25 = vpack.c.bf16 %v1553_v33, %v1545_v11  ;;  %v1896_v54 = vcvt.s32.f32 %v1384_v49  ;;  %v1177_v58 = vunpack.c.2.s8 %v7570_v28  ;;  %v2432_v11 = vpop.f32.mrf.mxu3 }
 0x269   :  { %v1185_v50 = vunpack.c.3.s8 %v7570_v28  ;;  %v2366_v16 = vadd.f32 %v7488_v44, %v7496_v13  ;;  %2658 = vmatpush.bf16.msra.mxu1 %v2121_v52  ;;  %v2201_v14 = vpack.c.bf16 %v1873_v5, %v1865_v47  ;;  %v1904_v1 = vcvt.s32.f32 %v1392_v4  ;;  %v7594_v44 = vld [vmem:[%s8997_s9 + $0x2b8] sm:$0xff]  ;;  %v2445_v52 = vpop.f32.mrf.mxu0 }
 0x26a   :  { %v2795_v57 = vadd.f32 %v2794_v23, %v2786_v43  ;;  %2647 = vmatpush.bf16.msra.mxu0 %v2041_v25  ;;  %v1689_v20 = vcvt.s32.f32 %v1177_v58  ;;  %v1497_v24 = vunpack.c.2.s8 %v7576_v48  ;;  %v1505_v34 = vunpack.c.3.s8 %v7576_v48  ;;  %v977_v52 = vld [vmem:[%s8997_s9 + $0x378] sm:$0xff] }
 0x26b   :  { %v1697_v60 = vcvt.s32.f32 %v1185_v50  ;;  %v7598_v2 = vadd.f32 %v7490_v26, %v7471_v22  ;;  %2669 = vmatpush.bf16.msra.mxu2 %v2201_v14  ;;  %v2216_v9 = vpack.c.bf16 %v1904_v1, %v1896_v54  ;;  %v2379_v61 = vadd.f32 %v7525_v35, %v2366_v16  ;;  %v905_v54 = vld [vmem:[%s8997_s9 + $0x138] sm:$0xff] }
 0x26c   :  { %v2796_v13 = vrot.slane %v2795_v57, 2  ;;  %v2009_v10 = vcvt.s32.f32 %v1497_v24  ;;  %v2017_v40 = vcvt.s32.f32 %v1505_v34  ;;  %v2697_v21 = vperm.slane %v7510_v18, 1  ;;  %v985_v24 = vld [vmem:[%s8997_s9 + $0x3b8] sm:$0xff] }
 0x26d   :  { %v2113_v42 = vpack.c.bf16 %v1697_v60, %v1689_v20  ;;  %2636 = vmatpush.bf16.msrb.mxu3 %v2216_v9  ;;  %v1017_v56 = vunpack.c.2.s8 %v873_v0  ;;  %v1025_v45 = vunpack.c.3.s8 %v873_v0  ;;  %v1337_v29 = vunpack.c.2.s8 %v7594_v44 }
 0x26e   :  { %v2797_v39 = vadd.f32 %v2796_v13, %v2795_v57  ;;  %v2273_v55 = vpack.c.bf16 %v2017_v40, %v2009_v10  ;;  %v7603_v22 = vmul.f32 %v2697_v21, %v2379_v61  ;;  %v1345_v26 = vunpack.c.3.s8 %v7594_v44  ;;  %v945_v61 = vld [vmem:[%s8997_s9 + $0x278] sm:$0xff] }
 0x26f   :  { %2659 = vmatpush.bf16.msra.mxu1 %v2113_v42  ;;  %v1161_v35 = vunpack.c.0.s8 %v7570_v28  ;;  %v1529_v63 = vcvt.s32.f32 %v1017_v56  ;;  %v1537_v38 = vcvt.s32.f32 %v1025_v45  ;;  %v1849_v3 = vcvt.s32.f32 %v1337_v29 }
 0x270   :  { %v2798_v6 = vrot.slane %v2797_v39, 1  ;;  %v2728_v46 = vrot.slane %v7603_v22, 4  ;;  %v1857_v30 = vcvt.s32.f32 %v1345_v26  ;;  %v1169_v7 = vunpack.c.1.s8 %v7570_v28  ;;  %2637 = vmatmul.bf16.vlgmr.msrb.gmra.mxu3 %v7199_v37 }
 0x271   :  { %2681 = vmatpush.bf16.msra.mxu3 %v2273_v55  ;;  %v1673_v17 = vcvt.s32.f32 %v1161_v35  ;;  %v2033_v43 = vpack.c.bf16 %v1537_v38, %v1529_v63  ;;  %v1481_v59 = vunpack.c.0.s8 %v7576_v48  ;;  %v1489_v19 = vunpack.c.1.s8 %v7576_v48  ;;  %v7622_v48 = vld [vmem:[%s8999_s11] sm:$0xff]  ;;  %v2458_v35 = vpop.f32.mrf.mxu1 }
 0x272   :  { %v2799_v27 = vadd.f32 %v2798_v6, %v2797_v39  ;;  %v2729_v33 = vadd.f32 %v2728_v46, %v7603_v22  ;;  %v2193_v47 = vpack.c.bf16 %v1857_v30, %v1849_v3  ;;  %v1681_v49 = vcvt.s32.f32 %v1169_v7 }
 0x273   :  { %v1001_v23 = vunpack.c.0.s8 %v873_v0  ;;  %2648 = vmatpush.bf16.msra.mxu0 %v2033_v43  ;;  %v1993_v5 = vcvt.s32.f32 %v1481_v59  ;;  %v2001_v4 = vcvt.s32.f32 %v1489_v19  ;;  %v1009_v25 = vunpack.c.1.s8 %v873_v0 }
 0x274   :  { %v2842_v28 = vmul.f32 %v2799_v27, %v6873_v36  ;;  %v2730_v58 = vrot.slane %v2729_v33, 2  ;;  %2670 = vmatpush.bf16.msra.mxu2 %v2193_v47  ;;  %v2105_v50 = vpack.c.bf16 %v1681_v49, %v1673_v17  ;;  %v1321_v16 = vunpack.c.0.s8 %v7594_v44 }
 0x275   :  { %v1513_v57 = vcvt.s32.f32 %v1001_v23  ;;  %v2265_v1 = vpack.c.bf16 %v2001_v4, %v1993_v5  ;;  %v1521_v20 = vcvt.s32.f32 %v1009_v25  ;;  %v1329_v60 = vunpack.c.1.s8 %v7594_v44 }
 0x276   :  { %v7625_v14 = vadd.f32 1e-05, %v2842_v28  ;;  %v2731_v34 = vadd.f32 %v2730_v58, %v2729_v33  ;;  %2660 = vmatpush.bf16.msra.mxu1 %v2105_v50  ;;  %v1833_v0 = vcvt.s32.f32 %v1321_v16  ;;  %v1145_v13 = vunpack.c.2.s8 %v905_v54 }
 0x277   :  { %v1153_v9 = vunpack.c.3.s8 %v905_v54  ;;  %v2947_v44 = vperm.slane %v7622_v48, 0  ;;  %2682 = vmatpush.bf16.msra.mxu3 %v2265_v1  ;;  %v2025_v42 = vpack.c.bf16 %v1521_v20, %v1513_v57  ;;  %v1841_v10 = vcvt.s32.f32 %v1329_v60 }
 0x278   :  { %6383 = vrsqrt.f32 %v7625_v14  ;;  %v2732_v40 = vrot.slane %v2731_v34, 1  ;;  %v1657_v21 = vcvt.s32.f32 %v1145_v13  ;;  %v1465_v56 = vunpack.c.2.s8 %v985_v24 }
 0x279   :  { %v1665_v39 = vcvt.s32.f32 %v1153_v9  ;;  %2649 = vmatpush.bf16.msra.mxu0 %v2025_v42  ;;  %v2185_v45 = vpack.c.bf16 %v1841_v10, %v1833_v0  ;;  %v1473_v29 = vunpack.c.3.s8 %v985_v24  ;;  %v1305_v55 = vunpack.c.2.s8 %v945_v61 }
 0x27a   :  { %v1313_v26 = vunpack.c.3.s8 %v945_v61  ;;  %v2972_v6 = vperm.slane %v7637_v53, 0  ;;  %v2733_v63 = vadd.f32 %v2732_v40, %v2731_v34  ;;  %v1977_v3 = vcvt.s32.f32 %v1465_v56 }
 0x27b   :  { %v2097_v38 = vpack.c.bf16 %v1665_v39, %v1657_v21  ;;  %2671 = vmatpush.bf16.msra.mxu2 %v2185_v45  ;;  %v1985_v46 = vcvt.s32.f32 %v1473_v29  ;;  %v1817_v30 = vcvt.s32.f32 %v1305_v55  ;;  %v1129_v17 = vunpack.c.0.s8 %v905_v54  ;;  %v7660_v21 = vpop.f32.mrf.mxu2 }
 0x27c   :  { %v1825_v7 = vcvt.s32.f32 %v1313_v26  ;;  %v2771_v27 = vmul.f32 %v2733_v63, %v6873_v36  ;;  %2650 = vmatmul.bf16.vlgmr.msra.gmra.mxu0 %v7124_v12  ;;  %v1137_v43 = vunpack.c.1.s8 %v905_v54  ;;  %v1449_v59 = vunpack.c.0.s8 %v985_v24 }
 0x27d   :  { %2661 = vmatpush.bf16.msra.mxu1 %v2097_v38  ;;  %v1457_v19 = vunpack.c.1.s8 %v985_v24  ;;  %v2257_v33 = vpack.c.bf16 %v1985_v46, %v1977_v3  ;;  %v1641_v49 = vcvt.s32.f32 %v1129_v17  ;;  %v1289_v23 = vunpack.c.0.s8 %v945_v61  ;;  %v3041_v3 = vld [vmem:[%s9001_s13 + $0xa8] sm:$0xff] }
 0x27e   :  { %v6384_v11 = vpop.eup %6383  ;;  %v2177_v47 = vpack.c.bf16 %v1825_v7, %v1817_v30  ;;  %v7649_v5 = vsub.f32 %v7603_v22, %v2771_v27  ;;  %v2418_v12 = vadd.f32 %v7563_v15, %v7598_v2  ;;  %v1649_v4 = vcvt.s32.f32 %v1137_v43  ;;  %v937_v22 = vld [vmem:[%s8997_s9 + $0x238] sm:$0xff] }
 0x27f   :  { %v2859_v28 = vmul.f32 %v6384_v11, %v7625_v14  ;;  %2683 = vmatpush.bf16.msra.mxu3 %v2257_v33  ;;  %v1961_v25 = vcvt.s32.f32 %v1449_v59  ;;  %v1969_v54 = vcvt.s32.f32 %v1457_v19  ;;  %v1297_v58 = vunpack.c.1.s8 %v945_v61 }
 0x280   :  { %2672 = vmatpush.bf16.msra.mxu2 %v2177_v47  ;;  %v1801_v50 = vcvt.s32.f32 %v1289_v23  ;;  %v2787_v16 = vmul.f32 %v7649_v5, %v7649_v5  ;;  %v2089_v1 = vpack.c.bf16 %v1649_v4, %v1641_v49  ;;  %v1433_v20 = vunpack.c.2.s8 %v977_v52  ;;  %v7672_v49 = vpop.f32.mrf.mxu3 }
 0x281   :  { %v2860_v57 = vmul.f32 %v6384_v11, %v2859_v28  ;;  %v2249_v60 = vpack.c.bf16 %v1969_v54, %v1961_v25  ;;  %v1809_v24 = vcvt.s32.f32 %v1297_v58  ;;  %v1441_v15 = vunpack.c.3.s8 %v977_v52 }
 0x282   :  { %v2431_v2 = vadd.f32 %v7582_v41, %v2418_v12  ;;  %v2800_v0 = vrot.slane %v2787_v16, 4  ;;  %2662 = vmatpush.bf16.msra.mxu1 %v2089_v1  ;;  %v1945_v13 = vcvt.s32.f32 %v1433_v20  ;;  %v2698_v9 = vperm.slane %v7510_v18, 2 }
 0x283   :  { %v2861_v34 = vmul.f32 0.5, %v2860_v57  ;;  %2684 = vmatpush.bf16.msra.mxu3 %v2249_v60  ;;  %v2169_v61 = vpack.c.bf16 %v1809_v24, %v1801_v50  ;;  %v1953_v42 = vcvt.s32.f32 %v1441_v15  ;;  %v1273_v10 = vunpack.c.2.s8 %v937_v22  ;;  %v2471_v58 = vpop.f32.mrf.mxu2 }
 0x284   :  { %v1281_v40 = vunpack.c.3.s8 %v937_v22  ;;  %vm2865_vm7 = vweird.f32 %v6384_v11  ;;  %v2801_v56 = vadd.f32 %v2800_v0, %v2787_v16  ;;  %v7662_v45 = vmul.f32 %v2698_v9, %v2431_v2 }
 0x285   :  { %v2862_v39 = vsub.f32 1.5, %v2861_v34  ;;  %2673 = vmatpush.bf16.msra.mxu2 %v2169_v61  ;;  %2663 = vmatmul.bf16.vlgmr.msra.gmra.mxu1 %v7157_v62  ;;  %v2241_v41 = vpack.c.bf16 %v1953_v42, %v1945_v13  ;;  %v1785_v29 = vcvt.s32.f32 %v1273_v10  ;;  %v1417_v26 = vunpack.c.0.s8 %v977_v52 }
 0x286   :  { %v1793_v55 = vcvt.s32.f32 %v1281_v40  ;;  %vm2864_vm8 = vweird.f32 %v7625_v14  ;;  %v2802_v63 = vrot.slane %v2801_v56, 2  ;;  %v2734_v38 = vrot.slane %v7662_v45, 4  ;;  %v3034_v40 = vld [vmem:[%s9001_s13 + $0x70] sm:$0xff] }
 0x287   :  { %v2863_v35 = vmul.f32 %v6384_v11, %v2862_v39  ;;  %vm2866_vm9 = vmor %vm2864_vm8, %vm2865_vm7  ;;  %2685 = vmatpush.bf16.msra.mxu3 %v2241_v41  ;;  %v1425_v30 = vunpack.c.1.s8 %v977_v52  ;;  %v1929_v7 = vcvt.s32.f32 %v1417_v26  ;;  %v1257_v62 = vunpack.c.0.s8 %v937_v22  ;;  %v7677_v52 = vpop.f32.mrf.mxu0  ;;  %v7689_v39 = vpop.f32.mrf.mxu1 }
 0x288   :  { %v2161_v46 = vpack.c.bf16 %v1793_v55, %v1785_v29  ;;  %v2803_v27 = vadd.f32 %v2802_v63, %v2801_v56  ;;  %v2735_v43 = vadd.f32 %v2734_v38, %v7662_v45  ;;  %v1265_v59 = vunpack.c.1.s8 %v937_v22  ;;  %v2484_v26 = vpop.f32.mrf.mxu3 }
 0x289   :  { %v2867_v17 = vsel %vm2866_vm9, %v6384_v11, %v2863_v35  ;;  %v1937_v19 = vcvt.s32.f32 %v1425_v30  ;;  %v1769_v33 = vcvt.s32.f32 %v1257_v62  ;;  %v3342_v47 = vunpack.c.2.s8 %v3041_v3  ;;  %v969_v11 = vld [vmem:[%s8997_s9 + $0x338] sm:$0xff] }
 0x28a   :  { %v2938_v14 = vmul.f32 %v2867_v17, %v7560_v8  ;;  %2674 = vmatpush.bf16.msra.mxu2 %v2161_v46  ;;  %v2804_v23 = vrot.slane %v2803_v27, 1  ;;  %v2736_v28 = vrot.slane %v2735_v43, 2  ;;  %v1777_v12 = vcvt.s32.f32 %v1265_v59 }
 0x28b   :  { %v3349_v4 = vunpack.c.3.s8 %v3041_v3  ;;  %v2233_v8 = vpack.c.bf16 %v1937_v19, %v1929_v7  ;;  %v4238_v54 = vcvt.s32.f32 %v3342_v47  ;;  %v1401_v22 = vunpack.c.2.s8 %v969_v11 }
 0x28c   :  { %v2963_v25 = vmul.f32 %v2947_v44, %v2938_v14  ;;  %v2805_v50 = vadd.f32 %v2804_v23, %v2803_v27  ;;  %v2737_v57 = vadd.f32 %v2736_v28, %v2735_v43  ;;  %v2153_v16 = vpack.c.bf16 %v1777_v12, %v1769_v33  ;;  %v3069_v14 = vld [vmem:[%s9001_s13 + $0x188] sm:$0xff] }
 0x28d   :  { %v4245_v1 = vcvt.s32.f32 %v3349_v4  ;;  %2686 = vmatpush.bf16.msra.mxu3 %v2233_v8  ;;  %v1409_v60 = vunpack.c.3.s8 %v969_v11  ;;  %v3328_v24 = vunpack.c.0.s8 %v3041_v3  ;;  %v3335_v44 = vunpack.c.1.s8 %v3041_v3  ;;  %v3027_v3 = vld [vmem:[%s9001_s13 + $0x38] sm:$0xff] }
 0x28e   :  { %v2988_v20 = vadd.f32 %v2972_v6, %v2963_v25  ;;  %v2843_v15 = vmul.f32 %v2805_v50, %v6873_v36  ;;  %v2738_v2 = vrot.slane %v2737_v57, 1  ;;  %2675 = vmatpush.bf16.msra.mxu2 %v2153_v16  ;;  %v1913_v13 = vcvt.s32.f32 %v1401_v22 }
 0x28f   :  { %v5085_v34 = vpack.c.bf16 %v4245_v1, %v4238_v54  ;;  %v1921_v9 = vcvt.s32.f32 %v1409_v60  ;;  %v4224_v10 = vcvt.s32.f32 %v3328_v24  ;;  %v4231_v6 = vcvt.s32.f32 %v3335_v44  ;;  %v2497_v46 = vpop.f32.mrf.mxu0 }
 0x290   :  { %vm2996_vm10 = vcmp.gt.f32.partialorder %v2988_v20, 0.0  ;;  %v3004_v0 = vmul.f32 0.2, %v2988_v20  ;;  %v7684_v61 = vadd.f32 1e-05, %v2843_v15  ;;  %v2739_v42 = vadd.f32 %v2738_v2, %v2737_v57 }
 0x291   :  { %5492 = vmatpush.bf16.msrb.mxu0 %v5085_v34  ;;  %v2948_v56 = vperm.slane %v7622_v48, 1  ;;  %v2225_v41 = vpack.c.bf16 %v1921_v9, %v1913_v13  ;;  %2676 = vmatmul.bf16.vlgmr.msra.gmra.mxu2 %v7186_v31  ;;  %v1385_v29 = vunpack.c.0.s8 %v969_v11  ;;  %v1393_v55 = vunpack.c.1.s8 %v969_v11  ;;  %v3020_v9 = vld [vmem:[%s9001_s13] sm:$0xff] }
 0x292   :  { %v3012_v35 = vsel %vm2996_vm10, %v2988_v20, %v3004_v0  ;;  %6385 = vrsqrt.f32 %v7684_v61  ;;  %v2973_v63 = vperm.slane %v7637_v53, 1  ;;  %v2772_v38 = vmul.f32 %v2739_v42, %v6873_v36  ;;  %v2510_v20 = vpop.f32.mrf.mxu1 }
 0x293   :  { %2687 = vmatpush.bf16.msra.mxu3 %v2225_v41  ;;  %v5078_v30 = vpack.c.bf16 %v4231_v6, %v4224_v10  ;;  %v1897_v7 = vcvt.s32.f32 %v1385_v29  ;;  %v1905_v31 = vcvt.s32.f32 %v1393_v55  ;;  %v3314_v62 = vunpack.c.2.s8 %v3034_v40 }
 0x294   :  { %v7701_v17 = vsub.f32 %v7662_v45, %v2772_v38  ;;  %v3321_v27 = vunpack.c.3.s8 %v3034_v40  ;;  %v3300_v43 = vunpack.c.0.s8 %v3034_v40  ;;  %v3307_v59 = vunpack.c.1.s8 %v3034_v40 }
 0x295   :  { %5493 = vmatpush.bf16.msrb.mxu0 %v5078_v30  ;;  %v2217_v19 = vpack.c.bf16 %v1905_v31, %v1897_v7  ;;  %v4210_v33 = vcvt.s32.f32 %v3314_v62  ;;  %v3286_v47 = vunpack.c.2.s8 %v3027_v3  ;;  %v3293_v23 = vunpack.c.3.s8 %v3027_v3 }
 0x296   :  { %v2788_v28 = vmul.f32 %v7701_v17, %v7701_v17  ;;  %v4217_v12 = vcvt.s32.f32 %v3321_v27  ;;  %v4196_v4 = vcvt.s32.f32 %v3300_v43  ;;  %v4203_v11 = vcvt.s32.f32 %v3307_v59 }
 0x297   :  { %v7708_v45 = vpack.c.bf16 %v3012_v35, %v3012_v35  ;;  %v2457_v25 = vadd.f32 %v7612_v32, %v7584_v51  ;;  %2688 = vmatpush.bf16.msra.mxu3 %v2217_v19  ;;  %v3454_v8 = vunpack.c.2.s8 %v3069_v14  ;;  %v3461_v54 = vunpack.c.3.s8 %v3069_v14 }
 0x298   :  { %v6386_v58 = vpop.eup %6385  ;;  %v2806_v50 = vrot.slane %v2788_v28, 4  ;;  %v5071_v57 = vpack.c.bf16 %v4217_v12, %v4210_v33  ;;  %v4182_v16 = vcvt.s32.f32 %v3286_v47  ;;  %v4189_v1 = vcvt.s32.f32 %v3293_v23 }
 0x299   :  { %v2869_v22 = vmul.f32 %v6386_v58, %v7684_v61  ;;  %vm2874_vm11 = vweird.f32 %v7684_v61  ;;  %v5064_v60 = vpack.c.bf16 %v4203_v11, %v4196_v4  ;;  %v4350_v24 = vcvt.s32.f32 %v3454_v8 }
 0x29a   :  { %v2470_v15 = vadd.f32 %v7660_v21, %v2457_v25  ;;  %vm2875_vm12 = vweird.f32 %v6386_v58  ;;  %v2807_v2 = vadd.f32 %v2806_v50, %v2788_v28  ;;  %2689 = vmatmul.bf16.vlgmr.msra.gmra.mxu3 %v7199_v37  ;;  %5494 = vmatpush.bf16.msrb.mxu0 %v5071_v57  ;;  %v4357_v51 = vcvt.s32.f32 %v3461_v54  ;;  %v3062_v37 = vld [vmem:[%s9001_s13 + $0x150] sm:$0xff] }
 0x29b   :  { %v3272_v32 = vunpack.c.0.s8 %v3027_v3  ;;  %v2870_v34 = vmul.f32 %v6386_v58, %v2869_v22  ;;  %v3279_v44 = vunpack.c.1.s8 %v3027_v3  ;;  %v3440_v0 = vunpack.c.0.s8 %v3069_v14  ;;  %vm2876_vm13 = vmor %vm2874_vm11, %vm2875_vm12 }
 0x29c   :  { %v3447_v13 = vunpack.c.1.s8 %v3069_v14  ;;  %v2808_v42 = vrot.slane %v2807_v2, 2  ;;  %v5057_v10 = vpack.c.bf16 %v4189_v1, %v4182_v16  ;;  %v5141_v6 = vpack.c.bf16 %v4357_v51, %v4350_v24  ;;  %v7726_v14 = vpop.f32.mrf.mxu2  ;;  %v3055_v16 = vld [vmem:[%s9001_s13 + $0x118] sm:$0xff] }
 0x29d   :  { %v4168_v40 = vcvt.s32.f32 %v3272_v32  ;;  %v2871_v21 = vmul.f32 0.5, %v2870_v34  ;;  %v4175_v41 = vcvt.s32.f32 %v3279_v44  ;;  %v4336_v29 = vcvt.s32.f32 %v3440_v0 }
 0x29e   :  { %v4343_v55 = vcvt.s32.f32 %v3447_v13  ;;  %v2809_v26 = vadd.f32 %v2808_v42, %v2807_v2  ;;  %5495 = vmatpush.bf16.msrb.mxu0 %v5064_v60  ;;  %5505 = vmatpush.bf16.msrb.mxu1 %v5141_v6  ;;  %v2483_v35 = vadd.f32 %v7672_v49, %v2470_v15  ;;  %v2699_v38 = vperm.slane %v7510_v18, 3  ;;  %v3097_v2 = vld [vmem:[%s9001_s13 + $0x268] sm:$0xff] }
 0x29f   :  { %v3258_v3 = vunpack.c.2.s8 %v3020_v9  ;;  %v2872_v46 = vsub.f32 1.5, %v2871_v21  ;;  %v5050_v30 = vpack.c.bf16 %v4175_v41, %v4168_v40  ;;  %v3265_v31 = vunpack.c.3.s8 %v3020_v9  ;;  %v7747_v51 = vpop.f32.mrf.mxu3 }
 0x2a0   :  { %v5134_v7 = vpack.c.bf16 %v4343_v55, %v4336_v29  ;;  %v2810_v62 = vrot.slane %v2809_v26, 1  ;;  %v7724_v27 = vmul.f32 %v2699_v38, %v2483_v35  ;;  %v3426_v59 = vunpack.c.2.s8 %v3062_v37 }
 0x2a1   :  { %v4154_v43 = vcvt.s32.f32 %v3258_v3  ;;  %v2873_v19 = vmul.f32 %v6386_v58, %v2872_v46  ;;  %v4161_v33 = vcvt.s32.f32 %v3265_v31  ;;  %v3433_v47 = vunpack.c.3.s8 %v3062_v37 }
 0x2a2   :  { %v3244_v23 = vunpack.c.0.s8 %v3020_v9  ;;  %v2811_v18 = vadd.f32 %v2810_v62, %v2809_v26  ;;  %5496 = vmatpush.bf16.msrb.mxu0 %v5057_v10  ;;  %5506 = vmatpush.bf16.msrb.mxu1 %v5134_v7  ;;  %v2740_v49 = vrot.slane %v7724_v27, 4  ;;  %v4322_v28 = vcvt.s32.f32 %v3426_v59  ;;  %v7749_v13 = vpop.f32.mrf.mxu0 }
 0x2a3   :  { %v3251_v12 = vunpack.c.1.s8 %v3020_v9  ;;  %v2877_v4 = vsel %vm2876_vm13, %v6386_v58, %v2873_v19  ;;  %v2949_v11 = vperm.slane %v7622_v48, 2  ;;  %v4329_v25 = vcvt.s32.f32 %v3433_v47 }
 0x2a4   :  { %v4140_v8 = vcvt.s32.f32 %v3244_v23  ;;  %v2939_v54 = vmul.f32 %v2877_v4, %v7649_v5  ;;  %v2844_v50 = vmul.f32 %v2811_v18, %v6873_v36  ;;  %v2741_v57 = vadd.f32 %v2740_v49, %v7724_v27  ;;  %v2523_v10 = vpop.f32.mrf.mxu2 }
 0x2a5   :  { %v4147_v61 = vcvt.s32.f32 %v3251_v12  ;;  %v2974_v1 = vperm.slane %v7637_v53, 2  ;;  %v5127_v20 = vpack.c.bf16 %v4329_v25, %v4322_v28  ;;  %v3412_v22 = vunpack.c.0.s8 %v3062_v37  ;;  %v3083_v10 = vld [vmem:[%s9001_s13 + $0x1f8] sm:$0xff] }
 0x2a6   :  { %v3419_v58 = vunpack.c.1.s8 %v3062_v37  ;;  %v2964_v60 = vmul.f32 %v2948_v56, %v2939_v54  ;;  %v7742_v24 = vadd.f32 1e-05, %v2844_v50  ;;  %5497 = vmatpush.bf16.msrb.mxu0 %v5050_v30  ;;  %v2742_v5 = vrot.slane %v2741_v57, 2 }
 0x2a7   :  { %v5043_v15 = vpack.c.bf16 %v4161_v33, %v4154_v43  ;;  %5507 = vmatpush.bf16.msrb.mxu1 %v5127_v20  ;;  %v4308_v32 = vcvt.s32.f32 %v3412_v22  ;;  %v3398_v44 = vunpack.c.2.s8 %v3055_v16  ;;  %v3405_v0 = vunpack.c.3.s8 %v3055_v16  ;;  %v3090_v33 = vld [vmem:[%s9001_s13 + $0x230] sm:$0xff] }
 0x2a8   :  { %v4315_v34 = vcvt.s32.f32 %v3419_v58  ;;  %v2989_v56 = vadd.f32 %v2973_v63, %v2964_v60  ;;  %6387 = vrsqrt.f32 %v7742_v24  ;;  %v2743_v9 = vadd.f32 %v2742_v5, %v2741_v57  ;;  %v3048_v63 = vld [vmem:[%s9001_s13 + $0xe0] sm:$0xff] }
 0x2a9   :  { %v5036_v42 = vpack.c.bf16 %v4147_v61, %v4140_v8  ;;  %v4294_v40 = vcvt.s32.f32 %v3398_v44  ;;  %v4301_v21 = vcvt.s32.f32 %v3405_v0  ;;  %v3566_v41 = vunpack.c.2.s8 %v3097_v2 }
 0x2aa   :  { %v5120_v6 = vpack.c.bf16 %v4315_v34, %v4308_v32  ;;  %vm2997_vm14 = vcmp.gt.f32.partialorder %v2989_v56, 0.0  ;;  %v3005_v29 = vmul.f32 0.2, %v2989_v56  ;;  %v2744_v55 = vrot.slane %v2743_v9, 1  ;;  %5498 = vmatpush.bf16.msrb.mxu0 %v5043_v15  ;;  %v7762_v47 = vpop.f32.mrf.mxu1  ;;  %v2549_v8 = vpop.f32.mrf.mxu0 }
 0x2ab   :  { %v3573_v37 = vunpack.c.3.s8 %v3097_v2  ;;  %v5113_v26 = vpack.c.bf16 %v4301_v21, %v4294_v40  ;;  %v4462_v35 = vcvt.s32.f32 %v3566_v41  ;;  %v3384_v38 = vunpack.c.0.s8 %v3055_v16 }
 0x2ac   :  { %5508 = vmatpush.bf16.msrb.mxu1 %v5120_v6  ;;  %v3391_v3 = vunpack.c.1.s8 %v3055_v16  ;;  %v2745_v46 = vadd.f32 %v2744_v55, %v2743_v9  ;;  %v2509_v30 = vadd.f32 %v7689_v39, %v7677_v52  ;;  %v3552_v31 = vunpack.c.0.s8 %v3097_v2  ;;  %v2536_v39 = vpop.f32.mrf.mxu3 }
 0x2ad   :  { %v4469_v7 = vcvt.s32.f32 %v3573_v37  ;;  %v3013_v62 = vsel %vm2997_vm14, %v2989_v56, %v3005_v29  ;;  %v4280_v43 = vcvt.s32.f32 %v3384_v38  ;;  %v3559_v19 = vunpack.c.1.s8 %v3097_v2 }
 0x2ae   :  { %v4287_v59 = vcvt.s32.f32 %v3391_v3  ;;  %v7764_v23 = vpop.eup %6387  ;;  %v2773_v18 = vmul.f32 %v2745_v46, %v6873_v36  ;;  %5499 = vmatpush.bf16.msrb.mxu0 %v5036_v42  ;;  %v4448_v28 = vcvt.s32.f32 %v3552_v31  ;;  %v3370_v52 = vunpack.c.2.s8 %v3048_v63  ;;  %v7794_v31 = vld [vmem:[%s8998_s10] sm:$0xff] }
 0x2af   :  { %v5197_v49 = vpack.c.bf16 %v4469_v7, %v4462_v35  ;;  %v2879_v12 = vmul.f32 %v7764_v23, %v7742_v24  ;;  %vm2884_vm15 = vweird.f32 %v7742_v24  ;;  %vm2885_vm0 = vweird.f32 %v7764_v23 }
 0x2b0   :  { %5509 = vmatpush.bf16.msrb.mxu1 %v5113_v26  ;;  %v5106_v4 = vpack.c.bf16 %v4287_v59, %v4280_v43  ;;  %v4455_v25 = vcvt.s32.f32 %v3559_v19  ;;  %v7772_v54 = vsub.f32 %v7724_v27, %v2773_v18  ;;  %v3377_v50 = vunpack.c.3.s8 %v3048_v63  ;;  %vm2886_vm1 = vmor %vm2884_vm15, %vm2885_vm0 }
 0x2b1   :  { %5518 = vmatpush.bf16.msrb.mxu2 %v5197_v49  ;;  %v4266_v57 = vcvt.s32.f32 %v3370_v52  ;;  %v3538_v61 = vunpack.c.2.s8 %v3090_v33  ;;  %v2880_v16 = vmul.f32 %v7764_v23, %v2879_v12  ;;  %5500 = vmatmul.bf16.vlgmr.msrb.gmra.mxu0 %v7708_v45  ;;  %v3545_v22 = vunpack.c.3.s8 %v3090_v33 }
 0x2b2   :  { %v5190_v20 = vpack.c.bf16 %v4455_v25, %v4448_v28  ;;  %v3356_v58 = vunpack.c.0.s8 %v3048_v63  ;;  %v2789_v60 = vmul.f32 %v7772_v54, %v7772_v54  ;;  %v4273_v5 = vcvt.s32.f32 %v3377_v50  ;;  %v2562_v29 = vpop.f32.mrf.mxu1 }
 0x2b3   :  { %v4434_v15 = vcvt.s32.f32 %v3538_v61  ;;  %v3363_v2 = vunpack.c.1.s8 %v3048_v63  ;;  %v2881_v32 = vmul.f32 0.5, %v2880_v16  ;;  %v4441_v27 = vcvt.s32.f32 %v3545_v22 }
 0x2b4   :  { %5510 = vmatpush.bf16.msrb.mxu1 %v5106_v4  ;;  %v4252_v34 = vcvt.s32.f32 %v3356_v58  ;;  %v3524_v44 = vunpack.c.0.s8 %v3090_v33  ;;  %v2812_v0 = vrot.slane %v2789_v60, 4  ;;  %v5099_v56 = vpack.c.bf16 %v4273_v5, %v4266_v57  ;;  %v3153_v5 = vld [vmem:[%s9001_s13 + $0x428] sm:$0xff] }
 0x2b5   :  { %5519 = vmatpush.bf16.msrb.mxu2 %v5190_v20  ;;  %v4259_v9 = vcvt.s32.f32 %v3363_v2  ;;  %v3531_v42 = vunpack.c.1.s8 %v3090_v33  ;;  %v2882_v6 = vsub.f32 1.5, %v2881_v32  ;;  %v5183_v40 = vpack.c.bf16 %v4441_v27, %v4434_v15 }
 0x2b6   :  { %v4420_v21 = vcvt.s32.f32 %v3524_v44  ;;  %v2522_v41 = vadd.f32 %v7726_v14, %v2509_v30  ;;  %v7782_v55 = vpack.c.bf16 %v3013_v62, %v3013_v62  ;;  %v2813_v37 = vadd.f32 %v2812_v0, %v2789_v60 }
 0x2b7   :  { %v5092_v26 = vpack.c.bf16 %v4259_v9, %v4252_v34  ;;  %v4427_v35 = vcvt.s32.f32 %v3531_v42  ;;  %v2883_v38 = vmul.f32 %v7764_v23, %v2882_v6  ;;  %v3510_v3 = vunpack.c.2.s8 %v3083_v10 }
 0x2b8   :  { %5511 = vmatpush.bf16.msrb.mxu1 %v5099_v56  ;;  %v3517_v63 = vunpack.c.3.s8 %v3083_v10  ;;  %v2535_v46 = vadd.f32 %v7747_v51, %v2522_v41  ;;  %v2814_v7 = vrot.slane %v2813_v37, 2  ;;  %v2950_v14 = vperm.slane %v7622_v48, 3  ;;  %v3076_v51 = vld [vmem:[%s9001_s13 + $0x1c0] sm:$0xff] }
 0x2b9   :  { %5520 = vmatpush.bf16.msrb.mxu2 %v5183_v40  ;;  %v5176_v30 = vpack.c.bf16 %v4427_v35, %v4420_v21  ;;  %v2700_v62 = vperm.slane %v7794_v31, 4  ;;  %v2887_v43 = vsel %vm2886_vm1, %v7764_v23, %v2883_v38  ;;  %v4406_v24 = vcvt.s32.f32 %v3510_v3 }
 0x2ba   :  { %v4413_v59 = vcvt.s32.f32 %v3517_v63  ;;  %v3496_v19 = vunpack.c.0.s8 %v3083_v10  ;;  %v2940_v33 = vmul.f32 %v2887_v43, %v7701_v17  ;;  %v2815_v18 = vadd.f32 %v2814_v7, %v2813_v37  ;;  %v3125_v17 = vld [vmem:[%s9001_s13 + $0x348] sm:$0xff] }
 0x2bb   :  { %v7802_v49 = vmul.f32 %v2700_v62, %v2535_v46  ;;  %v3503_v28 = vunpack.c.1.s8 %v3083_v10  ;;  %v3482_v12 = vunpack.c.2.s8 %v3076_v51  ;;  %v3489_v4 = vunpack.c.3.s8 %v3076_v51  ;;  %v3146_v62 = vld [vmem:[%s9001_s13 + $0x3f0] sm:$0xff] }
 0x2bc   :  { %5512 = vmatpush.bf16.msrb.mxu1 %v5092_v26  ;;  %v5169_v52 = vpack.c.bf16 %v4413_v59, %v4406_v24  ;;  %v4392_v39 = vcvt.s32.f32 %v3496_v19  ;;  %v2965_v25 = vmul.f32 %v2949_v11, %v2940_v33  ;;  %v2816_v8 = vrot.slane %v2815_v18, 1  ;;  %v3118_v26 = vld [vmem:[%s9001_s13 + $0x310] sm:$0xff] }
 0x2bd   :  { %5521 = vmatpush.bf16.msrb.mxu2 %v5176_v30  ;;  %v2746_v23 = vrot.slane %v7802_v49, 4  ;;  %v4399_v50 = vcvt.s32.f32 %v3503_v28  ;;  %v2975_v57 = vperm.slane %v7637_v53, 3  ;;  %v4378_v61 = vcvt.s32.f32 %v3482_v12 }
 0x2be   :  { %v4385_v16 = vcvt.s32.f32 %v3489_v4  ;;  %v3468_v20 = vunpack.c.0.s8 %v3076_v51  ;;  %v2990_v22 = vadd.f32 %v2974_v1, %v2965_v25  ;;  %v2817_v58 = vadd.f32 %v2816_v8, %v2815_v18 }
 0x2bf   :  { %5513 = vmatmul.bf16.vlgmr.msrb.gmra.mxu1 %v7782_v55  ;;  %v2747_v11 = vadd.f32 %v2746_v23, %v7802_v49  ;;  %v7817_v60 = vadd.f32 %v7762_v47, %v7749_v13  ;;  %v7822_v15 = vpop.f32.mrf.mxu2  ;;  %v5162_v2 = vpack.c.bf16 %v4399_v50, %v4392_v39  ;;  %v3475_v32 = vunpack.c.1.s8 %v3076_v51 }
 0x2c0   :  { %v7824_v27 = vcvt.s32.f32 %v3468_v20  ;;  %v3678_v1 = vunpack.c.2.s8 %v3125_v17  ;;  %vm2998_vm2 = vcmp.gt.f32.partialorder %v2990_v22, 0.0  ;;  %v3006_v34 = vmul.f32 0.2, %v2990_v22 }
 0x2c1   :  { %v2845_v44 = vmul.f32 %v2817_v58, %v6873_v36  ;;  %5522 = vmatpush.bf16.msrb.mxu2 %v5169_v52  ;;  %v2748_v0 = vrot.slane %v2747_v11, 2  ;;  %v4371_v56 = vcvt.s32.f32 %v3475_v32  ;;  %v3685_v13 = vunpack.c.3.s8 %v3125_v17 }
 0x2c2   :  { %v4574_v47 = vcvt.s32.f32 %v3678_v1  ;;  %v3790_v9 = vunpack.c.2.s8 %v3153_v5  ;;  %v3014_v42 = vsel %vm2998_vm2, %v2990_v22, %v3006_v34  ;;  %v3797_v40 = vunpack.c.3.s8 %v3153_v5  ;;  %v3111_v1 = vld [vmem:[%s9001_s13 + $0x2d8] sm:$0xff] }
 0x2c3   :  { %v7827_v10 = vadd.f32 1e-05, %v2845_v44  ;;  %v2749_v6 = vadd.f32 %v2748_v0, %v2747_v11  ;;  %v7829_v21 = vpack.c.bf16 %v3014_v42, %v3014_v42  ;;  %v5155_v41 = vpack.c.bf16 %v4385_v16, %v4378_v61 }
 0x2c4   :  { %v4581_v29 = vcvt.s32.f32 %v3685_v13  ;;  %v4686_v37 = vcvt.s32.f32 %v3790_v9  ;;  %v5148_v38 = vpack.c.bf16 %v4371_v56, %v7824_v27  ;;  %v4693_v3 = vcvt.s32.f32 %v3797_v40  ;;  %v3139_v56 = vld [vmem:[%s9001_s13 + $0x3b8] sm:$0xff] }
 0x2c5   :  { %6389 = vrsqrt.f32 %v7827_v10  ;;  %v2750_v35 = vrot.slane %v2749_v6, 1  ;;  %5523 = vmatpush.bf16.msrb.mxu2 %v5162_v2  ;;  %v3664_v46 = vunpack.c.0.s8 %v3125_v17  ;;  %v3671_v7 = vunpack.c.1.s8 %v3125_v17 }
 0x2c6   :  { %v5253_v63 = vpack.c.bf16 %v4581_v29, %v4574_v47  ;;  %v3776_v30 = vunpack.c.0.s8 %v3153_v5  ;;  %v5309_v43 = vpack.c.bf16 %v4693_v3, %v4686_v37  ;;  %v3783_v24 = vunpack.c.1.s8 %v3153_v5 }
 0x2c7   :  { %v2751_v51 = vadd.f32 %v2750_v35, %v2749_v6  ;;  %v3650_v59 = vunpack.c.2.s8 %v3118_v26  ;;  %v2575_v19 = vpop.f32.mrf.mxu2  ;;  %v4560_v33 = vcvt.s32.f32 %v3664_v46  ;;  %v4567_v18 = vcvt.s32.f32 %v3671_v7  ;;  %v7839_v39 = vpop.f32.mrf.mxu3 }
 0x2c8   :  { %5531 = vmatpush.bf16.msrb.mxu3 %v5253_v63  ;;  %v4672_v28 = vcvt.s32.f32 %v3776_v30  ;;  %v3657_v52 = vunpack.c.3.s8 %v3118_v26  ;;  %5544 = vmatpush.bf16.msra.mxu0 %v5309_v43  ;;  %v4679_v4 = vcvt.s32.f32 %v3783_v24  ;;  %v3762_v8 = vunpack.c.2.s8 %v3146_v62 }
 0x2c9   :  { %v2774_v12 = vmul.f32 %v2751_v51, %v6873_v36  ;;  %5524 = vmatpush.bf16.msrb.mxu2 %v5155_v41  ;;  %v4546_v25 = vcvt.s32.f32 %v3650_v59  ;;  %v5246_v23 = vpack.c.bf16 %v4567_v18, %v4560_v33  ;;  %v3769_v17 = vunpack.c.3.s8 %v3146_v62 }
 0x2ca   :  { %v4553_v50 = vcvt.s32.f32 %v3657_v52  ;;  %v3636_v61 = vunpack.c.0.s8 %v3118_v26  ;;  %v5302_v22 = vpack.c.bf16 %v4679_v4, %v4672_v28  ;;  %v4658_v58 = vcvt.s32.f32 %v3762_v8  ;;  %v7847_v5 = vpop.f32.mrf.mxu0 }
 0x2cb   :  { %v7842_v16 = vpop.eup %6389  ;;  %v7845_v20 = vsub.f32 %v7802_v49, %v2774_v12  ;;  %v3643_v11 = vunpack.c.1.s8 %v3118_v26  ;;  %vm2894_vm3 = vweird.f32 %v7827_v10  ;;  %v4665_v27 = vcvt.s32.f32 %v3769_v17 }
 0x2cc   :  { %v2889_v2 = vmul.f32 %v7842_v16, %v7827_v10  ;;  %5532 = vmatpush.bf16.msrb.mxu3 %v5246_v23  ;;  %v5239_v32 = vpack.c.bf16 %v4553_v50, %v4546_v25  ;;  %5545 = vmatpush.bf16.msra.mxu0 %v5302_v22  ;;  %v4532_v34 = vcvt.s32.f32 %v3636_v61  ;;  %v3748_v0 = vunpack.c.0.s8 %v3146_v62  ;;  %v3132_v10 = vld [vmem:[%s9001_s13 + $0x380] sm:$0xff] }
 0x2cd   :  { %v2790_v49 = vmul.f32 %v7845_v20, %v7845_v20  ;;  %5525 = vmatpush.bf16.msrb.mxu2 %v5148_v38  ;;  %v4539_v44 = vcvt.s32.f32 %v3643_v11  ;;  %vm2895_vm4 = vweird.f32 %v7842_v16  ;;  %v5295_v47 = vpack.c.bf16 %v4665_v27, %v4658_v58 }
 0x2ce   :  { %v2890_v13 = vmul.f32 %v7842_v16, %v2889_v2  ;;  %v3755_v9 = vunpack.c.1.s8 %v3146_v62  ;;  %v4644_v40 = vcvt.s32.f32 %v3748_v0  ;;  %v3622_v41 = vunpack.c.2.s8 %v3111_v1  ;;  %vm2896_vm5 = vmor %vm2894_vm3, %vm2895_vm4 }
 0x2cf   :  { %v2818_v42 = vrot.slane %v2790_v49, 4  ;;  %v5232_v6 = vpack.c.bf16 %v4539_v44, %v4532_v34  ;;  %v3629_v26 = vunpack.c.3.s8 %v3111_v1  ;;  %v3734_v35 = vunpack.c.2.s8 %v3139_v56  ;;  %v2588_v38 = vpop.f32.mrf.mxu3 }
 0x2d0   :  { %v2891_v29 = vmul.f32 0.5, %v2890_v13  ;;  %5526 = vmatmul.bf16.vlgmr.msrb.gmra.mxu2 %v7829_v21  ;;  %5533 = vmatpush.bf16.msrb.mxu3 %v5239_v32  ;;  %v4651_v37 = vcvt.s32.f32 %v3755_v9  ;;  %v2574_v63 = vadd.f32 %v7822_v15, %v7817_v60  ;;  %v4518_v46 = vcvt.s32.f32 %v3622_v41  ;;  %v3104_v60 = vld [vmem:[%s9001_s13 + $0x2a0] sm:$0xff] }
 0x2d1   :  { %v2819_v3 = vadd.f32 %v2818_v42, %v2790_v49  ;;  %5546 = vmatpush.bf16.msra.mxu0 %v5295_v47  ;;  %v3741_v7 = vunpack.c.3.s8 %v3139_v56  ;;  %v4525_v51 = vcvt.s32.f32 %v3629_v26  ;;  %v4630_v43 = vcvt.s32.f32 %v3734_v35 }
 0x2d2   :  { %v2892_v30 = vsub.f32 1.5, %v2891_v29  ;;  %v5288_v62 = vpack.c.bf16 %v4651_v37, %v4644_v40  ;;  %v2951_v59 = vperm.slane %v7622_v48, 4  ;;  %v3608_v33 = vunpack.c.0.s8 %v3111_v1  ;;  %v2601_v18 = vpop.f32.mrf.mxu0 }
 0x2d3   :  { %v2820_v24 = vrot.slane %v2819_v3, 2  ;;  %v4637_v19 = vcvt.s32.f32 %v3741_v7  ;;  %v5225_v52 = vpack.c.bf16 %v4525_v51, %v4518_v46  ;;  %v3615_v12 = vunpack.c.1.s8 %v3111_v1  ;;  %v2612_v15 = vpop.f32.mrf.mxu1  ;;  %v3042_v51 = vld [vmem:[%s9001_s13 + $0xb0] sm:$0xff] }
 0x2d4   :  { %v2893_v28 = vmul.f32 %v7842_v16, %v2892_v30  ;;  %5534 = vmatpush.bf16.msrb.mxu3 %v5232_v6  ;;  %v2587_v4 = vadd.f32 %v7839_v39, %v2574_v63  ;;  %v4504_v23 = vcvt.s32.f32 %v3608_v33  ;;  %v2701_v50 = vperm.slane %v7794_v31, 5 }
 0x2d5   :  { %v2821_v25 = vadd.f32 %v2820_v24, %v2819_v3  ;;  %5547 = vmatpush.bf16.msra.mxu0 %v5288_v62  ;;  %v5281_v8 = vpack.c.bf16 %v4637_v19, %v4630_v43  ;;  %v4511_v61 = vcvt.s32.f32 %v3615_v12  ;;  %v3720_v39 = vunpack.c.0.s8 %v3139_v56  ;;  %v3181_v62 = vld [vmem:[%s9001_s13 + $0x508] sm:$0xff] }
 0x2d6   :  { %v2897_v17 = vsel %vm2896_vm5, %v7842_v16, %v2893_v28  ;;  %v3727_v22 = vunpack.c.1.s8 %v3139_v56  ;;  %v7878_v2 = vmul.f32 %v2701_v50, %v2587_v4  ;;  %v3594_v32 = vunpack.c.2.s8 %v3104_v60 }
 0x2d7   :  { %v2941_v58 = vmul.f32 %v2897_v17, %v7772_v54  ;;  %v2822_v11 = vrot.slane %v2821_v25, 1  ;;  %v5218_v27 = vpack.c.bf16 %v4511_v61, %v4504_v23  ;;  %v4616_v1 = vcvt.s32.f32 %v3720_v39 }
 0x2d8   :  { %5535 = vmatpush.bf16.msrb.mxu3 %v5225_v52  ;;  %v4623_v49 = vcvt.s32.f32 %v3727_v22  ;;  %v3601_v34 = vunpack.c.3.s8 %v3104_v60  ;;  %v2752_v54 = vrot.slane %v7878_v2, 4  ;;  %v4490_v0 = vcvt.s32.f32 %v3594_v32 }
 0x2d9   :  { %v2966_v16 = vmul.f32 %v2950_v14, %v2941_v58  ;;  %v2823_v44 = vadd.f32 %v2822_v11, %v2821_v25  ;;  %5548 = vmatpush.bf16.msra.mxu0 %v5281_v8  ;;  %v3706_v47 = vunpack.c.2.s8 %v3132_v10  ;;  %v3713_v9 = vunpack.c.3.s8 %v3132_v10 }
 0x2da   :  { %v5274_v56 = vpack.c.bf16 %v4623_v49, %v4616_v1  ;;  %v4497_v13 = vcvt.s32.f32 %v3601_v34  ;;  %v2976_v40 = vperm.slane %v7637_v53, 4  ;;  %v2753_v41 = vadd.f32 %v2752_v54, %v7878_v2 }
 0x2db   :  { %v2991_v42 = vadd.f32 %v2975_v57, %v2966_v16  ;;  %v2846_v6 = vmul.f32 %v2823_v44, %v6873_v36  ;;  %v4602_v29 = vcvt.s32.f32 %v3706_v47  ;;  %v4609_v37 = vcvt.s32.f32 %v3713_v9  ;;  %v2614_v35 = vpop.f32.mrf.mxu1  ;;  %v3035_v44 = vld [vmem:[%s9001_s13 + $0x78] sm:$0xff] }
 0x2dc   :  { %5536 = vmatpush.bf16.msrb.mxu3 %v5218_v27  ;;  %v5211_v14 = vpack.c.bf16 %v4497_v13, %v4490_v0  ;;  %v3580_v26 = vunpack.c.0.s8 %v3104_v60  ;;  %v2754_v63 = vrot.slane %v2753_v41, 2  ;;  %v3587_v57 = vunpack.c.1.s8 %v3104_v60 }
 0x2dd   :  { %vm2999_vm6 = vcmp.gt.f32.partialorder %v2991_v42, 0.0  ;;  %v3007_v38 = vmul.f32 0.2, %v2991_v42  ;;  %v7891_v3 = vadd.f32 1e-05, %v2846_v6  ;;  %5549 = vmatpush.bf16.msra.mxu0 %v5274_v56  ;;  %v5267_v46 = vpack.c.bf16 %v4609_v37, %v4602_v29 }
 0x2de   :  { %v4476_v7 = vcvt.s32.f32 %v3580_v26  ;;  %v3692_v30 = vunpack.c.0.s8 %v3132_v10  ;;  %v2755_v24 = vadd.f32 %v2754_v63, %v2753_v41  ;;  %v7901_v19 = vadd.f32 %v2612_v15, %v7847_v5 }
 0x2df   :  { %v3015_v43 = vsel %vm2999_vm6, %v2991_v42, %v3007_v38  ;;  %6391 = vrsqrt.f32 %v7891_v3  ;;  %v4483_v18 = vcvt.s32.f32 %v3587_v57  ;;  %v3699_v28 = vunpack.c.1.s8 %v3132_v10  ;;  %v3174_v10 = vld [vmem:[%s9001_s13 + $0x4d0] sm:$0xff] }
 0x2e0   :  { %v7903_v33 = vpack.c.bf16 %v3015_v43, %v3015_v43  ;;  %5537 = vmatpush.bf16.msrb.mxu3 %v5211_v14  ;;  %v4588_v52 = vcvt.s32.f32 %v3692_v30  ;;  %v2756_v12 = vrot.slane %v2755_v24, 1  ;;  %v3902_v4 = vunpack.c.2.s8 %v3181_v62 }
 0x2e1   :  { %5550 = vmatpush.bf16.msra.mxu0 %v5267_v46  ;;  %v3909_v60 = vunpack.c.3.s8 %v3181_v62  ;;  %v3343_v25 = vunpack.c.2.s8 %v3042_v51  ;;  %v5204_v8 = vpack.c.bf16 %v4483_v18, %v4476_v7  ;;  %v4595_v23 = vcvt.s32.f32 %v3699_v28 }
 0x2e2   :  { %v3350_v50 = vunpack.c.3.s8 %v3042_v51  ;;  %v3888_v17 = vunpack.c.0.s8 %v3181_v62  ;;  %v2757_v61 = vadd.f32 %v2756_v12, %v2755_v24  ;;  %v4798_v39 = vcvt.s32.f32 %v3902_v4  ;;  %v3167_v12 = vld [vmem:[%s9001_s13 + $0x498] sm:$0xff] }
 0x2e3   :  { %v4805_v22 = vcvt.s32.f32 %v3909_v60  ;;  %v4239_v5 = vcvt.s32.f32 %v3343_v25  ;;  %v5260_v15 = vpack.c.bf16 %v4595_v23, %v4588_v52  ;;  %v3895_v11 = vunpack.c.1.s8 %v3181_v62 }
 0x2e4   :  { %5538 = vmatpush.bf16.msrb.mxu3 %v5204_v8  ;;  %v4246_v58 = vcvt.s32.f32 %v3350_v50  ;;  %v4784_v32 = vcvt.s32.f32 %v3888_v17  ;;  %v2775_v1 = vmul.f32 %v2757_v61, %v6873_v36  ;;  %v3329_v34 = vunpack.c.0.s8 %v3042_v51  ;;  %v3028_v8 = vld [vmem:[%s9001_s13 + $0x40] sm:$0xff] }
 0x2e5   :  { %v7908_v27 = vpop.eup %6391  ;;  %v5365_v49 = vpack.c.bf16 %v4805_v22, %v4798_v39  ;;  %v3336_v16 = vunpack.c.1.s8 %v3042_v51  ;;  %5551 = vmatpush.bf16.msra.mxu0 %v5260_v15  ;;  %v4791_v56 = vcvt.s32.f32 %v3895_v11  ;;  %v3874_v42 = vunpack.c.2.s8 %v3174_v10  ;;  %v7935_v50 = vld [vmem:[%s8999_s11] sm:$0xff] }
 0x2e6   :  { %v2899_v54 = vmul.f32 %v7908_v27, %v7891_v3  ;;  %vm2905_vm7 = vweird.f32 %v7908_v27  ;;  %v5086_v0 = vpack.c.bf16 %v4246_v58, %v4239_v5  ;;  %v7918_v13 = vsub.f32 %v7878_v2, %v2775_v1 }
 0x2e7   :  { %5539 = vmatmul.bf16.vlgmr.msrb.gmra.mxu3 %v7903_v33  ;;  %5557 = vmatpush.bf16.msra.mxu1 %v5365_v49  ;;  %v4225_v47 = vcvt.s32.f32 %v3329_v34  ;;  %v4232_v9 = vcvt.s32.f32 %v3336_v16  ;;  %v5358_v41 = vpack.c.bf16 %v4791_v56, %v4784_v32  ;;  %v3881_v14 = vunpack.c.3.s8 %v3174_v10 }
 0x2e8   :  { %v2900_v6 = vmul.f32 %v7908_v27, %v2899_v54  ;;  %v3315_v29 = vunpack.c.2.s8 %v3035_v44  ;;  %v2791_v37 = vmul.f32 %v7918_v13, %v7918_v13  ;;  %v4770_v35 = vcvt.s32.f32 %v3874_v42 }
 0x2e9   :  { %5596 = vmatpush.bf16.msrb.mxu0 %v5086_v0  ;;  %v5079_v26 = vpack.c.bf16 %v4232_v9, %v4225_v47  ;;  %v3322_v38 = vunpack.c.3.s8 %v3035_v44  ;;  %v4777_v63 = vcvt.s32.f32 %v3881_v14  ;;  %v3860_v57 = vunpack.c.0.s8 %v3174_v10  ;;  %v2625_v7 = vpop.f32.mrf.mxu2 }
 0x2ea   :  { %v2901_v2 = vmul.f32 0.5, %v2900_v6  ;;  %v4211_v46 = vcvt.s32.f32 %v3315_v29  ;;  %v2824_v30 = vrot.slane %v2791_v37, 4  ;;  %v3867_v51 = vunpack.c.1.s8 %v3174_v10 }
 0x2eb   :  { %5558 = vmatpush.bf16.msra.mxu1 %v5358_v41  ;;  %v4218_v62 = vcvt.s32.f32 %v3322_v38  ;;  %v3301_v43 = vunpack.c.0.s8 %v3035_v44  ;;  %v5351_v18 = vpack.c.bf16 %v4777_v63, %v4770_v35  ;;  %v4756_v28 = vcvt.s32.f32 %v3860_v57  ;;  %v3021_v57 = vld [vmem:[%s9001_s13 + $0x8] sm:$0xff] }
 0x2ec   :  { %v2902_v24 = vsub.f32 1.5, %v2901_v2  ;;  %v3308_v52 = vunpack.c.1.s8 %v3035_v44  ;;  %vm2904_vm8 = vweird.f32 %v7891_v3  ;;  %v2825_v4 = vadd.f32 %v2824_v30, %v2791_v37 }
 0x2ed   :  { %5597 = vmatpush.bf16.msrb.mxu0 %v5079_v26  ;;  %v5072_v60 = vpack.c.bf16 %v4218_v62, %v4211_v46  ;;  %v4763_v25 = vcvt.s32.f32 %v3867_v51  ;;  %v2952_v17 = vperm.slane %v7935_v50, 5  ;;  %v4197_v61 = vcvt.s32.f32 %v3301_v43  ;;  %vm2906_vm9 = vmor %vm2904_vm8, %vm2905_vm7 }
 0x2ee   :  { %v2903_v23 = vmul.f32 %v7908_v27, %v2902_v24  ;;  %v4204_v39 = vcvt.s32.f32 %v3308_v52  ;;  %v2826_v3 = vrot.slane %v2825_v4, 2  ;;  %v2626_v5 = vadd.f32 %v2625_v7, %v7901_v19 }
 0x2ef   :  { %5559 = vmatpush.bf16.msra.mxu1 %v5351_v18  ;;  %v5344_v22 = vpack.c.bf16 %v4763_v25, %v4756_v28  ;;  %v3846_v15 = vunpack.c.2.s8 %v3167_v12  ;;  %v3853_v32 = vunpack.c.3.s8 %v3167_v12  ;;  %v3287_v10 = vunpack.c.2.s8 %v3028_v8 }
 0x2f0   :  { %v2907_v58 = vsel %vm2906_vm9, %v7908_v27, %v2903_v23  ;;  %v5065_v11 = vpack.c.bf16 %v4204_v39, %v4197_v61  ;;  %v2827_v49 = vadd.f32 %v2826_v3, %v2825_v4  ;;  %v3294_v16 = vunpack.c.3.s8 %v3028_v8  ;;  %v7967_v23 = vld [vmem:[%s9001_s13 + $0x5e8] sm:$0xff]  ;;  %v7973_v61 = vld [vmem:[%s9000_s12] sm:$0xff] }
 0x2f1   :  { %5598 = vmatpush.bf16.msrb.mxu0 %v5072_v60  ;;  %v2942_v1 = vmul.f32 %v2907_v58, %v7845_v20  ;;  %v4742_v34 = vcvt.s32.f32 %v3846_v15  ;;  %v4749_v44 = vcvt.s32.f32 %v3853_v32  ;;  %v4183_v54 = vcvt.s32.f32 %v3287_v10  ;;  %v2627_v47 = vpop.f32.mrf.mxu2  ;;  %v3160_v20 = vld [vmem:[%s9001_s13 + $0x460] sm:$0xff] }
 0x2f2   :  { %v2702_v0 = vperm.slane %v7794_v31, 6  ;;  %v3832_v56 = vunpack.c.0.s8 %v3167_v12  ;;  %v2828_v9 = vrot.slane %v2827_v49, 1  ;;  %v4190_v27 = vcvt.s32.f32 %v3294_v16  ;;  %v3154_v47 = vld [vmem:[%s9001_s13 + $0x430] sm:$0xff] }
 0x2f3   :  { %v2967_v19 = vmul.f32 %v2951_v59, %v2942_v1  ;;  %5560 = vmatpush.bf16.msra.mxu1 %v5344_v22  ;;  %v3839_v42 = vunpack.c.1.s8 %v3167_v12  ;;  %v5337_v6 = vpack.c.bf16 %v4749_v44, %v4742_v34  ;;  %v3273_v14 = vunpack.c.0.s8 %v3028_v8  ;;  %v2638_v48 = vpop.f32.mrf.mxu3 }
 0x2f4   :  { %v4728_v41 = vcvt.s32.f32 %v3832_v56  ;;  %v3280_v29 = vunpack.c.1.s8 %v3028_v8  ;;  %v2829_v26 = vadd.f32 %v2828_v9, %v2827_v49  ;;  %v5058_v35 = vpack.c.bf16 %v4190_v27, %v4183_v54 }
 0x2f5   :  { %5599 = vmatpush.bf16.msrb.mxu0 %v5065_v11  ;;  %v2992_v37 = vadd.f32 %v2976_v40, %v2967_v19  ;;  %v4735_v59 = vcvt.s32.f32 %v3839_v42  ;;  %v2639_v38 = vadd.f32 %v2638_v48, %v2626_v5  ;;  %v4169_v2 = vcvt.s32.f32 %v3273_v14  ;;  %v3070_v5 = vld [vmem:[%s9001_s13 + $0x190] sm:$0xff] }
 0x2f6   :  { %v4176_v63 = vcvt.s32.f32 %v3280_v29  ;;  %v3818_v46 = vunpack.c.2.s8 %v3160_v20  ;;  %v2847_v30 = vmul.f32 %v2829_v26, %v6873_v36  ;;  %v3825_v51 = vunpack.c.3.s8 %v3160_v20 }
 0x2f7   :  { %vm3000_vm10 = vcmp.gt.f32.partialorder %v2992_v37, 0.0  ;;  %v3008_v7 = vmul.f32 0.2, %v2992_v37  ;;  %5561 = vmatpush.bf16.msra.mxu1 %v5337_v6  ;;  %v5330_v62 = vpack.c.bf16 %v4735_v59, %v4728_v41  ;;  %v7955_v53 = vmul.f32 %v2702_v0, %v2639_v38 }
 0x2f8   :  { %v5051_v40 = vpack.c.bf16 %v4176_v63, %v4169_v2  ;;  %v4714_v43 = vcvt.s32.f32 %v3818_v46  ;;  %v7957_v18 = vadd.f32 1e-05, %v2847_v30  ;;  %v3259_v28 = vunpack.c.2.s8 %v3021_v57 }
 0x2f9   :  { %5600 = vmatpush.bf16.msrb.mxu0 %v5058_v35  ;;  %v3016_v24 = vsel %vm3000_vm10, %v2992_v37, %v3008_v7  ;;  %v3266_v52 = vunpack.c.3.s8 %v3021_v57  ;;  %v2758_v4 = vrot.slane %v7955_v53, 4  ;;  %v7962_v60 = vpop.f32.mrf.mxu0  ;;  %v4721_v25 = vcvt.s32.f32 %v3825_v51 }
 0x2fa   :  { %v7959_v12 = vpack.c.bf16 %v3016_v24, %v3016_v24  ;;  %v3804_v8 = vunpack.c.0.s8 %v3160_v20  ;;  %6393 = vrsqrt.f32 %v7957_v18  ;;  %v2977_v39 = vperm.slane %v7973_v61, 5  ;;  %v7998_v24 = vld [vmem:[%s9001_s13 + $0x5b0] sm:$0xff] }
 0x2fb   :  { %5562 = vmatpush.bf16.msra.mxu1 %v5330_v62  ;;  %v4155_v3 = vcvt.s32.f32 %v3259_v28  ;;  %v4162_v22 = vcvt.s32.f32 %v3266_v52  ;;  %v2759_v15 = vadd.f32 %v2758_v4, %v7955_v53  ;;  %v5323_v58 = vpack.c.bf16 %v4721_v25, %v4714_v43  ;;  %v2640_v1 = vpop.f32.mrf.mxu3 }
 0x2fc   :  { %v3811_v11 = vunpack.c.1.s8 %v3160_v20  ;;  %v4700_v32 = vcvt.s32.f32 %v3804_v8  ;;  %v3245_v49 = vunpack.c.0.s8 %v3021_v57  ;;  %v3252_v34 = vunpack.c.1.s8 %v3021_v57  ;;  %5552 = vmatmul.bf16.vlgmr.msra.gmra.mxu0 %v7959_v12 }
 0x2fd   :  { %5601 = vmatpush.bf16.msrb.mxu0 %v5051_v40  ;;  %v5044_v10 = vpack.c.bf16 %v4162_v22, %v4155_v3  ;;  %v4014_v16 = vunpack.c.2.s8 %v7967_v23  ;;  %v2760_v44 = vrot.slane %v2759_v15, 2  ;;  %v4021_v0 = vunpack.c.3.s8 %v7967_v23 }
 0x2fe   :  { %v4707_v54 = vcvt.s32.f32 %v3811_v11  ;;  %v3455_v56 = vunpack.c.2.s8 %v3070_v5  ;;  %v4141_v19 = vcvt.s32.f32 %v3245_v49  ;;  %v4148_v9 = vcvt.s32.f32 %v3252_v34 }
 0x2ff   :  { %5563 = vmatpush.bf16.msra.mxu1 %v5323_v58  ;;  %v4910_v27 = vcvt.s32.f32 %v4014_v16  ;;  %v3462_v42 = vunpack.c.3.s8 %v3070_v5  ;;  %v2761_v20 = vadd.f32 %v2760_v44, %v2759_v15  ;;  %v4917_v41 = vcvt.s32.f32 %v4021_v0  ;;  %v3147_v16 = vld [vmem:[%s9001_s13 + $0x3f8] sm:$0xff] }
 0x300   :  { %v5316_v6 = vpack.c.bf16 %v4707_v54, %v4700_v32  ;;  %v4351_v14 = vcvt.s32.f32 %v3455_v56  ;;  %v7986_v29 = vpop.eup %6393  ;;  %v5037_v37 = vpack.c.bf16 %v4148_v9, %v4141_v19  ;;  %v3791_v35 = vunpack.c.2.s8 %v3154_v47 }
 0x301   :  { %5602 = vmatpush.bf16.msrb.mxu0 %v5044_v10  ;;  %v4358_v26 = vcvt.s32.f32 %v3462_v42  ;;  %v3798_v48 = vunpack.c.3.s8 %v3154_v47  ;;  %v2909_v59 = vmul.f32 %v7986_v29, %v7957_v18  ;;  %vm2914_vm11 = vweird.f32 %v7957_v18  ;;  %v2653_v2 = vpop.f32.mrf.mxu0  ;;  %v3063_v10 = vld [vmem:[%s9001_s13 + $0x158] sm:$0xff] }
 0x302   :  { %v2762_v38 = vrot.slane %v2761_v20, 1  ;;  %v5421_v63 = vpack.c.bf16 %v4917_v41, %v4910_v27  ;;  %v2664_v46 = vpop.f32.mrf.mxu1  ;;  %v4687_v7 = vcvt.s32.f32 %v3791_v35  ;;  %v4000_v62 = vunpack.c.0.s8 %v7967_v23 }
 0x303   :  { %5564 = vmatpush.bf16.msra.mxu1 %v5316_v6  ;;  %v5142_v57 = vpack.c.bf16 %v4358_v26, %v4351_v14  ;;  %v4694_v30 = vcvt.s32.f32 %v3798_v48  ;;  %v2910_v40 = vmul.f32 %v7986_v29, %v2909_v59  ;;  %vm2915_vm12 = vweird.f32 %v7986_v29 }
 0x304   :  { %v2763_v51 = vadd.f32 %v2762_v38, %v2761_v20  ;;  %5570 = vmatpush.bf16.msra.mxu2 %v5421_v63  ;;  %v4007_v43 = vunpack.c.1.s8 %v7967_v23  ;;  %v4896_v52 = vcvt.s32.f32 %v4000_v62  ;;  %v3441_v4 = vunpack.c.0.s8 %v3070_v5  ;;  %vm2916_vm13 = vmor %vm2914_vm11, %vm2915_vm12 }
 0x305   :  { %5603 = vmatpush.bf16.msrb.mxu0 %v5037_v37  ;;  %v5310_v28 = vpack.c.bf16 %v4694_v30, %v4687_v7  ;;  %v3448_v25 = vunpack.c.1.s8 %v3070_v5  ;;  %v2911_v8 = vmul.f32 0.5, %v2910_v40  ;;  %v3777_v15 = vunpack.c.0.s8 %v3154_v47  ;;  %v3195_v40 = vld [vmem:[%s9001_s13 + $0x578] sm:$0xff] }
 0x306   :  { %v2776_v3 = vmul.f32 %v2763_v51, %v6873_v36  ;;  %v4903_v22 = vcvt.s32.f32 %v4007_v43  ;;  %v4337_v58 = vcvt.s32.f32 %v3441_v4  ;;  %v3784_v32 = vunpack.c.1.s8 %v3154_v47 }
 0x307   :  { %5609 = vmatpush.bf16.msrb.mxu1 %v5142_v57  ;;  %v4344_v11 = vcvt.s32.f32 %v3448_v25  ;;  %v3986_v23 = vunpack.c.2.s8 %v7998_v24  ;;  %v2912_v1 = vsub.f32 1.5, %v2911_v8  ;;  %v4673_v34 = vcvt.s32.f32 %v3777_v15 }
 0x308   :  { %v8006_v49 = vsub.f32 %v7955_v53, %v2776_v3  ;;  %v5414_v5 = vpack.c.bf16 %v4903_v22, %v4896_v52  ;;  %v4680_v54 = vcvt.s32.f32 %v3784_v32  ;;  %v3993_v0 = vunpack.c.3.s8 %v7998_v24  ;;  %v3056_v22 = vld [vmem:[%s9001_s13 + $0x120] sm:$0xff] }
 0x309   :  { %5648 = vmatpush.bf16.msra.mxu0 %v5310_v28  ;;  %v5135_v44 = vpack.c.bf16 %v4344_v11, %v4337_v58  ;;  %v4882_v56 = vcvt.s32.f32 %v3986_v23  ;;  %v2913_v47 = vmul.f32 %v7986_v29, %v2912_v1  ;;  %v3427_v9 = vunpack.c.2.s8 %v3063_v10  ;;  %v3140_v1 = vld [vmem:[%s9001_s13 + $0x3c0] sm:$0xff] }
 0x30a   :  { %v2792_v19 = vmul.f32 %v8006_v49, %v8006_v49  ;;  %5571 = vmatpush.bf16.msra.mxu2 %v5414_v5  ;;  %v3434_v53 = vunpack.c.3.s8 %v3063_v10  ;;  %v5303_v27 = vpack.c.bf16 %v4680_v54, %v4673_v34  ;;  %v2666_v42 = vpop.f32.mrf.mxu1  ;;  %v4889_v20 = vcvt.s32.f32 %v3993_v0 }
 0x30b   :  { %5610 = vmatpush.bf16.msrb.mxu1 %v5135_v44  ;;  %v3763_v6 = vunpack.c.2.s8 %v3147_v16  ;;  %v3770_v41 = vunpack.c.3.s8 %v3147_v16  ;;  %v2917_v14 = vsel %vm2916_vm13, %v7986_v29, %v2913_v47  ;;  %v4323_v26 = vcvt.s32.f32 %v3427_v9 }
 0x30c   :  { %v2830_v37 = vrot.slane %v2792_v19, 4  ;;  %v4330_v35 = vcvt.s32.f32 %v3434_v53  ;;  %v2943_v48 = vmul.f32 %v2917_v14, %v7918_v13  ;;  %v5407_v59 = vpack.c.bf16 %v4889_v20, %v4882_v56  ;;  %5604 = vmatmul.bf16.vlgmr.msrb.gmra.mxu0 %v7708_v45 }
 0x30d   :  { %5649 = vmatpush.bf16.msra.mxu0 %v5303_v27  ;;  %v4659_v38 = vcvt.s32.f32 %v3763_v6  ;;  %v4666_v2 = vcvt.s32.f32 %v3770_v41  ;;  %v2665_v18 = vadd.f32 %v2664_v46, %v7962_v60  ;;  %v3972_v7 = vunpack.c.0.s8 %v7998_v24 }
 0x30e   :  { %v2831_v63 = vadd.f32 %v2830_v37, %v2792_v19  ;;  %v5128_v57 = vpack.c.bf16 %v4330_v35, %v4323_v26  ;;  %v2968_v29 = vmul.f32 %v2952_v17, %v2943_v48  ;;  %5572 = vmatpush.bf16.msra.mxu2 %v5407_v59  ;;  %v3979_v62 = vunpack.c.1.s8 %v7998_v24 }
 0x30f   :  { %v5296_v30 = vpack.c.bf16 %v4666_v2, %v4659_v38  ;;  %v3413_v13 = vunpack.c.0.s8 %v3063_v10  ;;  %v2953_v60 = vperm.slane %v7935_v50, 6  ;;  %v4868_v46 = vcvt.s32.f32 %v3972_v7 }
 0x310   :  { %v2832_v51 = vrot.slane %v2831_v63, 2  ;;  %5611 = vmatpush.bf16.msrb.mxu1 %v5128_v57  ;;  %v3420_v43 = vunpack.c.1.s8 %v3063_v10  ;;  %v2993_v28 = vadd.f32 %v2977_v39, %v2968_v29  ;;  %v4875_v17 = vcvt.s32.f32 %v3979_v62  ;;  %v3049_v62 = vld [vmem:[%s9001_s13 + $0xe8] sm:$0xff] }
 0x311   :  { %5650 = vmatpush.bf16.msra.mxu0 %v5296_v30  ;;  %v4309_v52 = vcvt.s32.f32 %v3413_v13  ;;  %v3749_v4 = vunpack.c.0.s8 %v3147_v16  ;;  %v3756_v8 = vunpack.c.1.s8 %v3147_v16  ;;  %v3958_v3 = vunpack.c.2.s8 %v3195_v40 }
 0x312   :  { %v2833_v25 = vadd.f32 %v2832_v51, %v2831_v63  ;;  %v4316_v24 = vcvt.s32.f32 %v3420_v43  ;;  %vm3001_vm14 = vcmp.gt.f32.partialorder %v2993_v28, 0.0  ;;  %v3009_v15 = vmul.f32 0.2, %v2993_v28 }
 0x313   :  { %v5400_v58 = vpack.c.bf16 %v4875_v17, %v4868_v46  ;;  %v4645_v11 = vcvt.s32.f32 %v3749_v4  ;;  %v4652_v10 = vcvt.s32.f32 %v3756_v8  ;;  %v3965_v39 = vunpack.c.3.s8 %v3195_v40  ;;  %v3133_v46 = vld [vmem:[%s9001_s13 + $0x388] sm:$0xff] }
 0x314   :  { %v2834_v32 = vrot.slane %v2833_v25, 1  ;;  %v5121_v23 = vpack.c.bf16 %v4316_v24, %v4309_v52  ;;  %v3017_v5 = vsel %vm3001_vm14, %v2993_v28, %v3009_v15  ;;  %v2677_v34 = vpop.f32.mrf.mxu2  ;;  %v4854_v16 = vcvt.s32.f32 %v3958_v3 }
 0x315   :  { %5573 = vmatpush.bf16.msra.mxu2 %v5400_v58  ;;  %v3399_v44 = vunpack.c.2.s8 %v3056_v22  ;;  %v3406_v54 = vunpack.c.3.s8 %v3056_v22  ;;  %v8039_v0 = vpack.c.bf16 %v3017_v5, %v3017_v5  ;;  %v2978_v47 = vperm.slane %v7973_v61, 6 }
 0x316   :  { %v2835_v56 = vadd.f32 %v2834_v32, %v2833_v25  ;;  %5612 = vmatpush.bf16.msrb.mxu1 %v5121_v23  ;;  %v5289_v19 = vpack.c.bf16 %v4652_v10, %v4645_v11  ;;  %v4861_v9 = vcvt.s32.f32 %v3965_v39  ;;  %v3735_v42 = vunpack.c.2.s8 %v3140_v1 }
 0x317   :  { %v4295_v53 = vcvt.s32.f32 %v3399_v44  ;;  %v4302_v27 = vcvt.s32.f32 %v3406_v54  ;;  %v2678_v6 = vadd.f32 %v2677_v34, %v2665_v18  ;;  %v3742_v41 = vunpack.c.3.s8 %v3140_v1  ;;  %5565 = vmatmul.bf16.vlgmr.msra.gmra.mxu1 %v8039_v0  ;;  %v3188_v18 = vld [vmem:[%s9001_s13 + $0x540] sm:$0xff] }
 0x318   :  { %v2848_v20 = vmul.f32 %v2835_v56, %v6873_v36  ;;  %5651 = vmatpush.bf16.msra.mxu0 %v5289_v19  ;;  %v3944_v14 = vunpack.c.0.s8 %v3195_v40  ;;  %v5393_v37 = vpack.c.bf16 %v4861_v9, %v4854_v16  ;;  %v4631_v35 = vcvt.s32.f32 %v3735_v42 }
 0x319   :  { %v5114_v26 = vpack.c.bf16 %v4302_v27, %v4295_v53  ;;  %v3951_v48 = vunpack.c.1.s8 %v3195_v40  ;;  %v4638_v38 = vcvt.s32.f32 %v3742_v41  ;;  %v3385_v63 = vunpack.c.0.s8 %v3056_v22 }
 0x31a   :  { %v8044_v59 = vadd.f32 1e-05, %v2848_v20  ;;  %v4840_v2 = vcvt.s32.f32 %v3944_v14  ;;  %5574 = vmatpush.bf16.msra.mxu2 %v5393_v37  ;;  %v3392_v7 = vunpack.c.1.s8 %v3056_v22  ;;  %v3721_v29 = vunpack.c.0.s8 %v3140_v1  ;;  %v8069_v20 = vld [vmem:[%s9001_s13 + $0x6c8] sm:$0xff] }
 0x31b   :  { %5613 = vmatpush.bf16.msrb.mxu1 %v5114_v26  ;;  %v4847_v57 = vcvt.s32.f32 %v3951_v48  ;;  %v3728_v30 = vunpack.c.1.s8 %v3140_v1  ;;  %v5282_v13 = vpack.c.bf16 %v4638_v38, %v4631_v35  ;;  %v2703_v40 = vperm.slane %v7794_v31, 7 }
 0x31c   :  { %6395 = vrsqrt.f32 %v8044_v59  ;;  %v4281_v51 = vcvt.s32.f32 %v3385_v63  ;;  %v4288_v28 = vcvt.s32.f32 %v3392_v7  ;;  %v4617_v17 = vcvt.s32.f32 %v3721_v29  ;;  %v2679_v4 = vpop.f32.mrf.mxu2 }
 0x31d   :  { %v5386_v43 = vpack.c.bf16 %v4847_v57, %v4840_v2  ;;  %v4624_v52 = vcvt.s32.f32 %v3728_v30  ;;  %5652 = vmatpush.bf16.msra.mxu0 %v5282_v13  ;;  %v2690_v25 = vpop.f32.mrf.mxu3  ;;  %v3930_v24 = vunpack.c.2.s8 %v3188_v18  ;;  %v3937_v8 = vunpack.c.3.s8 %v3188_v18  ;;  %v8076_v2 = vld [vmem:[%s9001_s13 + $0x270] sm:$0xff] }
 0x31e   :  { %v3371_v3 = vunpack.c.2.s8 %v3049_v62  ;;  %v3378_v22 = vunpack.c.3.s8 %v3049_v62  ;;  %v2691_v15 = vadd.f32 %v2690_v25, %v2678_v6  ;;  %v5107_v58 = vpack.c.bf16 %v4288_v28, %v4281_v51  ;;  %v3182_v51 = vld [vmem:[%s9001_s13 + $0x510] sm:$0xff] }
 0x31f   :  { %5575 = vmatpush.bf16.msra.mxu2 %v5386_v43  ;;  %v5275_v31 = vpack.c.bf16 %v4624_v52, %v4617_v17  ;;  %v3707_v11 = vunpack.c.2.s8 %v3133_v46  ;;  %v4826_v32 = vcvt.s32.f32 %v3930_v24  ;;  %v4833_v23 = vcvt.s32.f32 %v3937_v8  ;;  %v3043_v8 = vld [vmem:[%s9001_s13 + $0xb8] sm:$0xff] }
 0x320   :  { %v4267_v10 = vcvt.s32.f32 %v3371_v3  ;;  %v4274_v39 = vcvt.s32.f32 %v3378_v22  ;;  %v8057_v1 = vmul.f32 %v2703_v40, %v2691_v15  ;;  %5614 = vmatpush.bf16.msrb.mxu1 %v5107_v58  ;;  %v3714_v5 = vunpack.c.3.s8 %v3133_v46 }
 0x321   :  { %v4603_v34 = vcvt.s32.f32 %v3707_v11  ;;  %v3916_v16 = vunpack.c.0.s8 %v3188_v18  ;;  %5653 = vmatpush.bf16.msra.mxu0 %v5275_v31  ;;  %v5379_v54 = vpack.c.bf16 %v4833_v23, %v4826_v32  ;;  %v3923_v19 = vunpack.c.1.s8 %v3188_v18 }
 0x322   :  { %v8059_v44 = vpop.eup %6395  ;;  %v5100_v56 = vpack.c.bf16 %v4274_v39, %v4267_v10  ;;  %v3357_v9 = vunpack.c.0.s8 %v3049_v62  ;;  %vm2924_vm15 = vweird.f32 %v8044_v59  ;;  %v2764_v27 = vrot.slane %v8057_v1, 4 }
 0x323   :  { %v2919_v53 = vmul.f32 %v8059_v44, %v8044_v59  ;;  %vm2925_vm0 = vweird.f32 %v8059_v44  ;;  %v4610_v42 = vcvt.s32.f32 %v3714_v5  ;;  %5576 = vmatpush.bf16.msra.mxu2 %v5379_v54  ;;  %v4812_v6 = vcvt.s32.f32 %v3916_v16 }
 0x324   :  { %v4819_v41 = vcvt.s32.f32 %v3923_v19  ;;  %v3364_v14 = vunpack.c.1.s8 %v3049_v62  ;;  %v4253_v37 = vcvt.s32.f32 %v3357_v9  ;;  %v2765_v35 = vadd.f32 %v2764_v27, %v8057_v1  ;;  %5615 = vmatpush.bf16.msrb.mxu1 %v5100_v56  ;;  %vm2926_vm1 = vmor %vm2924_vm15, %vm2925_vm0 }
 0x325   :  { %v2920_v26 = vmul.f32 %v8059_v44, %v2919_v53  ;;  %v5268_v48 = vpack.c.bf16 %v4610_v42, %v4603_v34  ;;  %v3693_v38 = vunpack.c.0.s8 %v3133_v46  ;;  %v2692_v63 = vpop.f32.mrf.mxu3  ;;  %v3700_v29 = vunpack.c.1.s8 %v3133_v46 }
 0x326   :  { %v5372_v57 = vpack.c.bf16 %v4819_v41, %v4812_v6  ;;  %v4260_v7 = vcvt.s32.f32 %v3364_v14  ;;  %v4126_v30 = vunpack.c.2.s8 %v8069_v20  ;;  %v2766_v62 = vrot.slane %v2765_v35, 2 }
 0x327   :  { %v2921_v18 = vmul.f32 0.5, %v2920_v26  ;;  %5654 = vmatpush.bf16.msra.mxu0 %v5268_v48  ;;  %v4589_v13 = vcvt.s32.f32 %v3693_v38  ;;  %v4133_v40 = vunpack.c.3.s8 %v8069_v20  ;;  %v4596_v28 = vcvt.s32.f32 %v3700_v29 }
 0x328   :  { %5577 = vmatpush.bf16.msra.mxu2 %v5372_v57  ;;  %v5093_v43 = vpack.c.bf16 %v4260_v7, %v4253_v37  ;;  %v5022_v17 = vcvt.s32.f32 %v4126_v30  ;;  %v3567_v52 = vunpack.c.2.s8 %v8076_v2  ;;  %v2767_v46 = vadd.f32 %v2766_v62, %v2765_v35 }
 0x329   :  { %v2922_v4 = vsub.f32 1.5, %v2921_v18  ;;  %v5029_v25 = vcvt.s32.f32 %v4133_v40  ;;  %v3574_v24 = vunpack.c.3.s8 %v8076_v2  ;;  %v5261_v3 = vpack.c.bf16 %v4596_v28, %v4589_v13  ;;  %v3091_v13 = vld [vmem:[%s9001_s13 + $0x238] sm:$0xff] }
 0x32a   :  { %5616 = vmatpush.bf16.msrb.mxu1 %v5093_v43  ;;  %v4463_v22 = vcvt.s32.f32 %v3567_v52  ;;  %v3903_v15 = vunpack.c.2.s8 %v3182_v51  ;;  %v3910_v58 = vunpack.c.3.s8 %v3182_v51  ;;  %v2768_v11 = vrot.slane %v2767_v46, 1 }
 0x32b   :  { %v2923_v31 = vmul.f32 %v8059_v44, %v2922_v4  ;;  %v5477_v32 = vpack.c.bf16 %v5029_v25, %v5022_v17  ;;  %v4470_v23 = vcvt.s32.f32 %v3574_v24  ;;  %5655 = vmatpush.bf16.msra.mxu0 %v5261_v3  ;;  %v3344_v5 = vunpack.c.2.s8 %v3043_v8 }
 0x32c   :  { %v4799_v10 = vcvt.s32.f32 %v3903_v15  ;;  %v4806_v39 = vcvt.s32.f32 %v3910_v58  ;;  %v3351_v34 = vunpack.c.3.s8 %v3043_v8  ;;  %v2769_v54 = vadd.f32 %v2768_v11, %v2767_v46  ;;  %v3036_v58 = vld [vmem:[%s9001_s13 + $0x80] sm:$0xff] }
 0x32d   :  { %v2927_v16 = vsel %vm2926_vm1, %v8059_v44, %v2923_v31  ;;  %5583 = vmatpush.bf16.msra.mxu3 %v5477_v32  ;;  %v5198_v56 = vpack.c.bf16 %v4470_v23, %v4463_v22  ;;  %v4112_v19 = vunpack.c.0.s8 %v8069_v20  ;;  %5617 = vmatmul.bf16.vlgmr.msrb.gmra.mxu1 %v7782_v55  ;;  %v4240_v27 = vcvt.s32.f32 %v3344_v5 }
 0x32e   :  { %v2944_v9 = vmul.f32 %v2927_v16, %v8006_v49  ;;  %v5366_v53 = vpack.c.bf16 %v4806_v39, %v4799_v10  ;;  %v4247_v59 = vcvt.s32.f32 %v3351_v34  ;;  %v2777_v42 = vmul.f32 %v2769_v54, %v6873_v36  ;;  %5656 = vmatmul.bf16.vlgmr.msra.gmra.mxu0 %v7959_v12  ;;  %v8101_v14 = vpop.f32.mrf.mxu0 }
 0x32f   :  { %5622 = vmatpush.bf16.msrb.mxu2 %v5198_v56  ;;  %v4119_v6 = vunpack.c.1.s8 %v8069_v20  ;;  %v5008_v44 = vcvt.s32.f32 %v4112_v19  ;;  %v3553_v41 = vunpack.c.0.s8 %v8076_v2  ;;  %v3560_v26 = vunpack.c.1.s8 %v8076_v2 }
 0x330   :  { %v2969_v37 = vmul.f32 %v2953_v60, %v2944_v9  ;;  %5661 = vmatpush.bf16.msra.mxu1 %v5366_v53  ;;  %v5087_v49 = vpack.c.bf16 %v4247_v59, %v4240_v27  ;;  %v3889_v35 = vunpack.c.0.s8 %v3182_v51  ;;  %v8107_v48 = vsub.f32 %v8057_v1, %v2777_v42  ;;  %v3230_v60 = vld [vmem:[%s9001_s13 + $0x690] sm:$0xff] }
 0x331   :  { %v5015_v38 = vcvt.s32.f32 %v4119_v6  ;;  %v4449_v63 = vcvt.s32.f32 %v3553_v41  ;;  %v3896_v57 = vunpack.c.1.s8 %v3182_v51  ;;  %v4456_v7 = vcvt.s32.f32 %v3560_v26 }
 0x332   :  { %v2994_v20 = vadd.f32 %v2978_v47, %v2969_v37  ;;  %5700 = vmatpush.bf16.msrb.mxu0 %v5087_v49  ;;  %v4785_v29 = vcvt.s32.f32 %v3889_v35  ;;  %v3330_v30 = vunpack.c.0.s8 %v3043_v8  ;;  %v2793_v2 = vmul.f32 %v8107_v48, %v8107_v48 }
 0x333   :  { %v5470_v18 = vpack.c.bf16 %v5015_v38, %v5008_v44  ;;  %v4792_v1 = vcvt.s32.f32 %v3896_v57  ;;  %v3337_v62 = vunpack.c.1.s8 %v3043_v8  ;;  %v5191_v40 = vpack.c.bf16 %v4456_v7, %v4449_v63  ;;  %v3175_v8 = vld [vmem:[%s9001_s13 + $0x4d8] sm:$0xff] }
 0x334   :  { %vm3002_vm2 = vcmp.gt.f32.partialorder %v2994_v20, 0.0  ;;  %v3010_v47 = vmul.f32 0.2, %v2994_v20  ;;  %v4226_v51 = vcvt.s32.f32 %v3330_v30  ;;  %v2836_v43 = vrot.slane %v2793_v2, 4  ;;  %v3223_v57 = vld [vmem:[%s9001_s13 + $0x658] sm:$0xff] }
 0x335   :  { %5584 = vmatpush.bf16.msra.mxu3 %v5470_v18  ;;  %v5359_v28 = vpack.c.bf16 %v4792_v1, %v4785_v29  ;;  %v4233_v17 = vcvt.s32.f32 %v3337_v62  ;;  %v4098_v52 = vunpack.c.2.s8 %v3230_v60  ;;  %5623 = vmatpush.bf16.msrb.mxu2 %v5191_v40  ;;  %v4105_v46 = vunpack.c.3.s8 %v3230_v60  ;;  %v3084_v62 = vld [vmem:[%s9001_s13 + $0x200] sm:$0xff] }
 0x336   :  { %v3018_v4 = vsel %vm3002_vm2, %v2994_v20, %v3010_v47  ;;  %v3539_v25 = vunpack.c.2.s8 %v3091_v13  ;;  %v3546_v24 = vunpack.c.3.s8 %v3091_v13  ;;  %v2837_v22 = vadd.f32 %v2836_v43, %v2793_v2  ;;  %v5503_v31 = vpop.f32.mrf.mxu0  ;;  %v3168_v43 = vld [vmem:[%s9001_s13 + $0x4a0] sm:$0xff] }
 0x337   :  { %v8122_v3 = vpack.c.bf16 %v3018_v4, %v3018_v4  ;;  %5662 = vmatpush.bf16.msra.mxu1 %v5359_v28  ;;  %v5080_v15 = vpack.c.bf16 %v4233_v17, %v4226_v51  ;;  %v4994_v11 = vcvt.s32.f32 %v4098_v52  ;;  %v5001_v32 = vcvt.s32.f32 %v4105_v46 }
 0x338   :  { %v4435_v23 = vcvt.s32.f32 %v3539_v25  ;;  %v4442_v10 = vcvt.s32.f32 %v3546_v24  ;;  %v2838_v39 = vrot.slane %v2837_v22, 2  ;;  %v2954_v5 = vperm.slane %v7935_v50, 7 }
 0x339   :  { %5701 = vmatpush.bf16.msrb.mxu0 %v5080_v15  ;;  %v3875_v34 = vunpack.c.2.s8 %v3175_v8  ;;  %v3882_v16 = vunpack.c.3.s8 %v3175_v8  ;;  %5578 = vmatmul.bf16.vlgmr.msra.gmra.mxu2 %v8122_v3  ;;  %v5463_v54 = vpack.c.bf16 %v5001_v32, %v4994_v11  ;;  %v3316_v19 = vunpack.c.2.s8 %v3036_v58  ;;  %v3029_v11 = vld [vmem:[%s9001_s13 + $0x48] sm:$0xff] }
 0x33a   :  { %v5184_v56 = vpack.c.bf16 %v4442_v10, %v4435_v23  ;;  %v3323_v9 = vunpack.c.3.s8 %v3036_v58  ;;  %v2839_v53 = vadd.f32 %v2838_v39, %v2837_v22  ;;  %v4084_v42 = vunpack.c.0.s8 %v3230_v60 }
 0x33b   :  { %v4771_v27 = vcvt.s32.f32 %v3875_v34  ;;  %v4778_v59 = vcvt.s32.f32 %v3882_v16  ;;  %5585 = vmatpush.bf16.msra.mxu3 %v5463_v54  ;;  %v4212_v6 = vcvt.s32.f32 %v3316_v19  ;;  %v4091_v41 = vunpack.c.1.s8 %v3230_v60 }
 0x33c   :  { %5624 = vmatpush.bf16.msrb.mxu2 %v5184_v56  ;;  %v4219_v44 = vcvt.s32.f32 %v3323_v9  ;;  %v3525_v37 = vunpack.c.0.s8 %v3091_v13  ;;  %v8129_v49 = vpop.f32.mrf.mxu1  ;;  %v2840_v26 = vrot.slane %v2839_v53, 1  ;;  %v4980_v38 = vcvt.s32.f32 %v4084_v42 }
 0x33d   :  { %v5352_v35 = vpack.c.bf16 %v4778_v59, %v4771_v27  ;;  %v3532_v63 = vunpack.c.1.s8 %v3091_v13  ;;  %v4987_v7 = vcvt.s32.f32 %v4091_v41  ;;  %v3861_v30 = vunpack.c.0.s8 %v3175_v8 }
 0x33e   :  { %v5073_v20 = vpack.c.bf16 %v4219_v44, %v4212_v6  ;;  %v4421_v29 = vcvt.s32.f32 %v3525_v37  ;;  %v2841_v2 = vadd.f32 %v2840_v26, %v2839_v53  ;;  %v3868_v1 = vunpack.c.1.s8 %v3175_v8 }
 0x33f   :  { %5663 = vmatpush.bf16.msra.mxu1 %v5352_v35  ;;  %v4428_v18 = vcvt.s32.f32 %v3532_v63  ;;  %v3302_v60 = vunpack.c.0.s8 %v3036_v58  ;;  %v5456_v47 = vpack.c.bf16 %v4987_v7, %v4980_v38  ;;  %v4757_v13 = vcvt.s32.f32 %v3861_v30 }
 0x340   :  { %5702 = vmatpush.bf16.msrb.mxu0 %v5073_v20  ;;  %v3309_v40 = vunpack.c.1.s8 %v3036_v58  ;;  %v4070_v51 = vunpack.c.2.s8 %v3223_v57  ;;  %v2849_v28 = vmul.f32 %v2841_v2, %v6873_v36  ;;  %v4764_v52 = vcvt.s32.f32 %v3868_v1 }
 0x341   :  { %v5177_v17 = vpack.c.bf16 %v4428_v18, %v4421_v29  ;;  %v4198_v4 = vcvt.s32.f32 %v3302_v60  ;;  %5586 = vmatpush.bf16.msra.mxu3 %v5456_v47  ;;  %v4077_v25 = vunpack.c.3.s8 %v3223_v57  ;;  %v3511_v8 = vunpack.c.2.s8 %v3084_v62 }
 0x342   :  { %v4205_v46 = vcvt.s32.f32 %v3309_v40  ;;  %v4966_v24 = vcvt.s32.f32 %v4070_v51  ;;  %v8141_v22 = vadd.f32 1e-05, %v2849_v28  ;;  %v5345_v15 = vpack.c.bf16 %v4764_v52, %v4757_v13  ;;  %v3077_v13 = vld [vmem:[%s9001_s13 + $0x1c8] sm:$0xff] }
 0x343   :  { %5625 = vmatpush.bf16.msrb.mxu2 %v5177_v17  ;;  %v3518_v58 = vunpack.c.3.s8 %v3084_v62  ;;  %v3847_v31 = vunpack.c.2.s8 %v3168_v43  ;;  %v4973_v36 = vcvt.s32.f32 %v4077_v25  ;;  %v4407_v23 = vcvt.s32.f32 %v3511_v8  ;;  %v3161_v28 = vld [vmem:[%s9001_s13 + $0x468] sm:$0xff]  ;;  %v3022_v8 = vld [vmem:[%s9001_s13 + $0x10] sm:$0xff] }
 0x344   :  { %v5066_v32 = vpack.c.bf16 %v4205_v46, %v4198_v4  ;;  %v3854_v10 = vunpack.c.3.s8 %v3168_v43  ;;  %v5516_v39 = vpop.f32.mrf.mxu1  ;;  %6397 = vrsqrt.f32 %v8141_v22  ;;  %v2979_v34 = vperm.slane %v7973_v61, 7  ;;  %5664 = vmatpush.bf16.msra.mxu1 %v5345_v15 }
 0x345   :  { %v4414_v16 = vcvt.s32.f32 %v3518_v58  ;;  %v4743_v54 = vcvt.s32.f32 %v3847_v31  ;;  %v5449_v56 = vpack.c.bf16 %v4973_v36, %v4966_v24  ;;  %v3288_v9 = vunpack.c.2.s8 %v3029_v11 }
 0x346   :  { %5703 = vmatpush.bf16.msrb.mxu0 %v5066_v32  ;;  %v4750_v19 = vcvt.s32.f32 %v3854_v10  ;;  %v3295_v53 = vunpack.c.3.s8 %v3029_v11  ;;  %v4056_v59 = vunpack.c.0.s8 %v3223_v57  ;;  %v4063_v42 = vunpack.c.1.s8 %v3223_v57  ;;  %v3216_v57 = vld [vmem:[%s9001_s13 + $0x620] sm:$0xff] }
 0x347   :  { %v5170_v27 = vpack.c.bf16 %v4414_v16, %v4407_v23  ;;  %v3497_v6 = vunpack.c.0.s8 %v3084_v62  ;;  %5587 = vmatpush.bf16.msra.mxu3 %v5449_v56  ;;  %v4184_v41 = vcvt.s32.f32 %v3288_v9  ;;  %v3504_v26 = vunpack.c.1.s8 %v3084_v62 }
 0x348   :  { %v5338_v44 = vpack.c.bf16 %v4750_v19, %v4743_v54  ;;  %v4191_v37 = vcvt.s32.f32 %v3295_v53  ;;  %v4952_v35 = vcvt.s32.f32 %v4056_v59  ;;  %v4959_v38 = vcvt.s32.f32 %v4063_v42 }
 0x349   :  { %5626 = vmatpush.bf16.msrb.mxu2 %v5170_v27  ;;  %v4393_v63 = vcvt.s32.f32 %v3497_v6  ;;  %v3833_v20 = vunpack.c.0.s8 %v3168_v43  ;;  %v4400_v29 = vcvt.s32.f32 %v3504_v26  ;;  %v3840_v30 = vunpack.c.1.s8 %v3168_v43 }
 0x34a   :  { %5665 = vmatpush.bf16.msra.mxu1 %v5338_v44  ;;  %v5059_v7 = vpack.c.bf16 %v4191_v37, %v4184_v41  ;;  %v3274_v2 = vunpack.c.0.s8 %v3029_v11  ;;  %v8151_v18 = vpop.eup %6397  ;;  %v5442_v1 = vpack.c.bf16 %v4959_v38, %v4952_v35  ;;  %v3281_v47 = vunpack.c.1.s8 %v3029_v11 }
 0x34b   :  { %v4729_v60 = vcvt.s32.f32 %v3833_v20  ;;  %v8155_v62 = vadd.f32 %v8129_v49, %v8101_v14  ;;  %v2929_v40 = vmul.f32 %v8151_v18, %v8141_v22  ;;  %vm2934_vm3 = vweird.f32 %v8141_v22 }
 0x34c   :  { %vm2935_vm4 = vweird.f32 %v8151_v18  ;;  %5704 = vmatpush.bf16.msrb.mxu0 %v5059_v7  ;;  %v5163_v51 = vpack.c.bf16 %v4400_v29, %v4393_v63  ;;  %v4736_v43 = vcvt.s32.f32 %v3840_v30  ;;  %5588 = vmatpush.bf16.msra.mxu3 %v5442_v1  ;;  %v4170_v14 = vcvt.s32.f32 %v3274_v2  ;;  %v3126_v30 = vld [vmem:[%s9001_s13 + $0x350] sm:$0xff] }
 0x34d   :  { %v4177_v49 = vcvt.s32.f32 %v3281_v47  ;;  %v4042_v17 = vunpack.c.2.s8 %v3216_v57  ;;  %v4049_v52 = vunpack.c.3.s8 %v3216_v57  ;;  %v2930_v4 = vmul.f32 %v8151_v18, %v2929_v40  ;;  %vm2936_vm5 = vmor %vm2934_vm3, %vm2935_vm4  ;;  %v3210_v47 = vld [vmem:[%s9001_s13 + $0x5f0] sm:$0xff] }
 0x34e   :  { %5627 = vmatpush.bf16.msrb.mxu2 %v5163_v51  ;;  %v5331_v46 = vpack.c.bf16 %v4736_v43, %v4729_v60  ;;  %v3483_v25 = vunpack.c.2.s8 %v3077_v13  ;;  %v3490_v24 = vunpack.c.3.s8 %v3077_v13  ;;  %v3819_v11 = vunpack.c.2.s8 %v3161_v28  ;;  %v8189_v43 = vld [vmem:[%s9001_s13 + $0x198] sm:$0xff] }
 0x34f   :  { %v5052_v15 = vpack.c.bf16 %v4177_v49, %v4170_v14  ;;  %v4938_v58 = vcvt.s32.f32 %v4042_v17  ;;  %v4945_v31 = vcvt.s32.f32 %v4049_v52  ;;  %v2931_v32 = vmul.f32 0.5, %v2930_v4 }
 0x350   :  { %5666 = vmatpush.bf16.msra.mxu1 %v5331_v46  ;;  %v4379_v36 = vcvt.s32.f32 %v3483_v25  ;;  %v4386_v23 = vcvt.s32.f32 %v3490_v24  ;;  %v3826_v10 = vunpack.c.3.s8 %v3161_v28  ;;  %v4715_v16 = vcvt.s32.f32 %v3819_v11  ;;  %v3155_v46 = vld [vmem:[%s9001_s13 + $0x438] sm:$0xff] }
 0x351   :  { %5705 = vmatpush.bf16.msrb.mxu0 %v5052_v15  ;;  %v5435_v39 = vpack.c.bf16 %v4945_v31, %v4938_v58  ;;  %v3260_v54 = vunpack.c.2.s8 %v3022_v8  ;;  %v3267_v56 = vunpack.c.3.s8 %v3022_v8  ;;  %v2932_v19 = vsub.f32 1.5, %v2931_v32 }
 0x352   :  { %v5156_v9 = vpack.c.bf16 %v4386_v23, %v4379_v36  ;;  %v4722_v53 = vcvt.s32.f32 %v3826_v10  ;;  %v4028_v27 = vunpack.c.0.s8 %v3216_v57  ;;  %v4035_v6 = vunpack.c.1.s8 %v3216_v57 }
 0x353   :  { %5589 = vmatpush.bf16.msra.mxu3 %v5435_v39  ;;  %v4156_v59 = vcvt.s32.f32 %v3260_v54  ;;  %v4163_v42 = vcvt.s32.f32 %v3267_v56  ;;  %v3469_v44 = vunpack.c.0.s8 %v3077_v13  ;;  %v8171_v41 = vpop.f32.mrf.mxu2  ;;  %v2933_v37 = vmul.f32 %v8151_v18, %v2932_v19 }
 0x354   :  { %5628 = vmatpush.bf16.msrb.mxu2 %v5156_v9  ;;  %v5324_v26 = vpack.c.bf16 %v4722_v53, %v4715_v16  ;;  %v4924_v35 = vcvt.s32.f32 %v4028_v27  ;;  %v3476_v38 = vunpack.c.1.s8 %v3077_v13  ;;  %v4931_v20 = vcvt.s32.f32 %v4035_v6 }
 0x355   :  { %v5045_v63 = vpack.c.bf16 %v4163_v42, %v4156_v59  ;;  %v4365_v7 = vcvt.s32.f32 %v3469_v44  ;;  %v3805_v29 = vunpack.c.0.s8 %v3161_v28  ;;  %v2937_v2 = vsel %vm2936_vm5, %v8151_v18, %v2933_v37 }
 0x356   :  { %5667 = vmatpush.bf16.msra.mxu1 %v5324_v26  ;;  %v4372_v57 = vcvt.s32.f32 %v3476_v38  ;;  %v3812_v1 = vunpack.c.1.s8 %v3161_v28  ;;  %v3246_v60 = vunpack.c.0.s8 %v3022_v8  ;;  %v2945_v22 = vmul.f32 %v2937_v2, %v8107_v48  ;;  %v3119_v26 = vld [vmem:[%s9001_s13 + $0x318] sm:$0xff] }
 0x357   :  { %5706 = vmatpush.bf16.msrb.mxu0 %v5045_v63  ;;  %v5428_v13 = vpack.c.bf16 %v4931_v20, %v4924_v35  ;;  %v4701_v40 = vcvt.s32.f32 %v3805_v29  ;;  %v3253_v51 = vunpack.c.1.s8 %v3022_v8  ;;  %v3679_v28 = vunpack.c.2.s8 %v3126_v30 }
 0x358   :  { %v5149_v18 = vpack.c.bf16 %v4372_v57, %v4365_v7  ;;  %v4708_v14 = vcvt.s32.f32 %v3812_v1  ;;  %v4142_v49 = vcvt.s32.f32 %v3246_v60  ;;  %v2970_v17 = vmul.f32 %v2954_v5, %v2945_v22  ;;  %v3203_v57 = vld [vmem:[%s9001_s13 + $0x5b8] sm:$0xff] }
 0x359   :  { %5590 = vmatpush.bf16.msra.mxu3 %v5428_v13  ;;  %v4149_v52 = vcvt.s32.f32 %v3253_v51  ;;  %v3686_v4 = vunpack.c.3.s8 %v3126_v30  ;;  %v4015_v48 = vunpack.c.2.s8 %v3210_v47  ;;  %v4575_v24 = vcvt.s32.f32 %v3679_v28  ;;  %v3064_v13 = vld [vmem:[%s9001_s13 + $0x160] sm:$0xff] }
 0x35a   :  { %5629 = vmatpush.bf16.msrb.mxu2 %v5149_v18  ;;  %v5317_v25 = vpack.c.bf16 %v4708_v14, %v4701_v40  ;;  %v4022_v8 = vunpack.c.3.s8 %v3210_v47  ;;  %v3456_v15 = vunpack.c.2.s8 %v8189_v43  ;;  %v2995_v58 = vadd.f32 %v2979_v34, %v2970_v17  ;;  %v3148_v14 = vld [vmem:[%s9001_s13 + $0x400] sm:$0xff] }
 0x35b   :  { %v5038_v31 = vpack.c.bf16 %v4149_v52, %v4142_v49  ;;  %v4582_v50 = vcvt.s32.f32 %v3686_v4  ;;  %v4911_v5 = vcvt.s32.f32 %v4015_v48  ;;  %v5529_v11 = vpop.f32.mrf.mxu2  ;;  %v3463_v36 = vunpack.c.3.s8 %v8189_v43 }
 0x35c   :  { %5668 = vmatpush.bf16.msra.mxu1 %v5317_v25  ;;  %v4918_v32 = vcvt.s32.f32 %v4022_v8  ;;  %v4352_v23 = vcvt.s32.f32 %v3456_v15  ;;  %v3792_v10 = vunpack.c.2.s8 %v3155_v46  ;;  %vm3003_vm6 = vcmp.gt.f32.partialorder %v2995_v58, 0.0 }
 0x35d   :  { %v3011_v39 = vmul.f32 0.2, %v2995_v58  ;;  %5707 = vmatpush.bf16.msrb.mxu0 %v5038_v31  ;;  %v5254_v16 = vpack.c.bf16 %v4582_v50, %v4575_v24  ;;  %v3799_v54 = vunpack.c.3.s8 %v3155_v46  ;;  %5630 = vmatmul.bf16.vlgmr.msrb.gmra.mxu2 %v7829_v21  ;;  %v4359_v61 = vcvt.s32.f32 %v3463_v36 }
 0x35e   :  { %v5422_v56 = vpack.c.bf16 %v4918_v32, %v4911_v5  ;;  %v4688_v34 = vcvt.s32.f32 %v3792_v10  ;;  %v3665_v19 = vunpack.c.0.s8 %v3126_v30  ;;  %v3672_v27 = vunpack.c.1.s8 %v3126_v30 }
 0x35f   :  { %v3019_v9 = vsel %vm3003_vm6, %v2995_v58, %v3011_v39  ;;  %5635 = vmatpush.bf16.msrb.mxu3 %v5254_v16  ;;  %v4695_v53 = vcvt.s32.f32 %v3799_v54  ;;  %5669 = vmatmul.bf16.vlgmr.msra.gmra.mxu1 %v8039_v0  ;;  %v4001_v59 = vunpack.c.0.s8 %v3210_v47  ;;  %v5143_v6 = vpack.c.bf16 %v4359_v61, %v4352_v23 }
 0x360   :  { %v8202_v42 = vpack.c.bf16 %v3019_v9, %v3019_v9  ;;  %5674 = vmatpush.bf16.msra.mxu2 %v5422_v56  ;;  %5708 = vmatmul.bf16.vlgmr.msrb.gmra.mxu0 %v7708_v45  ;;  %v4561_v44 = vcvt.s32.f32 %v3665_v19  ;;  %v4008_v37 = vunpack.c.1.s8 %v3210_v47  ;;  %v4568_v38 = vcvt.s32.f32 %v3672_v27 }
 0x361   :  { %v5311_v35 = vpack.c.bf16 %v4695_v53, %v4688_v34  ;;  %v4897_v63 = vcvt.s32.f32 %v4001_v59  ;;  %v3442_v20 = vunpack.c.0.s8 %v8189_v43  ;;  %5713 = vmatpush.bf16.msrb.mxu1 %v5143_v6  ;;  %v3449_v29 = vunpack.c.1.s8 %v8189_v43  ;;  %v3112_v53 = vld [vmem:[%s9001_s13 + $0x2e0] sm:$0xff] }
 0x362   :  { %v4904_v7 = vcvt.s32.f32 %v4008_v37  ;;  %v3778_v30 = vunpack.c.0.s8 %v3155_v46  ;;  %v3785_v2 = vunpack.c.1.s8 %v3155_v46  ;;  %5591 = vmatmul.bf16.vlgmr.msra.gmra.mxu3 %v8202_v42  ;;  %v5247_v1 = vpack.c.bf16 %v4568_v38, %v4561_v44  ;;  %v3196_v37 = vld [vmem:[%s9001_s13 + $0x580] sm:$0xff] }
 0x363   :  { %5752 = vmatpush.bf16.msra.mxu0 %v5311_v35  ;;  %v4338_v60 = vcvt.s32.f32 %v3442_v20  ;;  %v3651_v47 = vunpack.c.2.s8 %v3119_v26  ;;  %v3658_v22 = vunpack.c.3.s8 %v3119_v26  ;;  %v4345_v51 = vcvt.s32.f32 %v3449_v29  ;;  %v3057_v20 = vld [vmem:[%s9001_s13 + $0x128] sm:$0xff] }
 0x364   :  { %v5415_v40 = vpack.c.bf16 %v4904_v7, %v4897_v63  ;;  %v4674_v43 = vcvt.s32.f32 %v3778_v30  ;;  %v4681_v18 = vcvt.s32.f32 %v3785_v2  ;;  %5636 = vmatpush.bf16.msrb.mxu3 %v5247_v1  ;;  %v3987_v17 = vunpack.c.2.s8 %v3203_v57 }
 0x365   :  { %v4547_v49 = vcvt.s32.f32 %v3651_v47  ;;  %v4554_v28 = vcvt.s32.f32 %v3658_v22  ;;  %v3994_v52 = vunpack.c.3.s8 %v3203_v57  ;;  %v5136_v4 = vpack.c.bf16 %v4345_v51, %v4338_v60 }
 0x366   :  { %5675 = vmatpush.bf16.msra.mxu2 %v5415_v40  ;;  %v5304_v48 = vpack.c.bf16 %v4681_v18, %v4674_v43  ;;  %v3428_v46 = vunpack.c.2.s8 %v3064_v13  ;;  %v3435_v25 = vunpack.c.3.s8 %v3064_v13  ;;  %v4883_v8 = vcvt.s32.f32 %v3987_v17 }
 0x367   :  { %v5240_v24 = vpack.c.bf16 %v4554_v28, %v4547_v49  ;;  %v4890_v15 = vcvt.s32.f32 %v3994_v52  ;;  %v3764_v58 = vunpack.c.2.s8 %v3148_v14  ;;  %5714 = vmatpush.bf16.msrb.mxu1 %v5136_v4  ;;  %v3771_v5 = vunpack.c.3.s8 %v3148_v14 }
 0x368   :  { %5753 = vmatpush.bf16.msra.mxu0 %v5304_v48  ;;  %v4324_v31 = vcvt.s32.f32 %v3428_v46  ;;  %v4331_v50 = vcvt.s32.f32 %v3435_v25  ;;  %v3637_v11 = vunpack.c.0.s8 %v3119_v26  ;;  %v3644_v23 = vunpack.c.1.s8 %v3119_v26 }
 0x369   :  { %5637 = vmatpush.bf16.msrb.mxu3 %v5240_v24  ;;  %v5408_v32 = vpack.c.bf16 %v4890_v15, %v4883_v8  ;;  %v4660_v36 = vcvt.s32.f32 %v3764_v58  ;;  %v3973_v10 = vunpack.c.0.s8 %v3203_v57  ;;  %v4667_v16 = vcvt.s32.f32 %v3771_v5 }
 0x36a   :  { %v5129_v39 = vpack.c.bf16 %v4331_v50, %v4324_v31  ;;  %v4533_v54 = vcvt.s32.f32 %v3637_v11  ;;  %v3980_v56 = vunpack.c.1.s8 %v3203_v57  ;;  %v4540_v61 = vcvt.s32.f32 %v3644_v23  ;;  %v3141_v57 = vld [vmem:[%s9001_s13 + $0x3c8] sm:$0xff] }
 0x36b   :  { %5676 = vmatpush.bf16.msra.mxu2 %v5408_v32  ;;  %v4869_v34 = vcvt.s32.f32 %v3973_v10  ;;  %v3414_v19 = vunpack.c.0.s8 %v3064_v13  ;;  %v3421_v9 = vunpack.c.1.s8 %v3064_v13  ;;  %v5297_v27 = vpack.c.bf16 %v4667_v16, %v4660_v36  ;;  %v3105_v32 = vld [vmem:[%s9001_s13 + $0x2a8] sm:$0xff] }
 0x36c   :  { %5715 = vmatpush.bf16.msrb.mxu1 %v5129_v39  ;;  %v4876_v59 = vcvt.s32.f32 %v3980_v56  ;;  %v3750_v6 = vunpack.c.0.s8 %v3148_v14  ;;  %v3757_v44 = vunpack.c.1.s8 %v3148_v14  ;;  %v5233_v26 = vpack.c.bf16 %v4540_v61, %v4533_v54  ;;  %v3189_v16 = vld [vmem:[%s9001_s13 + $0x548] sm:$0xff] }
 0x36d   :  { %v4310_v35 = vcvt.s32.f32 %v3414_v19  ;;  %v4317_v38 = vcvt.s32.f32 %v3421_v9  ;;  %v8228_v63 = vadd.f32 %v8171_v41, %v8155_v62  ;;  %5754 = vmatpush.bf16.msra.mxu0 %v5297_v27  ;;  %v3623_v2 = vunpack.c.2.s8 %v3112_v53  ;;  %v3050_v19 = vld [vmem:[%s9001_s13 + $0xf0] sm:$0xff] }
 0x36e   :  { %v5401_v7 = vpack.c.bf16 %v4876_v59, %v4869_v34  ;;  %v4646_v29 = vcvt.s32.f32 %v3750_v6  ;;  %v4653_v30 = vcvt.s32.f32 %v3757_v44  ;;  %5638 = vmatpush.bf16.msrb.mxu3 %v5233_v26  ;;  %v3630_v60 = vunpack.c.3.s8 %v3112_v53  ;;  %v3134_v6 = vld [vmem:[%s9001_s13 + $0x390] sm:$0xff] }
 0x36f   :  { %v5122_v1 = vpack.c.bf16 %v4317_v38, %v4310_v35  ;;  %v3959_v47 = vunpack.c.2.s8 %v3196_v37  ;;  %v3966_v22 = vunpack.c.3.s8 %v3196_v37  ;;  %v4519_v41 = vcvt.s32.f32 %v3623_v2 }
 0x370   :  { %5677 = vmatpush.bf16.msra.mxu2 %v5401_v7  ;;  %v5290_v62 = vpack.c.bf16 %v4653_v30, %v4646_v29  ;;  %v3400_v13 = vunpack.c.2.s8 %v3057_v20  ;;  %v3407_v40 = vunpack.c.3.s8 %v3057_v20  ;;  %v4526_v51 = vcvt.s32.f32 %v3630_v60  ;;  %v8248_v60 = vpop.f32.mrf.mxu3 }
 0x371   :  { %5716 = vmatpush.bf16.msrb.mxu1 %v5122_v1  ;;  %v4855_v43 = vcvt.s32.f32 %v3959_v47  ;;  %v4862_v18 = vcvt.s32.f32 %v3966_v22  ;;  %v3736_v14 = vunpack.c.2.s8 %v3141_v57  ;;  %v3743_v17 = vunpack.c.3.s8 %v3141_v57 }
 0x372   :  { %5755 = vmatpush.bf16.msra.mxu0 %v5290_v62  ;;  %v4296_v49 = vcvt.s32.f32 %v3400_v13  ;;  %v4303_v28 = vcvt.s32.f32 %v3407_v40  ;;  %v3609_v52 = vunpack.c.0.s8 %v3112_v53  ;;  %v5226_v4 = vpack.c.bf16 %v4526_v51, %v4519_v41 }
 0x373   :  { %v5394_v48 = vpack.c.bf16 %v4862_v18, %v4855_v43  ;;  %v4632_v46 = vcvt.s32.f32 %v3736_v14  ;;  %v3616_v25 = vunpack.c.1.s8 %v3112_v53  ;;  %v4639_v8 = vcvt.s32.f32 %v3743_v17 }
 0x374   :  { %v5115_v24 = vpack.c.bf16 %v4303_v28, %v4296_v49  ;;  %v4505_v15 = vcvt.s32.f32 %v3609_v52  ;;  %v3945_v58 = vunpack.c.0.s8 %v3196_v37  ;;  %5639 = vmatpush.bf16.msrb.mxu3 %v5226_v4  ;;  %v3952_v50 = vunpack.c.1.s8 %v3196_v37 }
 0x375   :  { %5678 = vmatpush.bf16.msra.mxu2 %v5394_v48  ;;  %v4512_v31 = vcvt.s32.f32 %v3616_v25  ;;  %v3386_v5 = vunpack.c.0.s8 %v3057_v20  ;;  %v3393_v11 = vunpack.c.1.s8 %v3057_v20  ;;  %v5283_v36 = vpack.c.bf16 %v4639_v8, %v4632_v46  ;;  %v3238_v46 = vld [vmem:[%s9001_s13 + $0x6d0] sm:$0xff] }
 0x376   :  { %5717 = vmatpush.bf16.msrb.mxu1 %v5115_v24  ;;  %v4841_v23 = vcvt.s32.f32 %v3945_v58  ;;  %v3722_v10 = vunpack.c.0.s8 %v3141_v57  ;;  %v3729_v39 = vunpack.c.1.s8 %v3141_v57  ;;  %v4848_v56 = vcvt.s32.f32 %v3952_v50  ;;  %v3099_v58 = vld [vmem:[%s9001_s13 + $0x278] sm:$0xff] }
 0x377   :  { %v5219_v54 = vpack.c.bf16 %v4512_v31, %v4505_v15  ;;  %v4282_v61 = vcvt.s32.f32 %v3386_v5  ;;  %v4289_v34 = vcvt.s32.f32 %v3393_v11  ;;  %5756 = vmatpush.bf16.msra.mxu0 %v5283_v36  ;;  %v3595_v27 = vunpack.c.2.s8 %v3105_v32 }
 0x378   :  { %v4618_v9 = vcvt.s32.f32 %v3722_v10  ;;  %v4625_v53 = vcvt.s32.f32 %v3729_v39  ;;  %v3602_v59 = vunpack.c.3.s8 %v3105_v32  ;;  %v5387_v44 = vpack.c.bf16 %v4848_v56, %v4841_v23 }
 0x379   :  { %5640 = vmatpush.bf16.msrb.mxu3 %v5219_v54  ;;  %v5108_v37 = vpack.c.bf16 %v4289_v34, %v4282_v61  ;;  %v3931_v26 = vunpack.c.2.s8 %v3189_v16  ;;  %v3938_v35 = vunpack.c.3.s8 %v3189_v16  ;;  %v4491_v20 = vcvt.s32.f32 %v3595_v27 }
 0x37a   :  { %v5276_v38 = vpack.c.bf16 %v4625_v53, %v4618_v9  ;;  %v4498_v7 = vcvt.s32.f32 %v3602_v59  ;;  %v3372_v29 = vunpack.c.2.s8 %v3050_v19  ;;  %5679 = vmatpush.bf16.msra.mxu2 %v5387_v44  ;;  %v3379_v57 = vunpack.c.3.s8 %v3050_v19 }
 0x37b   :  { %5718 = vmatpush.bf16.msrb.mxu1 %v5108_v37  ;;  %v4827_v30 = vcvt.s32.f32 %v3931_v26  ;;  %v4834_v2 = vcvt.s32.f32 %v3938_v35  ;;  %v3708_v1 = vunpack.c.2.s8 %v3134_v6  ;;  %v3715_v62 = vunpack.c.3.s8 %v3134_v6 }
 0x37c   :  { %5757 = vmatpush.bf16.msra.mxu0 %v5276_v38  ;;  %v5212_v47 = vpack.c.bf16 %v4498_v7, %v4491_v20  ;;  %v4268_v22 = vcvt.s32.f32 %v3372_v29  ;;  %v3581_v41 = vunpack.c.0.s8 %v3105_v32  ;;  %v4275_v40 = vcvt.s32.f32 %v3379_v57 }
 0x37d   :  { %v5380_v13 = vpack.c.bf16 %v4834_v2, %v4827_v30  ;;  %v4604_v51 = vcvt.s32.f32 %v3708_v1  ;;  %v3588_v43 = vunpack.c.1.s8 %v3105_v32  ;;  %v4611_v18 = vcvt.s32.f32 %v3715_v62  ;;  %v3183_v32 = vld [vmem:[%s9001_s13 + $0x518] sm:$0xff] }
 0x37e   :  { %5641 = vmatpush.bf16.msrb.mxu3 %v5212_v47  ;;  %v4477_v14 = vcvt.s32.f32 %v3581_v41  ;;  %v3917_v49 = vunpack.c.0.s8 %v3189_v16  ;;  %v3924_v28 = vunpack.c.1.s8 %v3189_v16  ;;  %v5101_v17 = vpack.c.bf16 %v4275_v40, %v4268_v22  ;;  %v3044_v16 = vld [vmem:[%s9001_s13 + $0xc0] sm:$0xff] }
 0x37f   :  { %5680 = vmatpush.bf16.msra.mxu2 %v5380_v13  ;;  %v4484_v52 = vcvt.s32.f32 %v3588_v43  ;;  %v3358_v4 = vunpack.c.0.s8 %v3050_v19  ;;  %v3365_v48 = vunpack.c.1.s8 %v3050_v19  ;;  %v5269_v25 = vpack.c.bf16 %v4611_v18, %v4604_v51  ;;  %v5542_v19 = vpop.f32.mrf.mxu3  ;;  %v3231_v43 = vld [vmem:[%s9001_s13 + $0x698] sm:$0xff] }
 0x380   :  { %v4813_v24 = vcvt.s32.f32 %v3917_v49  ;;  %v4820_v8 = vcvt.s32.f32 %v3924_v28  ;;  %v3694_v15 = vunpack.c.0.s8 %v3134_v6  ;;  %5719 = vmatpush.bf16.msrb.mxu1 %v5101_v17  ;;  %v3701_v11 = vunpack.c.1.s8 %v3134_v6  ;;  %v3092_v17 = vld [vmem:[%s9001_s13 + $0x240] sm:$0xff] }
 0x381   :  { %v5205_v31 = vpack.c.bf16 %v4484_v52, %v4477_v14  ;;  %v4254_v50 = vcvt.s32.f32 %v3358_v4  ;;  %v4261_v5 = vcvt.s32.f32 %v3365_v48  ;;  %5758 = vmatpush.bf16.msra.mxu0 %v5269_v25  ;;  %v4127_v10 = vunpack.c.2.s8 %v3238_v46  ;;  %v3176_v25 = vld [vmem:[%s9001_s13 + $0x4e0] sm:$0xff] }
 0x382   :  { %v5373_v36 = vpack.c.bf16 %v4820_v8, %v4813_v24  ;;  %v4590_v23 = vcvt.s32.f32 %v3694_v15  ;;  %v4134_v39 = vunpack.c.3.s8 %v3238_v46  ;;  %v4597_v56 = vcvt.s32.f32 %v3701_v11 }
 0x383   :  { %5642 = vmatpush.bf16.msrb.mxu3 %v5205_v31  ;;  %v5094_v54 = vpack.c.bf16 %v4261_v5, %v4254_v50  ;;  %v3568_v61 = vunpack.c.2.s8 %v3099_v58  ;;  %v3575_v34 = vunpack.c.3.s8 %v3099_v58  ;;  %v5023_v9 = vcvt.s32.f32 %v4127_v10  ;;  %v3037_v31 = vld [vmem:[%s9001_s13 + $0x88] sm:$0xff] }
 0x384   :  { %5681 = vmatpush.bf16.msra.mxu2 %v5373_v36  ;;  %v5030_v53 = vcvt.s32.f32 %v4134_v39  ;;  %v3904_v27 = vunpack.c.2.s8 %v3183_v32  ;;  %v3911_v59 = vunpack.c.3.s8 %v3183_v32  ;;  %v5262_v6 = vpack.c.bf16 %v4597_v56, %v4590_v23 }
 0x385   :  { %5720 = vmatpush.bf16.msrb.mxu1 %v5094_v54  ;;  %v4464_v44 = vcvt.s32.f32 %v3568_v61  ;;  %v4471_v37 = vcvt.s32.f32 %v3575_v34  ;;  %v3345_v26 = vunpack.c.2.s8 %v3044_v16  ;;  %v3352_v7 = vunpack.c.3.s8 %v3044_v16 }
 0x386   :  { %v5478_v35 = vpack.c.bf16 %v5030_v53, %v5023_v9  ;;  %v4800_v38 = vcvt.s32.f32 %v3904_v27  ;;  %v4807_v20 = vcvt.s32.f32 %v3911_v59  ;;  %5643 = vmatmul.bf16.vlgmr.msrb.gmra.mxu3 %v7903_v33  ;;  %5759 = vmatpush.bf16.msra.mxu0 %v5262_v6  ;;  %v4113_v2 = vunpack.c.0.s8 %v3238_v46 }
 0x387   :  { %v5199_v29 = vpack.c.bf16 %v4471_v37, %v4464_v44  ;;  %v4241_v30 = vcvt.s32.f32 %v3345_v26  ;;  %5682 = vmatmul.bf16.vlgmr.msra.gmra.mxu2 %v8122_v3  ;;  %v4120_v57 = vunpack.c.1.s8 %v3238_v46  ;;  %v4248_v47 = vcvt.s32.f32 %v3352_v7 }
 0x388   :  { %5687 = vmatpush.bf16.msra.mxu3 %v5478_v35  ;;  %v5367_v1 = vpack.c.bf16 %v4807_v20, %v4800_v38  ;;  %5721 = vmatmul.bf16.vlgmr.msrb.gmra.mxu1 %v7782_v55  ;;  %v3554_v22 = vunpack.c.0.s8 %v3099_v58  ;;  %v3561_v62 = vunpack.c.1.s8 %v3099_v58  ;;  %v5009_v41 = vcvt.s32.f32 %v4113_v2  ;;  %v3224_v2 = vld [vmem:[%s9001_s13 + $0x660] sm:$0xff] }
 0x389   :  { %5726 = vmatpush.bf16.msrb.mxu2 %v5199_v29  ;;  %v5016_v13 = vcvt.s32.f32 %v4120_v57  ;;  %v3890_v40 = vunpack.c.0.s8 %v3183_v32  ;;  %v3897_v51 = vunpack.c.1.s8 %v3183_v32  ;;  %v5088_v18 = vpack.c.bf16 %v4248_v47, %v4241_v30  ;;  %5760 = vmatmul.bf16.vlgmr.msra.gmra.mxu0 %v7959_v12 }
 0x38a   :  { %5765 = vmatpush.bf16.msra.mxu1 %v5367_v1  ;;  %v4450_v14 = vcvt.s32.f32 %v3554_v22  ;;  %v4457_v49 = vcvt.s32.f32 %v3561_v62  ;;  %v3331_v28 = vunpack.c.0.s8 %v3044_v16  ;;  %v3338_v46 = vunpack.c.1.s8 %v3044_v16  ;;  %v3085_v62 = vld [vmem:[%s9001_s13 + $0x208] sm:$0xff] }
 0x38b   :  { %v5471_v52 = vpack.c.bf16 %v5016_v13, %v5009_v41  ;;  %v4786_v4 = vcvt.s32.f32 %v3890_v40  ;;  %v4793_v48 = vcvt.s32.f32 %v3897_v51  ;;  %5804 = vmatpush.bf16.msrb.mxu0 %v5088_v18  ;;  %v4099_v15 = vunpack.c.2.s8 %v3231_v43 }
 0x38c   :  { %v5192_v24 = vpack.c.bf16 %v4457_v49, %v4450_v14  ;;  %v4227_v8 = vcvt.s32.f32 %v3331_v28  ;;  %v4106_v58 = vunpack.c.3.s8 %v3231_v43  ;;  %v4234_v5 = vcvt.s32.f32 %v3338_v46 }
 0x38d   :  { %5688 = vmatpush.bf16.msra.mxu3 %v5471_v52  ;;  %v5360_v50 = vpack.c.bf16 %v4793_v48, %v4786_v4  ;;  %v3540_v11 = vunpack.c.2.s8 %v3092_v17  ;;  %v3547_v32 = vunpack.c.3.s8 %v3092_v17  ;;  %v4995_v36 = vcvt.s32.f32 %v4099_v15 }
 0x38e   :  { %5727 = vmatpush.bf16.msrb.mxu2 %v5192_v24  ;;  %v5002_v23 = vcvt.s32.f32 %v4106_v58  ;;  %v3876_v10 = vunpack.c.2.s8 %v3176_v25  ;;  %v3883_v39 = vunpack.c.3.s8 %v3176_v25  ;;  %v5081_v16 = vpack.c.bf16 %v4234_v5, %v4227_v8 }
 0x38f   :  { %5766 = vmatpush.bf16.msra.mxu1 %v5360_v50  ;;  %v4436_v54 = vcvt.s32.f32 %v3540_v11  ;;  %v4443_v56 = vcvt.s32.f32 %v3547_v32  ;;  %v3317_v61 = vunpack.c.2.s8 %v3037_v31  ;;  %v3324_v53 = vunpack.c.3.s8 %v3037_v31 }
 0x390   :  { %v5464_v34 = vpack.c.bf16 %v5002_v23, %v4995_v36  ;;  %v4772_v19 = vcvt.s32.f32 %v3876_v10  ;;  %v4779_v9 = vcvt.s32.f32 %v3883_v39  ;;  %5805 = vmatpush.bf16.msrb.mxu0 %v5081_v16  ;;  %v4085_v6 = vunpack.c.0.s8 %v3231_v43 }
 0x391   :  { %v5185_v27 = vpack.c.bf16 %v4443_v56, %v4436_v54  ;;  %v4213_v59 = vcvt.s32.f32 %v3317_v61  ;;  %v4092_v44 = vunpack.c.1.s8 %v3231_v43  ;;  %v4220_v26 = vcvt.s32.f32 %v3324_v53  ;;  %v3169_v43 = vld [vmem:[%s9001_s13 + $0x4a8] sm:$0xff] }
 0x392   :  { %5689 = vmatpush.bf16.msra.mxu3 %v5464_v34  ;;  %v5353_v37 = vpack.c.bf16 %v4779_v9, %v4772_v19  ;;  %v3526_v35 = vunpack.c.0.s8 %v3092_v17  ;;  %v3533_v38 = vunpack.c.1.s8 %v3092_v17  ;;  %v4981_v20 = vcvt.s32.f32 %v4085_v6  ;;  %v3030_v17 = vld [vmem:[%s9001_s13 + $0x50] sm:$0xff] }
 0x393   :  { %5728 = vmatpush.bf16.msrb.mxu2 %v5185_v27  ;;  %v4988_v7 = vcvt.s32.f32 %v4092_v44  ;;  %v3862_v29 = vunpack.c.0.s8 %v3176_v25  ;;  %v3869_v30 = vunpack.c.1.s8 %v3176_v25  ;;  %v5074_v57 = vpack.c.bf16 %v4220_v26, %v4213_v59  ;;  %v3217_v27 = vld [vmem:[%s9001_s13 + $0x628] sm:$0xff]  ;;  %v3078_v26 = vld [vmem:[%s9001_s13 + $0x1d0] sm:$0xff] }
 0x394   :  { %5767 = vmatpush.bf16.msra.mxu1 %v5353_v37  ;;  %v4422_v1 = vcvt.s32.f32 %v3526_v35  ;;  %v4429_v47 = vcvt.s32.f32 %v3533_v38  ;;  %v3303_v22 = vunpack.c.0.s8 %v3037_v31  ;;  %v3310_v51 = vunpack.c.1.s8 %v3037_v31  ;;  %v8300_v35 = vpop.f32.mrf.mxu0 }
 0x395   :  { %v5457_v41 = vpack.c.bf16 %v4988_v7, %v4981_v20  ;;  %v4758_v13 = vcvt.s32.f32 %v3862_v29  ;;  %v4765_v40 = vcvt.s32.f32 %v3869_v30  ;;  %5806 = vmatpush.bf16.msrb.mxu0 %v5074_v57  ;;  %v8289_v49 = vadd.f32 %v8248_v60, %v8228_v63  ;;  %v3162_v30 = vld [vmem:[%s9001_s13 + $0x470] sm:$0xff] }
 0x396   :  { %v5178_v18 = vpack.c.bf16 %v4429_v47, %v4422_v1  ;;  %v4199_v14 = vcvt.s32.f32 %v3303_v22  ;;  %v4071_v28 = vunpack.c.2.s8 %v3224_v2  ;;  %v4206_v4 = vcvt.s32.f32 %v3310_v51 }
 0x397   :  { %5690 = vmatpush.bf16.msra.mxu3 %v5457_v41  ;;  %v5346_v52 = vpack.c.bf16 %v4765_v40, %v4758_v13  ;;  %v4078_v48 = vunpack.c.3.s8 %v3224_v2  ;;  %v3512_v46 = vunpack.c.2.s8 %v3085_v62  ;;  %v3519_v24 = vunpack.c.3.s8 %v3085_v62  ;;  %v3023_v40 = vld [vmem:[%s9001_s13 + $0x18] sm:$0xff] }
 0x398   :  { %5729 = vmatpush.bf16.msrb.mxu2 %v5178_v18  ;;  %v4967_v25 = vcvt.s32.f32 %v4071_v28  ;;  %v3848_v8 = vunpack.c.2.s8 %v3169_v43  ;;  %v3855_v15 = vunpack.c.3.s8 %v3169_v43  ;;  %v5067_v58 = vpack.c.bf16 %v4206_v4, %v4199_v14 }
 0x399   :  { %5768 = vmatpush.bf16.msra.mxu1 %v5346_v52  ;;  %v4974_v31 = vcvt.s32.f32 %v4078_v48  ;;  %v4408_v63 = vcvt.s32.f32 %v3512_v46  ;;  %v3289_v60 = vunpack.c.2.s8 %v3030_v17  ;;  %v4415_v50 = vcvt.s32.f32 %v3519_v24 }
 0x39a   :  { %v4744_v5 = vcvt.s32.f32 %v3848_v8  ;;  %v4751_v11 = vcvt.s32.f32 %v3855_v15  ;;  %v3296_v32 = vunpack.c.3.s8 %v3030_v17  ;;  %5807 = vmatpush.bf16.msrb.mxu0 %v5067_v58  ;;  %v4057_v10 = vunpack.c.0.s8 %v3224_v2 }
 0x39b   :  { %v5450_v36 = vpack.c.bf16 %v4974_v31, %v4967_v25  ;;  %v4185_v23 = vcvt.s32.f32 %v3289_v60  ;;  %v4064_v39 = vunpack.c.1.s8 %v3224_v2  ;;  %v5171_v16 = vpack.c.bf16 %v4415_v50, %v4408_v63 }
 0x39c   :  { %v5339_v54 = vpack.c.bf16 %v4751_v11, %v4744_v5  ;;  %v4192_v56 = vcvt.s32.f32 %v3296_v32  ;;  %v3498_v61 = vunpack.c.0.s8 %v3085_v62  ;;  %v4953_v34 = vcvt.s32.f32 %v4057_v10  ;;  %v5555_v11 = vpop.f32.mrf.mxu0 }
 0x39d   :  { %5691 = vmatpush.bf16.msra.mxu3 %v5450_v36  ;;  %v4960_v19 = vcvt.s32.f32 %v4064_v39  ;;  %v3505_v9 = vunpack.c.1.s8 %v3085_v62  ;;  %v3834_v53 = vunpack.c.0.s8 %v3169_v43  ;;  %5730 = vmatpush.bf16.msrb.mxu2 %v5171_v16  ;;  %v3841_v44 = vunpack.c.1.s8 %v3169_v43  ;;  %v3127_v39 = vld [vmem:[%s9001_s13 + $0x358] sm:$0xff]  ;;  %v3204_v11 = vld [vmem:[%s9001_s13 + $0x5c0] sm:$0xff] }
 0x39e   :  { %5769 = vmatpush.bf16.msra.mxu1 %v5339_v54  ;;  %v5060_v59 = vpack.c.bf16 %v4192_v56, %v4185_v23  ;;  %v4394_v6 = vcvt.s32.f32 %v3498_v61  ;;  %v3275_v37 = vunpack.c.0.s8 %v3030_v17  ;;  %v3282_v29 = vunpack.c.1.s8 %v3030_v17 }
 0x39f   :  { %v5443_v38 = vpack.c.bf16 %v4960_v19, %v4953_v34  ;;  %v4401_v20 = vcvt.s32.f32 %v3505_v9  ;;  %v4730_v7 = vcvt.s32.f32 %v3834_v53  ;;  %v4737_v2 = vcvt.s32.f32 %v3841_v44  ;;  %v3211_v34 = vld [vmem:[%s9001_s13 + $0x5f8] sm:$0xff] }
 0x3a0   :  { %5808 = vmatpush.bf16.msrb.mxu0 %v5060_v59  ;;  %v4171_v57 = vcvt.s32.f32 %v3275_v37  ;;  %v4043_v1 = vunpack.c.2.s8 %v3217_v27  ;;  %v4050_v47 = vunpack.c.3.s8 %v3217_v27  ;;  %v4178_v62 = vcvt.s32.f32 %v3282_v29  ;;  %v3072_v59 = vld [vmem:[%s9001_s13 + $0x1a0] sm:$0xff] }
 0x3a1   :  { %5692 = vmatpush.bf16.msra.mxu3 %v5443_v38  ;;  %v5164_v22 = vpack.c.bf16 %v4401_v20, %v4394_v6  ;;  %v3484_v41 = vunpack.c.2.s8 %v3078_v26  ;;  %v3491_v13 = vunpack.c.3.s8 %v3078_v26  ;;  %v5332_v51 = vpack.c.bf16 %v4737_v2, %v4730_v7 }
 0x3a2   :  { %v4939_v43 = vcvt.s32.f32 %v4043_v1  ;;  %v4946_v18 = vcvt.s32.f32 %v4050_v47  ;;  %v3820_v14 = vunpack.c.2.s8 %v3162_v30  ;;  %v5053_v28 = vpack.c.bf16 %v4178_v62, %v4171_v57 }
 0x3a3   :  { %5731 = vmatpush.bf16.msrb.mxu2 %v5164_v22  ;;  %v4380_v17 = vcvt.s32.f32 %v3484_v41  ;;  %v4387_v52 = vcvt.s32.f32 %v3491_v13  ;;  %v3827_v4 = vunpack.c.3.s8 %v3162_v30  ;;  %5770 = vmatpush.bf16.msra.mxu1 %v5332_v51  ;;  %v3261_v25 = vunpack.c.2.s8 %v3023_v40 }
 0x3a4   :  { %v5436_v48 = vpack.c.bf16 %v4946_v18, %v4939_v43  ;;  %v4716_v46 = vcvt.s32.f32 %v3820_v14  ;;  %v3268_v24 = vunpack.c.3.s8 %v3023_v40  ;;  %5809 = vmatpush.bf16.msrb.mxu0 %v5053_v28  ;;  %v4029_v58 = vunpack.c.0.s8 %v3217_v27 }
 0x3a5   :  { %v5157_v8 = vpack.c.bf16 %v4387_v52, %v4380_v17  ;;  %v4723_v15 = vcvt.s32.f32 %v3827_v4  ;;  %v4036_v31 = vunpack.c.1.s8 %v3217_v27  ;;  %v4157_v63 = vcvt.s32.f32 %v3261_v25 }
 0x3a6   :  { %5693 = vmatpush.bf16.msra.mxu3 %v5436_v48  ;;  %v4164_v60 = vcvt.s32.f32 %v3268_v24  ;;  %v3470_v50 = vunpack.c.0.s8 %v3078_v26  ;;  %v3477_v5 = vunpack.c.1.s8 %v3078_v26  ;;  %v4925_v36 = vcvt.s32.f32 %v4029_v58 }
 0x3a7   :  { %5732 = vmatpush.bf16.msrb.mxu2 %v5157_v8  ;;  %v5325_v32 = vpack.c.bf16 %v4723_v15, %v4716_v46  ;;  %v4932_v23 = vcvt.s32.f32 %v4036_v31  ;;  %v3806_v10 = vunpack.c.0.s8 %v3162_v30  ;;  %v3813_v61 = vunpack.c.1.s8 %v3162_v30  ;;  %v3156_v30 = vld [vmem:[%s9001_s13 + $0x440] sm:$0xff] }
 0x3a8   :  { %v5046_v16 = vpack.c.bf16 %v4164_v60, %v4157_v63  ;;  %v4366_v54 = vcvt.s32.f32 %v3470_v50  ;;  %v4373_v56 = vcvt.s32.f32 %v3477_v5  ;;  %v3247_v53 = vunpack.c.0.s8 %v3023_v40  ;;  %v3120_v31 = vld [vmem:[%s9001_s13 + $0x320] sm:$0xff] }
 0x3a9   :  { %5771 = vmatpush.bf16.msra.mxu1 %v5325_v32  ;;  %v5429_v19 = vpack.c.bf16 %v4932_v23, %v4925_v36  ;;  %v4702_v9 = vcvt.s32.f32 %v3806_v10  ;;  %v3254_v27 = vunpack.c.1.s8 %v3023_v40  ;;  %v4709_v44 = vcvt.s32.f32 %v3813_v61  ;;  %v8330_v32 = vpop.f32.mrf.mxu0 }
 0x3aa   :  { %5810 = vmatpush.bf16.msrb.mxu0 %v5046_v16  ;;  %v5150_v6 = vpack.c.bf16 %v4373_v56, %v4366_v54  ;;  %v3680_v37 = vunpack.c.2.s8 %v3127_v39  ;;  %v3687_v26 = vunpack.c.3.s8 %v3127_v39  ;;  %v4143_v38 = vcvt.s32.f32 %v3247_v53  ;;  %v3065_v16 = vld [vmem:[%s9001_s13 + $0x168] sm:$0xff] }
 0x3ab   :  { %5694 = vmatpush.bf16.msra.mxu3 %v5429_v19  ;;  %v4150_v20 = vcvt.s32.f32 %v3254_v27  ;;  %v4016_v7 = vunpack.c.2.s8 %v3211_v34  ;;  %v4023_v29 = vunpack.c.3.s8 %v3211_v34  ;;  %v5318_v2 = vpack.c.bf16 %v4709_v44, %v4702_v9 }
 0x3ac   :  { %5733 = vmatpush.bf16.msrb.mxu2 %v5150_v6  ;;  %v4576_v57 = vcvt.s32.f32 %v3680_v37  ;;  %v4583_v1 = vcvt.s32.f32 %v3687_v26  ;;  %v3457_v47 = vunpack.c.2.s8 %v3072_v59  ;;  %v3464_v13 = vunpack.c.3.s8 %v3072_v59 }
 0x3ad   :  { %v5039_v22 = vpack.c.bf16 %v4150_v20, %v4143_v38  ;;  %v4912_v62 = vcvt.s32.f32 %v4016_v7  ;;  %v4919_v41 = vcvt.s32.f32 %v4023_v29  ;;  %5772 = vmatpush.bf16.msra.mxu1 %v5318_v2  ;;  %v3793_v43 = vunpack.c.2.s8 %v3156_v30 }
 0x3ae   :  { %v5255_v40 = vpack.c.bf16 %v4583_v1, %v4576_v57  ;;  %v4353_v51 = vcvt.s32.f32 %v3457_v47  ;;  %v3800_v18 = vunpack.c.3.s8 %v3156_v30  ;;  %5695 = vmatmul.bf16.vlgmr.msra.gmra.mxu3 %v8202_v42  ;;  %v4360_v28 = vcvt.s32.f32 %v3464_v13 }
 0x3af   :  { %5811 = vmatpush.bf16.msrb.mxu0 %v5039_v22  ;;  %v5423_v14 = vpack.c.bf16 %v4919_v41, %v4912_v62  ;;  %5734 = vmatmul.bf16.vlgmr.msrb.gmra.mxu2 %v7829_v21  ;;  %v3666_v17 = vunpack.c.0.s8 %v3127_v39  ;;  %v3673_v52 = vunpack.c.1.s8 %v3127_v39  ;;  %v4689_v4 = vcvt.s32.f32 %v3793_v43 }
 0x3b0   :  { %5739 = vmatpush.bf16.msrb.mxu3 %v5255_v40  ;;  %v4696_v48 = vcvt.s32.f32 %v3800_v18  ;;  %v4002_v46 = vunpack.c.0.s8 %v3211_v34  ;;  %v4009_v25 = vunpack.c.1.s8 %v3211_v34  ;;  %v5144_v24 = vpack.c.bf16 %v4360_v28, %v4353_v51  ;;  %5773 = vmatmul.bf16.vlgmr.msra.gmra.mxu1 %v8039_v0 }
 0x3b1   :  { %5778 = vmatpush.bf16.msra.mxu2 %v5423_v14  ;;  %v4562_v8 = vcvt.s32.f32 %v3666_v17  ;;  %v4569_v15 = vcvt.s32.f32 %v3673_v52  ;;  %v3443_v58 = vunpack.c.0.s8 %v3072_v59  ;;  %v3450_v5 = vunpack.c.1.s8 %v3072_v59  ;;  %v3149_v59 = vld [vmem:[%s9001_s13 + $0x408] sm:$0xff]  ;;  %v5607_v18 = vpop.f32.mrf.mxu0 }
 0x3b2   :  { %v5312_v63 = vpack.c.bf16 %v4696_v48, %v4689_v4  ;;  %5812 = vmatmul.bf16.vlgmr.msrb.gmra.mxu0 %v7708_v45  ;;  %v4898_v60 = vcvt.s32.f32 %v4002_v46  ;;  %v4905_v50 = vcvt.s32.f32 %v4009_v25  ;;  %5817 = vmatpush.bf16.msrb.mxu1 %v5144_v24  ;;  %v3779_v10 = vunpack.c.0.s8 %v3156_v30  ;;  %v3113_v4 = vld [vmem:[%s9001_s13 + $0x2e8] sm:$0xff]  ;;  %v3190_v18 = vld [vmem:[%s9001_s13 + $0x550] sm:$0xff] }
 0x3b3   :  { %v5248_v36 = vpack.c.bf16 %v4569_v15, %v4562_v8  ;;  %v4339_v23 = vcvt.s32.f32 %v3443_v58  ;;  %v3786_v39 = vunpack.c.1.s8 %v3156_v30  ;;  %v4346_v56 = vcvt.s32.f32 %v3450_v5  ;;  %v3197_v25 = vld [vmem:[%s9001_s13 + $0x588] sm:$0xff]  ;;  %v3058_v5 = vld [vmem:[%s9001_s13 + $0x130] sm:$0xff] }
 0x3b4   :  { %5856 = vmatpush.bf16.msra.mxu0 %v5312_v63  ;;  %v5416_v54 = vpack.c.bf16 %v4905_v50, %v4898_v60  ;;  %v3652_v61 = vunpack.c.2.s8 %v3120_v31  ;;  %v3659_v34 = vunpack.c.3.s8 %v3120_v31  ;;  %v4675_v19 = vcvt.s32.f32 %v3779_v10 }
 0x3b5   :  { %5740 = vmatpush.bf16.msrb.mxu3 %v5248_v36  ;;  %v4682_v9 = vcvt.s32.f32 %v3786_v39  ;;  %v3988_v53 = vunpack.c.2.s8 %v3204_v11  ;;  %v3995_v27 = vunpack.c.3.s8 %v3204_v11  ;;  %v5137_v6 = vpack.c.bf16 %v4346_v56, %v4339_v23  ;;  %v3142_v39 = vld [vmem:[%s9001_s13 + $0x3d0] sm:$0xff] }
 0x3b6   :  { %5779 = vmatpush.bf16.msra.mxu2 %v5416_v54  ;;  %v4548_v44 = vcvt.s32.f32 %v3652_v61  ;;  %v4555_v37 = vcvt.s32.f32 %v3659_v34  ;;  %v3429_v26 = vunpack.c.2.s8 %v3065_v16  ;;  %v3436_v29 = vunpack.c.3.s8 %v3065_v16 }
 0x3b7   :  { %v5305_v38 = vpack.c.bf16 %v4682_v9, %v4675_v19  ;;  %v4884_v20 = vcvt.s32.f32 %v3988_v53  ;;  %v4891_v7 = vcvt.s32.f32 %v3995_v27  ;;  %5818 = vmatpush.bf16.msrb.mxu1 %v5137_v6  ;;  %v3765_v57 = vunpack.c.2.s8 %v3149_v59 }
 0x3b8   :  { %v5241_v30 = vpack.c.bf16 %v4555_v37, %v4548_v44  ;;  %v4325_v2 = vcvt.s32.f32 %v3429_v26  ;;  %v3772_v1 = vunpack.c.3.s8 %v3149_v59  ;;  %v4332_v22 = vcvt.s32.f32 %v3436_v29 }
 0x3b9   :  { %5857 = vmatpush.bf16.msra.mxu0 %v5305_v38  ;;  %v5409_v47 = vpack.c.bf16 %v4891_v7, %v4884_v20  ;;  %v8340_v62 = vadd.f32 %v8300_v35, %v8289_v49  ;;  %v3638_v41 = vunpack.c.0.s8 %v3120_v31  ;;  %v4661_v13 = vcvt.s32.f32 %v3765_v57 }
 0x3ba   :  { %5741 = vmatpush.bf16.msrb.mxu3 %v5241_v30  ;;  %v4668_v40 = vcvt.s32.f32 %v3772_v1  ;;  %v3645_v51 = vunpack.c.1.s8 %v3120_v31  ;;  %v3974_v43 = vunpack.c.0.s8 %v3204_v11  ;;  %v5130_v14 = vpack.c.bf16 %v4332_v22, %v4325_v2 }
 0x3bb   :  { %5780 = vmatpush.bf16.msra.mxu2 %v5409_v47  ;;  %v4534_v28 = vcvt.s32.f32 %v3638_v41  ;;  %v3981_v17 = vunpack.c.1.s8 %v3204_v11  ;;  %v3415_v52 = vunpack.c.0.s8 %v3065_v16  ;;  %v3422_v35 = vunpack.c.1.s8 %v3065_v16  ;;  %v3106_v41 = vld [vmem:[%s9001_s13 + $0x2b0] sm:$0xff] }
 0x3bc   :  { %v5298_v48 = vpack.c.bf16 %v4668_v40, %v4661_v13  ;;  %v4541_v46 = vcvt.s32.f32 %v3645_v51  ;;  %v4870_v49 = vcvt.s32.f32 %v3974_v43  ;;  %5819 = vmatpush.bf16.msrb.mxu1 %v5130_v14  ;;  %v3751_v15 = vunpack.c.0.s8 %v3149_v59  ;;  %v8360_v14 = vpop.f32.mrf.mxu1 }
 0x3bd   :  { %v4877_v24 = vcvt.s32.f32 %v3981_v17  ;;  %v4311_v8 = vcvt.s32.f32 %v3415_v52  ;;  %v3758_v58 = vunpack.c.1.s8 %v3149_v59  ;;  %v4318_v63 = vcvt.s32.f32 %v3422_v35 }
 0x3be   :  { %5858 = vmatpush.bf16.msra.mxu0 %v5298_v48  ;;  %v5234_v31 = vpack.c.bf16 %v4541_v46, %v4534_v28  ;;  %v3624_v60 = vunpack.c.2.s8 %v3113_v4  ;;  %v3631_v50 = vunpack.c.3.s8 %v3113_v4  ;;  %v4647_v36 = vcvt.s32.f32 %v3751_v15  ;;  %v8362_v28 = vpop.f32.mrf.mxu0 }
 0x3bf   :  { %v5402_v11 = vpack.c.bf16 %v4877_v24, %v4870_v49  ;;  %v4654_v23 = vcvt.s32.f32 %v3758_v58  ;;  %v3960_v10 = vunpack.c.2.s8 %v3197_v25  ;;  %v5123_v16 = vpack.c.bf16 %v4318_v63, %v4311_v8  ;;  %v3051_v24 = vld [vmem:[%s9001_s13 + $0xf8] sm:$0xff] }
 0x3c0   :  { %5742 = vmatpush.bf16.msrb.mxu3 %v5234_v31  ;;  %v4520_v54 = vcvt.s32.f32 %v3624_v60  ;;  %v4527_v56 = vcvt.s32.f32 %v3631_v50  ;;  %v3967_v61 = vunpack.c.3.s8 %v3197_v25  ;;  %v3401_v9 = vunpack.c.2.s8 %v3058_v5  ;;  %v3135_v63 = vld [vmem:[%s9001_s13 + $0x398] sm:$0xff] }
 0x3c1   :  { %5781 = vmatpush.bf16.msra.mxu2 %v5402_v11  ;;  %v5291_v34 = vpack.c.bf16 %v4654_v23, %v4647_v36  ;;  %v4856_v19 = vcvt.s32.f32 %v3960_v10  ;;  %v3408_v53 = vunpack.c.3.s8 %v3058_v5  ;;  %5820 = vmatpush.bf16.msrb.mxu1 %v5123_v16  ;;  %v3737_v6 = vunpack.c.2.s8 %v3142_v39 }
 0x3c2   :  { %v5227_v27 = vpack.c.bf16 %v4527_v56, %v4520_v54  ;;  %v4863_v59 = vcvt.s32.f32 %v3967_v61  ;;  %v3744_v44 = vunpack.c.3.s8 %v3142_v39  ;;  %v4297_v37 = vcvt.s32.f32 %v3401_v9 }
 0x3c3   :  { %5859 = vmatpush.bf16.msra.mxu0 %v5291_v34  ;;  %v4304_v26 = vcvt.s32.f32 %v3408_v53  ;;  %v3610_v38 = vunpack.c.0.s8 %v3113_v4  ;;  %v3617_v20 = vunpack.c.1.s8 %v3113_v4  ;;  %v4633_v29 = vcvt.s32.f32 %v3737_v6 }
 0x3c4   :  { %5743 = vmatpush.bf16.msrb.mxu3 %v5227_v27  ;;  %v5395_v7 = vpack.c.bf16 %v4863_v59, %v4856_v19  ;;  %v4640_v30 = vcvt.s32.f32 %v3744_v44  ;;  %v3946_v2 = vunpack.c.0.s8 %v3197_v25  ;;  %v3953_v22 = vunpack.c.1.s8 %v3197_v25 }
 0x3c5   :  { %v5116_v57 = vpack.c.bf16 %v4304_v26, %v4297_v37  ;;  %v4506_v1 = vcvt.s32.f32 %v3610_v38  ;;  %v4513_v47 = vcvt.s32.f32 %v3617_v20  ;;  %v3387_v51 = vunpack.c.0.s8 %v3058_v5  ;;  %v5568_v37 = vpop.f32.mrf.mxu1 }
 0x3c6   :  { %5782 = vmatpush.bf16.msra.mxu2 %v5395_v7  ;;  %v5284_v13 = vpack.c.bf16 %v4640_v30, %v4633_v29  ;;  %v4842_v40 = vcvt.s32.f32 %v3946_v2  ;;  %v3394_v43 = vunpack.c.1.s8 %v3058_v5  ;;  %v4849_v52 = vcvt.s32.f32 %v3953_v22  ;;  %v5659_v26 = vpop.f32.mrf.mxu0  ;;  %v3239_v30 = vld [vmem:[%s9001_s13 + $0x6d8] sm:$0xff]  ;;  %v3100_v22 = vld [vmem:[%s9001_s13 + $0x280] sm:$0xff] }
 0x3c7   :  { %5821 = vmatpush.bf16.msrb.mxu1 %v5116_v57  ;;  %v5220_v17 = vpack.c.bf16 %v4513_v47, %v4506_v1  ;;  %v3723_v4 = vunpack.c.0.s8 %v3142_v39  ;;  %v3730_v48 = vunpack.c.1.s8 %v3142_v39  ;;  %v4283_v46 = vcvt.s32.f32 %v3387_v51 }
 0x3c8   :  { %5860 = vmatpush.bf16.msra.mxu0 %v5284_v13  ;;  %v4290_v49 = vcvt.s32.f32 %v3394_v43  ;;  %v3596_v35 = vunpack.c.2.s8 %v3106_v41  ;;  %v3603_v25 = vunpack.c.3.s8 %v3106_v41  ;;  %v5388_v8 = vpack.c.bf16 %v4849_v52, %v4842_v40 }
 0x3c9   :  { %5744 = vmatpush.bf16.msrb.mxu3 %v5220_v17  ;;  %v4619_v15 = vcvt.s32.f32 %v3723_v4  ;;  %v4626_v58 = vcvt.s32.f32 %v3730_v48  ;;  %v3932_v31 = vunpack.c.2.s8 %v3190_v18  ;;  %v3939_v11 = vunpack.c.3.s8 %v3190_v18  ;;  %v3184_v4 = vld [vmem:[%s9001_s13 + $0x520] sm:$0xff] }
 0x3ca   :  { %v5109_v60 = vpack.c.bf16 %v4290_v49, %v4283_v46  ;;  %v4492_v50 = vcvt.s32.f32 %v3596_v35  ;;  %v4499_v5 = vcvt.s32.f32 %v3603_v25  ;;  %5783 = vmatpush.bf16.msra.mxu2 %v5388_v8  ;;  %v3373_v10 = vunpack.c.2.s8 %v3051_v24  ;;  %v3045_v25 = vld [vmem:[%s9001_s13 + $0xc8] sm:$0xff] }
 0x3cb   :  { %v5277_v36 = vpack.c.bf16 %v4626_v58, %v4619_v15  ;;  %v4828_v23 = vcvt.s32.f32 %v3932_v31  ;;  %v3380_v39 = vunpack.c.3.s8 %v3051_v24  ;;  %v4835_v54 = vcvt.s32.f32 %v3939_v11 }
 0x3cc   :  { %5822 = vmatpush.bf16.msrb.mxu1 %v5109_v60  ;;  %v5213_v16 = vpack.c.bf16 %v4499_v5, %v4492_v50  ;;  %v3709_v56 = vunpack.c.2.s8 %v3135_v63  ;;  %v3716_v61 = vunpack.c.3.s8 %v3135_v63  ;;  %v4269_v34 = vcvt.s32.f32 %v3373_v10 }
 0x3cd   :  { %5861 = vmatpush.bf16.msra.mxu0 %v5277_v36  ;;  %v4276_v19 = vcvt.s32.f32 %v3380_v39  ;;  %v3582_v9 = vunpack.c.0.s8 %v3106_v41  ;;  %v3589_v53 = vunpack.c.1.s8 %v3106_v41  ;;  %v5381_v27 = vpack.c.bf16 %v4835_v54, %v4828_v23 }
 0x3ce   :  { %5745 = vmatpush.bf16.msrb.mxu3 %v5213_v16  ;;  %v4605_v59 = vcvt.s32.f32 %v3709_v56  ;;  %v4612_v6 = vcvt.s32.f32 %v3716_v61  ;;  %v3918_v44 = vunpack.c.0.s8 %v3190_v18  ;;  %v3925_v29 = vunpack.c.1.s8 %v3190_v18 }
 0x3cf   :  { %v5102_v38 = vpack.c.bf16 %v4276_v19, %v4269_v34  ;;  %v4478_v20 = vcvt.s32.f32 %v3582_v9  ;;  %v4485_v7 = vcvt.s32.f32 %v3589_v53  ;;  %5784 = vmatpush.bf16.msra.mxu2 %v5381_v27  ;;  %v3359_v1 = vunpack.c.0.s8 %v3051_v24 }
 0x3d0   :  { %v5270_v2 = vpack.c.bf16 %v4612_v6, %v4605_v59  ;;  %v4814_v57 = vcvt.s32.f32 %v3918_v44  ;;  %v3366_v47 = vunpack.c.1.s8 %v3051_v24  ;;  %v4821_v13 = vcvt.s32.f32 %v3925_v29  ;;  %v3232_v6 = vld [vmem:[%s9001_s13 + $0x6a0] sm:$0xff] }
 0x3d1   :  { %5823 = vmatpush.bf16.msrb.mxu1 %v5102_v38  ;;  %v5206_v41 = vpack.c.bf16 %v4485_v7, %v4478_v20  ;;  %v3695_v40 = vunpack.c.0.s8 %v3135_v63  ;;  %v3702_v51 = vunpack.c.1.s8 %v3135_v63  ;;  %v4255_v43 = vcvt.s32.f32 %v3359_v1  ;;  %v3093_v20 = vld [vmem:[%s9001_s13 + $0x248] sm:$0xff]  ;;  %v8392_v7 = vpop.f32.mrf.mxu1 }
 0x3d2   :  { %5862 = vmatpush.bf16.msra.mxu0 %v5270_v2  ;;  %v4262_v18 = vcvt.s32.f32 %v3366_v47  ;;  %v4128_v17 = vunpack.c.2.s8 %v3239_v30  ;;  %v4135_v52 = vunpack.c.3.s8 %v3239_v30  ;;  %v5374_v48 = vpack.c.bf16 %v4821_v13, %v4814_v57  ;;  %v3177_v13 = vld [vmem:[%s9001_s13 + $0x4e8] sm:$0xff] }
 0x3d3   :  { %5746 = vmatpush.bf16.msrb.mxu3 %v5206_v41  ;;  %v4591_v46 = vcvt.s32.f32 %v3695_v40  ;;  %v4598_v49 = vcvt.s32.f32 %v3702_v51  ;;  %v3569_v35 = vunpack.c.2.s8 %v3100_v22  ;;  %v3576_v58 = vunpack.c.3.s8 %v3100_v22 }
 0x3d4   :  { %v5095_v24 = vpack.c.bf16 %v4262_v18, %v4255_v43  ;;  %v5024_v8 = vcvt.s32.f32 %v4128_v17  ;;  %v5031_v15 = vcvt.s32.f32 %v4135_v52  ;;  %5785 = vmatpush.bf16.msra.mxu2 %v5374_v48  ;;  %v3905_v60 = vunpack.c.2.s8 %v3184_v4  ;;  %v3038_v17 = vld [vmem:[%s9001_s13 + $0x90] sm:$0xff] }
 0x3d5   :  { %v5263_v31 = vpack.c.bf16 %v4598_v49, %v4591_v46  ;;  %v4465_v63 = vcvt.s32.f32 %v3569_v35  ;;  %v3912_v50 = vunpack.c.3.s8 %v3184_v4  ;;  %v4472_v11 = vcvt.s32.f32 %v3576_v58 }
 0x3d6   :  { %5824 = vmatpush.bf16.msrb.mxu1 %v5095_v24  ;;  %v5479_v5 = vpack.c.bf16 %v5031_v15, %v5024_v8  ;;  %v3346_v36 = vunpack.c.2.s8 %v3045_v25  ;;  %v3353_v23 = vunpack.c.3.s8 %v3045_v25  ;;  %5747 = vmatmul.bf16.vlgmr.msrb.gmra.mxu3 %v7903_v33  ;;  %v4801_v10 = vcvt.s32.f32 %v3905_v60 }
 0x3d7   :  { %5863 = vmatpush.bf16.msra.mxu0 %v5263_v31  ;;  %v4808_v39 = vcvt.s32.f32 %v3912_v50  ;;  %v4114_v16 = vunpack.c.0.s8 %v3239_v30  ;;  %v4121_v54 = vunpack.c.1.s8 %v3239_v30  ;;  %v5200_v56 = vpack.c.bf16 %v4472_v11, %v4465_v63  ;;  %5786 = vmatmul.bf16.vlgmr.msra.gmra.mxu2 %v8122_v3 }
 0x3d8   :  { %5791 = vmatpush.bf16.msra.mxu3 %v5479_v5  ;;  %v4242_v61 = vcvt.s32.f32 %v3346_v36  ;;  %v4249_v34 = vcvt.s32.f32 %v3353_v23  ;;  %v3555_v19 = vunpack.c.0.s8 %v3100_v22  ;;  %v3562_v59 = vunpack.c.1.s8 %v3100_v22 }
 0x3d9   :  { %v5368_v9 = vpack.c.bf16 %v4808_v39, %v4801_v10  ;;  %5825 = vmatmul.bf16.vlgmr.msrb.gmra.mxu1 %v7782_v55  ;;  %v5010_v53 = vcvt.s32.f32 %v4114_v16  ;;  %v5017_v27 = vcvt.s32.f32 %v4121_v54  ;;  %5830 = vmatpush.bf16.msrb.mxu2 %v5200_v56  ;;  %v3891_v26 = vunpack.c.0.s8 %v3184_v4  ;;  %v5620_v39 = vpop.f32.mrf.mxu1 }
 0x3da   :  { %v5089_v44 = vpack.c.bf16 %v4249_v34, %v4242_v61  ;;  %5864 = vmatmul.bf16.vlgmr.msra.gmra.mxu0 %v7959_v12  ;;  %v4451_v37 = vcvt.s32.f32 %v3555_v19  ;;  %v3898_v38 = vunpack.c.1.s8 %v3184_v4  ;;  %v4458_v30 = vcvt.s32.f32 %v3562_v59  ;;  %v3225_v34 = vld [vmem:[%s9001_s13 + $0x668] sm:$0xff] }
 0x3db   :  { %5869 = vmatpush.bf16.msra.mxu1 %v5368_v9  ;;  %v5472_v29 = vpack.c.bf16 %v5017_v27, %v5010_v53  ;;  %v3332_v2 = vunpack.c.0.s8 %v3045_v25  ;;  %v3339_v57 = vunpack.c.1.s8 %v3045_v25  ;;  %v4787_v1 = vcvt.s32.f32 %v3891_v26 }
 0x3dc   :  { %5908 = vmatpush.bf16.msrb.mxu0 %v5089_v44  ;;  %v4794_v47 = vcvt.s32.f32 %v3898_v38  ;;  %v4100_v22 = vunpack.c.2.s8 %v3232_v6  ;;  %v4107_v41 = vunpack.c.3.s8 %v3232_v6  ;;  %v5193_v40 = vpack.c.bf16 %v4458_v30, %v4451_v37 }
 0x3dd   :  { %5792 = vmatpush.bf16.msra.mxu3 %v5472_v29  ;;  %v4228_v51 = vcvt.s32.f32 %v3332_v2  ;;  %v4235_v43 = vcvt.s32.f32 %v3339_v57  ;;  %v3541_v18 = vunpack.c.2.s8 %v3093_v20  ;;  %v3548_v46 = vunpack.c.3.s8 %v3093_v20  ;;  %v3170_v29 = vld [vmem:[%s9001_s13 + $0x4b0] sm:$0xff] }
 0x3de   :  { %v5361_v52 = vpack.c.bf16 %v4794_v47, %v4787_v1  ;;  %v4996_v4 = vcvt.s32.f32 %v4100_v22  ;;  %v5003_v48 = vcvt.s32.f32 %v4107_v41  ;;  %5831 = vmatpush.bf16.msrb.mxu2 %v5193_v40  ;;  %v3877_v25 = vunpack.c.2.s8 %v3177_v13  ;;  %v3031_v47 = vld [vmem:[%s9001_s13 + $0x58] sm:$0xff] }
 0x3df   :  { %v5082_v49 = vpack.c.bf16 %v4235_v43, %v4228_v51  ;;  %v4437_v35 = vcvt.s32.f32 %v3541_v18  ;;  %v3884_v24 = vunpack.c.3.s8 %v3177_v13  ;;  %v4444_v15 = vcvt.s32.f32 %v3548_v46 }
 0x3e0   :  { %5870 = vmatpush.bf16.msra.mxu1 %v5361_v52  ;;  %v5465_v8 = vpack.c.bf16 %v5003_v48, %v4996_v4  ;;  %v3318_v58 = vunpack.c.2.s8 %v3038_v17  ;;  %v3325_v31 = vunpack.c.3.s8 %v3038_v17  ;;  %v4773_v63 = vcvt.s32.f32 %v3877_v25 }
 0x3e1   :  { %5909 = vmatpush.bf16.msrb.mxu0 %v5082_v49  ;;  %v4780_v60 = vcvt.s32.f32 %v3884_v24  ;;  %v8402_v50 = vadd.f32 %v8360_v14, %v8340_v62  ;;  %v4086_v5 = vunpack.c.0.s8 %v3232_v6  ;;  %v5186_v11 = vpack.c.bf16 %v4444_v15, %v4437_v35 }
 0x3e2   :  { %5793 = vmatpush.bf16.msra.mxu3 %v5465_v8  ;;  %v4214_v36 = vcvt.s32.f32 %v3318_v58  ;;  %v4221_v23 = vcvt.s32.f32 %v3325_v31  ;;  %v4093_v10 = vunpack.c.1.s8 %v3232_v6  ;;  %v3527_v56 = vunpack.c.0.s8 %v3093_v20  ;;  %v3086_v6 = vld [vmem:[%s9001_s13 + $0x210] sm:$0xff] }
 0x3e3   :  { %v5354_v16 = vpack.c.bf16 %v4780_v60, %v4773_v63  ;;  %v4982_v54 = vcvt.s32.f32 %v4086_v5  ;;  %v3534_v61 = vunpack.c.1.s8 %v3093_v20  ;;  %5832 = vmatpush.bf16.msrb.mxu2 %v5186_v11  ;;  %v3863_v62 = vunpack.c.0.s8 %v3177_v13 }
 0x3e4   :  { %v5075_v19 = vpack.c.bf16 %v4221_v23, %v4214_v36  ;;  %v4989_v9 = vcvt.s32.f32 %v4093_v10  ;;  %v3870_v14 = vunpack.c.1.s8 %v3177_v13  ;;  %v4423_v53 = vcvt.s32.f32 %v3527_v56  ;;  %v8419_v36 = vld [vmem:[%s9001_s13 + $0x630] sm:$0xff] }
 0x3e5   :  { %5871 = vmatpush.bf16.msra.mxu1 %v5354_v16  ;;  %v4430_v27 = vcvt.s32.f32 %v3534_v61  ;;  %v3304_v59 = vunpack.c.0.s8 %v3038_v17  ;;  %v3311_v44 = vunpack.c.1.s8 %v3038_v17  ;;  %v4759_v26 = vcvt.s32.f32 %v3863_v62  ;;  %v8426_v62 = vpop.f32.mrf.mxu1 }
 0x3e6   :  { %5910 = vmatpush.bf16.msrb.mxu0 %v5075_v19  ;;  %v5458_v37 = vpack.c.bf16 %v4989_v9, %v4982_v54  ;;  %v4766_v38 = vcvt.s32.f32 %v3870_v14  ;;  %v4072_v20 = vunpack.c.2.s8 %v3225_v34  ;;  %v4079_v1 = vunpack.c.3.s8 %v3225_v34  ;;  %v3079_v19 = vld [vmem:[%s9001_s13 + $0x1d8] sm:$0xff]  ;;  %v8424_v9 = vpop.f32.mrf.mxu0 }
 0x3e7   :  { %v5179_v30 = vpack.c.bf16 %v4430_v27, %v4423_v53  ;;  %v4200_v2 = vcvt.s32.f32 %v3304_v59  ;;  %v4207_v57 = vcvt.s32.f32 %v3311_v44  ;;  %v3513_v13 = vunpack.c.2.s8 %v3086_v6  ;;  %v3163_v44 = vld [vmem:[%s9001_s13 + $0x478] sm:$0xff] }
 0x3e8   :  { %5794 = vmatpush.bf16.msra.mxu3 %v5458_v37  ;;  %v5347_v22 = vpack.c.bf16 %v4766_v38, %v4759_v26  ;;  %v4968_v41 = vcvt.s32.f32 %v4072_v20  ;;  %v3520_v40 = vunpack.c.3.s8 %v3086_v6  ;;  %v4975_v43 = vcvt.s32.f32 %v4079_v1  ;;  %v3024_v20 = vld [vmem:[%s9001_s13 + $0x20] sm:$0xff] }
 0x3e9   :  { %5833 = vmatpush.bf16.msrb.mxu2 %v5179_v30  ;;  %v5068_v51 = vpack.c.bf16 %v4207_v57, %v4200_v2  ;;  %v3849_v18 = vunpack.c.2.s8 %v3170_v29  ;;  %v3856_v17 = vunpack.c.3.s8 %v3170_v29  ;;  %v4409_v52 = vcvt.s32.f32 %v3513_v13 }
 0x3ea   :  { %5872 = vmatpush.bf16.msra.mxu1 %v5347_v22  ;;  %v4416_v4 = vcvt.s32.f32 %v3520_v40  ;;  %v3290_v48 = vunpack.c.2.s8 %v3031_v47  ;;  %v3297_v46 = vunpack.c.3.s8 %v3031_v47  ;;  %v5451_v49 = vpack.c.bf16 %v4975_v43, %v4968_v41 }
 0x3eb   :  { %5911 = vmatpush.bf16.msrb.mxu0 %v5068_v51  ;;  %v4745_v35 = vcvt.s32.f32 %v3849_v18  ;;  %v4752_v25 = vcvt.s32.f32 %v3856_v17  ;;  %v4058_v24 = vunpack.c.0.s8 %v3225_v34  ;;  %v4065_v31 = vunpack.c.1.s8 %v3225_v34  ;;  %v8436_v18 = vpop.f32.mrf.mxu2 }
 0x3ec   :  { %v5172_v8 = vpack.c.bf16 %v4416_v4, %v4409_v52  ;;  %v4186_v15 = vcvt.s32.f32 %v3290_v48  ;;  %v4193_v58 = vcvt.s32.f32 %v3297_v46  ;;  %5795 = vmatpush.bf16.msra.mxu3 %v5451_v49  ;;  %v3499_v5 = vunpack.c.0.s8 %v3086_v6 }
 0x3ed   :  { %v5340_v63 = vpack.c.bf16 %v4752_v25, %v4745_v35  ;;  %v4954_v60 = vcvt.s32.f32 %v4058_v24  ;;  %v3506_v11 = vunpack.c.1.s8 %v3086_v6  ;;  %v4961_v10 = vcvt.s32.f32 %v4065_v31  ;;  %v3128_v31 = vld [vmem:[%s9001_s13 + $0x360] sm:$0xff] }
 0x3ee   :  { %5834 = vmatpush.bf16.msrb.mxu2 %v5172_v8  ;;  %v5061_v23 = vpack.c.bf16 %v4193_v58, %v4186_v15  ;;  %v3835_v39 = vunpack.c.0.s8 %v3170_v29  ;;  %v3842_v16 = vunpack.c.1.s8 %v3170_v29  ;;  %v4395_v54 = vcvt.s32.f32 %v3499_v5 }
 0x3ef   :  { %5873 = vmatpush.bf16.msra.mxu1 %v5340_v63  ;;  %v4402_v56 = vcvt.s32.f32 %v3506_v11  ;;  %v3276_v61 = vunpack.c.0.s8 %v3031_v47  ;;  %v3283_v34 = vunpack.c.1.s8 %v3031_v47  ;;  %v5444_v14 = vpack.c.bf16 %v4961_v10, %v4954_v60  ;;  %v5711_v63 = vpop.f32.mrf.mxu0  ;;  %v5672_v60 = vpop.f32.mrf.mxu1 }
 0x3f0   :  { %5912 = vmatpush.bf16.msrb.mxu0 %v5061_v23  ;;  %v4731_v53 = vcvt.s32.f32 %v3835_v39  ;;  %v4738_v27 = vcvt.s32.f32 %v3842_v16  ;;  %v4044_v59 = vunpack.c.2.s8 %v8419_v36  ;;  %v4051_v38 = vunpack.c.3.s8 %v8419_v36 }
 0x3f1   :  { %v5165_v6 = vpack.c.bf16 %v4402_v56, %v4395_v54  ;;  %v4172_v37 = vcvt.s32.f32 %v3276_v61  ;;  %v4179_v26 = vcvt.s32.f32 %v3283_v34  ;;  %5796 = vmatpush.bf16.msra.mxu3 %v5444_v14  ;;  %v3485_v2 = vunpack.c.2.s8 %v3079_v19 }
 0x3f2   :  { %v5333_v29 = vpack.c.bf16 %v4738_v27, %v4731_v53  ;;  %v4940_v30 = vcvt.s32.f32 %v4044_v59  ;;  %v3492_v57 = vunpack.c.3.s8 %v3079_v19  ;;  %v4947_v47 = vcvt.s32.f32 %v4051_v38 }
 0x3f3   :  { %5835 = vmatpush.bf16.msrb.mxu2 %v5165_v6  ;;  %v5054_v1 = vpack.c.bf16 %v4179_v26, %v4172_v37  ;;  %v3821_v22 = vunpack.c.2.s8 %v3163_v44  ;;  %v3828_v41 = vunpack.c.3.s8 %v3163_v44  ;;  %v4381_v13 = vcvt.s32.f32 %v3485_v2 }
 0x3f4   :  { %5874 = vmatpush.bf16.msra.mxu1 %v5333_v29  ;;  %v4388_v40 = vcvt.s32.f32 %v3492_v57  ;;  %v3262_v51 = vunpack.c.2.s8 %v3024_v20  ;;  %v3269_v43 = vunpack.c.3.s8 %v3024_v20  ;;  %v5437_v17 = vpack.c.bf16 %v4947_v47, %v4940_v30  ;;  %v5581_v29 = vpop.f32.mrf.mxu2 }
 0x3f5   :  { %5913 = vmatpush.bf16.msrb.mxu0 %v5054_v1  ;;  %v4717_v52 = vcvt.s32.f32 %v3821_v22  ;;  %v4724_v4 = vcvt.s32.f32 %v3828_v41  ;;  %v8440_v48 = vadd.f32 %v8392_v7, %v8330_v32  ;;  %v4030_v25 = vunpack.c.0.s8 %v8419_v36 }
 0x3f6   :  { %v5158_v46 = vpack.c.bf16 %v4388_v40, %v4381_v13  ;;  %v4158_v49 = vcvt.s32.f32 %v3262_v51  ;;  %v4165_v35 = vcvt.s32.f32 %v3269_v43  ;;  %5797 = vmatpush.bf16.msra.mxu3 %v5437_v17  ;;  %v4037_v8 = vunpack.c.1.s8 %v8419_v36  ;;  %v3212_v36 = vld [vmem:[%s9001_s13 + $0x600] sm:$0xff] }
 0x3f7   :  { %v5326_v24 = vpack.c.bf16 %v4724_v4, %v4717_v52  ;;  %v3471_v15 = vunpack.c.0.s8 %v3079_v19  ;;  %v3478_v58 = vunpack.c.1.s8 %v3079_v19  ;;  %v4926_v7 = vcvt.s32.f32 %v4030_v25  ;;  %v3073_v19 = vld [vmem:[%s9001_s13 + $0x1a8] sm:$0xff] }
 0x3f8   :  { %5836 = vmatpush.bf16.msrb.mxu2 %v5158_v46  ;;  %v5047_v32 = vpack.c.bf16 %v4165_v35, %v4158_v49  ;;  %v3807_v5 = vunpack.c.0.s8 %v3163_v44  ;;  %v3814_v11 = vunpack.c.1.s8 %v3163_v44  ;;  %v4933_v23 = vcvt.s32.f32 %v4037_v8  ;;  %v3157_v44 = vld [vmem:[%s9001_s13 + $0x448] sm:$0xff] }
 0x3f9   :  { %5875 = vmatpush.bf16.msra.mxu1 %v5326_v24  ;;  %v4367_v10 = vcvt.s32.f32 %v3471_v15  ;;  %v4374_v39 = vcvt.s32.f32 %v3478_v58  ;;  %v3248_v16 = vunpack.c.0.s8 %v3024_v20  ;;  %v3255_v61 = vunpack.c.1.s8 %v3024_v20  ;;  %v3121_v8 = vld [vmem:[%s9001_s13 + $0x328] sm:$0xff] }
 0x3fa   :  { %5914 = vmatpush.bf16.msrb.mxu0 %v5047_v32  ;;  %v4703_v54 = vcvt.s32.f32 %v3807_v5  ;;  %v4710_v56 = vcvt.s32.f32 %v3814_v11  ;;  %v3681_v34 = vunpack.c.2.s8 %v3128_v31  ;;  %v5430_v14 = vpack.c.bf16 %v4933_v23, %v4926_v7  ;;  %v3205_v11 = vld [vmem:[%s9001_s13 + $0x5c8] sm:$0xff] }
 0x3fb   :  { %v5151_v53 = vpack.c.bf16 %v4374_v39, %v4367_v10  ;;  %v4144_v27 = vcvt.s32.f32 %v3248_v16  ;;  %v3688_v59 = vunpack.c.3.s8 %v3128_v31  ;;  %v4151_v37 = vcvt.s32.f32 %v3255_v61 }
 0x3fc   :  { %v5319_v6 = vpack.c.bf16 %v4710_v56, %v4703_v54  ;;  %v4577_v26 = vcvt.s32.f32 %v3681_v34  ;;  %v4017_v38 = vunpack.c.2.s8 %v3212_v36  ;;  %5798 = vmatpush.bf16.msra.mxu3 %v5430_v14  ;;  %v4024_v30 = vunpack.c.3.s8 %v3212_v36 }
 0x3fd   :  { %5837 = vmatpush.bf16.msrb.mxu2 %v5151_v53  ;;  %v4584_v20 = vcvt.s32.f32 %v3688_v59  ;;  %v3458_v2 = vunpack.c.2.s8 %v3073_v19  ;;  %v3465_v57 = vunpack.c.3.s8 %v3073_v19  ;;  %v5040_v1 = vpack.c.bf16 %v4151_v37, %v4144_v27 }
 0x3fe   :  { %5876 = vmatpush.bf16.msra.mxu1 %v5319_v6  ;;  %v4913_v47 = vcvt.s32.f32 %v4017_v38  ;;  %v3794_v22 = vunpack.c.2.s8 %v3157_v44  ;;  %v3801_v41 = vunpack.c.3.s8 %v3157_v44  ;;  %v4920_v40 = vcvt.s32.f32 %v4024_v30 }
 0x3ff   :  { %v5256_v13 = vpack.c.bf16 %v4584_v20, %v4577_v26  ;;  %v4354_v51 = vcvt.s32.f32 %v3458_v2  ;;  %v4361_v43 = vcvt.s32.f32 %v3465_v57  ;;  %5915 = vmatpush.bf16.msrb.mxu0 %v5040_v1  ;;  %5799 = vmatmul.bf16.vlgmr.msra.gmra.mxu3 %v8202_v42  ;;  %v3667_v4 = vunpack.c.0.s8 %v3128_v31 }
 0x400   :  { %v4690_v17 = vcvt.s32.f32 %v3794_v22  ;;  %v4697_v52 = vcvt.s32.f32 %v3801_v41  ;;  %v3674_v46 = vunpack.c.1.s8 %v3128_v31  ;;  %v5424_v49 = vpack.c.bf16 %v4920_v40, %v4913_v47  ;;  %5838 = vmatmul.bf16.vlgmr.msrb.gmra.mxu2 %v7829_v21 }
 0x401   :  { %5843 = vmatpush.bf16.msrb.mxu3 %v5256_v13  ;;  %v5145_v35 = vpack.c.bf16 %v4361_v43, %v4354_v51  ;;  %v4003_v25 = vunpack.c.0.s8 %v3212_v36  ;;  %v4010_v24 = vunpack.c.1.s8 %v3212_v36  ;;  %5877 = vmatmul.bf16.vlgmr.msra.gmra.mxu1 %v8039_v0  ;;  %v4563_v58 = vcvt.s32.f32 %v3667_v4  ;;  %v3066_v36 = vld [vmem:[%s9001_s13 + $0x170] sm:$0xff] }
 0x402   :  { %v5313_v15 = vpack.c.bf16 %v4697_v52, %v4690_v17  ;;  %v4570_v63 = vcvt.s32.f32 %v3674_v46  ;;  %v3444_v60 = vunpack.c.0.s8 %v3073_v19  ;;  %5882 = vmatpush.bf16.msra.mxu2 %v5424_v49  ;;  %v3451_v7 = vunpack.c.1.s8 %v3073_v19  ;;  %5916 = vmatmul.bf16.vlgmr.msrb.gmra.mxu0 %v7708_v45  ;;  %v3150_v19 = vld [vmem:[%s9001_s13 + $0x410] sm:$0xff] }
 0x403   :  { %5921 = vmatpush.bf16.msrb.mxu1 %v5145_v35  ;;  %v4899_v31 = vcvt.s32.f32 %v4003_v25  ;;  %v4906_v32 = vcvt.s32.f32 %v4010_v24  ;;  %v3780_v5 = vunpack.c.0.s8 %v3157_v44  ;;  %v3787_v39 = vunpack.c.1.s8 %v3157_v44  ;;  %v3114_v25 = vld [vmem:[%s9001_s13 + $0x2f0] sm:$0xff] }
 0x404   :  { %5960 = vmatpush.bf16.msra.mxu0 %v5313_v15  ;;  %v5249_v23 = vpack.c.bf16 %v4570_v63, %v4563_v58  ;;  %v4340_v10 = vcvt.s32.f32 %v3444_v60  ;;  %v3653_v16 = vunpack.c.2.s8 %v3121_v8  ;;  %v4347_v56 = vcvt.s32.f32 %v3451_v7  ;;  %v8478_v60 = vpop.f32.mrf.mxu2 }
 0x405   :  { %v5417_v54 = vpack.c.bf16 %v4906_v32, %v4899_v31  ;;  %v4676_v61 = vcvt.s32.f32 %v3780_v5  ;;  %v3660_v34 = vunpack.c.3.s8 %v3121_v8  ;;  %v4683_v14 = vcvt.s32.f32 %v3787_v39 }
 0x406   :  { %5844 = vmatpush.bf16.msrb.mxu3 %v5249_v23  ;;  %v4549_v53 = vcvt.s32.f32 %v3653_v16  ;;  %v3989_v27 = vunpack.c.2.s8 %v3205_v11  ;;  %v3996_v59 = vunpack.c.3.s8 %v3205_v11  ;;  %v5138_v44 = vpack.c.bf16 %v4347_v56, %v4340_v10 }
 0x407   :  { %5883 = vmatpush.bf16.msra.mxu2 %v5417_v54  ;;  %v4556_v6 = vcvt.s32.f32 %v3660_v34  ;;  %v3430_v37 = vunpack.c.2.s8 %v3066_v36  ;;  %v3437_v26 = vunpack.c.3.s8 %v3066_v36  ;;  %v5306_v38 = vpack.c.bf16 %v4683_v14, %v4676_v61 }
 0x408   :  { %v4885_v29 = vcvt.s32.f32 %v3989_v27  ;;  %v4892_v20 = vcvt.s32.f32 %v3996_v59  ;;  %v3766_v30 = vunpack.c.2.s8 %v3150_v19  ;;  %5922 = vmatpush.bf16.msrb.mxu1 %v5138_v44  ;;  %v3773_v47 = vunpack.c.3.s8 %v3150_v19 }
 0x409   :  { %v5242_v2 = vpack.c.bf16 %v4556_v6, %v4549_v53  ;;  %v4326_v57 = vcvt.s32.f32 %v3430_v37  ;;  %v4333_v1 = vcvt.s32.f32 %v3437_v26  ;;  %5961 = vmatpush.bf16.msra.mxu0 %v5306_v38  ;;  %v3639_v13 = vunpack.c.0.s8 %v3121_v8 }
 0x40a   :  { %v5410_v22 = vpack.c.bf16 %v4892_v20, %v4885_v29  ;;  %v4662_v41 = vcvt.s32.f32 %v3766_v30  ;;  %v3646_v40 = vunpack.c.1.s8 %v3121_v8  ;;  %v4669_v43 = vcvt.s32.f32 %v3773_v47  ;;  %v3198_v8 = vld [vmem:[%s9001_s13 + $0x590] sm:$0xff] }
 0x40b   :  { %5845 = vmatpush.bf16.msrb.mxu3 %v5242_v2  ;;  %v5131_v51 = vpack.c.bf16 %v4333_v1, %v4326_v57  ;;  %v3975_v17 = vunpack.c.0.s8 %v3205_v11  ;;  %v3982_v52 = vunpack.c.1.s8 %v3205_v11  ;;  %v4535_v4 = vcvt.s32.f32 %v3639_v13  ;;  %v3059_v11 = vld [vmem:[%s9001_s13 + $0x138] sm:$0xff] }
 0x40c   :  { %5884 = vmatpush.bf16.msra.mxu2 %v5410_v22  ;;  %v4542_v46 = vcvt.s32.f32 %v3646_v40  ;;  %v3416_v49 = vunpack.c.0.s8 %v3066_v36  ;;  %v3423_v35 = vunpack.c.1.s8 %v3066_v36  ;;  %v5299_v24 = vpack.c.bf16 %v4669_v43, %v4662_v41  ;;  %v3143_v36 = vld [vmem:[%s9001_s13 + $0x3d8] sm:$0xff]  ;;  %v5633_v41 = vpop.f32.mrf.mxu2 }
 0x40d   :  { %5923 = vmatpush.bf16.msrb.mxu1 %v5131_v51  ;;  %v4871_v15 = vcvt.s32.f32 %v3975_v17  ;;  %v4878_v58 = vcvt.s32.f32 %v3982_v52  ;;  %v3752_v63 = vunpack.c.0.s8 %v3150_v19  ;;  %v3759_v5 = vunpack.c.1.s8 %v3150_v19  ;;  %v3107_v17 = vld [vmem:[%s9001_s13 + $0x2b8] sm:$0xff] }
 0x40e   :  { %v5235_v31 = vpack.c.bf16 %v4542_v46, %v4535_v4  ;;  %v4312_v32 = vcvt.s32.f32 %v3416_v49  ;;  %v4319_v7 = vcvt.s32.f32 %v3423_v35  ;;  %5962 = vmatpush.bf16.msra.mxu0 %v5299_v24  ;;  %v8485_v39 = vadd.f32 %v8436_v18, %v8402_v50  ;;  %v3191_v35 = vld [vmem:[%s9001_s13 + $0x558] sm:$0xff]  ;;  %v8498_v24 = vpop.f32.mrf.mxu0 }
 0x40f   :  { %v5403_v23 = vpack.c.bf16 %v4878_v58, %v4871_v15  ;;  %v4648_v10 = vcvt.s32.f32 %v3752_v63  ;;  %v3625_v16 = vunpack.c.2.s8 %v3114_v25  ;;  %v4655_v56 = vcvt.s32.f32 %v3759_v5 }
 0x410   :  { %5846 = vmatpush.bf16.msrb.mxu3 %v5235_v31  ;;  %v5124_v54 = vpack.c.bf16 %v4319_v7, %v4312_v32  ;;  %v3632_v61 = vunpack.c.3.s8 %v3114_v25  ;;  %v3961_v34 = vunpack.c.2.s8 %v3198_v8  ;;  %v3968_v14 = vunpack.c.3.s8 %v3198_v8  ;;  %v3052_v31 = vld [vmem:[%s9001_s13 + $0x100] sm:$0xff] }
 0x411   :  { %5885 = vmatpush.bf16.msra.mxu2 %v5403_v23  ;;  %v4521_v19 = vcvt.s32.f32 %v3625_v16  ;;  %v3402_v53 = vunpack.c.2.s8 %v3059_v11  ;;  %v3409_v27 = vunpack.c.3.s8 %v3059_v11  ;;  %v5292_v59 = vpack.c.bf16 %v4655_v56, %v4648_v10  ;;  %v3136_v56 = vld [vmem:[%s9001_s13 + $0x3a0] sm:$0xff] }
 0x412   :  { %5924 = vmatpush.bf16.msrb.mxu1 %v5124_v54  ;;  %v4528_v44 = vcvt.s32.f32 %v3632_v61  ;;  %v4857_v50 = vcvt.s32.f32 %v3961_v34  ;;  %v3738_v18 = vunpack.c.2.s8 %v3143_v36  ;;  %v4864_v6 = vcvt.s32.f32 %v3968_v14 }
 0x413   :  { %v4298_v37 = vcvt.s32.f32 %v3402_v53  ;;  %v4305_v26 = vcvt.s32.f32 %v3409_v27  ;;  %v3745_v38 = vunpack.c.3.s8 %v3143_v36  ;;  %5963 = vmatpush.bf16.msra.mxu0 %v5292_v59  ;;  %v3611_v30 = vunpack.c.0.s8 %v3114_v25 }
 0x414   :  { %v5228_v29 = vpack.c.bf16 %v4528_v44, %v4521_v19  ;;  %v4634_v20 = vcvt.s32.f32 %v3738_v18  ;;  %v3618_v2 = vunpack.c.1.s8 %v3114_v25  ;;  %v5396_v57 = vpack.c.bf16 %v4864_v6, %v4857_v50  ;;  %v8496_v25 = vpop.f32.mrf.mxu1  ;;  %v8506_v44 = vpop.f32.mrf.mxu3 }
 0x415   :  { %v5117_v1 = vpack.c.bf16 %v4305_v26, %v4298_v37  ;;  %v4641_v47 = vcvt.s32.f32 %v3745_v38  ;;  %v3947_v22 = vunpack.c.0.s8 %v3198_v8  ;;  %v4507_v13 = vcvt.s32.f32 %v3611_v30 }
 0x416   :  { %5847 = vmatpush.bf16.msrb.mxu3 %v5228_v29  ;;  %v4514_v40 = vcvt.s32.f32 %v3618_v2  ;;  %v3954_v51 = vunpack.c.1.s8 %v3198_v8  ;;  %v3388_v43 = vunpack.c.0.s8 %v3059_v11  ;;  %5886 = vmatpush.bf16.msra.mxu2 %v5396_v57  ;;  %v3395_v46 = vunpack.c.1.s8 %v3059_v11 }
 0x417   :  { %5925 = vmatpush.bf16.msrb.mxu1 %v5117_v1  ;;  %v5285_v52 = vpack.c.bf16 %v4641_v47, %v4634_v20  ;;  %v4843_v4 = vcvt.s32.f32 %v3947_v22  ;;  %v3724_v49 = vunpack.c.0.s8 %v3143_v36  ;;  %v3731_v8 = vunpack.c.1.s8 %v3143_v36  ;;  %v5763_v22 = vpop.f32.mrf.mxu0 }
 0x418   :  { %v5221_v15 = vpack.c.bf16 %v4514_v40, %v4507_v13  ;;  %v4850_v58 = vcvt.s32.f32 %v3954_v51  ;;  %v4284_v63 = vcvt.s32.f32 %v3388_v43  ;;  %v4291_v32 = vcvt.s32.f32 %v3395_v46  ;;  %v3240_v43 = vld [vmem:[%s9001_s13 + $0x6e0] sm:$0xff] }
 0x419   :  { %5964 = vmatpush.bf16.msra.mxu0 %v5285_v52  ;;  %v4620_v7 = vcvt.s32.f32 %v3724_v49  ;;  %v3597_v5 = vunpack.c.2.s8 %v3107_v17  ;;  %v3604_v11 = vunpack.c.3.s8 %v3107_v17  ;;  %v4627_v10 = vcvt.s32.f32 %v3731_v8  ;;  %v3101_v49 = vld [vmem:[%s9001_s13 + $0x288] sm:$0xff] }
 0x41a   :  { %5848 = vmatpush.bf16.msrb.mxu3 %v5221_v15  ;;  %v5389_v23 = vpack.c.bf16 %v4850_v58, %v4843_v4  ;;  %v3933_v16 = vunpack.c.2.s8 %v3191_v35  ;;  %v3940_v54 = vunpack.c.3.s8 %v3191_v35  ;;  %v5110_v61 = vpack.c.bf16 %v4291_v32, %v4284_v63  ;;  %v3185_v8 = vld [vmem:[%s9001_s13 + $0x528] sm:$0xff] }
 0x41b   :  { %v4493_v36 = vcvt.s32.f32 %v3597_v5  ;;  %v4500_v34 = vcvt.s32.f32 %v3604_v11  ;;  %v3374_v19 = vunpack.c.2.s8 %v3052_v31  ;;  %v5278_v14 = vpack.c.bf16 %v4627_v10, %v4620_v7 }
 0x41c   :  { %5887 = vmatpush.bf16.msra.mxu2 %v5389_v23  ;;  %v4829_v53 = vcvt.s32.f32 %v3933_v16  ;;  %v4836_v27 = vcvt.s32.f32 %v3940_v54  ;;  %v3381_v59 = vunpack.c.3.s8 %v3052_v31  ;;  %5926 = vmatpush.bf16.msrb.mxu1 %v5110_v61  ;;  %v3710_v6 = vunpack.c.2.s8 %v3136_v56  ;;  %v5724_v47 = vpop.f32.mrf.mxu1  ;;  %v3046_v54 = vld [vmem:[%s9001_s13 + $0xd0] sm:$0xff]  ;;  %v5594_v61 = vpop.f32.mrf.mxu3 }
 0x41d   :  { %v5214_v50 = vpack.c.bf16 %v4500_v34, %v4493_v36  ;;  %v4270_v18 = vcvt.s32.f32 %v3374_v19  ;;  %v3717_v37 = vunpack.c.3.s8 %v3136_v56  ;;  %5965 = vmatpush.bf16.msra.mxu0 %v5278_v14  ;;  %v3583_v29 = vunpack.c.0.s8 %v3107_v17  ;;  %v8520_v14 = vpop.f32.mrf.mxu2 }
 0x41e   :  { %v5382_v26 = vpack.c.bf16 %v4836_v27, %v4829_v53  ;;  %v4277_v38 = vcvt.s32.f32 %v3381_v59  ;;  %v3590_v20 = vunpack.c.1.s8 %v3107_v17  ;;  %v4606_v30 = vcvt.s32.f32 %v3710_v6 }
 0x41f   :  { %5849 = vmatpush.bf16.msrb.mxu3 %v5214_v50  ;;  %v4613_v2 = vcvt.s32.f32 %v3717_v37  ;;  %v3919_v57 = vunpack.c.0.s8 %v3191_v35  ;;  %v3926_v1 = vunpack.c.1.s8 %v3191_v35  ;;  %v4479_v13 = vcvt.s32.f32 %v3583_v29 }
 0x420   :  { %5888 = vmatpush.bf16.msra.mxu2 %v5382_v26  ;;  %v5103_v41 = vpack.c.bf16 %v4277_v38, %v4270_v18  ;;  %v4486_v40 = vcvt.s32.f32 %v3590_v20  ;;  %v3360_v51 = vunpack.c.0.s8 %v3052_v31  ;;  %v3367_v17 = vunpack.c.1.s8 %v3052_v31 }
 0x421   :  { %v5271_v52 = vpack.c.bf16 %v4613_v2, %v4606_v30  ;;  %v4815_v4 = vcvt.s32.f32 %v3919_v57  ;;  %v4822_v46 = vcvt.s32.f32 %v3926_v1  ;;  %v3696_v58 = vunpack.c.0.s8 %v3136_v56 }
 0x422   :  { %5927 = vmatpush.bf16.msrb.mxu1 %v5103_v41  ;;  %v5207_v35 = vpack.c.bf16 %v4486_v40, %v4479_v13  ;;  %v4256_v15 = vcvt.s32.f32 %v3360_v51  ;;  %v3703_v63 = vunpack.c.1.s8 %v3136_v56  ;;  %v4263_v7 = vcvt.s32.f32 %v3367_v17 }
 0x423   :  { %5966 = vmatpush.bf16.msra.mxu0 %v5271_v52  ;;  %v5375_v32 = vpack.c.bf16 %v4822_v46, %v4815_v4  ;;  %v4129_v5 = vunpack.c.2.s8 %v3240_v43  ;;  %v4136_v11 = vunpack.c.3.s8 %v3240_v43  ;;  %v4592_v31 = vcvt.s32.f32 %v3696_v58 }
 0x424   :  { %5850 = vmatpush.bf16.msrb.mxu3 %v5207_v35  ;;  %v4599_v23 = vcvt.s32.f32 %v3703_v63  ;;  %v3570_v10 = vunpack.c.2.s8 %v3101_v49  ;;  %v3577_v16 = vunpack.c.3.s8 %v3101_v49  ;;  %v5096_v56 = vpack.c.bf16 %v4263_v7, %v4256_v15  ;;  %v3178_v7 = vld [vmem:[%s9001_s13 + $0x4f0] sm:$0xff] }
 0x425   :  { %5889 = vmatpush.bf16.msra.mxu2 %v5375_v32  ;;  %v5025_v36 = vcvt.s32.f32 %v4129_v5  ;;  %v5032_v34 = vcvt.s32.f32 %v4136_v11  ;;  %v3906_v19 = vunpack.c.2.s8 %v3185_v8  ;;  %v3913_v50 = vunpack.c.3.s8 %v3185_v8  ;;  %v5685_v5 = vpop.f32.mrf.mxu2 }
 0x426   :  { %v5264_v53 = vpack.c.bf16 %v4599_v23, %v4592_v31  ;;  %v4466_v27 = vcvt.s32.f32 %v3570_v10  ;;  %v4473_v59 = vcvt.s32.f32 %v3577_v16  ;;  %5928 = vmatpush.bf16.msrb.mxu1 %v5096_v56  ;;  %v3347_v37 = vunpack.c.2.s8 %v3046_v54  ;;  %v3039_v10 = vld [vmem:[%s9001_s13 + $0x98] sm:$0xff] }
 0x427   :  { %v5480_v18 = vpack.c.bf16 %v5032_v34, %v5025_v36  ;;  %v4802_v6 = vcvt.s32.f32 %v3906_v19  ;;  %v3354_v26 = vunpack.c.3.s8 %v3046_v54  ;;  %5851 = vmatmul.bf16.vlgmr.msrb.gmra.mxu3 %v7903_v33  ;;  %v4809_v29 = vcvt.s32.f32 %v3913_v50 }
 0x428   :  { %5967 = vmatpush.bf16.msra.mxu0 %v5264_v53  ;;  %v5201_v38 = vpack.c.bf16 %v4473_v59, %v4466_v27  ;;  %v8525_v20 = vadd.f32 %v8478_v60, %v8440_v48  ;;  %5890 = vmatmul.bf16.vlgmr.msra.gmra.mxu2 %v8122_v3  ;;  %v4115_v30 = vunpack.c.0.s8 %v3240_v43  ;;  %v4243_v2 = vcvt.s32.f32 %v3347_v37  ;;  %v3233_v48 = vld [vmem:[%s9001_s13 + $0x6a8] sm:$0xff] }
 0x429   :  { %5895 = vmatpush.bf16.msra.mxu3 %v5480_v18  ;;  %v4250_v57 = vcvt.s32.f32 %v3354_v26  ;;  %v4122_v1 = vunpack.c.1.s8 %v3240_v43  ;;  %v3556_v47 = vunpack.c.0.s8 %v3101_v49  ;;  %v5369_v22 = vpack.c.bf16 %v4809_v29, %v4802_v6  ;;  %5929 = vmatmul.bf16.vlgmr.msrb.gmra.mxu1 %v7782_v55  ;;  %v3094_v43 = vld [vmem:[%s9001_s13 + $0x250] sm:$0xff] }
 0x42a   :  { %5934 = vmatpush.bf16.msrb.mxu2 %v5201_v38  ;;  %v5011_v41 = vcvt.s32.f32 %v4115_v30  ;;  %v3563_v13 = vunpack.c.1.s8 %v3101_v49  ;;  %v3892_v40 = vunpack.c.0.s8 %v3185_v8  ;;  %v3899_v4 = vunpack.c.1.s8 %v3185_v8 }
 0x42b   :  { %v5090_v60 = vpack.c.bf16 %v4250_v57, %v4243_v2  ;;  %5968 = vmatmul.bf16.vlgmr.msra.gmra.mxu0 %v7959_v12  ;;  %v5018_v51 = vcvt.s32.f32 %v4122_v1  ;;  %v4452_v52 = vcvt.s32.f32 %v3556_v47  ;;  %5973 = vmatpush.bf16.msra.mxu1 %v5369_v22  ;;  %v3333_v35 = vunpack.c.0.s8 %v3046_v54 }
 0x42c   :  { %v4459_v46 = vcvt.s32.f32 %v3563_v13  ;;  %v4788_v17 = vcvt.s32.f32 %v3892_v40  ;;  %v3340_v49 = vunpack.c.1.s8 %v3046_v54  ;;  %v4795_v58 = vcvt.s32.f32 %v3899_v4 }
 0x42d   :  { %6012 = vmatpush.bf16.msrb.mxu0 %v5090_v60  ;;  %v5473_v15 = vpack.c.bf16 %v5018_v51, %v5011_v41  ;;  %v4101_v63 = vunpack.c.2.s8 %v3233_v48  ;;  %v4108_v32 = vunpack.c.3.s8 %v3233_v48  ;;  %v4229_v11 = vcvt.s32.f32 %v3333_v35 }
 0x42e   :  { %v5194_v8 = vpack.c.bf16 %v4459_v46, %v4452_v52  ;;  %v4236_v31 = vcvt.s32.f32 %v3340_v49  ;;  %v3542_v23 = vunpack.c.2.s8 %v3094_v43  ;;  %v5362_v16 = vpack.c.bf16 %v4795_v58, %v4788_v17  ;;  %v3087_v58 = vld [vmem:[%s9001_s13 + $0x218] sm:$0xff] }
 0x42f   :  { %5896 = vmatpush.bf16.msra.mxu3 %v5473_v15  ;;  %v4997_v54 = vcvt.s32.f32 %v4101_v63  ;;  %v5004_v61 = vcvt.s32.f32 %v4108_v32  ;;  %v3549_v56 = vunpack.c.3.s8 %v3094_v43  ;;  %v3878_v19 = vunpack.c.2.s8 %v3178_v7  ;;  %v8564_v63 = vpop.f32.mrf.mxu3 }
 0x430   :  { %5935 = vmatpush.bf16.msrb.mxu2 %v5194_v8  ;;  %v5083_v36 = vpack.c.bf16 %v4236_v31, %v4229_v11  ;;  %v4438_v34 = vcvt.s32.f32 %v3542_v23  ;;  %v3885_v53 = vunpack.c.3.s8 %v3178_v7  ;;  %5974 = vmatpush.bf16.msra.mxu1 %v5362_v16  ;;  %v3319_v50 = vunpack.c.2.s8 %v3039_v10  ;;  %v3171_v11 = vld [vmem:[%s9001_s13 + $0x4b8] sm:$0xff] }
 0x431   :  { %v5466_v27 = vpack.c.bf16 %v5004_v61, %v4997_v54  ;;  %v4445_v59 = vcvt.s32.f32 %v3549_v56  ;;  %v3326_v18 = vunpack.c.3.s8 %v3039_v10  ;;  %v4774_v6 = vcvt.s32.f32 %v3878_v19 }
 0x432   :  { %6013 = vmatpush.bf16.msrb.mxu0 %v5083_v36  ;;  %v4781_v37 = vcvt.s32.f32 %v3885_v53  ;;  %v8544_v26 = vadd.f32 %v8496_v25, %v8424_v9  ;;  %v4087_v38 = vunpack.c.0.s8 %v3233_v48  ;;  %v4215_v30 = vcvt.s32.f32 %v3319_v50  ;;  %v8549_v9 = vld [vmem:[%s9002_s14] sm:$0x7f] }
 0x433   :  { %5897 = vmatpush.bf16.msra.mxu3 %v5466_v27  ;;  %v5187_v29 = vpack.c.bf16 %v4445_v59, %v4438_v34  ;;  %v4222_v2 = vcvt.s32.f32 %v3326_v18  ;;  %v4094_v57 = vunpack.c.1.s8 %v3233_v48  ;;  %v3528_v22 = vunpack.c.0.s8 %v3094_v43  ;;  %v8554_v48 = vld [vmem:[%s9003_s15] sm:$0x7f] }
 0x434   :  { %v5355_v1 = vpack.c.bf16 %v4781_v37, %v4774_v6  ;;  %v4983_v47 = vcvt.s32.f32 %v4087_v38  ;;  %v3535_v41 = vunpack.c.1.s8 %v3094_v43  ;;  %v3864_v60 = vunpack.c.0.s8 %v3178_v7  ;;  %v3226_v43 = vld [vmem:[%s9001_s13 + $0x670] sm:$0xff] }
 0x435   :  { %5936 = vmatpush.bf16.msrb.mxu2 %v5187_v29  ;;  %v5076_v13 = vpack.c.bf16 %v4222_v2, %v4215_v30  ;;  %v4990_v40 = vcvt.s32.f32 %v4094_v57  ;;  %v3871_v51 = vunpack.c.1.s8 %v3178_v7  ;;  %v4424_v25 = vcvt.s32.f32 %v3528_v22 }
 0x436   :  { %5975 = vmatpush.bf16.msra.mxu1 %v5355_v1  ;;  %v4431_v52 = vcvt.s32.f32 %v3535_v41  ;;  %v3305_v4 = vunpack.c.0.s8 %v3039_v10  ;;  %v3312_v46 = vunpack.c.1.s8 %v3039_v10  ;;  %v4760_v35 = vcvt.s32.f32 %v3864_v60  ;;  %v3032_v10 = vld [vmem:[%s9001_s13 + $0x60] sm:$0xff] }
 0x437   :  { %6014 = vmatpush.bf16.msrb.mxu0 %v5076_v13  ;;  %v5459_v17 = vpack.c.bf16 %v4990_v40, %v4983_v47  ;;  %v4767_v49 = vcvt.s32.f32 %v3871_v51  ;;  %v5593_v15 = vadd.f32 %v8506_v44, %v8485_v39  ;;  %v6222_v8 = vperm.slane %v8549_v9, 0  ;;  %v5646_v13 = vpop.f32.mrf.mxu3 }
 0x438   :  { %v5180_v32 = vpack.c.bf16 %v4431_v52, %v4424_v25  ;;  %v4201_v7 = vcvt.s32.f32 %v3305_v4  ;;  %v4208_v5 = vcvt.s32.f32 %v3312_v46  ;;  %v6245_v23 = vperm.slane %v8554_v48, 0  ;;  %v3219_v52 = vld [vmem:[%s9001_s13 + $0x638] sm:$0xff] }
 0x439   :  { %5898 = vmatpush.bf16.msra.mxu3 %v5459_v17  ;;  %v5348_v31 = vpack.c.bf16 %v4767_v49, %v4760_v35  ;;  %v4073_v39 = vunpack.c.2.s8 %v3226_v43  ;;  %v4080_v44 = vunpack.c.3.s8 %v3226_v43  ;;  %v6236_v54 = vmul.f32 %v6222_v8, %v5593_v15  ;;  %v8587_v8 = vpop.f32.mrf.mxu0 }
 0x43a   :  { %5937 = vmatpush.bf16.msrb.mxu2 %v5180_v32  ;;  %v5069_v16 = vpack.c.bf16 %v4208_v5, %v4201_v7  ;;  %v3514_v61 = vunpack.c.2.s8 %v3087_v58  ;;  %v3521_v56 = vunpack.c.3.s8 %v3087_v58  ;;  %v3850_v19 = vunpack.c.2.s8 %v3171_v11  ;;  %v8585_v5 = vpop.f32.mrf.mxu1 }
 0x43b   :  { %5976 = vmatpush.bf16.msra.mxu1 %v5348_v31  ;;  %v4969_v36 = vcvt.s32.f32 %v4073_v39  ;;  %v4976_v34 = vcvt.s32.f32 %v4080_v44  ;;  %v3857_v53 = vunpack.c.3.s8 %v3171_v11  ;;  %v6259_v27 = vadd.f32 %v6245_v23, %v6236_v54  ;;  %v3025_v44 = vld [vmem:[%s9001_s13 + $0x28] sm:$0xff] }
 0x43c   :  { %6015 = vmatpush.bf16.msrb.mxu0 %v5069_v16  ;;  %v4410_v59 = vcvt.s32.f32 %v3514_v61  ;;  %v4417_v50 = vcvt.s32.f32 %v3521_v56  ;;  %v3291_v18 = vunpack.c.2.s8 %v3032_v10  ;;  %v4746_v37 = vcvt.s32.f32 %v3850_v19 }
 0x43d   :  { %v5452_v6 = vpack.c.bf16 %v4976_v34, %v4969_v36  ;;  %v4753_v38 = vcvt.s32.f32 %v3857_v53  ;;  %v3298_v29 = vunpack.c.3.s8 %v3032_v10  ;;  %6399 = vtanh.f32 %v6259_v27 }
 0x43e   :  { %v5173_v30 = vpack.c.bf16 %v4417_v50, %v4410_v59  ;;  %v4187_v2 = vcvt.s32.f32 %v3291_v18  ;;  %v4059_v57 = vunpack.c.0.s8 %v3226_v43  ;;  %v4066_v22 = vunpack.c.1.s8 %v3226_v43  ;;  %v3080_v43 = vld [vmem:[%s9001_s13 + $0x1e0] sm:$0xff] }
 0x43f   :  { %5899 = vmatpush.bf16.msra.mxu3 %v5452_v6  ;;  %v5341_v1 = vpack.c.bf16 %v4753_v38, %v4746_v37  ;;  %v4194_v47 = vcvt.s32.f32 %v3298_v29  ;;  %v3500_v41 = vunpack.c.0.s8 %v3087_v58  ;;  %v3507_v60 = vunpack.c.1.s8 %v3087_v58  ;;  %v8583_v58 = vld [vmem:[%s9001_s13 + $0x480] sm:$0xff] }
 0x440   :  { %5938 = vmatpush.bf16.msrb.mxu2 %v5173_v30  ;;  %v4955_v40 = vcvt.s32.f32 %v4059_v57  ;;  %v3836_v51 = vunpack.c.0.s8 %v3171_v11  ;;  %v3843_v25 = vunpack.c.1.s8 %v3171_v11  ;;  %v4962_v46 = vcvt.s32.f32 %v4066_v22 }
 0x441   :  { %5977 = vmatpush.bf16.msra.mxu1 %v5341_v1  ;;  %v5062_v4 = vpack.c.bf16 %v4194_v47, %v4187_v2  ;;  %v4396_v17 = vcvt.s32.f32 %v3500_v41  ;;  %v3277_v35 = vunpack.c.0.s8 %v3032_v10  ;;  %v4403_v49 = vcvt.s32.f32 %v3507_v60 }
 0x442   :  { %v4732_v15 = vcvt.s32.f32 %v3836_v51  ;;  %v4739_v32 = vcvt.s32.f32 %v3843_v25  ;;  %v3284_v7 = vunpack.c.1.s8 %v3032_v10  ;;  %v5445_v11 = vpack.c.bf16 %v4962_v46, %v4955_v40  ;;  %v5776_v46 = vpop.f32.mrf.mxu1 }
 0x443   :  { %6016 = vmatpush.bf16.msrb.mxu0 %v5062_v4  ;;  %v4173_v31 = vcvt.s32.f32 %v3277_v35  ;;  %v4045_v23 = vunpack.c.2.s8 %v3219_v52  ;;  %v4052_v39 = vunpack.c.3.s8 %v3219_v52  ;;  %v6400_v16 = vpop.eup %6399  ;;  %v5166_v10 = vpack.c.bf16 %v4403_v49, %v4396_v17  ;;  %v8598_v4 = vld [vmem:[%s9001_s13 + $0x368] sm:$0xff]  ;;  %v5815_v17 = vpop.f32.mrf.mxu0 }
 0x444   :  { %v5334_v54 = vpack.c.bf16 %v4739_v32, %v4732_v15  ;;  %v4180_v61 = vcvt.s32.f32 %v3284_v7  ;;  %v3486_v56 = vunpack.c.2.s8 %v3080_v43  ;;  %6273 = vst [vmem:[#allocation2] sm:$0xff] %v6400_v16  ;;  %5900 = vmatpush.bf16.msra.mxu3 %v5445_v11  ;;  %v3493_v19 = vunpack.c.3.s8 %v3080_v43  ;;  %v8604_v32 = vpop.f32.mrf.mxu2  ;;  %v8606_v7 = vpop.f32.mrf.mxu3  ;;  %v8611_v16 = vld [vmem:[%s9001_s13 + $0x1b0] sm:$0xff] }
 0x445   :  { %v4941_v36 = vcvt.s32.f32 %v4045_v23  ;;  %v4948_v34 = vcvt.s32.f32 %v4052_v39  ;;  %v3822_v53 = vunpack.c.2.s8 %v8583_v58  ;;  %5939 = vmatpush.bf16.msrb.mxu2 %v5166_v10  ;;  %v3829_v50 = vunpack.c.3.s8 %v8583_v58 }
 0x446   :  { %5978 = vmatpush.bf16.msra.mxu1 %v5334_v54  ;;  %v5055_v27 = vpack.c.bf16 %v4180_v61, %v4173_v31  ;;  %v4382_v59 = vcvt.s32.f32 %v3486_v56  ;;  %v3263_v18 = vunpack.c.2.s8 %v3025_v44  ;;  %v4389_v37 = vcvt.s32.f32 %v3493_v19 }
 0x447   :  { %v5438_v6 = vpack.c.bf16 %v4948_v34, %v4941_v36  ;;  %v4718_v38 = vcvt.s32.f32 %v3822_v53  ;;  %v3270_v29 = vunpack.c.3.s8 %v3025_v44  ;;  %v4725_v30 = vcvt.s32.f32 %v3829_v50 }
 0x448   :  { %6017 = vmatpush.bf16.msrb.mxu0 %v5055_v27  ;;  %v4159_v2 = vcvt.s32.f32 %v3263_v18  ;;  %v4031_v57 = vunpack.c.0.s8 %v3219_v52  ;;  %v4038_v1 = vunpack.c.1.s8 %v3219_v52  ;;  %v5159_v47 = vpack.c.bf16 %v4389_v37, %v4382_v59 }
 0x449   :  { %5901 = vmatpush.bf16.msra.mxu3 %v5438_v6  ;;  %v4166_v22 = vcvt.s32.f32 %v3270_v29  ;;  %v3472_v41 = vunpack.c.0.s8 %v3080_v43  ;;  %v3479_v13 = vunpack.c.1.s8 %v3080_v43  ;;  %v5327_v40 = vpack.c.bf16 %v4725_v30, %v4718_v38  ;;  %v3213_v43 = vld [vmem:[%s9001_s13 + $0x608] sm:$0xff] }
 0x44a   :  { %v4927_v60 = vcvt.s32.f32 %v4031_v57  ;;  %v4934_v51 = vcvt.s32.f32 %v4038_v1  ;;  %v3808_v25 = vunpack.c.0.s8 %v8583_v58  ;;  %5940 = vmatpush.bf16.msrb.mxu2 %v5159_v47  ;;  %v3815_v15 = vunpack.c.1.s8 %v8583_v58 }
 0x44b   :  { %v5048_v35 = vpack.c.bf16 %v4166_v22, %v4159_v2  ;;  %v4368_v52 = vcvt.s32.f32 %v3472_v41  ;;  %v4375_v49 = vcvt.s32.f32 %v3479_v13  ;;  %5979 = vmatpush.bf16.msra.mxu1 %v5327_v40  ;;  %v3249_v23 = vunpack.c.0.s8 %v3025_v44 }
 0x44c   :  { %v5431_v11 = vpack.c.bf16 %v4934_v51, %v4927_v60  ;;  %v4704_v31 = vcvt.s32.f32 %v3808_v25  ;;  %v3256_v39 = vunpack.c.1.s8 %v3025_v44  ;;  %v4711_v10 = vcvt.s32.f32 %v3815_v15  ;;  %v3158_v44 = vld [vmem:[%s9001_s13 + $0x450] sm:$0xff]  ;;  %v5737_v25 = vpop.f32.mrf.mxu2  ;;  %v5698_v46 = vpop.f32.mrf.mxu3 }
 0x44d   :  { %6018 = vmatpush.bf16.msrb.mxu0 %v5048_v35  ;;  %v5152_v58 = vpack.c.bf16 %v4375_v49, %v4368_v52  ;;  %v3682_v54 = vunpack.c.2.s8 %v8598_v4  ;;  %v3689_v61 = vunpack.c.3.s8 %v8598_v4  ;;  %v4145_v56 = vcvt.s32.f32 %v3249_v23  ;;  %v3122_v52 = vld [vmem:[%s9001_s13 + $0x330] sm:$0xff] }
 0x44e   :  { %5902 = vmatpush.bf16.msra.mxu3 %v5431_v11  ;;  %v4152_v36 = vcvt.s32.f32 %v3256_v39  ;;  %v4018_v34 = vunpack.c.2.s8 %v3213_v43  ;;  %v4025_v19 = vunpack.c.3.s8 %v3213_v43  ;;  %v5320_v53 = vpack.c.bf16 %v4711_v10, %v4704_v31 }
 0x44f   :  { %5941 = vmatpush.bf16.msrb.mxu2 %v5152_v58  ;;  %v4578_v27 = vcvt.s32.f32 %v3682_v54  ;;  %v4585_v59 = vcvt.s32.f32 %v3689_v61  ;;  %v3459_v50 = vunpack.c.2.s8 %v8611_v16  ;;  %v3466_v38 = vunpack.c.3.s8 %v8611_v16 }
 0x450   :  { %v5041_v18 = vpack.c.bf16 %v4152_v36, %v4145_v56  ;;  %v4914_v6 = vcvt.s32.f32 %v4018_v34  ;;  %v4921_v37 = vcvt.s32.f32 %v4025_v19  ;;  %5980 = vmatpush.bf16.msra.mxu1 %v5320_v53  ;;  %v3795_v2 = vunpack.c.2.s8 %v3158_v44  ;;  %v3067_v56 = vld [vmem:[%s9001_s13 + $0x178] sm:$0xff] }
 0x451   :  { %v5257_v29 = vpack.c.bf16 %v4585_v59, %v4578_v27  ;;  %v4355_v30 = vcvt.s32.f32 %v3459_v50  ;;  %v3802_v57 = vunpack.c.3.s8 %v3158_v44  ;;  %5903 = vmatmul.bf16.vlgmr.msra.gmra.mxu3 %v8202_v42  ;;  %v4362_v47 = vcvt.s32.f32 %v3466_v38 }
 0x452   :  { %6019 = vmatpush.bf16.msrb.mxu0 %v5041_v18  ;;  %v5425_v1 = vpack.c.bf16 %v4921_v37, %v4914_v6  ;;  %v5645_v22 = vadd.f32 %v8564_v63, %v8525_v20  ;;  %5942 = vmatmul.bf16.vlgmr.msrb.gmra.mxu2 %v7829_v21  ;;  %v3668_v41 = vunpack.c.0.s8 %v8598_v4  ;;  %v4691_v13 = vcvt.s32.f32 %v3795_v2 }
 0x453   :  { %5947 = vmatpush.bf16.msrb.mxu3 %v5257_v29  ;;  %v4698_v40 = vcvt.s32.f32 %v3802_v57  ;;  %v3675_v60 = vunpack.c.1.s8 %v8598_v4  ;;  %v4004_v51 = vunpack.c.0.s8 %v3213_v43  ;;  %v5146_v17 = vpack.c.bf16 %v4362_v47, %v4355_v30  ;;  %5981 = vmatmul.bf16.vlgmr.msra.gmra.mxu1 %v8039_v0 }
 0x454   :  { %5986 = vmatpush.bf16.msra.mxu2 %v5425_v1  ;;  %v8627_v35 = vadd.f32 %v8362_v28, %v5645_v22  ;;  %v4564_v20 = vcvt.s32.f32 %v3668_v41  ;;  %v4011_v63 = vunpack.c.1.s8 %v3213_v43  ;;  %v3445_v11 = vunpack.c.0.s8 %v8611_v16  ;;  %v3206_v43 = vld [vmem:[%s9001_s13 + $0x5d0] sm:$0xff] }
 0x455   :  { %v5314_v49 = vpack.c.bf16 %v4698_v40, %v4691_v13  ;;  %6020 = vmatmul.bf16.vlgmr.msrb.gmra.mxu0 %v7708_v45  ;;  %v4571_v4 = vcvt.s32.f32 %v3675_v60  ;;  %v4900_v15 = vcvt.s32.f32 %v4004_v51  ;;  %6025 = vmatpush.bf16.msrb.mxu1 %v5146_v17  ;;  %v3452_v28 = vunpack.c.1.s8 %v8611_v16  ;;  %v3151_v16 = vld [vmem:[%s9001_s13 + $0x418] sm:$0xff] }
 0x456   :  { %v4907_v31 = vcvt.s32.f32 %v4011_v63  ;;  %v3781_v23 = vunpack.c.0.s8 %v3158_v44  ;;  %v3788_v39 = vunpack.c.1.s8 %v3158_v44  ;;  %v4341_v10 = vcvt.s32.f32 %v3445_v11  ;;  %v8648_v63 = vld [vmem:[%s9001_s13 + $0x2f8] sm:$0xff] }
 0x457   :  { %6064 = vmatpush.bf16.msra.mxu0 %v5314_v49  ;;  %v5250_v58 = vpack.c.bf16 %v4571_v4, %v4564_v20  ;;  %v3654_v54 = vunpack.c.2.s8 %v3122_v52  ;;  %v3661_v61 = vunpack.c.3.s8 %v3122_v52  ;;  %v4348_v34 = vcvt.s32.f32 %v3452_v28 }
 0x458   :  { %v5418_v36 = vpack.c.bf16 %v4907_v31, %v4900_v15  ;;  %v4677_v19 = vcvt.s32.f32 %v3781_v23  ;;  %v4684_v53 = vcvt.s32.f32 %v3788_v39  ;;  %v3990_v59 = vunpack.c.2.s8 %v3206_v43  ;;  %v3199_v39 = vld [vmem:[%s9001_s13 + $0x598] sm:$0xff] }
 0x459   :  { %5948 = vmatpush.bf16.msrb.mxu3 %v5250_v58  ;;  %v4550_v44 = vcvt.s32.f32 %v3654_v54  ;;  %v4557_v27 = vcvt.s32.f32 %v3661_v61  ;;  %v3997_v50 = vunpack.c.3.s8 %v3206_v43  ;;  %v5139_v18 = vpack.c.bf16 %v4348_v34, %v4341_v10  ;;  %v3060_v61 = vld [vmem:[%s9001_s13 + $0x140] sm:$0xff] }
 0x45a   :  { %5987 = vmatpush.bf16.msra.mxu2 %v5418_v36  ;;  %v5307_v6 = vpack.c.bf16 %v4684_v53, %v4677_v19  ;;  %v3431_v37 = vunpack.c.2.s8 %v3067_v56  ;;  %v3438_v38 = vunpack.c.3.s8 %v3067_v56  ;;  %v4886_v30 = vcvt.s32.f32 %v3990_v59  ;;  %v3144_v53 = vld [vmem:[%s9001_s13 + $0x3e0] sm:$0xff] }
 0x45b   :  { %v5243_v29 = vpack.c.bf16 %v4557_v27, %v4550_v44  ;;  %v4893_v2 = vcvt.s32.f32 %v3997_v50  ;;  %v3767_v57 = vunpack.c.2.s8 %v3151_v16  ;;  %6026 = vmatpush.bf16.msrb.mxu1 %v5139_v18  ;;  %v3774_v22 = vunpack.c.3.s8 %v3151_v16 }
 0x45c   :  { %6065 = vmatpush.bf16.msra.mxu0 %v5307_v6  ;;  %v4327_v1 = vcvt.s32.f32 %v3431_v37  ;;  %v4334_v47 = vcvt.s32.f32 %v3438_v38  ;;  %v3640_v41 = vunpack.c.0.s8 %v3122_v52  ;;  %v3647_v60 = vunpack.c.1.s8 %v3122_v52 }
 0x45d   :  { %5949 = vmatpush.bf16.msrb.mxu3 %v5243_v29  ;;  %v5411_v13 = vpack.c.bf16 %v4893_v2, %v4886_v30  ;;  %v4663_v40 = vcvt.s32.f32 %v3767_v57  ;;  %v3976_v51 = vunpack.c.0.s8 %v3206_v43  ;;  %v4670_v46 = vcvt.s32.f32 %v3774_v22 }
 0x45e   :  { %v5132_v25 = vpack.c.bf16 %v4334_v47, %v4327_v1  ;;  %v4536_v17 = vcvt.s32.f32 %v3640_v41  ;;  %v3983_v20 = vunpack.c.1.s8 %v3206_v43  ;;  %v4543_v49 = vcvt.s32.f32 %v3647_v60 }
 0x45f   :  { %5988 = vmatpush.bf16.msra.mxu2 %v5411_v13  ;;  %v4872_v4 = vcvt.s32.f32 %v3976_v51  ;;  %v3417_v15 = vunpack.c.0.s8 %v3067_v56  ;;  %v3424_v11 = vunpack.c.1.s8 %v3067_v56  ;;  %v5300_v31 = vpack.c.bf16 %v4670_v46, %v4663_v40 }
 0x460   :  { %6027 = vmatpush.bf16.msrb.mxu1 %v5132_v25  ;;  %v4879_v28 = vcvt.s32.f32 %v3983_v20  ;;  %v3753_v23 = vunpack.c.0.s8 %v3151_v16  ;;  %v3760_v52 = vunpack.c.1.s8 %v3151_v16  ;;  %v5236_v43 = vpack.c.bf16 %v4543_v49, %v4536_v17 }
 0x461   :  { %v4313_v58 = vcvt.s32.f32 %v3417_v15  ;;  %v4320_v10 = vcvt.s32.f32 %v3424_v11  ;;  %v3626_v54 = vunpack.c.2.s8 %v8648_v63  ;;  %6066 = vmatpush.bf16.msra.mxu0 %v5300_v31  ;;  %v3633_v19 = vunpack.c.3.s8 %v8648_v63 }
 0x462   :  { %v5404_v56 = vpack.c.bf16 %v4879_v28, %v4872_v4  ;;  %v4649_v36 = vcvt.s32.f32 %v3753_v23  ;;  %v4656_v34 = vcvt.s32.f32 %v3760_v52  ;;  %5950 = vmatpush.bf16.msrb.mxu3 %v5236_v43  ;;  %v3962_v27 = vunpack.c.2.s8 %v3199_v39  ;;  %v8679_v43 = vpop.f32.mrf.mxu1 }
 0x463   :  { %v5125_v16 = vpack.c.bf16 %v4320_v10, %v4313_v58  ;;  %v4522_v44 = vcvt.s32.f32 %v3626_v54  ;;  %v3969_v59 = vunpack.c.3.s8 %v3199_v39  ;;  %v4529_v18 = vcvt.s32.f32 %v3633_v19  ;;  %v8681_v58 = vpop.f32.mrf.mxu0 }
 0x464   :  { %5989 = vmatpush.bf16.msra.mxu2 %v5404_v56  ;;  %v5293_v50 = vpack.c.bf16 %v4656_v34, %v4649_v36  ;;  %v3403_v6 = vunpack.c.2.s8 %v3060_v61  ;;  %v3410_v37 = vunpack.c.3.s8 %v3060_v61  ;;  %v4858_v38 = vcvt.s32.f32 %v3962_v27 }
 0x465   :  { %6028 = vmatpush.bf16.msrb.mxu1 %v5125_v16  ;;  %v4865_v29 = vcvt.s32.f32 %v3969_v59  ;;  %v3739_v30 = vunpack.c.2.s8 %v3144_v53  ;;  %v3746_v2 = vunpack.c.3.s8 %v3144_v53  ;;  %v5229_v57 = vpack.c.bf16 %v4529_v18, %v4522_v44  ;;  %v3137_v16 = vld [vmem:[%s9001_s13 + $0x3a8] sm:$0xff] }
 0x466   :  { %6067 = vmatpush.bf16.msra.mxu0 %v5293_v50  ;;  %v4299_v1 = vcvt.s32.f32 %v3403_v6  ;;  %v4306_v47 = vcvt.s32.f32 %v3410_v37  ;;  %v8663_v22 = vadd.f32 %v8604_v32, %v8544_v26  ;;  %v5671_v60 = vadd.f32 %v8426_v62, %v8627_v35 }
 0x467   :  { %v5397_v41 = vpack.c.bf16 %v4865_v29, %v4858_v38  ;;  %v4635_v13 = vcvt.s32.f32 %v3739_v30  ;;  %v4642_v40 = vcvt.s32.f32 %v3746_v2  ;;  %5951 = vmatpush.bf16.msrb.mxu3 %v5229_v57  ;;  %v6223_v25 = vperm.slane %v8549_v9, 1  ;;  %v3108_v9 = vld [vmem:[%s9001_s13 + $0x2c0] sm:$0xff] }
 0x468   :  { %v5118_v51 = vpack.c.bf16 %v4306_v47, %v4299_v1  ;;  %v6246_v46 = vperm.slane %v8554_v48, 1  ;;  %v3612_v17 = vunpack.c.0.s8 %v8648_v63  ;;  %v5684_v49 = vadd.f32 %v8520_v14, %v5671_v60 }
 0x469   :  { %5990 = vmatpush.bf16.msra.mxu2 %v5397_v41  ;;  %v5286_v20 = vpack.c.bf16 %v4642_v40, %v4635_v13  ;;  %v3619_v26 = vunpack.c.1.s8 %v8648_v63  ;;  %v3948_v32 = vunpack.c.0.s8 %v3199_v39  ;;  %v3955_v15 = vunpack.c.1.s8 %v3199_v39  ;;  %v3192_v39 = vld [vmem:[%s9001_s13 + $0x560] sm:$0xff] }
 0x46a   :  { %6029 = vmatpush.bf16.msrb.mxu1 %v5118_v51  ;;  %v4508_v4 = vcvt.s32.f32 %v3612_v17  ;;  %v3389_v11 = vunpack.c.0.s8 %v3060_v61  ;;  %v3396_v62 = vunpack.c.1.s8 %v3060_v61  ;;  %v5697_v48 = vadd.f32 %v8606_v7, %v5684_v49  ;;  %v3053_v7 = vld [vmem:[%s9001_s13 + $0x108] sm:$0xff]  ;;  %v5828_v49 = vpop.f32.mrf.mxu1 }
 0x46b   :  { %6068 = vmatpush.bf16.msra.mxu0 %v5286_v20  ;;  %v4515_v35 = vcvt.s32.f32 %v3619_v26  ;;  %v4844_v31 = vcvt.s32.f32 %v3948_v32  ;;  %v3725_v28 = vunpack.c.0.s8 %v3144_v53  ;;  %v4851_v23 = vcvt.s32.f32 %v3955_v15  ;;  %v5867_v26 = vpop.f32.mrf.mxu0 }
 0x46c   :  { %v4285_v14 = vcvt.s32.f32 %v3389_v11  ;;  %v4292_v52 = vcvt.s32.f32 %v3396_v62  ;;  %v3732_v63 = vunpack.c.1.s8 %v3144_v53  ;;  %v6237_v10 = vmul.f32 %v6223_v25, %v5697_v48  ;;  %v3241_v62 = vld [vmem:[%s9001_s13 + $0x6e8] sm:$0xff] }
 0x46d   :  { %v5222_v54 = vpack.c.bf16 %v4515_v35, %v4508_v4  ;;  %v4621_v61 = vcvt.s32.f32 %v3725_v28  ;;  %v3598_v56 = vunpack.c.2.s8 %v3108_v9  ;;  %v5390_v36 = vpack.c.bf16 %v4851_v23, %v4844_v31  ;;  %v3102_v28 = vld [vmem:[%s9001_s13 + $0x290] sm:$0xff]  ;;  %v8695_v23 = vpop.f32.mrf.mxu3 }
 0x46e   :  { %v5111_v34 = vpack.c.bf16 %v4292_v52, %v4285_v14  ;;  %v4628_v19 = vcvt.s32.f32 %v3732_v63  ;;  %v3605_v53 = vunpack.c.3.s8 %v3108_v9  ;;  %v6260_v44 = vadd.f32 %v6246_v46, %v6237_v10  ;;  %v8697_v14 = vpop.f32.mrf.mxu2 }
 0x46f   :  { %5952 = vmatpush.bf16.msrb.mxu3 %v5222_v54  ;;  %v4494_v27 = vcvt.s32.f32 %v3598_v56  ;;  %v3934_v59 = vunpack.c.2.s8 %v3192_v39  ;;  %v3941_v50 = vunpack.c.3.s8 %v3192_v39  ;;  %5991 = vmatpush.bf16.msra.mxu2 %v5390_v36  ;;  %v3375_v37 = vunpack.c.2.s8 %v3053_v7 }
 0x470   :  { %6030 = vmatpush.bf16.msrb.mxu1 %v5111_v34  ;;  %v5279_v18 = vpack.c.bf16 %v4628_v19, %v4621_v61  ;;  %v4501_v6 = vcvt.s32.f32 %v3605_v53  ;;  %v3382_v38 = vunpack.c.3.s8 %v3053_v7  ;;  %6401 = vtanh.f32 %v6260_v44  ;;  %v3186_v61 = vld [vmem:[%s9001_s13 + $0x530] sm:$0xff]  ;;  %v3047_v19 = vld [vmem:[%s9001_s13 + $0xd8] sm:$0xff] }
 0x471   :  { %v4830_v29 = vcvt.s32.f32 %v3934_v59  ;;  %v4837_v30 = vcvt.s32.f32 %v3941_v50  ;;  %v3711_v2 = vunpack.c.2.s8 %v3137_v16  ;;  %v4271_v1 = vcvt.s32.f32 %v3375_v37 }
 0x472   :  { %6069 = vmatpush.bf16.msra.mxu0 %v5279_v18  ;;  %v5215_v57 = vpack.c.bf16 %v4501_v6, %v4494_v27  ;;  %v4278_v47 = vcvt.s32.f32 %v3382_v38  ;;  %v3718_v41 = vunpack.c.3.s8 %v3137_v16  ;;  %v3584_v60 = vunpack.c.0.s8 %v3108_v9 }
 0x473   :  { %v5383_v13 = vpack.c.bf16 %v4837_v30, %v4830_v29  ;;  %v4607_v40 = vcvt.s32.f32 %v3711_v2  ;;  %v3591_v51 = vunpack.c.1.s8 %v3108_v9  ;;  %v3920_v17 = vunpack.c.0.s8 %v3192_v39 }
 0x474   :  { %5953 = vmatpush.bf16.msrb.mxu3 %v5215_v57  ;;  %v5104_v25 = vpack.c.bf16 %v4278_v47, %v4271_v1  ;;  %v4614_v46 = vcvt.s32.f32 %v3718_v41  ;;  %v3927_v20 = vunpack.c.1.s8 %v3192_v39  ;;  %v4480_v32 = vcvt.s32.f32 %v3584_v60 }
 0x475   :  { %5992 = vmatpush.bf16.msra.mxu2 %v5383_v13  ;;  %v4487_v4 = vcvt.s32.f32 %v3591_v51  ;;  %v3361_v15 = vunpack.c.0.s8 %v3053_v7  ;;  %v3368_v11 = vunpack.c.1.s8 %v3053_v7  ;;  %v4816_v35 = vcvt.s32.f32 %v3920_v17 }
 0x476   :  { %6031 = vmatpush.bf16.msrb.mxu1 %v5104_v25  ;;  %v5272_v48 = vpack.c.bf16 %v4614_v46, %v4607_v40  ;;  %v4823_v9 = vcvt.s32.f32 %v3927_v20  ;;  %v3697_v31 = vunpack.c.0.s8 %v3137_v16  ;;  %v6402_v52 = vpop.eup %6401  ;;  %v3704_v54 = vunpack.c.1.s8 %v3137_v16  ;;  %v5750_v20 = vpop.f32.mrf.mxu3 }
 0x477   :  { %v5208_v63 = vpack.c.bf16 %v4487_v4, %v4480_v32  ;;  %v4257_v39 = vcvt.s32.f32 %v3361_v15  ;;  %v4264_v10 = vcvt.s32.f32 %v3368_v11  ;;  %6274 = vst [vmem:[#allocation2 + $0x8] sm:$0xff] %v6402_v52  ;;  %v4130_v36 = vunpack.c.2.s8 %v3241_v62  ;;  %v5789_v49 = vpop.f32.mrf.mxu2  ;;  %v3234_v11 = vld [vmem:[%s9001_s13 + $0x6b0] sm:$0xff] }
 0x478   :  { %6070 = vmatpush.bf16.msra.mxu0 %v5272_v48  ;;  %v5376_v56 = vpack.c.bf16 %v4823_v9, %v4816_v35  ;;  %v4593_v7 = vcvt.s32.f32 %v3697_v31  ;;  %v4137_v34 = vunpack.c.3.s8 %v3241_v62  ;;  %v4600_v44 = vcvt.s32.f32 %v3704_v54  ;;  %v3095_v31 = vld [vmem:[%s9001_s13 + $0x258] sm:$0xff] }
 0x479   :  { %5954 = vmatpush.bf16.msrb.mxu3 %v5208_v63  ;;  %v5097_v53 = vpack.c.bf16 %v4264_v10, %v4257_v39  ;;  %v3571_v27 = vunpack.c.2.s8 %v3102_v28  ;;  %v3578_v59 = vunpack.c.3.s8 %v3102_v28  ;;  %v5026_v16 = vcvt.s32.f32 %v4130_v36  ;;  %v3179_v10 = vld [vmem:[%s9001_s13 + $0x4f8] sm:$0xff]  ;;  %v3040_v36 = vld [vmem:[%s9001_s13 + $0xa0] sm:$0xff] }
 0x47a   :  { %5993 = vmatpush.bf16.msra.mxu2 %v5376_v56  ;;  %v5033_v50 = vcvt.s32.f32 %v4137_v34  ;;  %v3907_v18 = vunpack.c.2.s8 %v3186_v61  ;;  %v3914_v6 = vunpack.c.3.s8 %v3186_v61  ;;  %v5265_v37 = vpack.c.bf16 %v4600_v44, %v4593_v7 }
 0x47b   :  { %6032 = vmatpush.bf16.msrb.mxu1 %v5097_v53  ;;  %v4467_v38 = vcvt.s32.f32 %v3571_v27  ;;  %v4474_v29 = vcvt.s32.f32 %v3578_v59  ;;  %v3348_v30 = vunpack.c.2.s8 %v3047_v19  ;;  %v3355_v47 = vunpack.c.3.s8 %v3047_v19 }
 0x47c   :  { %v5481_v2 = vpack.c.bf16 %v5033_v50, %v5026_v16  ;;  %v4803_v57 = vcvt.s32.f32 %v3907_v18  ;;  %v4810_v1 = vcvt.s32.f32 %v3914_v6  ;;  %5955 = vmatmul.bf16.vlgmr.msrb.gmra.mxu3 %v7903_v33  ;;  %6071 = vmatpush.bf16.msra.mxu0 %v5265_v37  ;;  %v4116_v40 = vunpack.c.0.s8 %v3241_v62 }
 0x47d   :  { %v5202_v41 = vpack.c.bf16 %v4474_v29, %v4467_v38  ;;  %v4244_v13 = vcvt.s32.f32 %v3348_v30  ;;  %5994 = vmatmul.bf16.vlgmr.msra.gmra.mxu2 %v8122_v3  ;;  %v4123_v60 = vunpack.c.1.s8 %v3241_v62  ;;  %v4251_v25 = vcvt.s32.f32 %v3355_v47 }
 0x47e   :  { %5999 = vmatpush.bf16.msra.mxu3 %v5481_v2  ;;  %v5370_v51 = vpack.c.bf16 %v4810_v1, %v4803_v57  ;;  %6033 = vmatmul.bf16.vlgmr.msrb.gmra.mxu1 %v7782_v55  ;;  %v3557_v46 = vunpack.c.0.s8 %v3102_v28  ;;  %v3564_v17 = vunpack.c.1.s8 %v3102_v28  ;;  %v5012_v26 = vcvt.s32.f32 %v4116_v40 }
 0x47f   :  { %6038 = vmatpush.bf16.msrb.mxu2 %v5202_v41  ;;  %v5019_v32 = vcvt.s32.f32 %v4123_v60  ;;  %v3893_v4 = vunpack.c.0.s8 %v3186_v61  ;;  %v3900_v15 = vunpack.c.1.s8 %v3186_v61  ;;  %v5091_v62 = vpack.c.bf16 %v4251_v25, %v4244_v13  ;;  %6072 = vmatmul.bf16.vlgmr.msra.gmra.mxu0 %v7959_v12 }
 0x480   :  { %6077 = vmatpush.bf16.msra.mxu1 %v5370_v51  ;;  %v4453_v48 = vcvt.s32.f32 %v3557_v46  ;;  %v4460_v35 = vcvt.s32.f32 %v3564_v17  ;;  %v3334_v9 = vunpack.c.0.s8 %v3047_v19  ;;  %v3341_v39 = vunpack.c.1.s8 %v3047_v19 }
 0x481   :  { %v5474_v28 = vpack.c.bf16 %v5019_v32, %v5012_v26  ;;  %v4789_v52 = vcvt.s32.f32 %v3893_v4  ;;  %v4796_v63 = vcvt.s32.f32 %v3900_v15  ;;  %6116 = vmatpush.bf16.msrb.mxu0 %v5091_v62  ;;  %v4102_v56 = vunpack.c.2.s8 %v3234_v11  ;;  %v3227_v26 = vld [vmem:[%s9001_s13 + $0x678] sm:$0xff]  ;;  %v3088_v15 = vld [vmem:[%s9001_s13 + $0x220] sm:$0xff] }
 0x482   :  { %v5195_v54 = vpack.c.bf16 %v4460_v35, %v4453_v48  ;;  %v4230_v61 = vcvt.s32.f32 %v3334_v9  ;;  %v4109_v7 = vunpack.c.3.s8 %v3234_v11  ;;  %v4237_v53 = vcvt.s32.f32 %v3341_v39  ;;  %v3172_v9 = vld [vmem:[%s9001_s13 + $0x4c0] sm:$0xff]  ;;  %v3033_v39 = vld [vmem:[%s9001_s13 + $0x68] sm:$0xff] }
 0x483   :  { %6000 = vmatpush.bf16.msra.mxu3 %v5474_v28  ;;  %v5363_v34 = vpack.c.bf16 %v4796_v63, %v4789_v52  ;;  %v3543_v44 = vunpack.c.2.s8 %v3095_v31  ;;  %v3550_v27 = vunpack.c.3.s8 %v3095_v31  ;;  %v4998_v19 = vcvt.s32.f32 %v4102_v56 }
 0x484   :  { %6039 = vmatpush.bf16.msrb.mxu2 %v5195_v54  ;;  %v5005_v59 = vcvt.s32.f32 %v4109_v7  ;;  %v3879_v16 = vunpack.c.2.s8 %v3179_v10  ;;  %v3886_v50 = vunpack.c.3.s8 %v3179_v10  ;;  %v5084_v18 = vpack.c.bf16 %v4237_v53, %v4230_v61 }
 0x485   :  { %6078 = vmatpush.bf16.msra.mxu1 %v5363_v34  ;;  %v4439_v6 = vcvt.s32.f32 %v3543_v44  ;;  %v4446_v37 = vcvt.s32.f32 %v3550_v27  ;;  %v3320_v38 = vunpack.c.2.s8 %v3040_v36  ;;  %v3327_v57 = vunpack.c.3.s8 %v3040_v36 }
 0x486   :  { %v5467_v29 = vpack.c.bf16 %v5005_v59, %v4998_v19  ;;  %v4775_v30 = vcvt.s32.f32 %v3879_v16  ;;  %v4782_v2 = vcvt.s32.f32 %v3886_v50  ;;  %6117 = vmatpush.bf16.msrb.mxu0 %v5084_v18  ;;  %v8723_v41 = vadd.f32 %v8679_v43, %v8587_v8 }
 0x487   :  { %v5188_v1 = vpack.c.bf16 %v4446_v37, %v4439_v6  ;;  %v4216_v47 = vcvt.s32.f32 %v3320_v38  ;;  %v4088_v13 = vunpack.c.0.s8 %v3234_v11  ;;  %v4223_v60 = vcvt.s32.f32 %v3327_v57 }
 0x488   :  { %6001 = vmatpush.bf16.msra.mxu3 %v5467_v29  ;;  %v5356_v40 = vpack.c.bf16 %v4782_v2, %v4775_v30  ;;  %v4095_v51 = vunpack.c.1.s8 %v3234_v11  ;;  %v3529_v25 = vunpack.c.0.s8 %v3095_v31  ;;  %v3536_v17 = vunpack.c.1.s8 %v3095_v31 }
 0x489   :  { %6040 = vmatpush.bf16.msrb.mxu2 %v5188_v1  ;;  %v4984_v46 = vcvt.s32.f32 %v4088_v13  ;;  %v3865_v20 = vunpack.c.0.s8 %v3179_v10  ;;  %v3872_v49 = vunpack.c.1.s8 %v3179_v10  ;;  %v5077_v32 = vpack.c.bf16 %v4223_v60, %v4216_v47 }
 0x48a   :  { %6079 = vmatpush.bf16.msra.mxu1 %v5356_v40  ;;  %v4991_v4 = vcvt.s32.f32 %v4095_v51  ;;  %v4425_v8 = vcvt.s32.f32 %v3529_v25  ;;  %v3306_v43 = vunpack.c.0.s8 %v3040_v36  ;;  %v4432_v11 = vcvt.s32.f32 %v3536_v17  ;;  %v3220_v25 = vld [vmem:[%s9001_s13 + $0x640] sm:$0xff] }
 0x48b   :  { %v4761_v62 = vcvt.s32.f32 %v3865_v20  ;;  %v4768_v48 = vcvt.s32.f32 %v3872_v49  ;;  %v3313_v35 = vunpack.c.1.s8 %v3040_v36  ;;  %6118 = vmatpush.bf16.msrb.mxu0 %v5077_v32  ;;  %v4074_v52 = vunpack.c.2.s8 %v3227_v26 }
 0x48c   :  { %v5460_v31 = vpack.c.bf16 %v4991_v4, %v4984_v46  ;;  %v4202_v28 = vcvt.s32.f32 %v3306_v43  ;;  %v4081_v63 = vunpack.c.3.s8 %v3227_v26  ;;  %v5181_v10 = vpack.c.bf16 %v4432_v11, %v4425_v8  ;;  %v8747_v4 = vpop.f32.mrf.mxu1  ;;  %v8749_v8 = vpop.f32.mrf.mxu0 }
 0x48d   :  { %v5349_v54 = vpack.c.bf16 %v4768_v48, %v4761_v62  ;;  %v4209_v61 = vcvt.s32.f32 %v3313_v35  ;;  %v3515_v56 = vunpack.c.2.s8 %v3088_v15  ;;  %v4970_v7 = vcvt.s32.f32 %v4074_v52 }
 0x48e   :  { %6002 = vmatpush.bf16.msra.mxu3 %v5460_v31  ;;  %v4977_v36 = vcvt.s32.f32 %v4081_v63  ;;  %v3522_v34 = vunpack.c.3.s8 %v3088_v15  ;;  %v3851_v53 = vunpack.c.2.s8 %v3172_v9  ;;  %6041 = vmatpush.bf16.msrb.mxu2 %v5181_v10  ;;  %v3858_v19 = vunpack.c.3.s8 %v3172_v9 }
 0x48f   :  { %6080 = vmatpush.bf16.msra.mxu1 %v5349_v54  ;;  %v5070_v44 = vpack.c.bf16 %v4209_v61, %v4202_v28  ;;  %v4411_v27 = vcvt.s32.f32 %v3515_v56  ;;  %v3292_v59 = vunpack.c.2.s8 %v3033_v39  ;;  %v3299_v6 = vunpack.c.3.s8 %v3033_v39  ;;  %v3026_v28 = vld [vmem:[%s9001_s13 + $0x30] sm:$0xff] }
 0x490   :  { %v5453_v16 = vpack.c.bf16 %v4977_v36, %v4970_v7  ;;  %v4418_v50 = vcvt.s32.f32 %v3522_v34  ;;  %v4747_v18 = vcvt.s32.f32 %v3851_v53  ;;  %v4754_v37 = vcvt.s32.f32 %v3858_v19 }
 0x491   :  { %6119 = vmatpush.bf16.msrb.mxu0 %v5070_v44  ;;  %v4188_v38 = vcvt.s32.f32 %v3292_v59  ;;  %v5749_v29 = vadd.f32 %v8695_v23, %v8663_v22  ;;  %v4060_v30 = vunpack.c.0.s8 %v3227_v26  ;;  %v4195_v57 = vcvt.s32.f32 %v3299_v6 }
 0x492   :  { %6003 = vmatpush.bf16.msra.mxu3 %v5453_v16  ;;  %v5174_v2 = vpack.c.bf16 %v4418_v50, %v4411_v27  ;;  %v4067_v1 = vunpack.c.1.s8 %v3227_v26  ;;  %v3501_v47 = vunpack.c.0.s8 %v3088_v15  ;;  %v5342_v13 = vpack.c.bf16 %v4754_v37, %v4747_v18 }
 0x493   :  { %v5762_v40 = vadd.f32 %v8498_v24, %v5749_v29  ;;  %v4956_v60 = vcvt.s32.f32 %v4060_v30  ;;  %v3508_v51 = vunpack.c.1.s8 %v3088_v15  ;;  %v5063_v46 = vpack.c.bf16 %v4195_v57, %v4188_v38  ;;  %v3081_v24 = vld [vmem:[%s9001_s13 + $0x1e8] sm:$0xff] }
 0x494   :  { %6042 = vmatpush.bf16.msrb.mxu2 %v5174_v2  ;;  %v4963_v17 = vcvt.s32.f32 %v4067_v1  ;;  %v4397_v20 = vcvt.s32.f32 %v3501_v47  ;;  %v3837_v22 = vunpack.c.0.s8 %v3172_v9  ;;  %6081 = vmatpush.bf16.msra.mxu1 %v5342_v13  ;;  %v3844_v26 = vunpack.c.1.s8 %v3172_v9  ;;  %v5880_v2 = vpop.f32.mrf.mxu1  ;;  %v5919_v57 = vpop.f32.mrf.mxu0 }
 0x495   :  { %v5775_v23 = vadd.f32 %v8585_v5, %v5762_v40  ;;  %v4404_v49 = vcvt.s32.f32 %v3508_v51  ;;  %v3278_v32 = vunpack.c.0.s8 %v3033_v39  ;;  %6120 = vmatpush.bf16.msrb.mxu0 %v5063_v46  ;;  %v3285_v11 = vunpack.c.1.s8 %v3033_v39  ;;  %v3165_v5 = vld [vmem:[%s9001_s13 + $0x488] sm:$0xff] }
 0x496   :  { %v5446_v43 = vpack.c.bf16 %v4963_v17, %v4956_v60  ;;  %v4733_v15 = vcvt.s32.f32 %v3837_v22  ;;  %v4046_v62 = vunpack.c.2.s8 %v3220_v25  ;;  %v4740_v9 = vcvt.s32.f32 %v3844_v26  ;;  %v3130_v60 = vld [vmem:[%s9001_s13 + $0x370] sm:$0xff]  ;;  %v8766_v22 = vpop.f32.mrf.mxu3 }
 0x497   :  { %v8755_v48 = vadd.f32 %v8697_v14, %v5775_v23  ;;  %v5167_v35 = vpack.c.bf16 %v4404_v49, %v4397_v20  ;;  %v4174_v31 = vcvt.s32.f32 %v3278_v32  ;;  %v4181_v52 = vcvt.s32.f32 %v3285_v11  ;;  %v3214_v20 = vld [vmem:[%s9001_s13 + $0x610] sm:$0xff] }
 0x498   :  { %6004 = vmatpush.bf16.msra.mxu3 %v5446_v43  ;;  %v4053_v63 = vunpack.c.3.s8 %v3220_v25  ;;  %v4942_v10 = vcvt.s32.f32 %v4046_v62  ;;  %v3487_v39 = vunpack.c.2.s8 %v3081_v24  ;;  %v5335_v54 = vpack.c.bf16 %v4740_v9, %v4733_v15  ;;  %v8771_v43 = vpop.f32.mrf.mxu2 }
 0x499   :  { %6043 = vmatpush.bf16.msrb.mxu2 %v5167_v35  ;;  %v3494_v61 = vunpack.c.3.s8 %v3081_v24  ;;  %v3823_v56 = vunpack.c.2.s8 %v3165_v5  ;;  %v3830_v7 = vunpack.c.3.s8 %v3165_v5  ;;  %v5056_v36 = vpack.c.bf16 %v4181_v52, %v4174_v31 }
 0x49a   :  { %v4949_v14 = vcvt.s32.f32 %v4053_v63  ;;  %v4383_v34 = vcvt.s32.f32 %v3487_v39  ;;  %v3264_v53 = vunpack.c.2.s8 %v3026_v28  ;;  %6082 = vmatpush.bf16.msra.mxu1 %v5335_v54  ;;  %v3271_v59 = vunpack.c.3.s8 %v3026_v28 }
 0x49b   :  { %v4390_v44 = vcvt.s32.f32 %v3494_v61  ;;  %v4719_v27 = vcvt.s32.f32 %v3823_v56  ;;  %v4726_v19 = vcvt.s32.f32 %v3830_v7  ;;  %6121 = vmatpush.bf16.msrb.mxu0 %v5056_v36  ;;  %v4032_v18 = vunpack.c.0.s8 %v3220_v25 }
 0x49c   :  { %v5439_v16 = vpack.c.bf16 %v4949_v14, %v4942_v10  ;;  %v4160_v50 = vcvt.s32.f32 %v3264_v53  ;;  %v4039_v6 = vunpack.c.1.s8 %v3220_v25  ;;  %v4167_v29 = vcvt.s32.f32 %v3271_v59 }
 0x49d   :  { %v5160_v37 = vpack.c.bf16 %v4390_v44, %v4383_v34  ;;  %v5328_v38 = vpack.c.bf16 %v4726_v19, %v4719_v27  ;;  %v3473_v30 = vunpack.c.0.s8 %v3081_v24  ;;  %v4928_v1 = vcvt.s32.f32 %v4032_v18 }
 0x49e   :  { %6005 = vmatpush.bf16.msra.mxu3 %v5439_v16  ;;  %v4935_v47 = vcvt.s32.f32 %v4039_v6  ;;  %v3480_v13 = vunpack.c.1.s8 %v3081_v24  ;;  %v3809_v40 = vunpack.c.0.s8 %v3165_v5  ;;  %v5049_v51 = vpack.c.bf16 %v4167_v29, %v4160_v50  ;;  %v3075_v24 = vld [vmem:[%s9001_s13 + $0x1b8] sm:$0xff] }
 0x49f   :  { %6044 = vmatpush.bf16.msrb.mxu2 %v5160_v37  ;;  %6083 = vmatpush.bf16.msra.mxu1 %v5328_v38  ;;  %v4369_v46 = vcvt.s32.f32 %v3473_v30  ;;  %v3816_v25 = vunpack.c.1.s8 %v3165_v5  ;;  %v3250_v17 = vunpack.c.0.s8 %v3026_v28  ;;  %v3257_v32 = vunpack.c.1.s8 %v3026_v28  ;;  %v3159_v28 = vld [vmem:[%s9001_s13 + $0x458] sm:$0xff]  ;;  %v5802_v38 = vpop.f32.mrf.mxu3 }
 0x4a0   :  { %v5432_v23 = vpack.c.bf16 %v4935_v47, %v4928_v1  ;;  %v4376_v49 = vcvt.s32.f32 %v3480_v13  ;;  %v4705_v26 = vcvt.s32.f32 %v3809_v40  ;;  %6122 = vmatpush.bf16.msrb.mxu0 %v5049_v51  ;;  %v3683_v62 = vunpack.c.2.s8 %v3130_v60  ;;  %v3123_v1 = vld [vmem:[%s9001_s13 + $0x338] sm:$0xff]  ;;  %v5841_v47 = vpop.f32.mrf.mxu2  ;;  %v8795_v38 = vld [vmem:[%s9001_s13 + $0x300] sm:$0xff] }
 0x4a1   :  { %v4712_v15 = vcvt.s32.f32 %v3816_v25  ;;  %v4146_v11 = vcvt.s32.f32 %v3250_v17  ;;  %v3690_v5 = vunpack.c.3.s8 %v3130_v60  ;;  %v4153_v9 = vcvt.s32.f32 %v3257_v32 }
 0x4a2   :  { %6006 = vmatpush.bf16.msra.mxu3 %v5432_v23  ;;  %v5153_v35 = vpack.c.bf16 %v4376_v49, %v4369_v46  ;;  %v4019_v31 = vunpack.c.2.s8 %v3214_v20  ;;  %v4026_v52 = vunpack.c.3.s8 %v3214_v20  ;;  %v4579_v10 = vcvt.s32.f32 %v3683_v62  ;;  %v3207_v46 = vld [vmem:[%s9001_s13 + $0x5d8] sm:$0xff]  ;;  %v3068_v49 = vld [vmem:[%s9001_s13 + $0x180] sm:$0xff] }
 0x4a3   :  { %v5321_v63 = vpack.c.bf16 %v4712_v15, %v4705_v26  ;;  %v4586_v39 = vcvt.s32.f32 %v3690_v5  ;;  %v3460_v54 = vunpack.c.2.s8 %v3075_v24  ;;  %v5042_v61 = vpack.c.bf16 %v4153_v9, %v4146_v11 }
 0x4a4   :  { %6045 = vmatpush.bf16.msrb.mxu2 %v5153_v35  ;;  %v4915_v56 = vcvt.s32.f32 %v4019_v31  ;;  %v4922_v7 = vcvt.s32.f32 %v4026_v52  ;;  %v3467_v36 = vunpack.c.3.s8 %v3075_v24  ;;  %v3796_v53 = vunpack.c.2.s8 %v3159_v28  ;;  %v3152_v35 = vld [vmem:[%s9001_s13 + $0x420] sm:$0xff] }
 0x4a5   :  { %6084 = vmatpush.bf16.msra.mxu1 %v5321_v63  ;;  %v5258_v14 = vpack.c.bf16 %v4586_v39, %v4579_v10  ;;  %v4356_v34 = vcvt.s32.f32 %v3460_v54  ;;  %v3803_v44 = vunpack.c.3.s8 %v3159_v28  ;;  %6007 = vmatmul.bf16.vlgmr.msra.gmra.mxu3 %v8202_v42  ;;  %v3669_v59 = vunpack.c.0.s8 %v3130_v60 }
 0x4a6   :  { %6123 = vmatpush.bf16.msrb.mxu0 %v5042_v61  ;;  %v5426_v27 = vpack.c.bf16 %v4922_v7, %v4915_v56  ;;  %v4363_v19 = vcvt.s32.f32 %v3467_v36  ;;  %v3676_v16 = vunpack.c.1.s8 %v3130_v60  ;;  %v4692_v50 = vcvt.s32.f32 %v3796_v53 }
 0x4a7   :  { %6051 = vmatpush.bf16.msrb.mxu3 %v5258_v14  ;;  %v4699_v18 = vcvt.s32.f32 %v3803_v44  ;;  %6046 = vmatmul.bf16.vlgmr.msrb.gmra.mxu2 %v7829_v21  ;;  %v4005_v6 = vunpack.c.0.s8 %v3214_v20  ;;  %v4012_v37 = vunpack.c.1.s8 %v3214_v20  ;;  %v4565_v30 = vcvt.s32.f32 %v3669_v59 }
 0x4a8   :  { %6090 = vmatpush.bf16.msra.mxu2 %v5426_v27  ;;  %v5147_v29 = vpack.c.bf16 %v4363_v19, %v4356_v34  ;;  %6085 = vmatmul.bf16.vlgmr.msra.gmra.mxu1 %v8039_v0  ;;  %v4572_v2 = vcvt.s32.f32 %v3676_v16  ;;  %v3446_v57 = vunpack.c.0.s8 %v3075_v24  ;;  %v3453_v51 = vunpack.c.1.s8 %v3075_v24 }
 0x4a9   :  { %v5315_v13 = vpack.c.bf16 %v4699_v18, %v4692_v50  ;;  %6124 = vmatmul.bf16.vlgmr.msrb.gmra.mxu0 %v7708_v45  ;;  %v4901_v40 = vcvt.s32.f32 %v4005_v6  ;;  %v4908_v60 = vcvt.s32.f32 %v4012_v37  ;;  %v3782_v20 = vunpack.c.0.s8 %v3159_v28 }
 0x4aa   :  { %6129 = vmatpush.bf16.msrb.mxu1 %v5147_v29  ;;  %v5251_v25 = vpack.c.bf16 %v4572_v2, %v4565_v30  ;;  %v4342_v17 = vcvt.s32.f32 %v3446_v57  ;;  %v3789_v23 = vunpack.c.1.s8 %v3159_v28  ;;  %v4349_v32 = vcvt.s32.f32 %v3453_v51  ;;  %v8805_v51 = vld [vmem:[%s9001_s13 + $0x148] sm:$0xff] }
 0x4ab   :  { %6168 = vmatpush.bf16.msra.mxu0 %v5315_v13  ;;  %v5419_v26 = vpack.c.bf16 %v4908_v60, %v4901_v40  ;;  %v3655_v45 = vunpack.c.2.s8 %v3123_v1  ;;  %v3662_v15 = vunpack.c.3.s8 %v3123_v1  ;;  %v4678_v24 = vcvt.s32.f32 %v3782_v20 }
 0x4ac   :  { %6052 = vmatpush.bf16.msrb.mxu3 %v5251_v25  ;;  %v4685_v11 = vcvt.s32.f32 %v3789_v23  ;;  %v3991_v62 = vunpack.c.2.s8 %v3207_v46  ;;  %v3998_v5 = vunpack.c.3.s8 %v3207_v46  ;;  %v5140_v9 = vpack.c.bf16 %v4349_v32, %v4342_v17 }
 0x4ad   :  { %6091 = vmatpush.bf16.msra.mxu2 %v5419_v26  ;;  %v4551_v31 = vcvt.s32.f32 %v3655_v45  ;;  %v4558_v52 = vcvt.s32.f32 %v3662_v15  ;;  %v3432_v28 = vunpack.c.2.s8 %v3068_v49  ;;  %v3439_v54 = vunpack.c.3.s8 %v3068_v49  ;;  %v3145_v45 = vld [vmem:[%s9001_s13 + $0x3e8] sm:$0xff] }
 0x4ae   :  { %v5308_v63 = vpack.c.bf16 %v4685_v11, %v4678_v24  ;;  %v4887_v10 = vcvt.s32.f32 %v3991_v62  ;;  %v4894_v39 = vcvt.s32.f32 %v3998_v5  ;;  %6130 = vmatpush.bf16.msrb.mxu1 %v5140_v9  ;;  %v3768_v7 = vunpack.c.2.s8 %v3152_v35 }
 0x4af   :  { %v5244_v61 = vpack.c.bf16 %v4558_v52, %v4551_v31  ;;  %v4328_v56 = vcvt.s32.f32 %v3432_v28  ;;  %v3775_v36 = vunpack.c.3.s8 %v3152_v35  ;;  %v4335_v34 = vcvt.s32.f32 %v3439_v54 }
 0x4b0   :  { %6169 = vmatpush.bf16.msra.mxu0 %v5308_v63  ;;  %v5412_v14 = vpack.c.bf16 %v4894_v39, %v4887_v10  ;;  %v3641_v53 = vunpack.c.0.s8 %v3123_v1  ;;  %v3648_v44 = vunpack.c.1.s8 %v3123_v1  ;;  %v4664_v27 = vcvt.s32.f32 %v3768_v7  ;;  %v8800_v1 = vld [vmem:[%s9001_s13 + $0x5a0] sm:$0xff] }
 0x4b1   :  { %6053 = vmatpush.bf16.msrb.mxu3 %v5244_v61  ;;  %v4671_v19 = vcvt.s32.f32 %v3775_v36  ;;  %v3977_v59 = vunpack.c.0.s8 %v3207_v46  ;;  %v3984_v16 = vunpack.c.1.s8 %v3207_v46  ;;  %v5133_v50 = vpack.c.bf16 %v4335_v34, %v4328_v56  ;;  %v8821_v56 = vld [vmem:[%s9002_s14] sm:$0x7f] }
 0x4b2   :  { %6092 = vmatpush.bf16.msra.mxu2 %v5412_v14  ;;  %v4537_v18 = vcvt.s32.f32 %v3641_v53  ;;  %v4544_v6 = vcvt.s32.f32 %v3648_v44  ;;  %v3418_v37 = vunpack.c.0.s8 %v3068_v49  ;;  %v3425_v57 = vunpack.c.1.s8 %v3068_v49  ;;  %v8827_v34 = vld [vmem:[%s9003_s15] sm:$0x7f]  ;;  %v8836_v44 = vpop.f32.mrf.mxu0  ;;  %s6288_s15 = sshll.u32 %s9004_s16, 4  ;;  %s6289_s15 = int_to_ptr.hbm [resolvable:$true] %s6288_s15 }
 0x4b3   :  { %v5301_v29 = vpack.c.bf16 %v4671_v19, %v4664_v27  ;;  %v4873_v30 = vcvt.s32.f32 %v3977_v59  ;;  %v4880_v2 = vcvt.s32.f32 %v3984_v16  ;;  %6131 = vmatpush.bf16.msrb.mxu1 %v5133_v50  ;;  %v3754_v40 = vunpack.c.0.s8 %v3152_v35 }
 0x4b4   :  { %v5237_v47 = vpack.c.bf16 %v4544_v6, %v4537_v18  ;;  %v4314_v13 = vcvt.s32.f32 %v3418_v37  ;;  %v3761_v60 = vunpack.c.1.s8 %v3152_v35  ;;  %v4321_v25 = vcvt.s32.f32 %v3425_v57 }
 0x4b5   :  { %6170 = vmatpush.bf16.msra.mxu0 %v5301_v29  ;;  %v5405_v46 = vpack.c.bf16 %v4880_v2, %v4873_v30  ;;  %v3627_v17 = vunpack.c.2.s8 %v8795_v38  ;;  %v3634_v20 = vunpack.c.3.s8 %v8795_v38  ;;  %v4650_v23 = vcvt.s32.f32 %v3754_v40  ;;  %v3109_v2 = vld [vmem:[%s9001_s13 + $0x2c8] sm:$0xff] }
 0x4b6   :  { %6054 = vmatpush.bf16.msrb.mxu3 %v5237_v47  ;;  %v4657_v49 = vcvt.s32.f32 %v3761_v60  ;;  %v3963_v26 = vunpack.c.2.s8 %v8800_v1  ;;  %v3970_v32 = vunpack.c.3.s8 %v8800_v1  ;;  %v5126_v15 = vpack.c.bf16 %v4321_v25, %v4314_v13 }
 0x4b7   :  { %6093 = vmatpush.bf16.msra.mxu2 %v5405_v46  ;;  %v4523_v24 = vcvt.s32.f32 %v3627_v17  ;;  %v4530_v11 = vcvt.s32.f32 %v3634_v20  ;;  %v3404_v62 = vunpack.c.2.s8 %v8805_v51  ;;  %v3411_v31 = vunpack.c.3.s8 %v8805_v51 }
 0x4b8   :  { %v5294_v5 = vpack.c.bf16 %v4657_v49, %v4650_v23  ;;  %v4859_v35 = vcvt.s32.f32 %v3963_v26  ;;  %v4866_v9 = vcvt.s32.f32 %v3970_v32  ;;  %6132 = vmatpush.bf16.msrb.mxu1 %v5126_v15  ;;  %v3740_v63 = vunpack.c.2.s8 %v3145_v45  ;;  %v3138_v49 = vld [vmem:[%s9001_s13 + $0x3b0] sm:$0xff] }
 0x4b9   :  { %v5230_v52 = vpack.c.bf16 %v4530_v11, %v4523_v24  ;;  %v4300_v28 = vcvt.s32.f32 %v3404_v62  ;;  %v3747_v10 = vunpack.c.3.s8 %v3145_v45  ;;  %v4307_v54 = vcvt.s32.f32 %v3411_v31 }
 0x4ba   :  { %6171 = vmatpush.bf16.msra.mxu0 %v5294_v5  ;;  %v5398_v39 = vpack.c.bf16 %v4866_v9, %v4859_v35  ;;  %v5801_v61 = vadd.f32 %v8766_v22, %v8755_v48  ;;  %v6224_v7 = vperm.slane %v8821_v56, 2  ;;  %v4636_v36 = vcvt.s32.f32 %v3740_v63  ;;  %v8834_v22 = vpop.f32.mrf.mxu1  ;;  %v8856_v35 = vpop.f32.mrf.mxu3 }
 0x4bb   :  { %6055 = vmatpush.bf16.msrb.mxu3 %v5230_v52  ;;  %v4643_v14 = vcvt.s32.f32 %v3747_v10  ;;  %v6247_v53 = vperm.slane %v8827_v34, 2  ;;  %v8832_v48 = vadd.f32 %v8771_v43, %v8723_v41  ;;  %v5119_v27 = vpack.c.bf16 %v4307_v54, %v4300_v28  ;;  %v8858_v9 = vpop.f32.mrf.mxu2 }
 0x4bc   :  { %6094 = vmatpush.bf16.msra.mxu2 %v5398_v39  ;;  %v6238_v19 = vmul.f32 %v6224_v7, %v5801_v61  ;;  %v3613_v59 = vunpack.c.0.s8 %v8795_v38  ;;  %v3620_v16 = vunpack.c.1.s8 %v8795_v38  ;;  %v3949_v18 = vunpack.c.0.s8 %v8800_v1  ;;  %v5971_v39 = vpop.f32.mrf.mxu0 }
 0x4bd   :  { %v5287_v50 = vpack.c.bf16 %v4643_v14, %v4636_v36  ;;  %v3956_v6 = vunpack.c.1.s8 %v8800_v1  ;;  %v3390_v37 = vunpack.c.0.s8 %v8805_v51  ;;  %6133 = vmatpush.bf16.msrb.mxu1 %v5119_v27  ;;  %v3397_v30 = vunpack.c.1.s8 %v8805_v51  ;;  %v3193_v1 = vld [vmem:[%s9001_s13 + $0x568] sm:$0xff]  ;;  %v3054_v51 = vld [vmem:[%s9001_s13 + $0x110] sm:$0xff] }
 0x4be   :  { %v6261_v41 = vadd.f32 %v6247_v53, %v6238_v19  ;;  %v4509_v43 = vcvt.s32.f32 %v3613_v59  ;;  %v4516_v29 = vcvt.s32.f32 %v3620_v16  ;;  %v4845_v57 = vcvt.s32.f32 %v3949_v18 }
 0x4bf   :  { %6172 = vmatpush.bf16.msra.mxu0 %v5287_v50  ;;  %v4852_v38 = vcvt.s32.f32 %v3956_v6  ;;  %v4286_v47 = vcvt.s32.f32 %v3390_v37  ;;  %v3726_v13 = vunpack.c.0.s8 %v3145_v45  ;;  %v4293_v60 = vcvt.s32.f32 %v3397_v30  ;;  %v3242_v30 = vld [vmem:[%s9001_s13 + $0x6f0] sm:$0xff] }
 0x4c0   :  { %6403 = vtanh.f32 %v6261_v41  ;;  %v5223_v40 = vpack.c.bf16 %v4516_v29, %v4509_v43  ;;  %v3733_v46 = vunpack.c.1.s8 %v3145_v45  ;;  %v3599_v20 = vunpack.c.2.s8 %v3109_v2 }
 0x4c1   :  { %v5391_v25 = vpack.c.bf16 %v4852_v38, %v4845_v57  ;;  %v4622_v17 = vcvt.s32.f32 %v3726_v13  ;;  %v3606_v23 = vunpack.c.3.s8 %v3109_v2  ;;  %v5112_v26 = vpack.c.bf16 %v4293_v60, %v4286_v47  ;;  %v3103_v13 = vld [vmem:[%s9001_s13 + $0x298] sm:$0xff] }
 0x4c2   :  { %6056 = vmatpush.bf16.msrb.mxu3 %v5223_v40  ;;  %v4629_v32 = vcvt.s32.f32 %v3733_v46  ;;  %v3935_v15 = vunpack.c.2.s8 %v3193_v1  ;;  %v3942_v24 = vunpack.c.3.s8 %v3193_v1  ;;  %v4495_v11 = vcvt.s32.f32 %v3599_v20  ;;  %v5932_v10 = vpop.f32.mrf.mxu1 }
 0x4c3   :  { %6095 = vmatpush.bf16.msra.mxu2 %v5391_v25  ;;  %v4502_v45 = vcvt.s32.f32 %v3606_v23  ;;  %v3376_v62 = vunpack.c.2.s8 %v3054_v51  ;;  %v3383_v5 = vunpack.c.3.s8 %v3054_v51  ;;  %6134 = vmatpush.bf16.msrb.mxu1 %v5112_v26  ;;  %v3712_v63 = vunpack.c.2.s8 %v3138_v49  ;;  %v5854_v26 = vpop.f32.mrf.mxu3 }
 0x4c4   :  { %v5280_v31 = vpack.c.bf16 %v4629_v32, %v4622_v17  ;;  %v4831_v52 = vcvt.s32.f32 %v3935_v15  ;;  %v4838_v28 = vcvt.s32.f32 %v3942_v24  ;;  %v3719_v36 = vunpack.c.3.s8 %v3138_v49  ;;  %v5893_v32 = vpop.f32.mrf.mxu2 }
 0x4c5   :  { %v5216_v54 = vpack.c.bf16 %v4502_v45, %v4495_v11  ;;  %v4272_v61 = vcvt.s32.f32 %v3376_v62  ;;  %v4279_v7 = vcvt.s32.f32 %v3383_v5  ;;  %v4608_v27 = vcvt.s32.f32 %v3712_v63 }
 0x4c6   :  { %v6404_v14 = vpop.eup %6403  ;;  %6173 = vmatpush.bf16.msra.mxu0 %v5280_v31  ;;  %v5384_v53 = vpack.c.bf16 %v4838_v28, %v4831_v52  ;;  %v3585_v19 = vunpack.c.0.s8 %v3109_v2  ;;  %v3592_v59 = vunpack.c.1.s8 %v3109_v2  ;;  %v4615_v50 = vcvt.s32.f32 %v3719_v36  ;;  %v3235_v36 = vld [vmem:[%s9001_s13 + $0x6b8] sm:$0xff] }
 0x4c7   :  { %6275 = vst [vmem:[#allocation2 + $0x10] sm:$0xff] %v6404_v14  ;;  %6057 = vmatpush.bf16.msrb.mxu3 %v5216_v54  ;;  %v5105_v16 = vpack.c.bf16 %v4279_v7, %v4272_v61  ;;  %v3921_v18 = vunpack.c.0.s8 %v3193_v1  ;;  %v3928_v6 = vunpack.c.1.s8 %v3193_v1  ;;  %v3362_v43 = vunpack.c.0.s8 %v3054_v51 }
 0x4c8   :  { %6096 = vmatpush.bf16.msra.mxu2 %v5384_v53  ;;  %v4481_v37 = vcvt.s32.f32 %v3585_v19  ;;  %v4488_v41 = vcvt.s32.f32 %v3592_v59  ;;  %v3369_v29 = vunpack.c.1.s8 %v3054_v51  ;;  %v5273_v57 = vpack.c.bf16 %v4615_v50, %v4608_v27  ;;  %v3187_v51 = vld [vmem:[%s9001_s13 + $0x538] sm:$0xff]  ;;  %v3096_v59 = vld [vmem:[%s9001_s13 + $0x260] sm:$0xff] }
 0x4c9   :  { %6135 = vmatpush.bf16.msrb.mxu1 %v5105_v16  ;;  %v4817_v38 = vcvt.s32.f32 %v3921_v18  ;;  %v4824_v47 = vcvt.s32.f32 %v3928_v6  ;;  %v3698_v2 = vunpack.c.0.s8 %v3138_v49  ;;  %v4258_v1 = vcvt.s32.f32 %v3362_v43 }
 0x4ca   :  { %v5209_v40 = vpack.c.bf16 %v4488_v41, %v4481_v37  ;;  %v4265_v60 = vcvt.s32.f32 %v3369_v29  ;;  %v3705_v46 = vunpack.c.1.s8 %v3138_v49  ;;  %6174 = vmatpush.bf16.msra.mxu0 %v5273_v57  ;;  %v4131_v20 = vunpack.c.2.s8 %v3242_v30 }
 0x4cb   :  { %v5377_v25 = vpack.c.bf16 %v4824_v47, %v4817_v38  ;;  %v4594_v17 = vcvt.s32.f32 %v3698_v2  ;;  %v4138_v23 = vunpack.c.3.s8 %v3242_v30  ;;  %v3572_v11 = vunpack.c.2.s8 %v3103_v13 }
 0x4cc   :  { %6058 = vmatpush.bf16.msrb.mxu3 %v5209_v40  ;;  %v5098_v15 = vpack.c.bf16 %v4265_v60, %v4258_v1  ;;  %v4601_v24 = vcvt.s32.f32 %v3705_v46  ;;  %v3579_v45 = vunpack.c.3.s8 %v3103_v13  ;;  %v5027_v62 = vcvt.s32.f32 %v4131_v20 }
 0x4cd   :  { %6097 = vmatpush.bf16.msra.mxu2 %v5377_v25  ;;  %v5034_v5 = vcvt.s32.f32 %v4138_v23  ;;  %v3908_v49 = vunpack.c.2.s8 %v3187_v51  ;;  %v3915_v31 = vunpack.c.3.s8 %v3187_v51  ;;  %v4468_v28 = vcvt.s32.f32 %v3572_v11  ;;  %v3228_v11 = vld [vmem:[%s9001_s13 + $0x680] sm:$0xff] }
 0x4ce   :  { %6136 = vmatpush.bf16.msrb.mxu1 %v5098_v15  ;;  %v5266_v52 = vpack.c.bf16 %v4601_v24, %v4594_v17  ;;  %v4475_v63 = vcvt.s32.f32 %v3579_v45  ;;  %v4117_v10 = vunpack.c.0.s8 %v3242_v30  ;;  %v4124_v7 = vunpack.c.1.s8 %v3242_v30  ;;  %v3180_v30 = vld [vmem:[%s9001_s13 + $0x500] sm:$0xff] }
 0x4cf   :  { %v5482_v39 = vpack.c.bf16 %v5034_v5, %v5027_v62  ;;  %v4804_v54 = vcvt.s32.f32 %v3908_v49  ;;  %v4811_v61 = vcvt.s32.f32 %v3915_v31  ;;  %6059 = vmatmul.bf16.vlgmr.msrb.gmra.mxu3 %v7903_v33  ;;  %v3558_v27 = vunpack.c.0.s8 %v3103_v13  ;;  %v3089_v31 = vld [vmem:[%s9001_s13 + $0x228] sm:$0xff] }
 0x4d0   :  { %6175 = vmatpush.bf16.msra.mxu0 %v5266_v52  ;;  %v5203_v14 = vpack.c.bf16 %v4475_v63, %v4468_v28  ;;  %6098 = vmatmul.bf16.vlgmr.msra.gmra.mxu2 %v8122_v3  ;;  %v5013_v53 = vcvt.s32.f32 %v4117_v10  ;;  %v3565_v19 = vunpack.c.1.s8 %v3103_v13  ;;  %v5020_v50 = vcvt.s32.f32 %v4124_v7  ;;  %v3173_v63 = vld [vmem:[%s9001_s13 + $0x4c8] sm:$0xff]  ;;  %v8895_v7 = vpop.f32.mrf.mxu1 }
 0x4d1   :  { %6103 = vmatpush.bf16.msra.mxu3 %v5482_v39  ;;  %v5371_v16 = vpack.c.bf16 %v4811_v61, %v4804_v54  ;;  %6137 = vmatmul.bf16.vlgmr.msrb.gmra.mxu1 %v7782_v55  ;;  %v3894_v18 = vunpack.c.0.s8 %v3187_v51  ;;  %v3901_v6 = vunpack.c.1.s8 %v3187_v51  ;;  %v4454_v37 = vcvt.s32.f32 %v3558_v27 }
 0x4d2   :  { %6142 = vmatpush.bf16.msrb.mxu2 %v5203_v14  ;;  %v4461_v41 = vcvt.s32.f32 %v3565_v19  ;;  %v4103_v43 = vunpack.c.2.s8 %v3235_v36  ;;  %v4110_v29 = vunpack.c.3.s8 %v3235_v36  ;;  %v5475_v57 = vpack.c.bf16 %v5020_v50, %v5013_v53 }
 0x4d3   :  { %6181 = vmatpush.bf16.msra.mxu1 %v5371_v16  ;;  %6176 = vmatmul.bf16.vlgmr.msra.gmra.mxu0 %v7959_v12  ;;  %v4790_v38 = vcvt.s32.f32 %v3894_v18  ;;  %v4797_v47 = vcvt.s32.f32 %v3901_v6  ;;  %v3544_v2 = vunpack.c.2.s8 %v3096_v59  ;;  %v3551_v1 = vunpack.c.3.s8 %v3096_v59 }
 0x4d4   :  { %v5196_v55 = vpack.c.bf16 %v4461_v41, %v4454_v37  ;;  %v4999_v13 = vcvt.s32.f32 %v4103_v43  ;;  %v5006_v40 = vcvt.s32.f32 %v4110_v29  ;;  %v3880_v51 = vunpack.c.2.s8 %v3180_v30 }
 0x4d5   :  { %6104 = vmatpush.bf16.msra.mxu3 %v5475_v57  ;;  %v5364_v60 = vpack.c.bf16 %v4797_v47, %v4790_v38  ;;  %v4440_v46 = vcvt.s32.f32 %v3544_v2  ;;  %v3887_v25 = vunpack.c.3.s8 %v3180_v30  ;;  %v4447_v20 = vcvt.s32.f32 %v3551_v1 }
 0x4d6   :  { %6143 = vmatpush.bf16.msrb.mxu2 %v5196_v55  ;;  %v5468_v17 = vpack.c.bf16 %v5006_v40, %v4999_v13  ;;  %v8884_v23 = vadd.f32 %v8834_v22, %v8749_v8  ;;  %v4089_v12 = vunpack.c.0.s8 %v3235_v36  ;;  %v4776_v26 = vcvt.s32.f32 %v3880_v51  ;;  %v3221_v40 = vld [vmem:[%s9001_s13 + $0x648] sm:$0xff] }
 0x4d7   :  { %6182 = vmatpush.bf16.msra.mxu1 %v5364_v60  ;;  %v4783_v32 = vcvt.s32.f32 %v3887_v25  ;;  %v4096_v15 = vunpack.c.1.s8 %v3235_v36  ;;  %v3530_v24 = vunpack.c.0.s8 %v3096_v59  ;;  %v5189_v45 = vpack.c.bf16 %v4447_v20, %v4440_v46  ;;  %v8897_v36 = vpop.f32.mrf.mxu0  ;;  %v3082_v25 = vld [vmem:[%s9001_s13 + $0x1f0] sm:$0xff] }
 0x4d8   :  { %v4985_v62 = vcvt.s32.f32 %v4089_v12  ;;  %v3537_v5 = vunpack.c.1.s8 %v3096_v59  ;;  %v3866_v49 = vunpack.c.0.s8 %v3180_v30  ;;  %v3873_v28 = vunpack.c.1.s8 %v3180_v30 }
 0x4d9   :  { %6105 = vmatpush.bf16.msra.mxu3 %v5468_v17  ;;  %v5357_v8 = vpack.c.bf16 %v4783_v32, %v4776_v26  ;;  %v4992_v22 = vcvt.s32.f32 %v4096_v15  ;;  %v4426_v52 = vcvt.s32.f32 %v3530_v24  ;;  %v4075_v54 = vunpack.c.2.s8 %v3228_v11  ;;  %v8911_v15 = vpop.f32.mrf.mxu3  ;;  %v5984_v24 = vpop.f32.mrf.mxu1 }
 0x4da   :  { %6144 = vmatpush.bf16.msrb.mxu2 %v5189_v45  ;;  %v4433_v10 = vcvt.s32.f32 %v3537_v5  ;;  %v4762_v39 = vcvt.s32.f32 %v3866_v49  ;;  %v4082_v61 = vunpack.c.3.s8 %v3228_v11  ;;  %v4769_v53 = vcvt.s32.f32 %v3873_v28  ;;  %v8913_v49 = vpop.f32.mrf.mxu2 }
 0x4db   :  { %6183 = vmatpush.bf16.msra.mxu1 %v5357_v8  ;;  %v5461_v14 = vpack.c.bf16 %v4992_v22, %v4985_v62  ;;  %v3516_v27 = vunpack.c.2.s8 %v3089_v31  ;;  %v3523_v19 = vunpack.c.3.s8 %v3089_v31  ;;  %v4971_v16 = vcvt.s32.f32 %v4075_v54 }
 0x4dc   :  { %v5182_v59 = vpack.c.bf16 %v4433_v10, %v4426_v52  ;;  %v4978_v50 = vcvt.s32.f32 %v4082_v61  ;;  %v3852_v18 = vunpack.c.2.s8 %v3173_v63  ;;  %v5350_v6 = vpack.c.bf16 %v4769_v53, %v4762_v39 }
 0x4dd   :  { %6106 = vmatpush.bf16.msra.mxu3 %v5461_v14  ;;  %v4412_v37 = vcvt.s32.f32 %v3516_v27  ;;  %v4419_v41 = vcvt.s32.f32 %v3523_v19  ;;  %v3859_v43 = vunpack.c.3.s8 %v3173_v63  ;;  %v5853_v57 = vadd.f32 %v8856_v35, %v8832_v48 }
 0x4de   :  { %6145 = vmatpush.bf16.msrb.mxu2 %v5182_v59  ;;  %v5454_v29 = vpack.c.bf16 %v4978_v50, %v4971_v16  ;;  %v4748_v30 = vcvt.s32.f32 %v3852_v18  ;;  %v4061_v38 = vunpack.c.0.s8 %v3228_v11  ;;  %v4068_v55 = vunpack.c.1.s8 %v3228_v11 }
 0x4df   :  { %6184 = vmatpush.bf16.msra.mxu1 %v5350_v6  ;;  %v5175_v47 = vpack.c.bf16 %v4419_v41, %v4412_v37  ;;  %v4755_v2 = vcvt.s32.f32 %v3859_v43  ;;  %v3502_v13 = vunpack.c.0.s8 %v3089_v31  ;;  %v5866_v1 = vadd.f32 %v8681_v58, %v5853_v57  ;;  %v3166_v58 = vld [vmem:[%s9001_s13 + $0x490] sm:$0xff]  ;;  %v3215_v43 = vld [vmem:[%s9001_s13 + $0x618] sm:$0xff] }
 0x4e0   :  { %v4957_v60 = vcvt.s32.f32 %v4061_v38  ;;  %v3509_v46 = vunpack.c.1.s8 %v3089_v31  ;;  %v3838_v51 = vunpack.c.0.s8 %v3173_v63  ;;  %v4964_v35 = vcvt.s32.f32 %v4068_v55  ;;  %v6023_v31 = vpop.f32.mrf.mxu0 }
 0x4e1   :  { %6107 = vmatpush.bf16.msra.mxu3 %v5454_v29  ;;  %v5343_v48 = vpack.c.bf16 %v4755_v2, %v4748_v30  ;;  %v4398_v17 = vcvt.s32.f32 %v3502_v13  ;;  %v3845_v20 = vunpack.c.1.s8 %v3173_v63  ;;  %v4047_v32 = vunpack.c.2.s8 %v3221_v40 }
 0x4e2   :  { %6146 = vmatpush.bf16.msrb.mxu2 %v5175_v47  ;;  %v4405_v12 = vcvt.s32.f32 %v3509_v46  ;;  %v4734_v26 = vcvt.s32.f32 %v3838_v51  ;;  %v5447_v11 = vpack.c.bf16 %v4964_v35, %v4957_v60  ;;  %v4054_v62 = vunpack.c.3.s8 %v3221_v40 }
 0x4e3   :  { %6185 = vmatpush.bf16.msra.mxu1 %v5343_v48  ;;  %v4741_v45 = vcvt.s32.f32 %v3845_v20  ;;  %v3488_v5 = vunpack.c.2.s8 %v3082_v25  ;;  %v8916_v8 = vadd.f32 %v8747_v4, %v5866_v1  ;;  %v4943_v52 = vcvt.s32.f32 %v4047_v32  ;;  %v3131_v4 = vld [vmem:[%s9001_s13 + $0x378] sm:$0xff] }
 0x4e4   :  { %v5168_v22 = vpack.c.bf16 %v4405_v12, %v4398_v17  ;;  %v3495_v28 = vunpack.c.3.s8 %v3082_v25  ;;  %v4950_v10 = vcvt.s32.f32 %v4054_v62  ;;  %v3824_v54 = vunpack.c.2.s8 %v3166_v58  ;;  %v3124_v12 = vld [vmem:[%s9001_s13 + $0x340] sm:$0xff] }
 0x4e5   :  { %6108 = vmatpush.bf16.msra.mxu3 %v5447_v11  ;;  %v5336_v63 = vpack.c.bf16 %v4741_v45, %v4734_v26  ;;  %v4384_v39 = vcvt.s32.f32 %v3488_v5  ;;  %v3831_v14 = vunpack.c.3.s8 %v3166_v58  ;;  %v4033_v53 = vunpack.c.0.s8 %v3221_v40  ;;  %v3208_v11 = vld [vmem:[%s9001_s13 + $0x5e0] sm:$0xff] }
 0x4e6   :  { %6147 = vmatpush.bf16.msrb.mxu2 %v5168_v22  ;;  %v4391_v61 = vcvt.s32.f32 %v3495_v28  ;;  %v4040_v27 = vunpack.c.1.s8 %v3221_v40  ;;  %v5440_v19 = vpack.c.bf16 %v4950_v10, %v4943_v52  ;;  %v4720_v59 = vcvt.s32.f32 %v3824_v54  ;;  %v5906_v40 = vpop.f32.mrf.mxu3 }
 0x4e7   :  { %6186 = vmatpush.bf16.msra.mxu1 %v5336_v63  ;;  %v3474_v16 = vunpack.c.0.s8 %v3082_v25  ;;  %v3481_v50 = vunpack.c.1.s8 %v3082_v25  ;;  %v4727_v6 = vcvt.s32.f32 %v3831_v14  ;;  %v4929_v37 = vcvt.s32.f32 %v4033_v53  ;;  %v5945_v25 = vpop.f32.mrf.mxu2 }
 0x4e8   :  { %v5161_v18 = vpack.c.bf16 %v4391_v61, %v4384_v39  ;;  %v4936_v41 = vcvt.s32.f32 %v4040_v27  ;;  %v3810_v57 = vunpack.c.0.s8 %v3166_v58  ;;  %v3817_v38 = vunpack.c.1.s8 %v3166_v58  ;;  %v3110_v25 = vld [vmem:[%s9001_s13 + $0x2d0] sm:$0xff] }
 0x4e9   :  { %6109 = vmatpush.bf16.msra.mxu3 %v5440_v19  ;;  %v4370_v29 = vcvt.s32.f32 %v3474_v16  ;;  %v4377_v30 = vcvt.s32.f32 %v3481_v50  ;;  %v5329_v47 = vpack.c.bf16 %v4727_v6, %v4720_v59  ;;  %v3684_v55 = vunpack.c.2.s8 %v3131_v4  ;;  %v3117_v59 = vld [vmem:[%s9001_s13 + $0x308] sm:$0xff] }
 0x4ea   :  { %6148 = vmatpush.bf16.msrb.mxu2 %v5161_v18  ;;  %v5433_v2 = vpack.c.bf16 %v4936_v41, %v4929_v37  ;;  %v3691_v13 = vunpack.c.3.s8 %v3131_v4  ;;  %v4706_v60 = vcvt.s32.f32 %v3810_v57  ;;  %v4713_v46 = vcvt.s32.f32 %v3817_v38 }
 0x4eb   :  { %v5154_v1 = vpack.c.bf16 %v4377_v30, %v4370_v29  ;;  %v4020_v51 = vunpack.c.2.s8 %v3215_v43  ;;  %6187 = vmatpush.bf16.msra.mxu1 %v5329_v47  ;;  %v4580_v48 = vcvt.s32.f32 %v3684_v55  ;;  %v4027_v17 = vunpack.c.3.s8 %v3215_v43 }
 0x4ec   :  { %v4587_v35 = vcvt.s32.f32 %v3691_v13  ;;  %v3670_v20 = vunpack.c.0.s8 %v3131_v4  ;;  %v5322_v26 = vpack.c.bf16 %v4713_v46, %v4706_v60  ;;  %v3677_v58 = vunpack.c.1.s8 %v3131_v4 }
 0x4ed   :  { %6110 = vmatpush.bf16.msra.mxu3 %v5433_v2  ;;  %v4916_v32 = vcvt.s32.f32 %v4020_v51  ;;  %v4006_v24 = vunpack.c.0.s8 %v3215_v43  ;;  %v4923_v62 = vcvt.s32.f32 %v4027_v17  ;;  %v4013_v31 = vunpack.c.1.s8 %v3215_v43  ;;  %v3201_v43 = vld [vmem:[%s9001_s13 + $0x5a8] sm:$0xff] }
 0x4ee   :  { %6149 = vmatpush.bf16.msrb.mxu2 %v5154_v1  ;;  %v5259_v45 = vpack.c.bf16 %v4587_v35, %v4580_v48  ;;  %v4566_v5 = vcvt.s32.f32 %v3670_v20  ;;  %v4573_v22 = vcvt.s32.f32 %v3677_v58  ;;  %v3656_v28 = vunpack.c.2.s8 %v3124_v12 }
 0x4ef   :  { %v4902_v52 = vcvt.s32.f32 %v4006_v24  ;;  %v3663_v63 = vunpack.c.3.s8 %v3124_v12  ;;  %6188 = vmatpush.bf16.msra.mxu1 %v5322_v26  ;;  %v5427_v10 = vpack.c.bf16 %v4923_v62, %v4916_v32  ;;  %v4909_v39 = vcvt.s32.f32 %v4013_v31  ;;  %v3194_v32 = vld [vmem:[%s9001_s13 + $0x570] sm:$0xff] }
 0x4f0   :  { %v3992_v54 = vunpack.c.2.s8 %v3208_v11  ;;  %v3999_v61 = vunpack.c.3.s8 %v3208_v11  ;;  %6111 = vmatmul.bf16.vlgmr.msra.gmra.mxu3 %v8202_v42  ;;  %v5252_v14 = vpack.c.bf16 %v4573_v22, %v4566_v5  ;;  %v4552_v53 = vcvt.s32.f32 %v3656_v28 }
 0x4f1   :  { %6155 = vmatpush.bf16.msrb.mxu3 %v5259_v45  ;;  %6150 = vmatmul.bf16.vlgmr.msrb.gmra.mxu2 %v7829_v21  ;;  %v4559_v27 = vcvt.s32.f32 %v3663_v63  ;;  %v3642_v19 = vunpack.c.0.s8 %v3124_v12  ;;  %v5420_v16 = vpack.c.bf16 %v4909_v39, %v4902_v52  ;;  %v3649_v18 = vunpack.c.1.s8 %v3124_v12 }
 0x4f2   :  { %6194 = vmatpush.bf16.msra.mxu2 %v5427_v10  ;;  %v4888_v50 = vcvt.s32.f32 %v3992_v54  ;;  %v4895_v4 = vcvt.s32.f32 %v3999_v61  ;;  %v5892_v6 = vadd.f32 %v8858_v9, %v8916_v8  ;;  %6189 = vmatmul.bf16.vlgmr.msra.gmra.mxu1 %v8039_v0  ;;  %v3978_v21 = vunpack.c.0.s8 %v3208_v11  ;;  %v3243_v54 = vld [vmem:[%s9001_s13 + $0x6f8] sm:$0xff] }
 0x4f3   :  { %v4538_v37 = vcvt.s32.f32 %v3642_v19  ;;  %v3985_v41 = vunpack.c.1.s8 %v3208_v11  ;;  %v5245_v29 = vpack.c.bf16 %v4559_v27, %v4552_v53  ;;  %v4545_v30 = vcvt.s32.f32 %v3649_v18 }
 0x4f4   :  { %v3628_v57 = vunpack.c.2.s8 %v3117_v59  ;;  %v3635_v38 = vunpack.c.3.s8 %v3117_v59  ;;  %v4874_v47 = vcvt.s32.f32 %v3978_v21  ;;  %v5413_v55 = vpack.c.bf16 %v4895_v4, %v4888_v50 }
 0x4f5   :  { %6156 = vmatpush.bf16.msrb.mxu3 %v5252_v14  ;;  %v4881_v2 = vcvt.s32.f32 %v3985_v41  ;;  %v3964_v13 = vunpack.c.2.s8 %v3201_v43  ;;  %v3971_v9 = vunpack.c.3.s8 %v3201_v43  ;;  %v5905_v0 = vadd.f32 %v8911_v15, %v5892_v6 }
 0x4f6   :  { %6195 = vmatpush.bf16.msra.mxu2 %v5420_v16  ;;  %v5238_v8 = vpack.c.bf16 %v4545_v30, %v4538_v37  ;;  %v6225_v40 = vperm.slane %v8821_v56, 3  ;;  %v4524_v1 = vcvt.s32.f32 %v3628_v57  ;;  %v4531_v60 = vcvt.s32.f32 %v3635_v38 }
 0x4f7   :  { %v6248_v46 = vperm.slane %v8827_v34, 3  ;;  %v3614_v51 = vunpack.c.0.s8 %v3117_v59  ;;  %v5406_v48 = vpack.c.bf16 %v4881_v2, %v4874_v47  ;;  %v3621_v17 = vunpack.c.1.s8 %v3117_v59 }
 0x4f8   :  { %v6239_v35 = vmul.f32 %v6225_v40, %v5905_v0  ;;  %v4860_v20 = vcvt.s32.f32 %v3964_v13  ;;  %v4867_v12 = vcvt.s32.f32 %v3971_v9  ;;  %v3950_v15 = vunpack.c.0.s8 %v3201_v43 }
 0x4f9   :  { %6157 = vmatpush.bf16.msrb.mxu3 %v5245_v29  ;;  %v3957_v26 = vunpack.c.1.s8 %v3201_v43  ;;  %v3600_v24 = vunpack.c.2.s8 %v3110_v25  ;;  %v5231_v45 = vpack.c.bf16 %v4531_v60, %v4524_v1  ;;  %v4510_v62 = vcvt.s32.f32 %v3614_v51 }
 0x4fa   :  { %6196 = vmatpush.bf16.msra.mxu2 %v5413_v55  ;;  %v6262_v58 = vadd.f32 %v6248_v46, %v6239_v35  ;;  %v4517_v5 = vcvt.s32.f32 %v3621_v17  ;;  %v3607_v31 = vunpack.c.3.s8 %v3110_v25  ;;  %v3936_v22 = vunpack.c.2.s8 %v3194_v32 }
 0x4fb   :  { %v6034_v11 = vpop.f32.mrf.mxu1  ;;  %v5399_v28 = vpack.c.bf16 %v4867_v12, %v4860_v20  ;;  %v4846_v63 = vcvt.s32.f32 %v3950_v15  ;;  %v4853_v10 = vcvt.s32.f32 %v3957_v26  ;;  %v3943_v39 = vunpack.c.3.s8 %v3194_v32 }
 0x4fc   :  { %6405 = vtanh.f32 %v6262_v58  ;;  %v8950_v52 = vpop.f32.mrf.mxu0  ;;  %v4496_v61 = vcvt.s32.f32 %v3600_v24  ;;  %v5224_v53 = vpack.c.bf16 %v4517_v5, %v4510_v62  ;;  %v4503_v27 = vcvt.s32.f32 %v3607_v31 }
 0x4fd   :  { %6158 = vmatpush.bf16.msrb.mxu3 %v5238_v8  ;;  %v3586_v19 = vunpack.c.0.s8 %v3110_v25  ;;  %v3593_v59 = vunpack.c.1.s8 %v3110_v25  ;;  %v4832_v50 = vcvt.s32.f32 %v3936_v22  ;;  %v4132_v4 = vunpack.c.2.s8 %v3243_v54  ;;  %v3236_v8 = vld [vmem:[%s9001_s13 + $0x6c0] sm:$0xff] }
 0x4fe   :  { %6197 = vmatpush.bf16.msra.mxu2 %v5406_v48  ;;  %v4139_v18 = vunpack.c.3.s8 %v3243_v54  ;;  %v5392_v6 = vpack.c.bf16 %v4853_v10, %v4846_v63  ;;  %v4839_v37 = vcvt.s32.f32 %v3943_v39  ;;  %v3922_v21 = vunpack.c.0.s8 %v3194_v32 }
 0x4ff   :  { %v5956_v14 = vpop.f32.mrf.mxu3  ;;  %v3929_v41 = vunpack.c.1.s8 %v3194_v32  ;;  %v8958_v29 = vadd.f32 %v6034_v11, %v8897_v36  ;;  %v5944_v57 = vadd.f32 %v8913_v49, %v8884_v23  ;;  %v5217_v38 = vpack.c.bf16 %v4503_v27, %v4496_v61  ;;  %v3222_v61 = vld [vmem:[%s9001_s13 + $0x650] sm:$0xff] }
 0x500   :  { %v8955_v16 = vpop.f32.mrf.mxu2  ;;  %v4482_v47 = vcvt.s32.f32 %v3586_v19  ;;  %v4489_v2 = vcvt.s32.f32 %v3593_v59  ;;  %v5028_v55 = vcvt.s32.f32 %v4132_v4  ;;  %v5035_v13 = vcvt.s32.f32 %v4139_v18 }
 0x501   :  { %6159 = vmatpush.bf16.msrb.mxu3 %v5231_v45  ;;  %v4118_v9 = vunpack.c.0.s8 %v3243_v54  ;;  %v4125_v0 = vunpack.c.1.s8 %v3243_v54  ;;  %v5385_v36 = vpack.c.bf16 %v4839_v37, %v4832_v50  ;;  %v4818_v1 = vcvt.s32.f32 %v3922_v21 }
 0x502   :  { %6198 = vmatpush.bf16.msra.mxu2 %v5399_v28  ;;  %v6406_v43 = vpop.eup %6405  ;;  %v4825_v60 = vcvt.s32.f32 %v3929_v41  ;;  %v5957_v46 = vadd.f32 %v5956_v14, %v5944_v57  ;;  %v5210_v23 = vpack.c.bf16 %v4489_v2, %v4482_v47  ;;  %v4104_v49 = vunpack.c.2.s8 %v3236_v8 }
 0x503   :  { %v6036_v30 = vpop.f32.mrf.mxu1  ;;  %6276 = vst [vmem:[#allocation2 + $0x18] sm:$0xff] %v6406_v43  ;;  %v5483_v35 = vpack.c.bf16 %v5035_v13, %v5028_v55  ;;  %v5014_v17 = vcvt.s32.f32 %v4118_v9  ;;  %v5021_v20 = vcvt.s32.f32 %v4125_v0  ;;  %v4111_v12 = vunpack.c.3.s8 %v3236_v8 }
 0x504   :  { %v6075_v40 = vpop.f32.mrf.mxu0  ;;  %v5970_v25 = vadd.f32 %v8836_v44, %v5957_v46  ;;  %v5378_v15 = vpack.c.bf16 %v4825_v60, %v4818_v1  ;;  %v5000_v32 = vcvt.s32.f32 %v4104_v49  ;;  %v4090_v11 = vunpack.c.0.s8 %v3236_v8  ;;  %v3229_v44 = vld [vmem:[%s9001_s13 + $0x688] sm:$0xff]  ;;  %s6445_s13 = smov [#allocation2]  }
 0x505   :  { %6160 = vmatpush.bf16.msrb.mxu3 %v5224_v53  ;;  %v5476_v58 = vpack.c.bf16 %v5021_v20, %v5014_v17  ;;  %v5007_v24 = vcvt.s32.f32 %v4111_v12  ;;  %v4097_v45 = vunpack.c.1.s8 %v3236_v8  ;;  %v4076_v62 = vunpack.c.2.s8 %v3229_v44  ;;  %s6286_s7 = sshll.u32 %s6445_s13, 4  ;;  %s6287_s7 = int_to_ptr.vmem [resolvable:$true] %s6286_s7 }
 0x506   :  { %6199 = vmatpush.bf16.msra.mxu2 %v5392_v6  ;;  %v5983_v26 = vadd.f32 %v8895_v7, %v5970_v25  ;;  %v4986_v7 = vcvt.s32.f32 %v4090_v11  ;;  %v4083_v22 = vunpack.c.3.s8 %v3229_v44  ;;  %v4062_v28 = vunpack.c.0.s8 %v3229_v44 }
 0x507   :  { %v5958_v51 = vpop.f32.mrf.mxu3  ;;  %v5469_v5 = vpack.c.bf16 %v5007_v24, %v5000_v32  ;;  %v4993_v31 = vcvt.s32.f32 %v4097_v45  ;;  %v4972_v10 = vcvt.s32.f32 %v4076_v62  ;;  %v4069_v54 = vunpack.c.1.s8 %v3229_v44 }
 0x508   :  { %v5997_v48 = vpop.f32.mrf.mxu2  ;;  %v4979_v39 = vcvt.s32.f32 %v4083_v22  ;;  %v4958_v14 = vcvt.s32.f32 %v4062_v28  ;;  %v4055_v27 = vunpack.c.3.s8 %v3222_v61  ;;  %v4034_v19 = vunpack.c.0.s8 %v3222_v61 }
 0x509   :  { %6161 = vmatpush.bf16.msrb.mxu3 %v5217_v38  ;;  %v5462_v63 = vpack.c.bf16 %v4993_v31, %v4986_v7  ;;  %v4965_v53 = vcvt.s32.f32 %v4069_v54  ;;  %v4041_v18 = vunpack.c.1.s8 %v3222_v61  ;;  %v5996_v57 = vadd.f32 %v8955_v16, %v5983_v26 }
 0x50a   :  { %6200 = vmatpush.bf16.msra.mxu2 %v5385_v36  ;;  %v4951_v4 = vcvt.s32.f32 %v4055_v27  ;;  %v4930_v37 = vcvt.s32.f32 %v4034_v19  ;;  %v6226_v38 = vperm.slane %v8821_v56, 4  ;;  %v6249_v55 = vperm.slane %v8827_v34, 4 }
 0x50b   :  { %v5448_v59 = vpack.c.bf16 %v4965_v53, %v4958_v14  ;;  %v4937_v21 = vcvt.s32.f32 %v4041_v18  ;;  %v6227_v32 = vperm.slane %v8821_v56, 5  ;;  %v6250_v45 = vperm.slane %v8827_v34, 5 }
 0x50c   :  { %v6228_v53 = vperm.slane %v8821_v56, 6  ;;  %v6251_v19 = vperm.slane %v8827_v34, 6  ;;  %vm6279_vm7 = vcmask 130048  }
 0x50d   :  { %6162 = vmatpush.bf16.msrb.mxu3 %v5210_v23  ;;  %v5434_v41 = vpack.c.bf16 %v4937_v21, %v4930_v37 }
 0x50e   :  { %6201 = vmatpush.bf16.msra.mxu2 %v5378_v15 }
 0x510   :  { %6163 = vmatmul.bf16.vlgmr.msrb.gmra.mxu3 %v7903_v33  ;;  %v5455_v33 = vpack.c.bf16 %v4979_v39, %v4972_v10 }
 0x511   :  { %6207 = vmatpush.bf16.msra.mxu3 %v5483_v35  ;;  %6202 = vmatmul.bf16.vlgmr.msra.gmra.mxu2 %v8122_v3  ;;  %v4048_v3 = vunpack.c.2.s8 %v3222_v61 }
 0x513   :  { %v4944_v50 = vcvt.s32.f32 %v4048_v3 }
 0x515   :  { %6208 = vmatpush.bf16.msra.mxu3 %v5476_v58  ;;  %v5441_v6 = vpack.c.bf16 %v4951_v4, %v4944_v50 }
 0x519   :  { %6209 = vmatpush.bf16.msra.mxu3 %v5469_v5 }
 0x51d   :  { %6210 = vmatpush.bf16.msra.mxu3 %v5462_v63 }
 0x521   :  { %6211 = vmatpush.bf16.msra.mxu3 %v5455_v33 }
 0x525   :  { %6212 = vmatpush.bf16.msra.mxu3 %v5448_v59  ;;  %v6086_v43 = vpop.f32.mrf.mxu1 }
 0x526   :  { %v6125_v30 = vpop.f32.mrf.mxu0 }
 0x528   :  { %v6008_v47 = vpop.f32.mrf.mxu3 }
 0x529   :  { %6213 = vmatpush.bf16.msra.mxu3 %v5441_v6  ;;  %v6009_v2 = vadd.f32 %v6008_v47, %v5996_v57 }
 0x52a   :  { %v6047_v13 = vpop.f32.mrf.mxu2 }
 0x52b   :  { %v6240_v9 = vmul.f32 %v6226_v38, %v6009_v2  ;;  %v6048_v0 = vadd.f32 %v6047_v13, %v8958_v29 }
 0x52d   :  { %6214 = vmatpush.bf16.msra.mxu3 %v5434_v41  ;;  %v6263_v8 = vadd.f32 %v6249_v55, %v6240_v9  ;;  %v6088_v40 = vpop.f32.mrf.mxu1 }
 0x52e   :  { %v6127_v36 = vpop.f32.mrf.mxu0 }
 0x52f   :  { %6407 = vtanh.f32 %v6263_v8 }
 0x530   :  { %6215 = vmatmul.bf16.vlgmr.msra.gmra.mxu3 %v8202_v42  ;;  %v6010_v1 = vpop.f32.mrf.mxu3 }
 0x532   :  { %v6049_v60 = vpop.f32.mrf.mxu2 }
 0x535   :  { %v6408_v16 = vpop.eup %6407 }
 0x536   :  { %6277 = vst [vmem:[#allocation2 + $0x20] sm:$0xff] %v6408_v16 }
 0x54e   :  { %v6138_v46 = vpop.f32.mrf.mxu1 }
 0x54f   :  { %v6139_v51 = vadd.f32 %v6138_v46, %v6125_v30 }
 0x550   :  { %v6177_v23 = vpop.f32.mrf.mxu0 }
 0x552   :  { %v6060_v49 = vpop.f32.mrf.mxu3 }
 0x553   :  { %v6061_v25 = vadd.f32 %v6060_v49, %v6048_v0  ;;  %v6099_v48 = vpop.f32.mrf.mxu2 }
 0x555   :  { %v6074_v35 = vadd.f32 %v8950_v52, %v6061_v25 }
 0x556   :  { %v6140_v17 = vpop.f32.mrf.mxu1 }
 0x557   :  { %v6087_v29 = vadd.f32 %v6086_v43, %v6074_v35 }
 0x558   :  { %v6179_v20 = vpop.f32.mrf.mxu0 }
 0x559   :  { %v6100_v26 = vadd.f32 %v6099_v48, %v6087_v29 }
 0x55a   :  { %v6062_v42 = vpop.f32.mrf.mxu3 }
 0x55b   :  { %v6101_v12 = vpop.f32.mrf.mxu2 }
 0x56f   :  { %v6190_v15 = vpop.f32.mrf.mxu1 }
 0x573   :  { %v6112_v58 = vpop.f32.mrf.mxu3 }
 0x574   :  { %v6151_v24 = vpop.f32.mrf.mxu2  ;;  %v6113_v11 = vadd.f32 %v6112_v58, %v6100_v26 }
 0x575   :  { %v6152_v22 = vadd.f32 %v6151_v24, %v6139_v51 }
 0x576   :  { %v6241_v44 = vmul.f32 %v6227_v32, %v6113_v11 }
 0x577   :  { %v6192_v62 = vpop.f32.mrf.mxu1 }
 0x578   :  { %v6264_v5 = vadd.f32 %v6250_v45, %v6241_v44 }
 0x57a   :  { %6409 = vtanh.f32 %v6264_v5 }
 0x57b   :  { %v6114_v7 = vpop.f32.mrf.mxu3 }
 0x57c   :  { %v6153_v52 = vpop.f32.mrf.mxu2 }
 0x580   :  { %v6410_v31 = vpop.eup %6409 }
 0x581   :  { %6278 = vst [vmem:[#allocation2 + $0x28] sm:$0xff] %v6410_v31 }
 0x593   :  { %v6164_v28 = vpop.f32.mrf.mxu3 }
 0x594   :  { %v6165_v63 = vadd.f32 %v6164_v28, %v6152_v22  ;;  %v6203_v10 = vpop.f32.mrf.mxu2 }
 0x596   :  { %v6178_v39 = vadd.f32 %v6177_v23, %v6165_v63 }
 0x598   :  { %v6191_v14 = vadd.f32 %v6190_v15, %v6178_v39 }
 0x59a   :  { %v6204_v33 = vadd.f32 %v6203_v10, %v6191_v14 }
 0x59b   :  { %v6166_v54 = vpop.f32.mrf.mxu3 }
 0x59c   :  { %v6205_v61 = vpop.f32.mrf.mxu2 }
 0x5b3   :  { %v6216_v3 = vpop.f32.mrf.mxu3 }
 0x5b4   :  { %v6217_v27 = vadd.f32 %v6216_v3, %v6204_v33 }
 0x5b6   :  { %v6242_v59 = vmul.f32 %v6228_v53, %v6217_v27 }
 0x5b8   :  { %v6265_v50 = vadd.f32 %v6251_v19, %v6242_v59 }
 0x5ba   :  { %6411 = vtanh.f32 %v6265_v50 }
 0x5bb   :  { %v6218_v4 = vpop.f32.mrf.mxu3 }
 0x5c0   :  { %v6412_v18 = vpop.eup %6411 }
 0x5c1   :  { %6280 = vst.msk [vmem:[#allocation2 + $0x30] sm:$0xff] %vm6279_vm7, %v6412_v18 }
 0x5c2   :  { %6291 = dma.vmem_to_hbm [thread:$0]  %s6287_s7, 896, %s6289_s15, [#allocation3]  }
 0x5c3   :  { %6442 = dma.done.wait [#allocation3], 896  }
 0x5c4   :  { %6443 = vsyncadd [#allocation3], 4294966400 }
 0x5c5   :  { %6296 = vsyncpa [#allocation3], 1 }

</bundles_post_ra>
